<compile_context>
chip_gen: v5e
topology: v5e:2x2
jax: 0.10.0
libtpu: 0.0.40
codegen_flags: <defaults>
</compile_context>

<pallas_src>
import jax
import jax.numpy as jnp
from jax.experimental import pallas as pl
from jax.experimental.pallas import tpu as pltpu

# Activation-storage / MXU-operand dtype.  bf16 halves HBM traffic of every
# activation round-trip and halves VMEM block sizes; accumulation and all BN
# statistics stay in float32.
ACT_DTYPE = jnp.bfloat16
_BN_EPS = 1e-5
# v5e's default scoped-VMEM limit is 16 MiB; raise it explicitly while staying
# well under v7x's 64 MiB physical VMEM (leave headroom for double buffering).
_VMEM_LIMIT_BYTES = 48 * 1024 * 1024


def _cparams(n_grid=1):
    # Every kernel writes disjoint per-tile outputs (including per-tile partial
    # stats), so all grid axes can be "parallel" (megacore-shardable on v7x).
    return pltpu.CompilerParams(
        dimension_semantics=("parallel",) * n_grid,
        vmem_limit_bytes=_VMEM_LIMIT_BYTES)


def _pick_tm(m):
    # Larger row tiles amortize the ~0.35us per-grid-step overhead; 1024 is
    # measurably (slightly) better than 512 for mem-bound kernels on v5e/v6e.
    # TODO(synk): on v7x (64 MiB VMEM) prefer 512; and use a cdiv grid with a
    # masked tail for awkward M instead of the tm=m fallback.
    for t in (1024, 512, 256, 128, 64, 32, 16, 8):
        if m % t == 0:
            return t
    return m


# ----------------------------------------------------------------------------
# Pallas kernels (1x1-conv family)
# ----------------------------------------------------------------------------

def _stats_kernel(x_ref, s_ref, q_ref):
    # Per-tile per-channel sum / sum-of-squares (reduced across tiles in JAX).
    x = x_ref[...].astype(jnp.float32)
    s_ref[0] = jnp.sum(x, axis=0, keepdims=True)
    q_ref[0] = jnp.sum(x * x, axis=0, keepdims=True)


def _bn_relu_mm_stats_kernel(x_ref, sc_ref, sh_ref, w_ref, y_ref, s_ref, q_ref):
    # y = relu(x*scale + shift) @ w ; also emit per-tile stats of the *stored* y.
    a = jnp.maximum(x_ref[...].astype(jnp.float32) * sc_ref[...] + sh_ref[...], 0.0)
    y = jnp.dot(a.astype(w_ref.dtype), w_ref[...], preferred_element_type=jnp.float32)
    yc = y.astype(y_ref.dtype)
    y_ref[...] = yc
    yf = yc.astype(jnp.float32)   # stats of the stored value -> next BN is exact
    s_ref[0] = jnp.sum(yf, axis=0, keepdims=True)
    q_ref[0] = jnp.sum(yf * yf, axis=0, keepdims=True)


def _bn_relu_dual_mm_stats_kernel(x_ref, sc1_ref, sh1_ref, sci_ref, shi_ref,
                                  w1_ref, wi_ref, y_ref, id_ref, s_ref, q_ref):
    # One read of x, two BN folds, two 1x1 convs (main + identity path),
    # plus per-tile stats of the main-path output (for the next BN).
    x = x_ref[...].astype(jnp.float32)

    a1 = jnp.maximum(x * sc1_ref[...] + sh1_ref[...], 0.0)
    y = jnp.dot(a1.astype(w1_ref.dtype), w1_ref[...], preferred_element_type=jnp.float32)
    yc = y.astype(y_ref.dtype)
    y_ref[...] = yc

    ai = jnp.maximum(x * sci_ref[...] + shi_ref[...], 0.0)
    id_ref[...] = jnp.dot(ai.astype(wi_ref.dtype), wi_ref[...],
                          preferred_element_type=jnp.float32).astype(id_ref.dtype)

    yf = yc.astype(jnp.float32)
    s_ref[0] = jnp.sum(yf, axis=0, keepdims=True)
    q_ref[0] = jnp.sum(yf * yf, axis=0, keepdims=True)


def _bn_relu_mm_add_stats_kernel(x_ref, sc_ref, sh_ref, w_ref, res_ref,
                                 o_ref, s_ref, q_ref):
    # o = relu(x*scale + shift) @ w + residual ; also per-tile stats of o
    # (they become the next layer's BN statistics -> no re-read of o).
    a = jnp.maximum(x_ref[...].astype(jnp.float32) * sc_ref[...] + sh_ref[...], 0.0)
    o = (jnp.dot(a.astype(w_ref.dtype), w_ref[...], preferred_element_type=jnp.float32)
         + res_ref[...].astype(jnp.float32))
    oc = o.astype(o_ref.dtype)
    o_ref[...] = oc
    of = oc.astype(jnp.float32)
    s_ref[0] = jnp.sum(of, axis=0, keepdims=True)
    q_ref[0] = jnp.sum(of * of, axis=0, keepdims=True)


# ----------------------------------------------------------------------------
# Pallas wrappers (1x1-conv family)
# ----------------------------------------------------------------------------

def channel_stats(x2d):
    """Per-channel (sum, sum_sq) over the M rows of (M, C).  Used only once,
    for the block input; every other BN reuses stats emitted by the producer.
    TODO(synk): fuse this pass into a Pallas NCHW->NHWC transpose kernel so the
    block input is only read once."""
    m, c = x2d.shape
    tm = _pick_tm(m)
    nt = m // tm
    s, q = pl.pallas_call(
        _stats_kernel,
        out_shape=(jax.ShapeDtypeStruct((nt, 1, c), jnp.float32),
                   jax.ShapeDtypeStruct((nt, 1, c), jnp.float32)),
        grid=(nt,),
        in_specs=[pl.BlockSpec((tm, c), lambda i: (i, 0))],
        out_specs=(pl.BlockSpec((1, 1, c), lambda i: (i, 0, 0)),
                   pl.BlockSpec((1, 1, c), lambda i: (i, 0, 0))),
        compiler_params=_cparams(),
    )(x2d)
    return jnp.sum(s, axis=0), jnp.sum(q, axis=0)


def fold_bn(stats, m, gamma, beta, eps=_BN_EPS):
    """Fold training-mode BatchNorm (batch stats, biased variance) into a
    per-channel scale/shift.  Tiny (1, C) arithmetic -> plain JAX."""
    s, q = stats
    mean = s / m
    var = jnp.maximum(q / m - mean * mean, 0.0)
    scale = gamma.reshape(1, -1) * jax.lax.rsqrt(var + eps)
    shift = beta.reshape(1, -1) - mean * scale
    return scale, shift


def bn_relu_matmul_stats(x2d, scale, shift, w):
    m, c = x2d.shape
    co = w.shape[1]
    tm = _pick_tm(m)
    nt = m // tm
    y, s, q = pl.pallas_call(
        _bn_relu_mm_stats_kernel,
        out_shape=(jax.ShapeDtypeStruct((m, co), ACT_DTYPE),
                   jax.ShapeDtypeStruct((nt, 1, co), jnp.float32),
                   jax.ShapeDtypeStruct((nt, 1, co), jnp.float32)),
        grid=(nt,),
        in_specs=[pl.BlockSpec((tm, c), lambda i: (i, 0)),
                  pl.BlockSpec((1, c), lambda i: (0, 0)),
                  pl.BlockSpec((1, c), lambda i: (0, 0)),
                  pl.BlockSpec((c, co), lambda i: (0, 0))],
        out_specs=(pl.BlockSpec((tm, co), lambda i: (i, 0)),
                   pl.BlockSpec((1, 1, co), lambda i: (i, 0, 0)),
                   pl.BlockSpec((1, 1, co), lambda i: (i, 0, 0))),
        compiler_params=_cparams(),
    )(x2d, scale, shift, w.astype(ACT_DTYPE))
    return y, jnp.sum(s, axis=0), jnp.sum(q, axis=0)


def bn_relu_dual_matmul_stats(x2d, sc1, sh1, sci, shi, w1, wi):
    m, c = x2d.shape
    c1, ci = w1.shape[1], wi.shape[1]
    tm = _pick_tm(m)
    nt = m // tm
    y, idf, s, q = pl.pallas_call(
        _bn_relu_dual_mm_stats_kernel,
        out_shape=(jax.ShapeDtypeStruct((m, c1), ACT_DTYPE),
                   jax.ShapeDtypeStruct((m, ci), ACT_DTYPE),
                   jax.ShapeDtypeStruct((nt, 1, c1), jnp.float32),
                   jax.ShapeDtypeStruct((nt, 1, c1), jnp.float32)),
        grid=(nt,),
        in_specs=[pl.BlockSpec((tm, c), lambda i: (i, 0)),
                  pl.BlockSpec((1, c), lambda i: (0, 0)),
                  pl.BlockSpec((1, c), lambda i: (0, 0)),
                  pl.BlockSpec((1, c), lambda i: (0, 0)),
                  pl.BlockSpec((1, c), lambda i: (0, 0)),
                  pl.BlockSpec((c, c1), lambda i: (0, 0)),
                  pl.BlockSpec((c, ci), lambda i: (0, 0))],
        out_specs=(pl.BlockSpec((tm, c1), lambda i: (i, 0)),
                   pl.BlockSpec((tm, ci), lambda i: (i, 0)),
                   pl.BlockSpec((1, 1, c1), lambda i: (i, 0, 0)),
                   pl.BlockSpec((1, 1, c1), lambda i: (i, 0, 0))),
        compiler_params=_cparams(),
    )(x2d, sc1, sh1, sci, shi, w1.astype(ACT_DTYPE), wi.astype(ACT_DTYPE))
    return y, idf, jnp.sum(s, axis=0), jnp.sum(q, axis=0)


def bn_relu_matmul_add_stats(x2d, scale, shift, w, res2d):
    m, c = x2d.shape
    co = w.shape[1]
    tm = _pick_tm(m)
    nt = m // tm
    o, s, q = pl.pallas_call(
        _bn_relu_mm_add_stats_kernel,
        out_shape=(jax.ShapeDtypeStruct((m, co), ACT_DTYPE),
                   jax.ShapeDtypeStruct((nt, 1, co), jnp.float32),
                   jax.ShapeDtypeStruct((nt, 1, co), jnp.float32)),
        grid=(nt,),
        in_specs=[pl.BlockSpec((tm, c), lambda i: (i, 0)),
                  pl.BlockSpec((1, c), lambda i: (0, 0)),
                  pl.BlockSpec((1, c), lambda i: (0, 0)),
                  pl.BlockSpec((c, co), lambda i: (0, 0)),
                  pl.BlockSpec((tm, co), lambda i: (i, 0))],
        out_specs=(pl.BlockSpec((tm, co), lambda i: (i, 0)),
                   pl.BlockSpec((1, 1, co), lambda i: (i, 0, 0)),
                   pl.BlockSpec((1, 1, co), lambda i: (i, 0, 0))),
        compiler_params=_cparams(),
    )(x2d, scale, shift, w.astype(ACT_DTYPE), res2d)
    return o, jnp.sum(s, axis=0), jnp.sum(q, axis=0)


# ----------------------------------------------------------------------------
# Fused BN + ReLU + 3x3 conv (+ output stats), one image per grid step
# ----------------------------------------------------------------------------

def conv3x3_bn_relu_stats(x_nhwc, scale, shift, w2):
    """Fused BN+ReLU + zero-padded 3x3 conv (+ per-image output stats).

    The raw activation is read unpadded (no HBM jnp.pad pass); the kernel
    builds three column-shifted, row-padded slabs of the BN+ReLU'd activation
    in VMEM and accumulates the 9 taps as (H*W, C) x (C, Co) MXU matmuls, so
    every dot has a large M and no sublane-misaligned slices.
    TODO(synk): row-tile the per-image grid (halo rows) once H*W*C exceeds the
    VMEM budget (64 MiB physical on v7x).
    TODO(synk): pad C / Co to multiples of 128 at production channel counts for
    lane-dense stores and full MXU utilization."""
    n, h, wd, c = x_nhwc.shape
    co = w2.shape[3]
    hw = h * wd
    x2 = x_nhwc.reshape(n, hw, c)
    w9 = w2.reshape(9, c, co).astype(ACT_DTYPE)
    sc = scale.astype(jnp.float32)
    sh = shift.astype(jnp.float32)

    def kernel(x_ref, sc_ref, sh_ref, w_ref, o_ref, s_ref, q_ref):
        # BN + ReLU in f32, then cast to the MXU operand dtype.
        a = jnp.maximum(x_ref[0].astype(jnp.float32) * sc_ref[...] + sh_ref[...], 0.0)
        a = a.astype(w_ref.dtype)                                      # (hw, c)

        # Column-shifted copies (dw = 0 / 2) with a zero left/right border.
        col = jax.lax.broadcasted_iota(jnp.int32, (hw, 1), 0) % wd
        zrow = jnp.zeros((1, c), a.dtype)
        a_m1 = jnp.where(col == 0, jnp.zeros_like(a),
                         jnp.concatenate([zrow, a[:hw - 1]], axis=0))  # value at w-1
        a_p1 = jnp.where(col == wd - 1, jnp.zeros_like(a),
                         jnp.concatenate([a[1:], zrow], axis=0))       # value at w+1

        # Row-padded slabs: slab_dw[hp*wd + q] == padded_act[hp, q + dw].
        zpad = jnp.zeros((wd, c), a.dtype)
        slabs = (jnp.concatenate([zpad, a_m1, zpad], axis=0),          # dw = 0
                 jnp.concatenate([zpad, a, zpad], axis=0),             # dw = 1
                 jnp.concatenate([zpad, a_p1, zpad], axis=0))          # dw = 2

        # 9 taps, each one big (hw, c) x (c, co) MXU matmul.
        acc = jnp.zeros((hw, co), jnp.float32)
        for dh in range(3):
            for dw in range(3):
                lhs = slabs[dw][dh * wd:dh * wd + hw, :]
                acc = acc + jnp.dot(lhs, w_ref[3 * dh + dw],
                                    preferred_element_type=jnp.float32)

        yc = acc.astype(o_ref.dtype)
        o_ref[0] = yc
        # Stats of the stored value, written once at the end (no per-row RMW).
        yf = yc.astype(jnp.float32)
        s_ref[0] = jnp.sum(yf, axis=0, keepdims=True)
        q_ref[0] = jnp.sum(yf * yf, axis=0, keepdims=True)

    y, s, q = pl.pallas_call(
        kernel,
        out_shape=(jax.ShapeDtypeStruct((n, hw, co), ACT_DTYPE),
                   jax.ShapeDtypeStruct((n, 1, co), jnp.float32),
                   jax.ShapeDtypeStruct((n, 1, co), jnp.float32)),
        grid=(n,),
        in_specs=[pl.BlockSpec((1, hw, c), lambda b: (b, 0, 0)),
                  pl.BlockSpec((1, c), lambda b: (0, 0)),
                  pl.BlockSpec((1, c), lambda b: (0, 0)),
                  pl.BlockSpec((9, c, co), lambda b: (0, 0, 0))],
        out_specs=(pl.BlockSpec((1, hw, co), lambda b: (b, 0, 0)),
                   pl.BlockSpec((1, 1, co), lambda b: (b, 0, 0)),
                   pl.BlockSpec((1, 1, co), lambda b: (b, 0, 0))),
        compiler_params=_cparams(),
    )(x2, sc, sh, w9)
    return y.reshape(n * hw, co), jnp.sum(s, axis=0), jnp.sum(q, axis=0)


# ----------------------------------------------------------------------------
# DecoderBottleneckLayer / DecoderBottleneckBlock forward (NHWC glue)
# ----------------------------------------------------------------------------

def decoder_bottleneck_layer(x_nhwc, p, in_stats):
    """x_nhwc: (N, H, W, Cin).  in_stats: per-channel (sum, sum_sq) of x."""
    n, h, wd, cin = x_nhwc.shape
    m = n * h * wd
    chid = p["w1"].shape[1]
    cd = p["w3"].shape[1]
    upsample = p["upsample"]
    xf = x_nhwc.reshape(m, cin)

    # weight_layer1 (+ identity-path 1x1 for the upsample layer): one pass
    # over xf; both BN folds reuse the same input statistics.
    sc1, sh1 = fold_bn(in_stats, m, p["bn1_g"], p["bn1_b"])
    if upsample:
        sci, shi = fold_bn(in_stats, m, p["bni_g"], p["bni_b"])
        y1, idf, s1, q1 = bn_relu_dual_matmul_stats(
            xf, sc1, sh1, sci, shi, p["w1"], p["wi"])
    else:
        y1, s1, q1 = bn_relu_matmul_stats(xf, sc1, sh1, p["w1"])
        idf = xf  # down_channels == in_channels inside the block -> raw identity

    # weight_layer2: fused BN + ReLU + zero-pad + 3x3 conv (+ stats of y2).
    sc2, sh2 = fold_bn((s1, q1), m, p["bn2_g"], p["bn2_b"])
    y2, s2, q2 = conv3x3_bn_relu_stats(y1.reshape(n, h, wd, chid), sc2, sh2, p["w2"])

    # weight_layer3 + residual add (+ stats of the layer output for the next BN).
    sc3, sh3 = fold_bn((s2, q2), m, p["bn3_g"], p["bn3_b"])
    out2d, s_out, q_out = bn_relu_matmul_add_stats(y2, sc3, sh3, p["w3"], idf)

    if upsample:
        # ConvTranspose2d(k=1, stride=2, output_padding=1): the 1x1 matmuls
        # (main + identity, already summed) ran in Pallas; the zero interleave
        # is a single dense lax.pad (interior padding) -- no 2x intermediate.
        # TODO(synk): fuse the interleave into the final Pallas kernel's stores.
        z = out2d.reshape(n, h, wd, cd)
        out = jax.lax.pad(z, jnp.zeros((), z.dtype),
                          ((0, 0, 0), (0, 1, 1), (0, 1, 1), (0, 0, 0)))
        return out, None
    return out2d.reshape(n, h, wd, cd), (s_out, q_out)


def decoder_bottleneck_block(x_nchw, params):
    x = jnp.transpose(x_nchw, (0, 2, 3, 1)).astype(jnp.float32)   # NCHW -> NHWC
    n, h, wd, c = x.shape
    stats = channel_stats(x.reshape(n * h * wd, c))  # only standalone stats pass
    for p in params:
        x, stats = decoder_bottleneck_layer(x, p, stats)
    return jnp.transpose(x, (0, 3, 1, 2)).astype(jnp.float32)     # NHWC -> NCHW


# ----------------------------------------------------------------------------
# Deterministic parameter init (shapes follow the PyTorch module __init__)
# ----------------------------------------------------------------------------

def init_block_params(key, in_channels, hidden_channels, down_channels, layers):
    params = []
    f32 = jnp.float32
    for i in range(layers):
        upsample = (i == layers - 1)
        cd = down_channels if upsample else in_channels
        key, *ks = jax.random.split(key, 13)
        p = {
            "upsample": upsample,
            "bn1_g": 1.0 + 0.1 * jax.random.normal(ks[0], (in_channels,), f32),
            "bn1_b": 0.1 * jax.random.normal(ks[1], (in_channels,), f32),
            "w1": 0.2 * jax.random.normal(ks[2], (in_channels, hidden_channels), f32),
            "bn2_g": 1.0 + 0.1 * jax.random.normal(ks[3], (hidden_channels,), f32),
            "bn2_b": 0.1 * jax.random.normal(ks[4], (hidden_channels,), f32),
            "w2": 0.1 * jax.random.normal(ks[5], (3, 3, hidden_channels, hidden_channels), f32),
            "bn3_g": 1.0 + 0.1 * jax.random.normal(ks[6], (hidden_channels,), f32),
            "bn3_b": 0.1 * jax.random.normal(ks[7], (hidden_channels,), f32),
            "w3": 0.2 * jax.random.normal(ks[8], (hidden_channels, cd), f32),
        }
        if upsample:
            p["bni_g"] = 1.0 + 0.1 * jax.random.normal(ks[9], (in_channels,), f32)
            p["bni_b"] = 0.1 * jax.random.normal(ks[10], (in_channels,), f32)
            p["wi"] = 0.2 * jax.random.normal(ks[11], (in_channels, cd), f32)
        params.append(p)
    return params


# ----------------------------------------------------------------------------
# Pure-JAX reference (mirrors the PyTorch forward) for a correctness check
# ----------------------------------------------------------------------------

def _bn_relu_ref(x, gamma, beta, eps=_BN_EPS):
    mean = jnp.mean(x, axis=(0, 1, 2), keepdims=True)
    var = jnp.mean(jnp.square(x - mean), axis=(0, 1, 2), keepdims=True)
    y = (x - mean) * jax.lax.rsqrt(var + eps)
    return jnp.maximum(y * gamma.reshape(1, 1, 1, -1) + beta.reshape(1, 1, 1, -1), 0.0)


def _conv1x1_ref(x, w):
    return jnp.einsum("nhwc,cd->nhwd", x, w, precision="highest")


def _conv3x3_ref(x, w):
    n, h, ww, c = x.shape
    xp = jnp.pad(x, ((0, 0), (1, 1), (1, 1), (0, 0)))
    out = jnp.zeros((n, h, ww, w.shape[3]), jnp.float32)
    for kh in range(3):
        for kw in range(3):
            out = out + jnp.einsum("nhwc,cd->nhwd",
                                   xp[:, kh:kh + h, kw:kw + ww, :], w[kh, kw],
                                   precision="highest")
    return out


def _upsample2x_ref(z):
    n, h, w, c = z.shape
    out = jnp.zeros((n, 2 * h, 2 * w, c), z.dtype)
    return out.at[:, ::2, ::2, :].set(z)


def decoder_block_ref(x_nchw, params):
    x = jnp.transpose(x_nchw, (0, 2, 3, 1)).astype(jnp.float32)
    for p in params:
        idn = x
        y = _conv1x1_ref(_bn_relu_ref(x, p["bn1_g"], p["bn1_b"]), p["w1"])
        y = _conv3x3_ref(_bn_relu_ref(y, p["bn2_g"], p["bn2_b"]), p["w2"])
        y = _conv1x1_ref(_bn_relu_ref(y, p["bn3_g"], p["bn3_b"]), p["w3"])
        if p["upsample"]:
            idn = _conv1x1_ref(_bn_relu_ref(idn, p["bni_g"], p["bni_b"]), p["wi"])
            x = _upsample2x_ref(y) + _upsample2x_ref(idn)
        else:
            x = y + idn
    return jnp.transpose(x, (0, 3, 1, 2))


# ----------------------------------------------------------------------------
# Demo
# ----------------------------------------------------------------------------

if __name__ == "__main__":
    key = jax.random.PRNGKey(0)
    k_x, k_p = jax.random.split(key)

    N, Cin, H, W = 2, 8, 16, 16
    Chid, Cdown, layers = 4, 4, 2

    x = jax.random.normal(k_x, (N, Cin, H, W), jnp.float32)       # NCHW like PyTorch
    params = init_block_params(k_p, Cin, Chid, Cdown, layers)

    block_fn = jax.jit(lambda inp: decoder_bottleneck_block(inp, params))
    out = jax.block_until_ready(block_fn(x))

    expected = (N, Cdown, 2 * H, 2 * W)
    assert out.shape == expected, (out.shape, expected)
    assert bool(jnp.all(jnp.isfinite(out)))

    ref = jax.block_until_ready(decoder_block_ref(x, params))
    max_err = float(jnp.max(jnp.abs(out - ref)))
    # bf16 activation storage (ACT_DTYPE) -> compare against the f32 reference
    # with a correspondingly relaxed tolerance.
    assert jnp.allclose(out, ref, rtol=1e-1, atol=1e-1), max_err

    print("KERNEL_OK")
</pallas_src>

<mosaic_0001>
module attributes {stable_mosaic.version = 11 : i64} {
  func.func @_stats_kernel(%arg0: i32, %arg1: memref<512x8xf32, #tpu.memory_space<vmem>>, %arg2: memref<1x1x8xf32, #tpu.memory_space<vmem>>, %arg3: memref<1x1x8xf32, #tpu.memory_space<vmem>>) attributes {dimension_semantics = [#tpu.dimension_semantics<parallel>], iteration_bounds = array<i64: 1>, scalar_prefetch = 0 : i64, scratch_operands = 0 : i64, tpu.core_type = #tpu.core_type<tc>, window_params = [{transform_indices = @transform_0, window_bounds = array<i64: 512, 8>}, {transform_indices = @transform_1, window_bounds = array<i64: 1, 1, 8>}, {transform_indices = @transform_2, window_bounds = array<i64: 1, 1, 8>}]} {
    %c0 = arith.constant 0 : index
    %c0_0 = arith.constant 0 : index
    %0 = vector.load %arg1[%c0, %c0_0] : memref<512x8xf32, #tpu.memory_space<vmem>>, vector<512x8xf32>
    %cst = arith.constant dense<0.000000e+00> : vector<8xf32>
    %1 = vector.multi_reduction <add>, %0, %cst [0] : vector<512x8xf32> to vector<8xf32>
    %2 = vector.shape_cast %1 : vector<8xf32> to vector<1x8xf32>
    %c0_1 = arith.constant 0 : index
    %c0_2 = arith.constant 0 : index
    %c0_3 = arith.constant 0 : index
    %3 = vector.load %arg2[%c0_1, %c0_2, %c0_3] : memref<1x1x8xf32, #tpu.memory_space<vmem>>, vector<1x1x8xf32>
    %4 = vector.shape_cast %3 : vector<1x1x8xf32> to vector<1x8xf32>
    %5 = vector.shape_cast %2 : vector<1x8xf32> to vector<1x1x8xf32>
    tpu.vector_store %arg2[%c0_1, %c0_2, %c0_3], %5 {strides = array<i32>} : memref<1x1x8xf32, #tpu.memory_space<vmem>>, vector<1x1x8xf32>,
    %6 = arith.mulf %0, %0 : vector<512x8xf32>
    %cst_4 = arith.constant dense<0.000000e+00> : vector<8xf32>
    %7 = vector.multi_reduction <add>, %6, %cst_4 [0] : vector<512x8xf32> to vector<8xf32>
    %8 = vector.shape_cast %7 : vector<8xf32> to vector<1x8xf32>
    %c0_5 = arith.constant 0 : index
    %c0_6 = arith.constant 0 : index
    %c0_7 = arith.constant 0 : index
    %9 = vector.load %arg3[%c0_5, %c0_6, %c0_7] : memref<1x1x8xf32, #tpu.memory_space<vmem>>, vector<1x1x8xf32>
    %10 = vector.shape_cast %9 : vector<1x1x8xf32> to vector<1x8xf32>
    %11 = vector.shape_cast %8 : vector<1x8xf32> to vector<1x1x8xf32>
    tpu.vector_store %arg3[%c0_5, %c0_6, %c0_7], %11 {strides = array<i32>} : memref<1x1x8xf32, #tpu.memory_space<vmem>>, vector<1x1x8xf32>,
    return
  }
  func.func @transform_0(%arg0: i32) -> (i32, i32) {
    %c0_i32 = arith.constant 0 : i32
    %c0_i32_0 = arith.constant 0 : i32
    return %arg0, %c0_i32 : i32, i32
  }
  func.func @transform_1(%arg0: i32) -> (i32, i32, i32) {
    %c0_i32 = arith.constant 0 : i32
    %c0_i32_0 = arith.constant 0 : i32
    %c0_i32_1 = arith.constant 0 : i32
    return %arg0, %c0_i32, %c0_i32_0 : i32, i32, i32
  }
  func.func @transform_2(%arg0: i32) -> (i32, i32, i32) {
    %c0_i32 = arith.constant 0 : i32
    %c0_i32_0 = arith.constant 0 : i32
    %c0_i32_1 = arith.constant 0 : i32
    return %arg0, %c0_i32, %c0_i32_0 : i32, i32, i32
  }
}

module attributes {stable_mosaic.version = 11 : i64} {
  func.func @_bn_relu_mm_stats_kernel(%arg0: i32, %arg1: memref<512x8xf32, #tpu.memory_space<vmem>>, %arg2: memref<1x8xf32, #tpu.memory_space<vmem>>, %arg3: memref<1x8xf32, #tpu.memory_space<vmem>>, %arg4: memref<8x4xbf16, #tpu.memory_space<vmem>>, %arg5: memref<512x4xbf16, #tpu.memory_space<vmem>>, %arg6: memref<1x1x4xf32, #tpu.memory_space<vmem>>, %arg7: memref<1x1x4xf32, #tpu.memory_space<vmem>>) attributes {dimension_semantics = [#tpu.dimension_semantics<parallel>], iteration_bounds = array<i64: 1>, scalar_prefetch = 0 : i64, scratch_operands = 0 : i64, tpu.core_type = #tpu.core_type<tc>, window_params = [{transform_indices = @transform_0, window_bounds = array<i64: 512, 8>}, {pipeline_mode = #tpu.pipeline_mode<synchronous>, transform_indices = @transform_1, window_bounds = array<i64: 1, 8>}, {pipeline_mode = #tpu.pipeline_mode<synchronous>, transform_indices = @transform_2, window_bounds = array<i64: 1, 8>}, {pipeline_mode = #tpu.pipeline_mode<synchronous>, transform_indices = @transform_3, window_bounds = array<i64: 8, 4>}, {transform_indices = @transform_4, window_bounds = array<i64: 512, 4>}, {transform_indices = @transform_5, window_bounds = array<i64: 1, 1, 4>}, {transform_indices = @transform_6, window_bounds = array<i64: 1, 1, 4>}]} {
    %c0 = arith.constant 0 : index
    %c0_0 = arith.constant 0 : index
    %0 = vector.load %arg1[%c0, %c0_0] : memref<512x8xf32, #tpu.memory_space<vmem>>, vector<512x8xf32>
    %c0_1 = arith.constant 0 : index
    %c0_2 = arith.constant 0 : index
    %1 = vector.load %arg2[%c0_1, %c0_2] : memref<1x8xf32, #tpu.memory_space<vmem>>, vector<1x8xf32>
    %2 = vector.broadcast %1 : vector<1x8xf32> to vector<512x8xf32>
    %3 = arith.mulf %0, %2 : vector<512x8xf32>
    %c0_3 = arith.constant 0 : index
    %c0_4 = arith.constant 0 : index
    %4 = vector.load %arg3[%c0_3, %c0_4] : memref<1x8xf32, #tpu.memory_space<vmem>>, vector<1x8xf32>
    %5 = vector.broadcast %4 : vector<1x8xf32> to vector<512x8xf32>
    %6 = arith.addf %3, %5 : vector<512x8xf32>
    %cst = arith.constant 0.000000e+00 : f32
    %7 = vector.broadcast %cst : f32 to vector<512x8xf32>
    %8 = arith.maximumf %6, %7 : vector<512x8xf32>
    %9 = arith.truncf %8 : vector<512x8xf32> to vector<512x8xbf16>
    %c0_5 = arith.constant 0 : index
    %c0_6 = arith.constant 0 : index
    %10 = vector.load %arg4[%c0_5, %c0_6] : memref<8x4xbf16, #tpu.memory_space<vmem>>, vector<8x4xbf16>
    %cst_7 = arith.constant dense<0.000000e+00> : vector<512x4xf32>
    %11 = tpu.matmul %9, %10, %cst_7 {dimension_numbers = #tpu.dot_dimension_numbers<[1], [0], [0], [1], [0, 0, 1, 1], [], []>} : vector<512x8xbf16>, vector<8x4xbf16>, vector<512x4xf32> -> vector<512x4xf32>
    %12 = arith.truncf %11 : vector<512x4xf32> to vector<512x4xbf16>
    %c0_8 = arith.constant 0 : index
    %c0_9 = arith.constant 0 : index
    %13 = vector.load %arg5[%c0_8, %c0_9] : memref<512x4xbf16, #tpu.memory_space<vmem>>, vector<512x4xbf16>
    tpu.vector_store %arg5[%c0_8, %c0_9], %12 {strides = array<i32>} : memref<512x4xbf16, #tpu.memory_space<vmem>>, vector<512x4xbf16>,
    %14 = arith.extf %12 : vector<512x4xbf16> to vector<512x4xf32>
    %cst_10 = arith.constant dense<0.000000e+00> : vector<4xf32>
    %15 = vector.multi_reduction <add>, %14, %cst_10 [0] : vector<512x4xf32> to vector<4xf32>
    %16 = vector.shape_cast %15 : vector<4xf32> to vector<1x4xf32>
    %c0_11 = arith.constant 0 : index
    %c0_12 = arith.constant 0 : index
    %c0_13 = arith.constant 0 : index
    %17 = vector.load %arg6[%c0_11, %c0_12, %c0_13] : memref<1x1x4xf32, #tpu.memory_space<vmem>>, vector<1x1x4xf32>
    %18 = vector.shape_cast %17 : vector<1x1x4xf32> to vector<1x4xf32>
    %19 = vector.shape_cast %16 : vector<1x4xf32> to vector<1x1x4xf32>
    tpu.vector_store %arg6[%c0_11, %c0_12, %c0_13], %19 {strides = array<i32>} : memref<1x1x4xf32, #tpu.memory_space<vmem>>, vector<1x1x4xf32>,
    %20 = arith.mulf %14, %14 : vector<512x4xf32>
    %cst_14 = arith.constant dense<0.000000e+00> : vector<4xf32>
    %21 = vector.multi_reduction <add>, %20, %cst_14 [0] : vector<512x4xf32> to vector<4xf32>
    %22 = vector.shape_cast %21 : vector<4xf32> to vector<1x4xf32>
    %c0_15 = arith.constant 0 : index
    %c0_16 = arith.constant 0 : index
    %c0_17 = arith.constant 0 : index
    %23 = vector.load %arg7[%c0_15, %c0_16, %c0_17] : memref<1x1x4xf32, #tpu.memory_space<vmem>>, vector<1x1x4xf32>
    %24 = vector.shape_cast %23 : vector<1x1x4xf32> to vector<1x4xf32>
    %25 = vector.shape_cast %22 : vector<1x4xf32> to vector<1x1x4xf32>
    tpu.vector_store %arg7[%c0_15, %c0_16, %c0_17], %25 {strides = array<i32>} : memref<1x1x4xf32, #tpu.memory_space<vmem>>, vector<1x1x4xf32>,
    return
  }
  func.func @transform_0(%arg0: i32) -> (i32, i32) {
    %c0_i32 = arith.constant 0 : i32
    %c0_i32_0 = arith.constant 0 : i32
    return %arg0, %c0_i32 : i32, i32
  }
  func.func @transform_1(%arg0: i32) -> (i32, i32) {
    %c0_i32 = arith.constant 0 : i32
    %c0_i32_0 = arith.constant 0 : i32
    %c0_i32_1 = arith.constant 0 : i32
    return %c0_i32, %c0_i32_0 : i32, i32
  }
  func.func @transform_2(%arg0: i32) -> (i32, i32) {
    %c0_i32 = arith.constant 0 : i32
    %c0_i32_0 = arith.constant 0 : i32
    %c0_i32_1 = arith.constant 0 : i32
    return %c0_i32, %c0_i32_0 : i32, i32
  }
  func.func @transform_3(%arg0: i32) -> (i32, i32) {
    %c0_i32 = arith.constant 0 : i32
    %c0_i32_0 = arith.constant 0 : i32
    %c0_i32_1 = arith.constant 0 : i32
    return %c0_i32, %c0_i32_0 : i32, i32
  }
  func.func @transform_4(%arg0: i32) -> (i32, i32) {
    %c0_i32 = arith.constant 0 : i32
    %c0_i32_0 = arith.constant 0 : i32
    return %arg0, %c0_i32 : i32, i32
  }
  func.func @transform_5(%arg0: i32) -> (i32, i32, i32) {
    %c0_i32 = arith.constant 0 : i32
    %c0_i32_0 = arith.constant 0 : i32
    %c0_i32_1 = arith.constant 0 : i32
    return %arg0, %c0_i32, %c0_i32_0 : i32, i32, i32
  }
  func.func @transform_6(%arg0: i32) -> (i32, i32, i32) {
    %c0_i32 = arith.constant 0 : i32
    %c0_i32_0 = arith.constant 0 : i32
    %c0_i32_1 = arith.constant 0 : i32
    return %arg0, %c0_i32, %c0_i32_0 : i32, i32, i32
  }
}

module attributes {stable_mosaic.version = 11 : i64} {
  func.func @kernel(%arg0: i32, %arg1: memref<1x256x4xbf16, #tpu.memory_space<vmem>>, %arg2: memref<1x4xf32, #tpu.memory_space<vmem>>, %arg3: memref<1x4xf32, #tpu.memory_space<vmem>>, %arg4: memref<9x4x4xbf16, #tpu.memory_space<vmem>>, %arg5: memref<1x256x4xbf16, #tpu.memory_space<vmem>>, %arg6: memref<1x1x4xf32, #tpu.memory_space<vmem>>, %arg7: memref<1x1x4xf32, #tpu.memory_space<vmem>>) attributes {dimension_semantics = [#tpu.dimension_semantics<parallel>], iteration_bounds = array<i64: 2>, scalar_prefetch = 0 : i64, scratch_operands = 0 : i64, tpu.core_type = #tpu.core_type<tc>, window_params = [{transform_indices = @transform_0, window_bounds = array<i64: 1, 256, 4>}, {pipeline_mode = #tpu.pipeline_mode<synchronous>, transform_indices = @transform_1, window_bounds = array<i64: 1, 4>}, {pipeline_mode = #tpu.pipeline_mode<synchronous>, transform_indices = @transform_2, window_bounds = array<i64: 1, 4>}, {pipeline_mode = #tpu.pipeline_mode<synchronous>, transform_indices = @transform_3, window_bounds = array<i64: 9, 4, 4>}, {transform_indices = @transform_4, window_bounds = array<i64: 1, 256, 4>}, {transform_indices = @transform_5, window_bounds = array<i64: 1, 1, 4>}, {transform_indices = @transform_6, window_bounds = array<i64: 1, 1, 4>}]} {
    %c0 = arith.constant 0 : index
    %c0_0 = arith.constant 0 : index
    %c0_1 = arith.constant 0 : index
    %0 = vector.load %arg1[%c0, %c0_0, %c0_1] : memref<1x256x4xbf16, #tpu.memory_space<vmem>>, vector<1x256x4xbf16>
    %1 = vector.shape_cast %0 : vector<1x256x4xbf16> to vector<256x4xbf16>
    %2 = arith.extf %1 : vector<256x4xbf16> to vector<256x4xf32>
    %c0_2 = arith.constant 0 : index
    %c0_3 = arith.constant 0 : index
    %3 = vector.load %arg2[%c0_2, %c0_3] : memref<1x4xf32, #tpu.memory_space<vmem>>, vector<1x4xf32>
    %4 = vector.broadcast %3 : vector<1x4xf32> to vector<256x4xf32>
    %5 = arith.mulf %2, %4 : vector<256x4xf32>
    %c0_4 = arith.constant 0 : index
    %c0_5 = arith.constant 0 : index
    %6 = vector.load %arg3[%c0_4, %c0_5] : memref<1x4xf32, #tpu.memory_space<vmem>>, vector<1x4xf32>
    %7 = vector.broadcast %6 : vector<1x4xf32> to vector<256x4xf32>
    %8 = arith.addf %5, %7 : vector<256x4xf32>
    %cst = arith.constant 0.000000e+00 : f32
    %9 = vector.broadcast %cst : f32 to vector<256x4xf32>
    %10 = arith.maximumf %8, %9 : vector<256x4xf32>
    %11 = arith.truncf %10 : vector<256x4xf32> to vector<256x4xbf16>
    %12 = tpu.iota {dimensions = array<i32: 0>} : vector<256x1xi32>
    %c16_i32 = arith.constant 16 : i32
    %c0_i32 = arith.constant 0 : i32
    %13 = arith.cmpi eq, %c16_i32, %c0_i32 : i32
    %c1_i32 = arith.constant 1 : i32
    %14 = arith.select %13, %c1_i32, %c16_i32 : i32
    %15 = vector.broadcast %14 : i32 to vector<256x1xi32>
    %16 = arith.remsi %12, %15 : vector<256x1xi32>
    %c0_i32_6 = arith.constant 0 : i32
    %17 = vector.broadcast %c0_i32_6 : i32 to vector<256x1xi32>
    %18 = arith.cmpi ne, %16, %17 : vector<256x1xi32>
    %c0_i32_7 = arith.constant 0 : i32
    %19 = vector.broadcast %c0_i32_7 : i32 to vector<256x1xi32>
    %20 = arith.cmpi slt, %16, %19 : vector<256x1xi32>
    %c0_i32_8 = arith.constant 0 : i32
    %21 = arith.cmpi slt, %14, %c0_i32_8 : i32
    %22 = vector.broadcast %21 : i1 to vector<256x1xi1>
    %23 = vector.broadcast %22 : vector<256x1xi1> to vector<256x1xi1>
    %24 = arith.xori %20, %23 : vector<256x1xi1>
    %25 = arith.andi %24, %18 : vector<256x1xi1>
    %26 = vector.broadcast %14 : i32 to vector<256x1xi32>
    %27 = arith.addi %16, %26 : vector<256x1xi32>
    %28 = arith.select %25, %27, %16 : vector<256x1xi1>, vector<256x1xi32>
    %cst_9 = arith.constant 0.000000e+00 : bf16
    %29 = vector.broadcast %cst_9 : bf16 to vector<1x4xbf16>
    %c0_i32_10 = arith.constant 0 : i32
    %30 = vector.broadcast %c0_i32_10 : i32 to vector<256x1xi32>
    %31 = arith.cmpi eq, %28, %30 : vector<256x1xi32>
    %cst_11 = arith.constant 0.000000e+00 : bf16
    %32 = vector.broadcast %cst_11 : bf16 to vector<256x4xbf16>
    %33 = vector.extract_strided_slice %11 {offsets = [0, 0], sizes = [255, 4], strides = [1, 1]} : vector<256x4xbf16> to vector<255x4xbf16>
    %34 = tpu.concatenate %29, %33 in 0 : vector<1x4xbf16>, vector<255x4xbf16> -> vector<256x4xbf16>
    %35 = vector.shape_cast %31 : vector<256x1xi1> to vector<256x1xi1>
    %36 = vector.broadcast %35 : vector<256x1xi1> to vector<256x4xi1>
    %37 = arith.select %36, %32, %34 : vector<256x4xi1>, vector<256x4xbf16>
    %c15_i32 = arith.constant 15 : i32
    %38 = vector.broadcast %c15_i32 : i32 to vector<256x1xi32>
    %39 = arith.cmpi eq, %28, %38 : vector<256x1xi32>
    %cst_12 = arith.constant 0.000000e+00 : bf16
    %40 = vector.broadcast %cst_12 : bf16 to vector<256x4xbf16>
    %41 = vector.extract_strided_slice %11 {offsets = [1, 0], sizes = [255, 4], strides = [1, 1]} : vector<256x4xbf16> to vector<255x4xbf16>
    %42 = tpu.concatenate %41, %29 in 0 : vector<255x4xbf16>, vector<1x4xbf16> -> vector<256x4xbf16>
    %43 = vector.shape_cast %39 : vector<256x1xi1> to vector<256x1xi1>
    %44 = vector.broadcast %43 : vector<256x1xi1> to vector<256x4xi1>
    %45 = arith.select %44, %40, %42 : vector<256x4xi1>, vector<256x4xbf16>
    %cst_13 = arith.constant 0.000000e+00 : bf16
    %46 = vector.broadcast %cst_13 : bf16 to vector<16x4xbf16>
    %47 = tpu.concatenate %46, %37, %46 in 0 : vector<16x4xbf16>, vector<256x4xbf16>, vector<16x4xbf16> -> vector<288x4xbf16>
    %48 = tpu.concatenate %46, %11, %46 in 0 : vector<16x4xbf16>, vector<256x4xbf16>, vector<16x4xbf16> -> vector<288x4xbf16>
    %49 = tpu.concatenate %46, %45, %46 in 0 : vector<16x4xbf16>, vector<256x4xbf16>, vector<16x4xbf16> -> vector<288x4xbf16>
    %cst_14 = arith.constant 0.000000e+00 : f32
    %50 = vector.broadcast %cst_14 : f32 to vector<256x4xf32>
    %51 = vector.extract_strided_slice %47 {offsets = [0, 0], sizes = [256, 4], strides = [1, 1]} : vector<288x4xbf16> to vector<256x4xbf16>
    %c0_15 = arith.constant 0 : index
    %c0_16 = arith.constant 0 : index
    %c0_17 = arith.constant 0 : index
    %52 = vector.load %arg4[%c0_15, %c0_16, %c0_17] : memref<9x4x4xbf16, #tpu.memory_space<vmem>>, vector<1x4x4xbf16>
    %53 = vector.shape_cast %52 : vector<1x4x4xbf16> to vector<4x4xbf16>
    %cst_18 = arith.constant dense<0.000000e+00> : vector<256x4xf32>
    %54 = tpu.matmul %51, %53, %cst_18 {dimension_numbers = #tpu.dot_dimension_numbers<[1], [0], [0], [1], [0, 0, 1, 1], [], []>} : vector<256x4xbf16>, vector<4x4xbf16>, vector<256x4xf32> -> vector<256x4xf32>
    %55 = arith.addf %50, %54 : vector<256x4xf32>
    %56 = vector.extract_strided_slice %48 {offsets = [0, 0], sizes = [256, 4], strides = [1, 1]} : vector<288x4xbf16> to vector<256x4xbf16>
    %c1 = arith.constant 1 : index
    %c0_19 = arith.constant 0 : index
    %c0_20 = arith.constant 0 : index
    %57 = vector.load %arg4[%c1, %c0_19, %c0_20] : memref<9x4x4xbf16, #tpu.memory_space<vmem>>, vector<1x4x4xbf16>
    %58 = vector.shape_cast %57 : vector<1x4x4xbf16> to vector<4x4xbf16>
    %cst_21 = arith.constant dense<0.000000e+00> : vector<256x4xf32>
    %59 = tpu.matmul %56, %58, %cst_21 {dimension_numbers = #tpu.dot_dimension_numbers<[1], [0], [0], [1], [0, 0, 1, 1], [], []>} : vector<256x4xbf16>, vector<4x4xbf16>, vector<256x4xf32> -> vector<256x4xf32>
    %60 = arith.addf %55, %59 : vector<256x4xf32>
    %61 = vector.extract_strided_slice %49 {offsets = [0, 0], sizes = [256, 4], strides = [1, 1]} : vector<288x4xbf16> to vector<256x4xbf16>
    %c2 = arith.constant 2 : index
    %c0_22 = arith.constant 0 : index
    %c0_23 = arith.constant 0 : index
    %62 = vector.load %arg4[%c2, %c0_22, %c0_23] : memref<9x4x4xbf16, #tpu.memory_space<vmem>>, vector<1x4x4xbf16>
    %63 = vector.shape_cast %62 : vector<1x4x4xbf16> to vector<4x4xbf16>
    %cst_24 = arith.constant dense<0.000000e+00> : vector<256x4xf32>
    %64 = tpu.matmul %61, %63, %cst_24 {dimension_numbers = #tpu.dot_dimension_numbers<[1], [0], [0], [1], [0, 0, 1, 1], [], []>} : vector<256x4xbf16>, vector<4x4xbf16>, vector<256x4xf32> -> vector<256x4xf32>
    %65 = arith.addf %60, %64 : vector<256x4xf32>
    %66 = vector.extract_strided_slice %47 {offsets = [16, 0], sizes = [256, 4], strides = [1, 1]} : vector<288x4xbf16> to vector<256x4xbf16>
    %c3 = arith.constant 3 : index
    %c0_25 = arith.constant 0 : index
    %c0_26 = arith.constant 0 : index
    %67 = vector.load %arg4[%c3, %c0_25, %c0_26] : memref<9x4x4xbf16, #tpu.memory_space<vmem>>, vector<1x4x4xbf16>
    %68 = vector.shape_cast %67 : vector<1x4x4xbf16> to vector<4x4xbf16>
    %cst_27 = arith.constant dense<0.000000e+00> : vector<256x4xf32>
    %69 = tpu.matmul %66, %68, %cst_27 {dimension_numbers = #tpu.dot_dimension_numbers<[1], [0], [0], [1], [0, 0, 1, 1], [], []>} : vector<256x4xbf16>, vector<4x4xbf16>, vector<256x4xf32> -> vector<256x4xf32>
    %70 = arith.addf %65, %69 : vector<256x4xf32>
    %71 = vector.extract_strided_slice %48 {offsets = [16, 0], sizes = [256, 4], strides = [1, 1]} : vector<288x4xbf16> to vector<256x4xbf16>
    %c4 = arith.constant 4 : index
    %c0_28 = arith.constant 0 : index
    %c0_29 = arith.constant 0 : index
    %72 = vector.load %arg4[%c4, %c0_28, %c0_29] : memref<9x4x4xbf16, #tpu.memory_space<vmem>>, vector<1x4x4xbf16>
    %73 = vector.shape_cast %72 : vector<1x4x4xbf16> to vector<4x4xbf16>
    %cst_30 = arith.constant dense<0.000000e+00> : vector<256x4xf32>
    %74 = tpu.matmul %71, %73, %cst_30 {dimension_numbers = #tpu.dot_dimension_numbers<[1], [0], [0], [1], [0, 0, 1, 1], [], []>} : vector<256x4xbf16>, vector<4x4xbf16>, vector<256x4xf32> -> vector<256x4xf32>
    %75 = arith.addf %70, %74 : vector<256x4xf32>
    %76 = vector.extract_strided_slice %49 {offsets = [16, 0], sizes = [256, 4], strides = [1, 1]} : vector<288x4xbf16> to vector<256x4xbf16>
    %c5 = arith.constant 5 : index
    %c0_31 = arith.constant 0 : index
    %c0_32 = arith.constant 0 : index
    %77 = vector.load %arg4[%c5, %c0_31, %c0_32] : memref<9x4x4xbf16, #tpu.memory_space<vmem>>, vector<1x4x4xbf16>
    %78 = vector.shape_cast %77 : vector<1x4x4xbf16> to vector<4x4xbf16>
    %cst_33 = arith.constant dense<0.000000e+00> : vector<256x4xf32>
    %79 = tpu.matmul %76, %78, %cst_33 {dimension_numbers = #tpu.dot_dimension_numbers<[1], [0], [0], [1], [0, 0, 1, 1], [], []>} : vector<256x4xbf16>, vector<4x4xbf16>, vector<256x4xf32> -> vector<256x4xf32>
    %80 = arith.addf %75, %79 : vector<256x4xf32>
    %81 = vector.extract_strided_slice %47 {offsets = [32, 0], sizes = [256, 4], strides = [1, 1]} : vector<288x4xbf16> to vector<256x4xbf16>
    %c6 = arith.constant 6 : index
    %c0_34 = arith.constant 0 : index
    %c0_35 = arith.constant 0 : index
    %82 = vector.load %arg4[%c6, %c0_34, %c0_35] : memref<9x4x4xbf16, #tpu.memory_space<vmem>>, vector<1x4x4xbf16>
    %83 = vector.shape_cast %82 : vector<1x4x4xbf16> to vector<4x4xbf16>
    %cst_36 = arith.constant dense<0.000000e+00> : vector<256x4xf32>
    %84 = tpu.matmul %81, %83, %cst_36 {dimension_numbers = #tpu.dot_dimension_numbers<[1], [0], [0], [1], [0, 0, 1, 1], [], []>} : vector<256x4xbf16>, vector<4x4xbf16>, vector<256x4xf32> -> vector<256x4xf32>
    %85 = arith.addf %80, %84 : vector<256x4xf32>
    %86 = vector.extract_strided_slice %48 {offsets = [32, 0], sizes = [256, 4], strides = [1, 1]} : vector<288x4xbf16> to vector<256x4xbf16>
    %c7 = arith.constant 7 : index
    %c0_37 = arith.constant 0 : index
    %c0_38 = arith.constant 0 : index
    %87 = vector.load %arg4[%c7, %c0_37, %c0_38] : memref<9x4x4xbf16, #tpu.memory_space<vmem>>, vector<1x4x4xbf16>
    %88 = vector.shape_cast %87 : vector<1x4x4xbf16> to vector<4x4xbf16>
    %cst_39 = arith.constant dense<0.000000e+00> : vector<256x4xf32>
    %89 = tpu.matmul %86, %88, %cst_39 {dimension_numbers = #tpu.dot_dimension_numbers<[1], [0], [0], [1], [0, 0, 1, 1], [], []>} : vector<256x4xbf16>, vector<4x4xbf16>, vector<256x4xf32> -> vector<256x4xf32>
    %90 = arith.addf %85, %89 : vector<256x4xf32>
    %91 = vector.extract_strided_slice %49 {offsets = [32, 0], sizes = [256, 4], strides = [1, 1]} : vector<288x4xbf16> to vector<256x4xbf16>
    %c8 = arith.constant 8 : index
    %c0_40 = arith.constant 0 : index
    %c0_41 = arith.constant 0 : index
    %92 = vector.load %arg4[%c8, %c0_40, %c0_41] : memref<9x4x4xbf16, #tpu.memory_space<vmem>>, vector<1x4x4xbf16>
    %93 = vector.shape_cast %92 : vector<1x4x4xbf16> to vector<4x4xbf16>
    %cst_42 = arith.constant dense<0.000000e+00> : vector<256x4xf32>
    %94 = tpu.matmul %91, %93, %cst_42 {dimension_numbers = #tpu.dot_dimension_numbers<[1], [0], [0], [1], [0, 0, 1, 1], [], []>} : vector<256x4xbf16>, vector<4x4xbf16>, vector<256x4xf32> -> vector<256x4xf32>
    %95 = arith.addf %90, %94 : vector<256x4xf32>
    %96 = arith.truncf %95 : vector<256x4xf32> to vector<256x4xbf16>
    %c0_43 = arith.constant 0 : index
    %c0_44 = arith.constant 0 : index
    %c0_45 = arith.constant 0 : index
    %97 = vector.load %arg5[%c0_43, %c0_44, %c0_45] : memref<1x256x4xbf16, #tpu.memory_space<vmem>>, vector<1x256x4xbf16>
    %98 = vector.shape_cast %97 : vector<1x256x4xbf16> to vector<256x4xbf16>
    %99 = vector.shape_cast %96 : vector<256x4xbf16> to vector<1x256x4xbf16>
    tpu.vector_store %arg5[%c0_43, %c0_44, %c0_45], %99 {strides = array<i32>} : memref<1x256x4xbf16, #tpu.memory_space<vmem>>, vector<1x256x4xbf16>,
    %100 = arith.extf %96 : vector<256x4xbf16> to vector<256x4xf32>
    %cst_46 = arith.constant dense<0.000000e+00> : vector<4xf32>
    %101 = vector.multi_reduction <add>, %100, %cst_46 [0] : vector<256x4xf32> to vector<4xf32>
    %102 = vector.shape_cast %101 : vector<4xf32> to vector<1x4xf32>
    %c0_47 = arith.constant 0 : index
    %c0_48 = arith.constant 0 : index
    %c0_49 = arith.constant 0 : index
    %103 = vector.load %arg6[%c0_47, %c0_48, %c0_49] : memref<1x1x4xf32, #tpu.memory_space<vmem>>, vector<1x1x4xf32>
    %104 = vector.shape_cast %103 : vector<1x1x4xf32> to vector<1x4xf32>
    %105 = vector.shape_cast %102 : vector<1x4xf32> to vector<1x1x4xf32>
    tpu.vector_store %arg6[%c0_47, %c0_48, %c0_49], %105 {strides = array<i32>} : memref<1x1x4xf32, #tpu.memory_space<vmem>>, vector<1x1x4xf32>,
    %106 = arith.mulf %100, %100 : vector<256x4xf32>
    %cst_50 = arith.constant dense<0.000000e+00> : vector<4xf32>
    %107 = vector.multi_reduction <add>, %106, %cst_50 [0] : vector<256x4xf32> to vector<4xf32>
    %108 = vector.shape_cast %107 : vector<4xf32> to vector<1x4xf32>
    %c0_51 = arith.constant 0 : index
    %c0_52 = arith.constant 0 : index
    %c0_53 = arith.constant 0 : index
    %109 = vector.load %arg7[%c0_51, %c0_52, %c0_53] : memref<1x1x4xf32, #tpu.memory_space<vmem>>, vector<1x1x4xf32>
    %110 = vector.shape_cast %109 : vector<1x1x4xf32> to vector<1x4xf32>
    %111 = vector.shape_cast %108 : vector<1x4xf32> to vector<1x1x4xf32>
    tpu.vector_store %arg7[%c0_51, %c0_52, %c0_53], %111 {strides = array<i32>} : memref<1x1x4xf32, #tpu.memory_space<vmem>>, vector<1x1x4xf32>,
    return
  }
  func.func @transform_0(%arg0: i32) -> (i32, i32, i32) {
    %c0_i32 = arith.constant 0 : i32
    %c0_i32_0 = arith.constant 0 : i32
    %c0_i32_1 = arith.constant 0 : i32
    return %arg0, %c0_i32, %c0_i32_0 : i32, i32, i32
  }
  func.func @transform_1(%arg0: i32) -> (i32, i32) {
    %c0_i32 = arith.constant 0 : i32
    %c0_i32_0 = arith.constant 0 : i32
    %c0_i32_1 = arith.constant 0 : i32
    return %c0_i32, %c0_i32_0 : i32, i32
  }
  func.func @transform_2(%arg0: i32) -> (i32, i32) {
    %c0_i32 = arith.constant 0 : i32
    %c0_i32_0 = arith.constant 0 : i32
    %c0_i32_1 = arith.constant 0 : i32
    return %c0_i32, %c0_i32_0 : i32, i32
  }
  func.func @transform_3(%arg0: i32) -> (i32, i32, i32) {
    %c0_i32 = arith.constant 0 : i32
    %c0_i32_0 = arith.constant 0 : i32
    %c0_i32_1 = arith.constant 0 : i32
    %c0_i32_2 = arith.constant 0 : i32
    return %c0_i32, %c0_i32_0, %c0_i32_1 : i32, i32, i32
  }
  func.func @transform_4(%arg0: i32) -> (i32, i32, i32) {
    %c0_i32 = arith.constant 0 : i32
    %c0_i32_0 = arith.constant 0 : i32
    %c0_i32_1 = arith.constant 0 : i32
    return %arg0, %c0_i32, %c0_i32_0 : i32, i32, i32
  }
  func.func @transform_5(%arg0: i32) -> (i32, i32, i32) {
    %c0_i32 = arith.constant 0 : i32
    %c0_i32_0 = arith.constant 0 : i32
    %c0_i32_1 = arith.constant 0 : i32
    return %arg0, %c0_i32, %c0_i32_0 : i32, i32, i32
  }
  func.func @transform_6(%arg0: i32) -> (i32, i32, i32) {
    %c0_i32 = arith.constant 0 : i32
    %c0_i32_0 = arith.constant 0 : i32
    %c0_i32_1 = arith.constant 0 : i32
    return %arg0, %c0_i32, %c0_i32_0 : i32, i32, i32
  }
}

module attributes {stable_mosaic.version = 11 : i64} {
  func.func @_bn_relu_mm_add_stats_kernel(%arg0: i32, %arg1: memref<512x4xbf16, #tpu.memory_space<vmem>>, %arg2: memref<1x4xf32, #tpu.memory_space<vmem>>, %arg3: memref<1x4xf32, #tpu.memory_space<vmem>>, %arg4: memref<4x8xbf16, #tpu.memory_space<vmem>>, %arg5: memref<512x8xf32, #tpu.memory_space<vmem>>, %arg6: memref<512x8xbf16, #tpu.memory_space<vmem>>, %arg7: memref<1x1x8xf32, #tpu.memory_space<vmem>>, %arg8: memref<1x1x8xf32, #tpu.memory_space<vmem>>) attributes {dimension_semantics = [#tpu.dimension_semantics<parallel>], iteration_bounds = array<i64: 1>, scalar_prefetch = 0 : i64, scratch_operands = 0 : i64, tpu.core_type = #tpu.core_type<tc>, window_params = [{transform_indices = @transform_0, window_bounds = array<i64: 512, 4>}, {pipeline_mode = #tpu.pipeline_mode<synchronous>, transform_indices = @transform_1, window_bounds = array<i64: 1, 4>}, {pipeline_mode = #tpu.pipeline_mode<synchronous>, transform_indices = @transform_2, window_bounds = array<i64: 1, 4>}, {pipeline_mode = #tpu.pipeline_mode<synchronous>, transform_indices = @transform_3, window_bounds = array<i64: 4, 8>}, {transform_indices = @transform_4, window_bounds = array<i64: 512, 8>}, {transform_indices = @transform_5, window_bounds = array<i64: 512, 8>}, {transform_indices = @transform_6, window_bounds = array<i64: 1, 1, 8>}, {transform_indices = @transform_7, window_bounds = array<i64: 1, 1, 8>}]} {
    %c0 = arith.constant 0 : index
    %c0_0 = arith.constant 0 : index
    %0 = vector.load %arg1[%c0, %c0_0] : memref<512x4xbf16, #tpu.memory_space<vmem>>, vector<512x4xbf16>
    %1 = arith.extf %0 : vector<512x4xbf16> to vector<512x4xf32>
    %c0_1 = arith.constant 0 : index
    %c0_2 = arith.constant 0 : index
    %2 = vector.load %arg2[%c0_1, %c0_2] : memref<1x4xf32, #tpu.memory_space<vmem>>, vector<1x4xf32>
    %3 = vector.broadcast %2 : vector<1x4xf32> to vector<512x4xf32>
    %4 = arith.mulf %1, %3 : vector<512x4xf32>
    %c0_3 = arith.constant 0 : index
    %c0_4 = arith.constant 0 : index
    %5 = vector.load %arg3[%c0_3, %c0_4] : memref<1x4xf32, #tpu.memory_space<vmem>>, vector<1x4xf32>
    %6 = vector.broadcast %5 : vector<1x4xf32> to vector<512x4xf32>
    %7 = arith.addf %4, %6 : vector<512x4xf32>
    %cst = arith.constant 0.000000e+00 : f32
    %8 = vector.broadcast %cst : f32 to vector<512x4xf32>
    %9 = arith.maximumf %7, %8 : vector<512x4xf32>
    %10 = arith.truncf %9 : vector<512x4xf32> to vector<512x4xbf16>
    %c0_5 = arith.constant 0 : index
    %c0_6 = arith.constant 0 : index
    %11 = vector.load %arg4[%c0_5, %c0_6] : memref<4x8xbf16, #tpu.memory_space<vmem>>, vector<4x8xbf16>
    %cst_7 = arith.constant dense<0.000000e+00> : vector<512x8xf32>
    %12 = tpu.matmul %10, %11, %cst_7 {dimension_numbers = #tpu.dot_dimension_numbers<[1], [0], [0], [1], [0, 0, 1, 1], [], []>} : vector<512x4xbf16>, vector<4x8xbf16>, vector<512x8xf32> -> vector<512x8xf32>
    %c0_8 = arith.constant 0 : index
    %c0_9 = arith.constant 0 : index
    %13 = vector.load %arg5[%c0_8, %c0_9] : memref<512x8xf32, #tpu.memory_space<vmem>>, vector<512x8xf32>
    %14 = arith.addf %12, %13 : vector<512x8xf32>
    %15 = arith.truncf %14 : vector<512x8xf32> to vector<512x8xbf16>
    %c0_10 = arith.constant 0 : index
    %c0_11 = arith.constant 0 : index
    %16 = vector.load %arg6[%c0_10, %c0_11] : memref<512x8xbf16, #tpu.memory_space<vmem>>, vector<512x8xbf16>
    tpu.vector_store %arg6[%c0_10, %c0_11], %15 {strides = array<i32>} : memref<512x8xbf16, #tpu.memory_space<vmem>>, vector<512x8xbf16>,
    %17 = arith.extf %15 : vector<512x8xbf16> to vector<512x8xf32>
    %cst_12 = arith.constant dense<0.000000e+00> : vector<8xf32>
    %18 = vector.multi_reduction <add>, %17, %cst_12 [0] : vector<512x8xf32> to vector<8xf32>
    %19 = vector.shape_cast %18 : vector<8xf32> to vector<1x8xf32>
    %c0_13 = arith.constant 0 : index
    %c0_14 = arith.constant 0 : index
    %c0_15 = arith.constant 0 : index
    %20 = vector.load %arg7[%c0_13, %c0_14, %c0_15] : memref<1x1x8xf32, #tpu.memory_space<vmem>>, vector<1x1x8xf32>
    %21 = vector.shape_cast %20 : vector<1x1x8xf32> to vector<1x8xf32>
    %22 = vector.shape_cast %19 : vector<1x8xf32> to vector<1x1x8xf32>
    tpu.vector_store %arg7[%c0_13, %c0_14, %c0_15], %22 {strides = array<i32>} : memref<1x1x8xf32, #tpu.memory_space<vmem>>, vector<1x1x8xf32>,
    %23 = arith.mulf %17, %17 : vector<512x8xf32>
    %cst_16 = arith.constant dense<0.000000e+00> : vector<8xf32>
    %24 = vector.multi_reduction <add>, %23, %cst_16 [0] : vector<512x8xf32> to vector<8xf32>
    %25 = vector.shape_cast %24 : vector<8xf32> to vector<1x8xf32>
    %c0_17 = arith.constant 0 : index
    %c0_18 = arith.constant 0 : index
    %c0_19 = arith.constant 0 : index
    %26 = vector.load %arg8[%c0_17, %c0_18, %c0_19] : memref<1x1x8xf32, #tpu.memory_space<vmem>>, vector<1x1x8xf32>
    %27 = vector.shape_cast %26 : vector<1x1x8xf32> to vector<1x8xf32>
    %28 = vector.shape_cast %25 : vector<1x8xf32> to vector<1x1x8xf32>
    tpu.vector_store %arg8[%c0_17, %c0_18, %c0_19], %28 {strides = array<i32>} : memref<1x1x8xf32, #tpu.memory_space<vmem>>, vector<1x1x8xf32>,
    return
  }
  func.func @transform_0(%arg0: i32) -> (i32, i32) {
    %c0_i32 = arith.constant 0 : i32
    %c0_i32_0 = arith.constant 0 : i32
    return %arg0, %c0_i32 : i32, i32
  }
  func.func @transform_1(%arg0: i32) -> (i32, i32) {
    %c0_i32 = arith.constant 0 : i32
    %c0_i32_0 = arith.constant 0 : i32
    %c0_i32_1 = arith.constant 0 : i32
    return %c0_i32, %c0_i32_0 : i32, i32
  }
  func.func @transform_2(%arg0: i32) -> (i32, i32) {
    %c0_i32 = arith.constant 0 : i32
    %c0_i32_0 = arith.constant 0 : i32
    %c0_i32_1 = arith.constant 0 : i32
    return %c0_i32, %c0_i32_0 : i32, i32
  }
  func.func @transform_3(%arg0: i32) -> (i32, i32) {
    %c0_i32 = arith.constant 0 : i32
    %c0_i32_0 = arith.constant 0 : i32
    %c0_i32_1 = arith.constant 0 : i32
    return %c0_i32, %c0_i32_0 : i32, i32
  }
  func.func @transform_4(%arg0: i32) -> (i32, i32) {
    %c0_i32 = arith.constant 0 : i32
    %c0_i32_0 = arith.constant 0 : i32
    return %arg0, %c0_i32 : i32, i32
  }
  func.func @transform_5(%arg0: i32) -> (i32, i32) {
    %c0_i32 = arith.constant 0 : i32
    %c0_i32_0 = arith.constant 0 : i32
    return %arg0, %c0_i32 : i32, i32
  }
  func.func @transform_6(%arg0: i32) -> (i32, i32, i32) {
    %c0_i32 = arith.constant 0 : i32
    %c0_i32_0 = arith.constant 0 : i32
    %c0_i32_1 = arith.constant 0 : i32
    return %arg0, %c0_i32, %c0_i32_0 : i32, i32, i32
  }
  func.func @transform_7(%arg0: i32) -> (i32, i32, i32) {
    %c0_i32 = arith.constant 0 : i32
    %c0_i32_0 = arith.constant 0 : i32
    %c0_i32_1 = arith.constant 0 : i32
    return %arg0, %c0_i32, %c0_i32_0 : i32, i32, i32
  }
}

module attributes {stable_mosaic.version = 11 : i64} {
  func.func @_bn_relu_dual_mm_stats_kernel(%arg0: i32, %arg1: memref<512x8xbf16, #tpu.memory_space<vmem>>, %arg2: memref<1x8xf32, #tpu.memory_space<vmem>>, %arg3: memref<1x8xf32, #tpu.memory_space<vmem>>, %arg4: memref<1x8xf32, #tpu.memory_space<vmem>>, %arg5: memref<1x8xf32, #tpu.memory_space<vmem>>, %arg6: memref<8x4xbf16, #tpu.memory_space<vmem>>, %arg7: memref<8x4xbf16, #tpu.memory_space<vmem>>, %arg8: memref<512x4xbf16, #tpu.memory_space<vmem>>, %arg9: memref<512x4xbf16, #tpu.memory_space<vmem>>, %arg10: memref<1x1x4xf32, #tpu.memory_space<vmem>>, %arg11: memref<1x1x4xf32, #tpu.memory_space<vmem>>) attributes {dimension_semantics = [#tpu.dimension_semantics<parallel>], iteration_bounds = array<i64: 1>, scalar_prefetch = 0 : i64, scratch_operands = 0 : i64, tpu.core_type = #tpu.core_type<tc>, window_params = [{transform_indices = @transform_0, window_bounds = array<i64: 512, 8>}, {pipeline_mode = #tpu.pipeline_mode<synchronous>, transform_indices = @transform_1, window_bounds = array<i64: 1, 8>}, {pipeline_mode = #tpu.pipeline_mode<synchronous>, transform_indices = @transform_2, window_bounds = array<i64: 1, 8>}, {pipeline_mode = #tpu.pipeline_mode<synchronous>, transform_indices = @transform_3, window_bounds = array<i64: 1, 8>}, {pipeline_mode = #tpu.pipeline_mode<synchronous>, transform_indices = @transform_4, window_bounds = array<i64: 1, 8>}, {pipeline_mode = #tpu.pipeline_mode<synchronous>, transform_indices = @transform_5, window_bounds = array<i64: 8, 4>}, {pipeline_mode = #tpu.pipeline_mode<synchronous>, transform_indices = @transform_6, window_bounds = array<i64: 8, 4>}, {transform_indices = @transform_7, window_bounds = array<i64: 512, 4>}, {transform_indices = @transform_8, window_bounds = array<i64: 512, 4>}, {transform_indices = @transform_9, window_bounds = array<i64: 1, 1, 4>}, {transform_indices = @transform_10, window_bounds = array<i64: 1, 1, 4>}]} {
    %c0 = arith.constant 0 : index
    %c0_0 = arith.constant 0 : index
    %0 = vector.load %arg1[%c0, %c0_0] : memref<512x8xbf16, #tpu.memory_space<vmem>>, vector<512x8xbf16>
    %1 = arith.extf %0 : vector<512x8xbf16> to vector<512x8xf32>
    %c0_1 = arith.constant 0 : index
    %c0_2 = arith.constant 0 : index
    %2 = vector.load %arg2[%c0_1, %c0_2] : memref<1x8xf32, #tpu.memory_space<vmem>>, vector<1x8xf32>
    %3 = vector.broadcast %2 : vector<1x8xf32> to vector<512x8xf32>
    %4 = arith.mulf %1, %3 : vector<512x8xf32>
    %c0_3 = arith.constant 0 : index
    %c0_4 = arith.constant 0 : index
    %5 = vector.load %arg3[%c0_3, %c0_4] : memref<1x8xf32, #tpu.memory_space<vmem>>, vector<1x8xf32>
    %6 = vector.broadcast %5 : vector<1x8xf32> to vector<512x8xf32>
    %7 = arith.addf %4, %6 : vector<512x8xf32>
    %cst = arith.constant 0.000000e+00 : f32
    %8 = vector.broadcast %cst : f32 to vector<512x8xf32>
    %9 = arith.maximumf %7, %8 : vector<512x8xf32>
    %10 = arith.truncf %9 : vector<512x8xf32> to vector<512x8xbf16>
    %c0_5 = arith.constant 0 : index
    %c0_6 = arith.constant 0 : index
    %11 = vector.load %arg6[%c0_5, %c0_6] : memref<8x4xbf16, #tpu.memory_space<vmem>>, vector<8x4xbf16>
    %cst_7 = arith.constant dense<0.000000e+00> : vector<512x4xf32>
    %12 = tpu.matmul %10, %11, %cst_7 {dimension_numbers = #tpu.dot_dimension_numbers<[1], [0], [0], [1], [0, 0, 1, 1], [], []>} : vector<512x8xbf16>, vector<8x4xbf16>, vector<512x4xf32> -> vector<512x4xf32>
    %13 = arith.truncf %12 : vector<512x4xf32> to vector<512x4xbf16>
    %c0_8 = arith.constant 0 : index
    %c0_9 = arith.constant 0 : index
    %14 = vector.load %arg8[%c0_8, %c0_9] : memref<512x4xbf16, #tpu.memory_space<vmem>>, vector<512x4xbf16>
    tpu.vector_store %arg8[%c0_8, %c0_9], %13 {strides = array<i32>} : memref<512x4xbf16, #tpu.memory_space<vmem>>, vector<512x4xbf16>,
    %c0_10 = arith.constant 0 : index
    %c0_11 = arith.constant 0 : index
    %15 = vector.load %arg4[%c0_10, %c0_11] : memref<1x8xf32, #tpu.memory_space<vmem>>, vector<1x8xf32>
    %16 = vector.broadcast %15 : vector<1x8xf32> to vector<512x8xf32>
    %17 = arith.mulf %1, %16 : vector<512x8xf32>
    %c0_12 = arith.constant 0 : index
    %c0_13 = arith.constant 0 : index
    %18 = vector.load %arg5[%c0_12, %c0_13] : memref<1x8xf32, #tpu.memory_space<vmem>>, vector<1x8xf32>
    %19 = vector.broadcast %18 : vector<1x8xf32> to vector<512x8xf32>
    %20 = arith.addf %17, %19 : vector<512x8xf32>
    %cst_14 = arith.constant 0.000000e+00 : f32
    %21 = vector.broadcast %cst_14 : f32 to vector<512x8xf32>
    %22 = arith.maximumf %20, %21 : vector<512x8xf32>
    %23 = arith.truncf %22 : vector<512x8xf32> to vector<512x8xbf16>
    %c0_15 = arith.constant 0 : index
    %c0_16 = arith.constant 0 : index
    %24 = vector.load %arg7[%c0_15, %c0_16] : memref<8x4xbf16, #tpu.memory_space<vmem>>, vector<8x4xbf16>
    %cst_17 = arith.constant dense<0.000000e+00> : vector<512x4xf32>
    %25 = tpu.matmul %23, %24, %cst_17 {dimension_numbers = #tpu.dot_dimension_numbers<[1], [0], [0], [1], [0, 0, 1, 1], [], []>} : vector<512x8xbf16>, vector<8x4xbf16>, vector<512x4xf32> -> vector<512x4xf32>
    %26 = arith.truncf %25 : vector<512x4xf32> to vector<512x4xbf16>
    %c0_18 = arith.constant 0 : index
    %c0_19 = arith.constant 0 : index
    %27 = vector.load %arg9[%c0_18, %c0_19] : memref<512x4xbf16, #tpu.memory_space<vmem>>, vector<512x4xbf16>
    tpu.vector_store %arg9[%c0_18, %c0_19], %26 {strides = array<i32>} : memref<512x4xbf16, #tpu.memory_space<vmem>>, vector<512x4xbf16>,
    %28 = arith.extf %13 : vector<512x4xbf16> to vector<512x4xf32>
    %cst_20 = arith.constant dense<0.000000e+00> : vector<4xf32>
    %29 = vector.multi_reduction <add>, %28, %cst_20 [0] : vector<512x4xf32> to vector<4xf32>
    %30 = vector.shape_cast %29 : vector<4xf32> to vector<1x4xf32>
    %c0_21 = arith.constant 0 : index
    %c0_22 = arith.constant 0 : index
    %c0_23 = arith.constant 0 : index
    %31 = vector.load %arg10[%c0_21, %c0_22, %c0_23] : memref<1x1x4xf32, #tpu.memory_space<vmem>>, vector<1x1x4xf32>
    %32 = vector.shape_cast %31 : vector<1x1x4xf32> to vector<1x4xf32>
    %33 = vector.shape_cast %30 : vector<1x4xf32> to vector<1x1x4xf32>
    tpu.vector_store %arg10[%c0_21, %c0_22, %c0_23], %33 {strides = array<i32>} : memref<1x1x4xf32, #tpu.memory_space<vmem>>, vector<1x1x4xf32>,
    %34 = arith.mulf %28, %28 : vector<512x4xf32>
    %cst_24 = arith.constant dense<0.000000e+00> : vector<4xf32>
    %35 = vector.multi_reduction <add>, %34, %cst_24 [0] : vector<512x4xf32> to vector<4xf32>
    %36 = vector.shape_cast %35 : vector<4xf32> to vector<1x4xf32>
    %c0_25 = arith.constant 0 : index
    %c0_26 = arith.constant 0 : index
    %c0_27 = arith.constant 0 : index
    %37 = vector.load %arg11[%c0_25, %c0_26, %c0_27] : memref<1x1x4xf32, #tpu.memory_space<vmem>>, vector<1x1x4xf32>
    %38 = vector.shape_cast %37 : vector<1x1x4xf32> to vector<1x4xf32>
    %39 = vector.shape_cast %36 : vector<1x4xf32> to vector<1x1x4xf32>
    tpu.vector_store %arg11[%c0_25, %c0_26, %c0_27], %39 {strides = array<i32>} : memref<1x1x4xf32, #tpu.memory_space<vmem>>, vector<1x1x4xf32>,
    return
  }
  func.func @transform_0(%arg0: i32) -> (i32, i32) {
    %c0_i32 = arith.constant 0 : i32
    %c0_i32_0 = arith.constant 0 : i32
    return %arg0, %c0_i32 : i32, i32
  }
  func.func @transform_1(%arg0: i32) -> (i32, i32) {
    %c0_i32 = arith.constant 0 : i32
    %c0_i32_0 = arith.constant 0 : i32
    %c0_i32_1 = arith.constant 0 : i32
    return %c0_i32, %c0_i32_0 : i32, i32
  }
  func.func @transform_2(%arg0: i32) -> (i32, i32) {
    %c0_i32 = arith.constant 0 : i32
    %c0_i32_0 = arith.constant 0 : i32
    %c0_i32_1 = arith.constant 0 : i32
    return %c0_i32, %c0_i32_0 : i32, i32
  }
  func.func @transform_3(%arg0: i32) -> (i32, i32) {
    %c0_i32 = arith.constant 0 : i32
    %c0_i32_0 = arith.constant 0 : i32
    %c0_i32_1 = arith.constant 0 : i32
    return %c0_i32, %c0_i32_0 : i32, i32
  }
  func.func @transform_4(%arg0: i32) -> (i32, i32) {
    %c0_i32 = arith.constant 0 : i32
    %c0_i32_0 = arith.constant 0 : i32
    %c0_i32_1 = arith.constant 0 : i32
    return %c0_i32, %c0_i32_0 : i32, i32
  }
  func.func @transform_5(%arg0: i32) -> (i32, i32) {
    %c0_i32 = arith.constant 0 : i32
    %c0_i32_0 = arith.constant 0 : i32
    %c0_i32_1 = arith.constant 0 : i32
    return %c0_i32, %c0_i32_0 : i32, i32
  }
  func.func @transform_6(%arg0: i32) -> (i32, i32) {
    %c0_i32 = arith.constant 0 : i32
    %c0_i32_0 = arith.constant 0 : i32
    %c0_i32_1 = arith.constant 0 : i32
    return %c0_i32, %c0_i32_0 : i32, i32
  }
  func.func @transform_7(%arg0: i32) -> (i32, i32) {
    %c0_i32 = arith.constant 0 : i32
    %c0_i32_0 = arith.constant 0 : i32
    return %arg0, %c0_i32 : i32, i32
  }
  func.func @transform_8(%arg0: i32) -> (i32, i32) {
    %c0_i32 = arith.constant 0 : i32
    %c0_i32_0 = arith.constant 0 : i32
    return %arg0, %c0_i32 : i32, i32
  }
  func.func @transform_9(%arg0: i32) -> (i32, i32, i32) {
    %c0_i32 = arith.constant 0 : i32
    %c0_i32_0 = arith.constant 0 : i32
    %c0_i32_1 = arith.constant 0 : i32
    return %arg0, %c0_i32, %c0_i32_0 : i32, i32, i32
  }
  func.func @transform_10(%arg0: i32) -> (i32, i32, i32) {
    %c0_i32 = arith.constant 0 : i32
    %c0_i32_0 = arith.constant 0 : i32
    %c0_i32_1 = arith.constant 0 : i32
    return %arg0, %c0_i32, %c0_i32_0 : i32, i32, i32
  }
}

module attributes {stable_mosaic.version = 11 : i64} {
  func.func @_bn_relu_mm_add_stats_kernel(%arg0: i32, %arg1: memref<512x4xbf16, #tpu.memory_space<vmem>>, %arg2: memref<1x4xf32, #tpu.memory_space<vmem>>, %arg3: memref<1x4xf32, #tpu.memory_space<vmem>>, %arg4: memref<4x4xbf16, #tpu.memory_space<vmem>>, %arg5: memref<512x4xbf16, #tpu.memory_space<vmem>>, %arg6: memref<512x4xbf16, #tpu.memory_space<vmem>>, %arg7: memref<1x1x4xf32, #tpu.memory_space<vmem>>, %arg8: memref<1x1x4xf32, #tpu.memory_space<vmem>>) attributes {dimension_semantics = [#tpu.dimension_semantics<parallel>], iteration_bounds = array<i64: 1>, scalar_prefetch = 0 : i64, scratch_operands = 0 : i64, tpu.core_type = #tpu.core_type<tc>, window_params = [{transform_indices = @transform_0, window_bounds = array<i64: 512, 4>}, {pipeline_mode = #tpu.pipeline_mode<synchronous>, transform_indices = @transform_1, window_bounds = array<i64: 1, 4>}, {pipeline_mode = #tpu.pipeline_mode<synchronous>, transform_indices = @transform_2, window_bounds = array<i64: 1, 4>}, {pipeline_mode = #tpu.pipeline_mode<synchronous>, transform_indices = @transform_3, window_bounds = array<i64: 4, 4>}, {transform_indices = @transform_4, window_bounds = array<i64: 512, 4>}, {transform_indices = @transform_5, window_bounds = array<i64: 512, 4>}, {transform_indices = @transform_6, window_bounds = array<i64: 1, 1, 4>}, {transform_indices = @transform_7, window_bounds = array<i64: 1, 1, 4>}]} {
    %c0 = arith.constant 0 : index
    %c0_0 = arith.constant 0 : index
    %0 = vector.load %arg1[%c0, %c0_0] : memref<512x4xbf16, #tpu.memory_space<vmem>>, vector<512x4xbf16>
    %1 = arith.extf %0 : vector<512x4xbf16> to vector<512x4xf32>
    %c0_1 = arith.constant 0 : index
    %c0_2 = arith.constant 0 : index
    %2 = vector.load %arg2[%c0_1, %c0_2] : memref<1x4xf32, #tpu.memory_space<vmem>>, vector<1x4xf32>
    %3 = vector.broadcast %2 : vector<1x4xf32> to vector<512x4xf32>
    %4 = arith.mulf %1, %3 : vector<512x4xf32>
    %c0_3 = arith.constant 0 : index
    %c0_4 = arith.constant 0 : index
    %5 = vector.load %arg3[%c0_3, %c0_4] : memref<1x4xf32, #tpu.memory_space<vmem>>, vector<1x4xf32>
    %6 = vector.broadcast %5 : vector<1x4xf32> to vector<512x4xf32>
    %7 = arith.addf %4, %6 : vector<512x4xf32>
    %cst = arith.constant 0.000000e+00 : f32
    %8 = vector.broadcast %cst : f32 to vector<512x4xf32>
    %9 = arith.maximumf %7, %8 : vector<512x4xf32>
    %10 = arith.truncf %9 : vector<512x4xf32> to vector<512x4xbf16>
    %c0_5 = arith.constant 0 : index
    %c0_6 = arith.constant 0 : index
    %11 = vector.load %arg4[%c0_5, %c0_6] : memref<4x4xbf16, #tpu.memory_space<vmem>>, vector<4x4xbf16>
    %cst_7 = arith.constant dense<0.000000e+00> : vector<512x4xf32>
    %12 = tpu.matmul %10, %11, %cst_7 {dimension_numbers = #tpu.dot_dimension_numbers<[1], [0], [0], [1], [0, 0, 1, 1], [], []>} : vector<512x4xbf16>, vector<4x4xbf16>, vector<512x4xf32> -> vector<512x4xf32>
    %c0_8 = arith.constant 0 : index
    %c0_9 = arith.constant 0 : index
    %13 = vector.load %arg5[%c0_8, %c0_9] : memref<512x4xbf16, #tpu.memory_space<vmem>>, vector<512x4xbf16>
    %14 = arith.extf %13 : vector<512x4xbf16> to vector<512x4xf32>
    %15 = arith.addf %12, %14 : vector<512x4xf32>
    %16 = arith.truncf %15 : vector<512x4xf32> to vector<512x4xbf16>
    %c0_10 = arith.constant 0 : index
    %c0_11 = arith.constant 0 : index
    %17 = vector.load %arg6[%c0_10, %c0_11] : memref<512x4xbf16, #tpu.memory_space<vmem>>, vector<512x4xbf16>
    tpu.vector_store %arg6[%c0_10, %c0_11], %16 {strides = array<i32>} : memref<512x4xbf16, #tpu.memory_space<vmem>>, vector<512x4xbf16>,
    %18 = arith.extf %16 : vector<512x4xbf16> to vector<512x4xf32>
    %cst_12 = arith.constant dense<0.000000e+00> : vector<4xf32>
    %19 = vector.multi_reduction <add>, %18, %cst_12 [0] : vector<512x4xf32> to vector<4xf32>
    %20 = vector.shape_cast %19 : vector<4xf32> to vector<1x4xf32>
    %c0_13 = arith.constant 0 : index
    %c0_14 = arith.constant 0 : index
    %c0_15 = arith.constant 0 : index
    %21 = vector.load %arg7[%c0_13, %c0_14, %c0_15] : memref<1x1x4xf32, #tpu.memory_space<vmem>>, vector<1x1x4xf32>
    %22 = vector.shape_cast %21 : vector<1x1x4xf32> to vector<1x4xf32>
    %23 = vector.shape_cast %20 : vector<1x4xf32> to vector<1x1x4xf32>
    tpu.vector_store %arg7[%c0_13, %c0_14, %c0_15], %23 {strides = array<i32>} : memref<1x1x4xf32, #tpu.memory_space<vmem>>, vector<1x1x4xf32>,
    %24 = arith.mulf %18, %18 : vector<512x4xf32>
    %cst_16 = arith.constant dense<0.000000e+00> : vector<4xf32>
    %25 = vector.multi_reduction <add>, %24, %cst_16 [0] : vector<512x4xf32> to vector<4xf32>
    %26 = vector.shape_cast %25 : vector<4xf32> to vector<1x4xf32>
    %c0_17 = arith.constant 0 : index
    %c0_18 = arith.constant 0 : index
    %c0_19 = arith.constant 0 : index
    %27 = vector.load %arg8[%c0_17, %c0_18, %c0_19] : memref<1x1x4xf32, #tpu.memory_space<vmem>>, vector<1x1x4xf32>
    %28 = vector.shape_cast %27 : vector<1x1x4xf32> to vector<1x4xf32>
    %29 = vector.shape_cast %26 : vector<1x4xf32> to vector<1x1x4xf32>
    tpu.vector_store %arg8[%c0_17, %c0_18, %c0_19], %29 {strides = array<i32>} : memref<1x1x4xf32, #tpu.memory_space<vmem>>, vector<1x1x4xf32>,
    return
  }
  func.func @transform_0(%arg0: i32) -> (i32, i32) {
    %c0_i32 = arith.constant 0 : i32
    %c0_i32_0 = arith.constant 0 : i32
    return %arg0, %c0_i32 : i32, i32
  }
  func.func @transform_1(%arg0: i32) -> (i32, i32) {
    %c0_i32 = arith.constant 0 : i32
    %c0_i32_0 = arith.constant 0 : i32
    %c0_i32_1 = arith.constant 0 : i32
    return %c0_i32, %c0_i32_0 : i32, i32
  }
  func.func @transform_2(%arg0: i32) -> (i32, i32) {
    %c0_i32 = arith.constant 0 : i32
    %c0_i32_0 = arith.constant 0 : i32
    %c0_i32_1 = arith.constant 0 : i32
    return %c0_i32, %c0_i32_0 : i32, i32
  }
  func.func @transform_3(%arg0: i32) -> (i32, i32) {
    %c0_i32 = arith.constant 0 : i32
    %c0_i32_0 = arith.constant 0 : i32
    %c0_i32_1 = arith.constant 0 : i32
    return %c0_i32, %c0_i32_0 : i32, i32
  }
  func.func @transform_4(%arg0: i32) -> (i32, i32) {
    %c0_i32 = arith.constant 0 : i32
    %c0_i32_0 = arith.constant 0 : i32
    return %arg0, %c0_i32 : i32, i32
  }
  func.func @transform_5(%arg0: i32) -> (i32, i32) {
    %c0_i32 = arith.constant 0 : i32
    %c0_i32_0 = arith.constant 0 : i32
    return %arg0, %c0_i32 : i32, i32
  }
  func.func @transform_6(%arg0: i32) -> (i32, i32, i32) {
    %c0_i32 = arith.constant 0 : i32
    %c0_i32_0 = arith.constant 0 : i32
    %c0_i32_1 = arith.constant 0 : i32
    return %arg0, %c0_i32, %c0_i32_0 : i32, i32, i32
  }
  func.func @transform_7(%arg0: i32) -> (i32, i32, i32) {
    %c0_i32 = arith.constant 0 : i32
    %c0_i32_0 = arith.constant 0 : i32
    %c0_i32_1 = arith.constant 0 : i32
    return %arg0, %c0_i32, %c0_i32_0 : i32, i32, i32
  }
}

</mosaic_0001>

<bundles_post_ra>
// kernel: _lambda_.7
= control target key start
LH: loop header
LB: loop body
LE: loop exit
PB: predicated region body
PF: predicated region fallthrough
CT: control target
= control target key end

     0   :  { %vm74_vm0 = vcmask 64512   ;;  %vm208_vm1 = vcmask 57344   ;;  %s757_s0 = inlined_call_operand.vmem [shape: f32[512,8], index: 0, kind: input, shape index: {}]   ;;  %s758_s1 = inlined_call_operand.vmem [shape: f32[1,1,8], index: 1, kind: output, shape index: {0}]   ;;  %s759_s2 = inlined_call_operand.vmem [shape: f32[1,1,8], index: 2, kind: output, shape index: {1}]  }
   0x1   :  { %v10_v0 = vld [vmem:[%s757_s0] sm:$0xff]  ;;  %v11_v1 = vld [vmem:[%s757_s0 + $0x8] sm:$0xff]  ;;  %v12_v2 = vld [vmem:[%s757_s0 + $0x10] sm:$0xff] }
   0x2   :  { %v75_v3 = vsel %vm74_vm0, %v10_v0, 0.0  ;;  %v76_v4 = vsel %vm74_vm0, %v11_v1, 0.0  ;;  %v78_v5 = vsel %vm74_vm0, %v12_v2, 0.0  ;;  %v13_v6 = vld [vmem:[%s757_s0 + $0x18] sm:$0xff]  ;;  %v14_v9 = vld [vmem:[%s757_s0 + $0x20] sm:$0xff]  ;;  %v15_v12 = vld [vmem:[%s757_s0 + $0x28] sm:$0xff]  ;;  %v210_v20 = vmul.f32 %v10_v0, %v10_v0 }
   0x3   :  { %v77_v7 = vadd.f32 %v76_v4, %v75_v3  ;;  %v80_v8 = vsel %vm74_vm0, %v13_v6, 0.0  ;;  %v82_v11 = vsel %vm74_vm0, %v14_v9, 0.0  ;;  %v84_v14 = vsel %vm74_vm0, %v15_v12, 0.0  ;;  %v16_v15 = vld [vmem:[%s757_s0 + $0x30] sm:$0xff]  ;;  %v17_v18 = vld [vmem:[%s757_s0 + $0x38] sm:$0xff]  ;;  %v18_v24 = vld [vmem:[%s757_s0 + $0x40] sm:$0xff] }
   0x4   :  { %v86_v17 = vsel %vm74_vm0, %v16_v15, 0.0  ;;  %v88_v21 = vsel %vm74_vm0, %v17_v18, 0.0  ;;  %v211_v22 = vmul.f32 %v11_v1, %v11_v1  ;;  %v212_v23 = vmul.f32 %v12_v2, %v12_v2  ;;  %v19_v28 = vld [vmem:[%s757_s0 + $0x48] sm:$0xff]  ;;  %v20_v35 = vld [vmem:[%s757_s0 + $0x50] sm:$0xff]  ;;  %v21_v41 = vld [vmem:[%s757_s0 + $0x58] sm:$0xff] }
   0x5   :  { %v79_v10 = vadd.f32 %v78_v5, %v77_v7  ;;  %v90_v26 = vsel %vm74_vm0, %v18_v24, 0.0  ;;  %v213_v27 = vmul.f32 %v13_v6, %v13_v6  ;;  %v274_v30 = vsel %vm74_vm0, %v210_v20, 0.0  ;;  %v22_v47 = vld [vmem:[%s757_s0 + $0x60] sm:$0xff]  ;;  %v23_v53 = vld [vmem:[%s757_s0 + $0x68] sm:$0xff]  ;;  %v24_v59 = vld [vmem:[%s757_s0 + $0x70] sm:$0xff] }
   0x6   :  { %v92_v31 = vsel %vm74_vm0, %v19_v28, 0.0  ;;  %v214_v32 = vmul.f32 %v14_v9, %v14_v9  ;;  %v275_v33 = vsel %vm74_vm0, %v211_v22, 0.0  ;;  %v277_v34 = vsel %vm74_vm0, %v212_v23, 0.0  ;;  %v25_v1 = vld [vmem:[%s757_s0 + $0x78] sm:$0xff]  ;;  %v26_v7 = vld [vmem:[%s757_s0 + $0x80] sm:$0xff] }
   0x7   :  { %v81_v13 = vadd.f32 %v80_v8, %v79_v10  ;;  %v276_v37 = vadd.f32 %v275_v33, %v274_v30  ;;  %v94_v38 = vsel %vm74_vm0, %v20_v35, 0.0  ;;  %v215_v39 = vmul.f32 %v15_v12, %v15_v12 }
   0x8   :  { %v279_v40 = vsel %vm74_vm0, %v213_v27, 0.0  ;;  %v96_v44 = vsel %vm74_vm0, %v21_v41, 0.0  ;;  %v216_v45 = vmul.f32 %v16_v15, %v16_v15  ;;  %v281_v46 = vsel %vm74_vm0, %v214_v32, 0.0 }
   0x9   :  { %v83_v16 = vadd.f32 %v82_v11, %v81_v13  ;;  %v278_v43 = vadd.f32 %v277_v34, %v276_v37  ;;  %v98_v50 = vsel %vm74_vm0, %v22_v47, 0.0  ;;  %v217_v51 = vmul.f32 %v17_v18, %v17_v18  ;;  %v27_v13 = vld [vmem:[%s757_s0 + $0x88] sm:$0xff] }
   0xa   :  { %v283_v52 = vsel %vm74_vm0, %v215_v39, 0.0  ;;  %v100_v56 = vsel %vm74_vm0, %v23_v53, 0.0  ;;  %v218_v57 = vmul.f32 %v18_v24, %v18_v24  ;;  %v285_v58 = vsel %vm74_vm0, %v216_v45, 0.0  ;;  %v31_v37 = vld [vmem:[%s757_s0 + $0xa8] sm:$0xff] }
   0xb   :  { %v85_v19 = vadd.f32 %v84_v14, %v83_v16  ;;  %v280_v49 = vadd.f32 %v279_v40, %v278_v43  ;;  %v102_v62 = vsel %vm74_vm0, %v24_v59, 0.0  ;;  %v219_v63 = vmul.f32 %v19_v28, %v19_v28  ;;  %v32_v43 = vld [vmem:[%s757_s0 + $0xb0] sm:$0xff] }
   0xc   :  { %v287_v0 = vsel %vm74_vm0, %v217_v51, 0.0  ;;  %v104_v4 = vsel %vm74_vm0, %v25_v1, 0.0  ;;  %v220_v5 = vmul.f32 %v20_v35, %v20_v35  ;;  %v289_v6 = vsel %vm74_vm0, %v218_v57, 0.0 }
   0xd   :  { %v87_v25 = vadd.f32 %v86_v17, %v85_v19  ;;  %v282_v55 = vadd.f32 %v281_v46, %v280_v49  ;;  %v106_v10 = vsel %vm74_vm0, %v26_v7, 0.0  ;;  %v221_v11 = vmul.f32 %v21_v41, %v21_v41  ;;  %v28_v19 = vld [vmem:[%s757_s0 + $0x90] sm:$0xff]  ;;  %v33_v49 = vld [vmem:[%s757_s0 + $0xb8] sm:$0xff] }
   0xe   :  { %v291_v12 = vsel %vm74_vm0, %v219_v63, 0.0  ;;  %v108_v16 = vsel %vm74_vm0, %v27_v13, 0.0  ;;  %v222_v17 = vmul.f32 %v22_v47, %v22_v47  ;;  %v293_v18 = vsel %vm74_vm0, %v220_v5, 0.0 }
   0xf   :  { %v89_v29 = vadd.f32 %v88_v21, %v87_v25  ;;  %v284_v61 = vadd.f32 %v283_v52, %v282_v55  ;;  %v110_v22 = vsel %vm74_vm0, %v28_v19, 0.0  ;;  %v223_v23 = vmul.f32 %v23_v53, %v23_v53  ;;  %v29_v25 = vld [vmem:[%s757_s0 + $0x98] sm:$0xff]  ;;  %v34_v55 = vld [vmem:[%s757_s0 + $0xc0] sm:$0xff] }
  0x10   :  { %v295_v24 = vsel %vm74_vm0, %v221_v11, 0.0  ;;  %v112_v28 = vsel %vm74_vm0, %v29_v25, 0.0  ;;  %v297_v30 = vsel %vm74_vm0, %v222_v17, 0.0  ;;  %v225_v35 = vmul.f32 %v25_v1, %v25_v1 }
  0x11   :  { %v91_v36 = vadd.f32 %v90_v26, %v89_v29  ;;  %v286_v3 = vadd.f32 %v285_v58, %v284_v61  ;;  %v224_v29 = vmul.f32 %v24_v59, %v24_v59  ;;  %v116_v40 = vsel %vm74_vm0, %v31_v37, 0.0  ;;  %v35_v61 = vld [vmem:[%s757_s0 + $0xc8] sm:$0xff] }
  0x12   :  { %v226_v41 = vmul.f32 %v26_v7, %v26_v7  ;;  %v118_v46 = vsel %vm74_vm0, %v32_v43, 0.0  ;;  %v227_v47 = vmul.f32 %v27_v13, %v27_v13  ;;  %v120_v52 = vsel %vm74_vm0, %v33_v49, 0.0 }
  0x13   :  { %v93_v42 = vadd.f32 %v92_v31, %v91_v36  ;;  %v288_v9 = vadd.f32 %v287_v0, %v286_v3  ;;  %v30_v31 = vld [vmem:[%s757_s0 + $0xa0] sm:$0xff]  ;;  %v299_v36 = vsel %vm74_vm0, %v223_v23, 0.0  ;;  %v228_v53 = vmul.f32 %v28_v19, %v28_v19  ;;  %v36_v3 = vld [vmem:[%s757_s0 + $0xd0] sm:$0xff] }
  0x14   :  { %v114_v34 = vsel %vm74_vm0, %v30_v31, 0.0  ;;  %v122_v58 = vsel %vm74_vm0, %v34_v55, 0.0  ;;  %v229_v59 = vmul.f32 %v29_v25, %v29_v25  ;;  %v124_v0 = vsel %vm74_vm0, %v35_v61, 0.0 }
  0x15   :  { %v95_v48 = vadd.f32 %v94_v38, %v93_v42  ;;  %v290_v15 = vadd.f32 %v289_v6, %v288_v9  ;;  %v301_v42 = vsel %vm74_vm0, %v224_v29, 0.0  ;;  %v230_v1 = vmul.f32 %v30_v31, %v30_v31  ;;  %v37_v9 = vld [vmem:[%s757_s0 + $0xd8] sm:$0xff] }
  0x16   :  { %v126_v6 = vsel %vm74_vm0, %v36_v3, 0.0  ;;  %v231_v7 = vmul.f32 %v31_v37, %v31_v37  ;;  %v232_v13 = vmul.f32 %v32_v43, %v32_v43  ;;  %v233_v19 = vmul.f32 %v33_v49, %v33_v49 }
  0x17   :  { %v97_v54 = vadd.f32 %v96_v44, %v95_v48  ;;  %v292_v21 = vadd.f32 %v291_v12, %v290_v15  ;;  %v303_v48 = vsel %vm74_vm0, %v225_v35, 0.0  ;;  %v128_v12 = vsel %vm74_vm0, %v37_v9, 0.0  ;;  %v38_v15 = vld [vmem:[%s757_s0 + $0xe0] sm:$0xff] }
  0x18   :  { %v234_v25 = vmul.f32 %v34_v55, %v34_v55  ;;  %v235_v31 = vmul.f32 %v35_v61, %v35_v61  ;;  %v236_v37 = vmul.f32 %v36_v3, %v36_v3  ;;  %v237_v43 = vmul.f32 %v37_v9, %v37_v9 }
  0x19   :  { %v99_v60 = vadd.f32 %v98_v50, %v97_v54  ;;  %v294_v27 = vadd.f32 %v293_v18, %v292_v21  ;;  %v305_v54 = vsel %vm74_vm0, %v226_v41, 0.0  ;;  %v130_v18 = vsel %vm74_vm0, %v38_v15, 0.0  ;;  %v39_v21 = vld [vmem:[%s757_s0 + $0xe8] sm:$0xff] }
  0x1a   :  { %v238_v49 = vmul.f32 %v38_v15, %v38_v15  ;;  %v239_v55 = vmul.f32 %v39_v21, %v39_v21 }
  0x1b   :  { %v101_v2 = vadd.f32 %v100_v56, %v99_v60  ;;  %v296_v33 = vadd.f32 %v295_v24, %v294_v27  ;;  %v307_v60 = vsel %vm74_vm0, %v227_v47, 0.0  ;;  %v132_v24 = vsel %vm74_vm0, %v39_v21, 0.0  ;;  %v40_v27 = vld [vmem:[%s757_s0 + $0xf0] sm:$0xff] }
  0x1c   :  { %v240_v61 = vmul.f32 %v40_v27, %v40_v27 }
  0x1d   :  { %v103_v8 = vadd.f32 %v102_v62, %v101_v2  ;;  %v298_v39 = vadd.f32 %v297_v30, %v296_v33  ;;  %v309_v2 = vsel %vm74_vm0, %v228_v53, 0.0  ;;  %v134_v30 = vsel %vm74_vm0, %v40_v27, 0.0  ;;  %v41_v33 = vld [vmem:[%s757_s0 + $0xf8] sm:$0xff] }
  0x1e   :  { %v241_v3 = vmul.f32 %v41_v33, %v41_v33 }
  0x1f   :  { %v105_v14 = vadd.f32 %v104_v4, %v103_v8  ;;  %v300_v45 = vadd.f32 %v299_v36, %v298_v39  ;;  %v311_v8 = vsel %vm74_vm0, %v229_v59, 0.0  ;;  %v136_v36 = vsel %vm74_vm0, %v41_v33, 0.0  ;;  %v42_v39 = vld [vmem:[%s757_s0 + $0x100] sm:$0xff] }
  0x20   :  { %v242_v9 = vmul.f32 %v42_v39, %v42_v39 }
  0x21   :  { %v107_v20 = vadd.f32 %v106_v10, %v105_v14  ;;  %v302_v51 = vadd.f32 %v301_v42, %v300_v45  ;;  %v313_v14 = vsel %vm74_vm0, %v230_v1, 0.0  ;;  %v138_v42 = vsel %vm74_vm0, %v42_v39, 0.0  ;;  %v43_v45 = vld [vmem:[%s757_s0 + $0x108] sm:$0xff] }
  0x22   :  { %v243_v15 = vmul.f32 %v43_v45, %v43_v45 }
  0x23   :  { %v109_v26 = vadd.f32 %v108_v16, %v107_v20  ;;  %v304_v57 = vadd.f32 %v303_v48, %v302_v51  ;;  %v315_v20 = vsel %vm74_vm0, %v231_v7, 0.0  ;;  %v140_v48 = vsel %vm74_vm0, %v43_v45, 0.0  ;;  %v44_v51 = vld [vmem:[%s757_s0 + $0x110] sm:$0xff] }
  0x24   :  { %v244_v21 = vmul.f32 %v44_v51, %v44_v51 }
  0x25   :  { %v111_v32 = vadd.f32 %v110_v22, %v109_v26  ;;  %v306_v63 = vadd.f32 %v305_v54, %v304_v57  ;;  %v317_v26 = vsel %vm74_vm0, %v232_v13, 0.0  ;;  %v142_v54 = vsel %vm74_vm0, %v44_v51, 0.0  ;;  %v45_v57 = vld [vmem:[%s757_s0 + $0x118] sm:$0xff] }
  0x26   :  { %v245_v27 = vmul.f32 %v45_v57, %v45_v57 }
  0x27   :  { %v113_v38 = vadd.f32 %v112_v28, %v111_v32  ;;  %v308_v5 = vadd.f32 %v307_v60, %v306_v63  ;;  %v319_v32 = vsel %vm74_vm0, %v233_v19, 0.0  ;;  %v144_v60 = vsel %vm74_vm0, %v45_v57, 0.0  ;;  %v46_v63 = vld [vmem:[%s757_s0 + $0x120] sm:$0xff] }
  0x28   :  { %v246_v33 = vmul.f32 %v46_v63, %v46_v63 }
  0x29   :  { %v115_v44 = vadd.f32 %v114_v34, %v113_v38  ;;  %v310_v11 = vadd.f32 %v309_v2, %v308_v5  ;;  %v321_v38 = vsel %vm74_vm0, %v234_v25, 0.0  ;;  %v146_v2 = vsel %vm74_vm0, %v46_v63, 0.0  ;;  %v47_v5 = vld [vmem:[%s757_s0 + $0x128] sm:$0xff] }
  0x2a   :  { %v247_v39 = vmul.f32 %v47_v5, %v47_v5 }
  0x2b   :  { %v117_v50 = vadd.f32 %v116_v40, %v115_v44  ;;  %v312_v17 = vadd.f32 %v311_v8, %v310_v11  ;;  %v323_v44 = vsel %vm74_vm0, %v235_v31, 0.0  ;;  %v148_v8 = vsel %vm74_vm0, %v47_v5, 0.0  ;;  %v48_v11 = vld [vmem:[%s757_s0 + $0x130] sm:$0xff] }
  0x2c   :  { %v248_v45 = vmul.f32 %v48_v11, %v48_v11 }
  0x2d   :  { %v119_v56 = vadd.f32 %v118_v46, %v117_v50  ;;  %v314_v23 = vadd.f32 %v313_v14, %v312_v17  ;;  %v325_v50 = vsel %vm74_vm0, %v236_v37, 0.0  ;;  %v150_v14 = vsel %vm74_vm0, %v48_v11, 0.0  ;;  %v49_v17 = vld [vmem:[%s757_s0 + $0x138] sm:$0xff] }
  0x2e   :  { %v249_v51 = vmul.f32 %v49_v17, %v49_v17 }
  0x2f   :  { %v121_v62 = vadd.f32 %v120_v52, %v119_v56  ;;  %v316_v29 = vadd.f32 %v315_v20, %v314_v23  ;;  %v327_v56 = vsel %vm74_vm0, %v237_v43, 0.0  ;;  %v152_v20 = vsel %vm74_vm0, %v49_v17, 0.0  ;;  %v50_v23 = vld [vmem:[%s757_s0 + $0x140] sm:$0xff] }
  0x30   :  { %v250_v57 = vmul.f32 %v50_v23, %v50_v23 }
  0x31   :  { %v123_v4 = vadd.f32 %v122_v58, %v121_v62  ;;  %v318_v35 = vadd.f32 %v317_v26, %v316_v29  ;;  %v329_v62 = vsel %vm74_vm0, %v238_v49, 0.0  ;;  %v154_v26 = vsel %vm74_vm0, %v50_v23, 0.0  ;;  %v51_v29 = vld [vmem:[%s757_s0 + $0x148] sm:$0xff] }
  0x32   :  { %v251_v63 = vmul.f32 %v51_v29, %v51_v29 }
  0x33   :  { %v125_v10 = vadd.f32 %v124_v0, %v123_v4  ;;  %v320_v41 = vadd.f32 %v319_v32, %v318_v35  ;;  %v331_v4 = vsel %vm74_vm0, %v239_v55, 0.0  ;;  %v156_v32 = vsel %vm74_vm0, %v51_v29, 0.0  ;;  %v52_v35 = vld [vmem:[%s757_s0 + $0x150] sm:$0xff] }
  0x34   :  { %v252_v5 = vmul.f32 %v52_v35, %v52_v35 }
  0x35   :  { %v127_v16 = vadd.f32 %v126_v6, %v125_v10  ;;  %v322_v47 = vadd.f32 %v321_v38, %v320_v41  ;;  %v333_v10 = vsel %vm74_vm0, %v240_v61, 0.0  ;;  %v158_v38 = vsel %vm74_vm0, %v52_v35, 0.0  ;;  %v53_v41 = vld [vmem:[%s757_s0 + $0x158] sm:$0xff] }
  0x36   :  { %v253_v11 = vmul.f32 %v53_v41, %v53_v41 }
  0x37   :  { %v129_v22 = vadd.f32 %v128_v12, %v127_v16  ;;  %v324_v53 = vadd.f32 %v323_v44, %v322_v47  ;;  %v335_v16 = vsel %vm74_vm0, %v241_v3, 0.0  ;;  %v160_v44 = vsel %vm74_vm0, %v53_v41, 0.0  ;;  %v54_v47 = vld [vmem:[%s757_s0 + $0x160] sm:$0xff] }
  0x38   :  { %v254_v17 = vmul.f32 %v54_v47, %v54_v47 }
  0x39   :  { %v131_v28 = vadd.f32 %v130_v18, %v129_v22  ;;  %v326_v59 = vadd.f32 %v325_v50, %v324_v53  ;;  %v337_v22 = vsel %vm74_vm0, %v242_v9, 0.0  ;;  %v162_v50 = vsel %vm74_vm0, %v54_v47, 0.0  ;;  %v55_v53 = vld [vmem:[%s757_s0 + $0x168] sm:$0xff] }
  0x3a   :  { %v255_v23 = vmul.f32 %v55_v53, %v55_v53 }
  0x3b   :  { %v133_v34 = vadd.f32 %v132_v24, %v131_v28  ;;  %v328_v1 = vadd.f32 %v327_v56, %v326_v59  ;;  %v339_v28 = vsel %vm74_vm0, %v243_v15, 0.0  ;;  %v164_v56 = vsel %vm74_vm0, %v55_v53, 0.0  ;;  %v56_v59 = vld [vmem:[%s757_s0 + $0x170] sm:$0xff] }
  0x3c   :  { %v256_v29 = vmul.f32 %v56_v59, %v56_v59 }
  0x3d   :  { %v135_v40 = vadd.f32 %v134_v30, %v133_v34  ;;  %v330_v7 = vadd.f32 %v329_v62, %v328_v1  ;;  %v341_v34 = vsel %vm74_vm0, %v244_v21, 0.0  ;;  %v166_v62 = vsel %vm74_vm0, %v56_v59, 0.0  ;;  %v57_v1 = vld [vmem:[%s757_s0 + $0x178] sm:$0xff] }
  0x3e   :  { %v257_v35 = vmul.f32 %v57_v1, %v57_v1 }
  0x3f   :  { %v137_v46 = vadd.f32 %v136_v36, %v135_v40  ;;  %v332_v13 = vadd.f32 %v331_v4, %v330_v7  ;;  %v343_v40 = vsel %vm74_vm0, %v245_v27, 0.0  ;;  %v168_v4 = vsel %vm74_vm0, %v57_v1, 0.0  ;;  %v58_v7 = vld [vmem:[%s757_s0 + $0x180] sm:$0xff] }
  0x40   :  { %v258_v41 = vmul.f32 %v58_v7, %v58_v7 }
  0x41   :  { %v139_v52 = vadd.f32 %v138_v42, %v137_v46  ;;  %v334_v19 = vadd.f32 %v333_v10, %v332_v13  ;;  %v345_v46 = vsel %vm74_vm0, %v246_v33, 0.0  ;;  %v170_v10 = vsel %vm74_vm0, %v58_v7, 0.0  ;;  %v59_v13 = vld [vmem:[%s757_s0 + $0x188] sm:$0xff] }
  0x42   :  { %v259_v47 = vmul.f32 %v59_v13, %v59_v13 }
  0x43   :  { %v141_v58 = vadd.f32 %v140_v48, %v139_v52  ;;  %v336_v25 = vadd.f32 %v335_v16, %v334_v19  ;;  %v347_v52 = vsel %vm74_vm0, %v247_v39, 0.0  ;;  %v172_v16 = vsel %vm74_vm0, %v59_v13, 0.0  ;;  %v60_v19 = vld [vmem:[%s757_s0 + $0x190] sm:$0xff] }
  0x44   :  { %v260_v53 = vmul.f32 %v60_v19, %v60_v19 }
  0x45   :  { %v143_v0 = vadd.f32 %v142_v54, %v141_v58  ;;  %v338_v31 = vadd.f32 %v337_v22, %v336_v25  ;;  %v349_v58 = vsel %vm74_vm0, %v248_v45, 0.0  ;;  %v174_v22 = vsel %vm74_vm0, %v60_v19, 0.0  ;;  %v61_v25 = vld [vmem:[%s757_s0 + $0x198] sm:$0xff] }
  0x46   :  { %v261_v59 = vmul.f32 %v61_v25, %v61_v25 }
  0x47   :  { %v145_v6 = vadd.f32 %v144_v60, %v143_v0  ;;  %v340_v37 = vadd.f32 %v339_v28, %v338_v31  ;;  %v351_v0 = vsel %vm74_vm0, %v249_v51, 0.0  ;;  %v176_v28 = vsel %vm74_vm0, %v61_v25, 0.0  ;;  %v62_v31 = vld [vmem:[%s757_s0 + $0x1a0] sm:$0xff] }
  0x48   :  { %v262_v1 = vmul.f32 %v62_v31, %v62_v31 }
  0x49   :  { %v147_v12 = vadd.f32 %v146_v2, %v145_v6  ;;  %v342_v43 = vadd.f32 %v341_v34, %v340_v37  ;;  %v353_v6 = vsel %vm74_vm0, %v250_v57, 0.0  ;;  %v178_v34 = vsel %vm74_vm0, %v62_v31, 0.0  ;;  %v63_v37 = vld [vmem:[%s757_s0 + $0x1a8] sm:$0xff] }
  0x4a   :  { %v263_v7 = vmul.f32 %v63_v37, %v63_v37 }
  0x4b   :  { %v149_v18 = vadd.f32 %v148_v8, %v147_v12  ;;  %v344_v49 = vadd.f32 %v343_v40, %v342_v43  ;;  %v355_v12 = vsel %vm74_vm0, %v251_v63, 0.0  ;;  %v180_v40 = vsel %vm74_vm0, %v63_v37, 0.0  ;;  %v64_v43 = vld [vmem:[%s757_s0 + $0x1b0] sm:$0xff] }
  0x4c   :  { %v264_v13 = vmul.f32 %v64_v43, %v64_v43 }
  0x4d   :  { %v151_v24 = vadd.f32 %v150_v14, %v149_v18  ;;  %v346_v55 = vadd.f32 %v345_v46, %v344_v49  ;;  %v357_v18 = vsel %vm74_vm0, %v252_v5, 0.0  ;;  %v182_v46 = vsel %vm74_vm0, %v64_v43, 0.0  ;;  %v65_v49 = vld [vmem:[%s757_s0 + $0x1b8] sm:$0xff] }
  0x4e   :  { %v265_v19 = vmul.f32 %v65_v49, %v65_v49 }
  0x4f   :  { %v153_v30 = vadd.f32 %v152_v20, %v151_v24  ;;  %v348_v61 = vadd.f32 %v347_v52, %v346_v55  ;;  %v359_v24 = vsel %vm74_vm0, %v253_v11, 0.0  ;;  %v184_v52 = vsel %vm74_vm0, %v65_v49, 0.0  ;;  %v66_v55 = vld [vmem:[%s757_s0 + $0x1c0] sm:$0xff] }
  0x50   :  { %v266_v25 = vmul.f32 %v66_v55, %v66_v55 }
  0x51   :  { %v155_v36 = vadd.f32 %v154_v26, %v153_v30  ;;  %v350_v3 = vadd.f32 %v349_v58, %v348_v61  ;;  %v361_v30 = vsel %vm74_vm0, %v254_v17, 0.0  ;;  %v186_v58 = vsel %vm74_vm0, %v66_v55, 0.0  ;;  %v67_v61 = vld [vmem:[%s757_s0 + $0x1c8] sm:$0xff] }
  0x52   :  { %v267_v31 = vmul.f32 %v67_v61, %v67_v61 }
  0x53   :  { %v157_v42 = vadd.f32 %v156_v32, %v155_v36  ;;  %v352_v9 = vadd.f32 %v351_v0, %v350_v3  ;;  %v363_v36 = vsel %vm74_vm0, %v255_v23, 0.0  ;;  %v188_v0 = vsel %vm74_vm0, %v67_v61, 0.0  ;;  %v68_v3 = vld [vmem:[%s757_s0 + $0x1d0] sm:$0xff] }
  0x54   :  { %v268_v37 = vmul.f32 %v68_v3, %v68_v3 }
  0x55   :  { %v159_v48 = vadd.f32 %v158_v38, %v157_v42  ;;  %v354_v15 = vadd.f32 %v353_v6, %v352_v9  ;;  %v365_v42 = vsel %vm74_vm0, %v256_v29, 0.0  ;;  %v190_v6 = vsel %vm74_vm0, %v68_v3, 0.0  ;;  %v69_v9 = vld [vmem:[%s757_s0 + $0x1d8] sm:$0xff] }
  0x57   :  { %v161_v54 = vadd.f32 %v160_v44, %v159_v48  ;;  %v356_v21 = vadd.f32 %v355_v12, %v354_v15  ;;  %v367_v48 = vsel %vm74_vm0, %v257_v35, 0.0  ;;  %v192_v12 = vsel %vm74_vm0, %v69_v9, 0.0  ;;  %v70_v15 = vld [vmem:[%s757_s0 + $0x1e0] sm:$0xff] }
  0x59   :  { %v163_v60 = vadd.f32 %v162_v50, %v161_v54  ;;  %v358_v27 = vadd.f32 %v357_v18, %v356_v21  ;;  %v369_v54 = vsel %vm74_vm0, %v258_v41, 0.0  ;;  %v194_v18 = vsel %vm74_vm0, %v70_v15, 0.0  ;;  %v71_v21 = vld [vmem:[%s757_s0 + $0x1e8] sm:$0xff] }
  0x5a   :  { %v269_v41 = vmul.f32 %v69_v9, %v69_v9  ;;  %v271_v49 = vmul.f32 %v71_v21, %v71_v21 }
  0x5b   :  { %v165_v2 = vadd.f32 %v164_v56, %v163_v60  ;;  %v360_v33 = vadd.f32 %v359_v24, %v358_v27  ;;  %v371_v60 = vsel %vm74_vm0, %v259_v47, 0.0  ;;  %v196_v24 = vsel %vm74_vm0, %v71_v21, 0.0  ;;  %v72_v27 = vld [vmem:[%s757_s0 + $0x1f0] sm:$0xff] }
  0x5d   :  { %v167_v8 = vadd.f32 %v166_v62, %v165_v2  ;;  %v362_v39 = vadd.f32 %v361_v30, %v360_v33  ;;  %v373_v2 = vsel %vm74_vm0, %v260_v53, 0.0  ;;  %v198_v30 = vsel %vm74_vm0, %v72_v27, 0.0  ;;  %v73_v33 = vld [vmem:[%s757_s0 + $0x1f8] sm:$0xff] }
  0x5e   :  { %v272_v53 = vmul.f32 %v72_v27, %v72_v27 }
  0x5f   :  { %v169_v14 = vadd.f32 %v168_v4, %v167_v8  ;;  %v364_v45 = vadd.f32 %v363_v36, %v362_v39  ;;  %v375_v8 = vsel %vm74_vm0, %v261_v59, 0.0  ;;  %v200_v36 = vsel %vm74_vm0, %v73_v33, 0.0 }
  0x60   :  { %v397_v61 = vsel %vm74_vm0, %v272_v53, 0.0 }
  0x61   :  { %v171_v20 = vadd.f32 %v170_v10, %v169_v14  ;;  %v366_v51 = vadd.f32 %v365_v42, %v364_v45  ;;  %v377_v14 = vsel %vm74_vm0, %v262_v1, 0.0  ;;  %v387_v42 = vsel %vm74_vm0, %v267_v31, 0.0 }
  0x62   :  { %v270_v45 = vmul.f32 %v70_v15, %v70_v15 }
  0x63   :  { %v173_v26 = vadd.f32 %v172_v16, %v171_v20  ;;  %v368_v57 = vadd.f32 %v367_v48, %v366_v51  ;;  %v379_v20 = vsel %vm74_vm0, %v263_v7, 0.0 }
  0x65   :  { %v175_v32 = vadd.f32 %v174_v22, %v173_v26  ;;  %v370_v63 = vadd.f32 %v369_v54, %v368_v57  ;;  %v381_v26 = vsel %vm74_vm0, %v264_v13, 0.0  ;;  %v393_v54 = vsel %vm74_vm0, %v270_v45, 0.0 }
  0x66   :  { %v273_v57 = vmul.f32 %v73_v33, %v73_v33 }
  0x67   :  { %v177_v38 = vadd.f32 %v176_v28, %v175_v32  ;;  %v372_v5 = vadd.f32 %v371_v60, %v370_v63  ;;  %v383_v32 = vsel %vm74_vm0, %v265_v19, 0.0 }
  0x69   :  { %v179_v44 = vadd.f32 %v178_v34, %v177_v38  ;;  %v374_v11 = vadd.f32 %v373_v2, %v372_v5  ;;  %v385_v38 = vsel %vm74_vm0, %v266_v25, 0.0 }
  0x6b   :  { %v181_v50 = vadd.f32 %v180_v40, %v179_v44  ;;  %v376_v17 = vadd.f32 %v375_v8, %v374_v11 }
  0x6d   :  { %v183_v56 = vadd.f32 %v182_v46, %v181_v50  ;;  %v378_v23 = vadd.f32 %v377_v14, %v376_v17  ;;  %v389_v46 = vsel %vm74_vm0, %v268_v37, 0.0  ;;  %v391_v50 = vsel %vm74_vm0, %v269_v41, 0.0 }
  0x6f   :  { %v185_v62 = vadd.f32 %v184_v52, %v183_v56  ;;  %v380_v29 = vadd.f32 %v379_v20, %v378_v23 }
  0x71   :  { %v187_v4 = vadd.f32 %v186_v58, %v185_v62  ;;  %v382_v35 = vadd.f32 %v381_v26, %v380_v29  ;;  %v395_v58 = vsel %vm74_vm0, %v271_v49, 0.0 }
  0x73   :  { %v189_v10 = vadd.f32 %v188_v0, %v187_v4  ;;  %v384_v40 = vadd.f32 %v383_v32, %v382_v35  ;;  %v399_v0 = vsel %vm74_vm0, %v273_v57, 0.0 }
  0x75   :  { %v191_v16 = vadd.f32 %v190_v6, %v189_v10  ;;  %v386_v44 = vadd.f32 %v385_v38, %v384_v40 }
  0x77   :  { %v193_v22 = vadd.f32 %v192_v12, %v191_v16  ;;  %v388_v48 = vadd.f32 %v387_v42, %v386_v44 }
  0x79   :  { %v195_v28 = vadd.f32 %v194_v18, %v193_v22  ;;  %v390_v52 = vadd.f32 %v389_v46, %v388_v48 }
  0x7b   :  { %v197_v34 = vadd.f32 %v196_v24, %v195_v28  ;;  %v392_v56 = vadd.f32 %v391_v50, %v390_v52 }
  0x7d   :  { %v199_v39 = vadd.f32 %v198_v30, %v197_v34  ;;  %v394_v60 = vadd.f32 %v393_v54, %v392_v56 }
  0x7f   :  { %v201_v43 = vadd.f32 %v200_v36, %v199_v39  ;;  %v396_v63 = vadd.f32 %v395_v58, %v394_v60 }
  0x81   :  { %v202_v47 = vrot.slane %v201_v43, 4  ;;  %v398_v2 = vadd.f32 %v397_v61, %v396_v63 }
  0x83   :  { %v203_v51 = vadd.f32 %v202_v47, %v201_v43  ;;  %v400_v3 = vadd.f32 %v399_v0, %v398_v2 }
  0x85   :  { %v204_v55 = vrot.slane %v203_v51, 2  ;;  %v401_v4 = vrot.slane %v400_v3, 4 }
  0x87   :  { %v205_v59 = vadd.f32 %v204_v55, %v203_v51  ;;  %v402_v5 = vadd.f32 %v401_v4, %v400_v3 }
  0x89   :  { %v206_v62 = vrot.slane %v205_v59, 1  ;;  %v403_v6 = vrot.slane %v402_v5, 2 }
  0x8b   :  { %v207_v1 = vadd.f32 %v206_v62, %v205_v59  ;;  %v404_v7 = vadd.f32 %v403_v6, %v402_v5 }
  0x8d   :  { %209 = vst.msk [vmem:[%s758_s1] sm:$0x1] %vm208_vm1, %v207_v1  ;;  %v405_v8 = vrot.slane %v404_v7, 1 }
  0x8f   :  { %v406_v9 = vadd.f32 %v405_v8, %v404_v7 }
  0x91   :  { %407 = vst.msk [vmem:[%s759_s2] sm:$0x1] %vm208_vm1, %v406_v9 }

// kernel: _lambda_.8
= control target key start
LH: loop header
LB: loop body
LE: loop exit
PB: predicated region body
PF: predicated region fallthrough
CT: control target
= control target key end

     0   :  { %vm415_vm0 = vcmask 1043456   ;;  %vm318_vm1 = vcmask 64512   ;;  %vm652_vm2 = vcmask 27648   ;;  %vm781_vm3 = vcmask 31744   ;;  %s2164_s3 = inlined_call_operand.vmem [shape: bf16[8,4], index: 3, kind: input, shape index: {}]   ;;  %s2165_s0 = inlined_call_operand.vmem [shape: f32[512,8], index: 0, kind: input, shape index: {}]   ;;  %s2166_s1 = inlined_call_operand.vmem [shape: f32[1,8], index: 1, kind: input, shape index: {}]   ;;  %s2167_s2 = inlined_call_operand.vmem [shape: f32[1,8], index: 2, kind: input, shape index: {}]   ;;  %s2168_s4 = inlined_call_operand.vmem [shape: bf16[512,4], index: 4, kind: output, shape index: {0}]   ;;  %s2169_s5 = inlined_call_operand.vmem [shape: f32[1,1,4], index: 5, kind: output, shape index: {1}]   ;;  %s2170_s6 = inlined_call_operand.vmem [shape: f32[1,1,4], index: 6, kind: output, shape index: {2}]  }
   0x1   :  { %v317_v0 = vld [vmem:[%s2164_s3] sm:$0xf]  ;;  %v22_v2 = vld [vmem:[%s2165_s0 + $0x8] sm:$0xff]  ;;  %v23_v18 = vld [vmem:[%s2165_s0 + $0x10] sm:$0xff]  ;;  %vm915_vm4 = vcmask 24576  }
   0x2   :  { %v21_v1 = vld [vmem:[%s2165_s0] sm:$0xff]  ;;  %v417_v3 = vsel %vm415_vm0, %v317_v0, 0  ;;  %v38_v9 = vld [vmem:[%s2165_s0 + $0x88] sm:$0xff]  ;;  %v24_v19 = vld [vmem:[%s2165_s0 + $0x18] sm:$0xff] }
   0x3   :  { %v1211_v4 = vld [vmem:[%s2166_s1] ss:$0 sm:$0xff]  ;;  %426 = vmatpush.bf16.msra.mxu0 %v417_v3  ;;  %1159 = vmatpush.bf16.msra.mxu1 %v417_v3  ;;  %v39_v24 = vld [vmem:[%s2165_s0 + $0x90] sm:$0xff]  ;;  %v40_v25 = vld [vmem:[%s2165_s0 + $0x98] sm:$0xff] }
   0x4   :  { %v1216_v5 = vld [vmem:[%s2167_s2] ss:$0 sm:$0xff]  ;;  %v89_v6 = vmul.f32 %v1211_v4, %v21_v1  ;;  %v90_v7 = vmul.f32 %v1211_v4, %v22_v2  ;;  %1160 = vmatpush.bf16.msra.mxu2 %v417_v3  ;;  %v106_v11 = vmul.f32 %v1211_v4, %v38_v9  ;;  %1161 = vmatpush.bf16.msra.mxu3 %v417_v3  ;;  %v54_v39 = vld [vmem:[%s2165_s0 + $0x108] sm:$0xff]  ;;  %v55_v1 = vld [vmem:[%s2165_s0 + $0x110] sm:$0xff] }
   0x5   :  { %v37_v8 = vld [vmem:[%s2165_s0 + $0x80] sm:$0xff]  ;;  %v91_v26 = vmul.f32 %v1211_v4, %v23_v18  ;;  %v92_v27 = vmul.f32 %v1211_v4, %v24_v19  ;;  %v107_v28 = vmul.f32 %v1211_v4, %v39_v24  ;;  %v108_v29 = vmul.f32 %v1211_v4, %v40_v25  ;;  %v26_v46 = vld [vmem:[%s2165_s0 + $0x28] sm:$0xff]  ;;  %v56_v2 = vld [vmem:[%s2165_s0 + $0x118] sm:$0xff] }
   0x6   :  { %v105_v10 = vmul.f32 %v1211_v4, %v37_v8  ;;  %v157_v12 = vadd.f32 %v1216_v5, %v89_v6  ;;  %v158_v13 = vadd.f32 %v1216_v5, %v90_v7  ;;  %v174_v15 = vadd.f32 %v1216_v5, %v106_v11  ;;  %v53_v38 = vld [vmem:[%s2165_s0 + $0x100] sm:$0xff]  ;;  %v42_v51 = vld [vmem:[%s2165_s0 + $0xa8] sm:$0xff]  ;;  %v28_v11 = vld [vmem:[%s2165_s0 + $0x38] sm:$0xff] }
   0x7   :  { %v159_v30 = vadd.f32 %v1216_v5, %v91_v26  ;;  %v160_v31 = vadd.f32 %v1216_v5, %v92_v27  ;;  %v175_v32 = vadd.f32 %v1216_v5, %v107_v28  ;;  %v176_v33 = vadd.f32 %v1216_v5, %v108_v29  ;;  %v25_v45 = vld [vmem:[%s2165_s0 + $0x20] sm:$0xff] }
   0x8   :  { %v173_v14 = vadd.f32 %v1216_v5, %v105_v10  ;;  %v221_v16 = vmax.f32 %v157_v12, 0.0  ;;  %v222_v17 = vmax.f32 %v158_v13, 0.0  ;;  %v238_v21 = vmax.f32 %v174_v15, 0.0  ;;  %v41_v50 = vld [vmem:[%s2165_s0 + $0xa0] sm:$0xff]  ;;  %v27_v10 = vld [vmem:[%s2165_s0 + $0x30] sm:$0xff] }
   0x9   :  { %v223_v34 = vmax.f32 %v159_v30, 0.0  ;;  %v224_v35 = vmax.f32 %v160_v31, 0.0  ;;  %v239_v36 = vmax.f32 %v175_v32, 0.0  ;;  %v240_v37 = vmax.f32 %v176_v33, 0.0  ;;  %v43_v15 = vld [vmem:[%s2165_s0 + $0xb0] sm:$0xff]  ;;  %v57_v30 = vld [vmem:[%s2165_s0 + $0x120] sm:$0xff] }
   0xa   :  { %v237_v20 = vmax.f32 %v173_v14, 0.0  ;;  %v285_v22 = vpack.c.bf16 %v222_v17, %v221_v16  ;;  %v121_v40 = vmul.f32 %v1211_v4, %v53_v38  ;;  %v122_v41 = vmul.f32 %v1211_v4, %v54_v39  ;;  %v44_v16 = vld [vmem:[%s2165_s0 + $0xb8] sm:$0xff]  ;;  %v58_v31 = vld [vmem:[%s2165_s0 + $0x128] sm:$0xff]  ;;  %v69_v32 = vld [vmem:[%s2165_s0 + $0x180] sm:$0xff] }
   0xb   :  { %v286_v42 = vpack.c.bf16 %v224_v35, %v223_v34  ;;  %v294_v47 = vpack.c.bf16 %v240_v37, %v239_v36  ;;  %v93_v52 = vmul.f32 %v1211_v4, %v25_v45  ;;  %v94_v53 = vmul.f32 %v1211_v4, %v26_v46  ;;  %v70_v35 = vld [vmem:[%s2165_s0 + $0x188] sm:$0xff] }
   0xc   :  { %v293_v23 = vpack.c.bf16 %v238_v21, %v237_v20  ;;  %1127 = vmatmul.msk.bf16.vlgmr.msra.gmra.mxu0 %vm318_vm1, %v285_v22  ;;  %v189_v43 = vadd.f32 %v1216_v5, %v121_v40  ;;  %v190_v44 = vadd.f32 %v1216_v5, %v122_v41  ;;  %v109_v55 = vmul.f32 %v1211_v4, %v41_v50  ;;  %v45_v50 = vld [vmem:[%s2165_s0 + $0xc0] sm:$0xff] }
   0xd   :  { %v110_v56 = vmul.f32 %v1211_v4, %v42_v51  ;;  %v161_v57 = vadd.f32 %v1216_v5, %v93_v52  ;;  %v162_v58 = vadd.f32 %v1216_v5, %v94_v53  ;;  %v123_v3 = vmul.f32 %v1211_v4, %v55_v1  ;;  %v46_v51 = vld [vmem:[%s2165_s0 + $0xc8] sm:$0xff] }
   0xe   :  { %1135 = vmatmul.msk.bf16.vlgmr.msra.gmra.mxu1 %vm318_vm1, %v293_v23  ;;  %v253_v48 = vmax.f32 %v189_v43, 0.0  ;;  %v254_v49 = vmax.f32 %v190_v44, 0.0  ;;  %v177_v59 = vadd.f32 %v1216_v5, %v109_v55  ;;  %v124_v6 = vmul.f32 %v1211_v4, %v56_v2  ;;  %v30_v43 = vld [vmem:[%s2165_s0 + $0x48] sm:$0xff]  ;;  %v59_v2 = vld [vmem:[%s2165_s0 + $0x130] sm:$0xff] }
   0xf   :  { %v178_v60 = vadd.f32 %v1216_v5, %v110_v56  ;;  %v225_v61 = vmax.f32 %v161_v57, 0.0  ;;  %v226_v62 = vmax.f32 %v162_v58, 0.0  ;;  %v191_v8 = vadd.f32 %v1216_v5, %v123_v3  ;;  %v60_v3 = vld [vmem:[%s2165_s0 + $0x138] sm:$0xff] }
  0x10   :  { %v301_v54 = vpack.c.bf16 %v254_v49, %v253_v48  ;;  %v241_v63 = vmax.f32 %v177_v59, 0.0  ;;  %v192_v9 = vadd.f32 %v1216_v5, %v124_v6  ;;  %v95_v17 = vmul.f32 %v1211_v4, %v27_v10  ;;  %v71_v6 = vld [vmem:[%s2165_s0 + $0x190] sm:$0xff] }
  0x11   :  { %v242_v0 = vmax.f32 %v178_v60, 0.0  ;;  %v287_v7 = vpack.c.bf16 %v226_v62, %v225_v61  ;;  %v255_v13 = vmax.f32 %v191_v8, 0.0  ;;  %v96_v18 = vmul.f32 %v1211_v4, %v28_v11 }
  0x12   :  { %1143 = vmatmul.msk.bf16.vlgmr.msra.gmra.mxu2 %vm318_vm1, %v301_v54  ;;  %v256_v14 = vmax.f32 %v192_v9, 0.0  ;;  %v111_v20 = vmul.f32 %v1211_v4, %v43_v15  ;;  %v112_v21 = vmul.f32 %v1211_v4, %v44_v16  ;;  %v163_v22 = vadd.f32 %v1216_v5, %v95_v17  ;;  %v72_v9 = vld [vmem:[%s2165_s0 + $0x198] sm:$0xff]  ;;  %v31_v16 = vld [vmem:[%s2165_s0 + $0x50] sm:$0xff] }
  0x13   :  { %v295_v12 = vpack.c.bf16 %v242_v0, %v241_v63  ;;  %v164_v23 = vadd.f32 %v1216_v5, %v96_v18  ;;  %v125_v33 = vmul.f32 %v1211_v4, %v57_v30  ;;  %v126_v34 = vmul.f32 %v1211_v4, %v58_v31  ;;  %v32_v17 = vld [vmem:[%s2165_s0 + $0x58] sm:$0xff] }
  0x14   :  { %v302_v19 = vpack.c.bf16 %v256_v14, %v255_v13  ;;  %v179_v24 = vadd.f32 %v1216_v5, %v111_v20  ;;  %v180_v25 = vadd.f32 %v1216_v5, %v112_v21  ;;  %v227_v26 = vmax.f32 %v163_v22, 0.0 }
  0x15   :  { %v228_v27 = vmax.f32 %v164_v23, 0.0  ;;  %v137_v36 = vmul.f32 %v1211_v4, %v69_v32  ;;  %v138_v37 = vmul.f32 %v1211_v4, %v70_v35  ;;  %v193_v39 = vadd.f32 %v1216_v5, %v125_v33 }
  0x16   :  { %v243_v28 = vmax.f32 %v179_v24, 0.0  ;;  %v244_v29 = vmax.f32 %v180_v25, 0.0  ;;  %v194_v40 = vadd.f32 %v1216_v5, %v126_v34  ;;  %v98_v53 = vmul.f32 %v1211_v4, %v30_v43  ;;  %v47_v24 = vld [vmem:[%s2165_s0 + $0xd0] sm:$0xff]  ;;  %v48_v25 = vld [vmem:[%s2165_s0 + $0xd8] sm:$0xff] }
  0x17   :  { %v288_v38 = vpack.c.bf16 %v228_v27, %v227_v26  ;;  %v205_v41 = vadd.f32 %v1216_v5, %v137_v36  ;;  %v206_v45 = vadd.f32 %v1216_v5, %v138_v37  ;;  %v257_v46 = vmax.f32 %v193_v39, 0.0 }
  0x18   :  { %v296_v44 = vpack.c.bf16 %v244_v29, %v243_v28  ;;  %v113_v56 = vmul.f32 %v1211_v4, %v45_v50  ;;  %v114_v57 = vmul.f32 %v1211_v4, %v46_v51  ;;  %v166_v59 = vadd.f32 %v1216_v5, %v98_v53  ;;  %v34_v53 = vld [vmem:[%s2165_s0 + $0x68] sm:$0xff] }
  0x19   :  { %v269_v48 = vmax.f32 %v205_v41, 0.0  ;;  %v270_v49 = vmax.f32 %v206_v45, 0.0  ;;  %v128_v8 = vmul.f32 %v1211_v4, %v60_v3  ;;  %v139_v10 = vmul.f32 %v1211_v4, %v71_v6  ;;  %v62_v41 = vld [vmem:[%s2165_s0 + $0x148] sm:$0xff] }
  0x1a   :  { %v181_v60 = vadd.f32 %v1216_v5, %v113_v56  ;;  %v182_v61 = vadd.f32 %v1216_v5, %v114_v57  ;;  %v230_v63 = vmax.f32 %v166_v59, 0.0  ;;  %v140_v11 = vmul.f32 %v1211_v4, %v72_v9  ;;  %v74_v45 = vld [vmem:[%s2165_s0 + $0x1a8] sm:$0xff] }
  0x1b   :  { %v309_v55 = vpack.c.bf16 %v270_v49, %v269_v48  ;;  %v196_v14 = vadd.f32 %v1216_v5, %v128_v8  ;;  %v207_v15 = vadd.f32 %v1216_v5, %v139_v10  ;;  %v99_v26 = vmul.f32 %v1211_v4, %v31_v16  ;;  %v75_v16 = vld [vmem:[%s2165_s0 + $0x1b0] sm:$0xff] }
  0x1c   :  { %1128 = vmatmul.msk.bf16.gmra.mxu0 %vm318_vm1, %v286_v42  ;;  %v29_v42 = vld [vmem:[%s2165_s0 + $0x40] sm:$0xff]  ;;  %v245_v0 = vmax.f32 %v181_v60, 0.0  ;;  %v246_v1 = vmax.f32 %v182_v61, 0.0  ;;  %v100_v27 = vmul.f32 %v1211_v4, %v32_v17  ;;  %v115_v30 = vmul.f32 %v1211_v4, %v47_v24  ;;  %v50_v61 = vld [vmem:[%s2165_s0 + $0xe8] sm:$0xff] }
  0x1d   :  { %v97_v52 = vmul.f32 %v1211_v4, %v29_v42  ;;  %1151 = vmatmul.msk.bf16.vlgmr.msra.gmra.mxu3 %vm318_vm1, %v309_v55  ;;  %v260_v21 = vmax.f32 %v196_v14, 0.0  ;;  %v271_v22 = vmax.f32 %v207_v15, 0.0  ;;  %v116_v31 = vmul.f32 %v1211_v4, %v48_v25  ;;  %v73_v42 = vld [vmem:[%s2165_s0 + $0x1a0] sm:$0xff]  ;;  %v63_v14 = vld [vmem:[%s2165_s0 + $0x150] sm:$0xff]  ;;  %v64_v15 = vld [vmem:[%s2165_s0 + $0x158] sm:$0xff] }
  0x1e   :  { %1136 = vmatmul.msk.bf16.gmra.mxu1 %vm318_vm1, %v294_v47  ;;  %v258_v47 = vmax.f32 %v194_v40, 0.0  ;;  %v297_v18 = vpack.c.bf16 %v246_v1, %v245_v0  ;;  %v167_v32 = vadd.f32 %v1216_v5, %v99_v26  ;;  %v168_v33 = vadd.f32 %v1216_v5, %v100_v27  ;;  %v61_v40 = vld [vmem:[%s2165_s0 + $0x140] sm:$0xff]  ;;  %v35_v26 = vld [vmem:[%s2165_s0 + $0x70] sm:$0xff]  ;;  %v36_v27 = vld [vmem:[%s2165_s0 + $0x78] sm:$0xff] }
  0x1f   :  { %v165_v58 = vadd.f32 %v1216_v5, %v97_v52  ;;  %v183_v34 = vadd.f32 %v1216_v5, %v115_v30  ;;  %v184_v35 = vadd.f32 %v1216_v5, %v116_v31  ;;  %v129_v43 = vmul.f32 %v1211_v4, %v61_v40  ;;  %v33_v52 = vld [vmem:[%s2165_s0 + $0x60] sm:$0xff] }
  0x20   :  { %v303_v54 = vpack.c.bf16 %v258_v47, %v257_v46  ;;  %v231_v36 = vmax.f32 %v167_v32, 0.0  ;;  %v232_v37 = vmax.f32 %v168_v33, 0.0  ;;  %v141_v46 = vmul.f32 %v1211_v4, %v73_v42  ;;  %v49_v60 = vld [vmem:[%s2165_s0 + $0xe0] sm:$0xff] }
  0x21   :  { %v229_v62 = vmax.f32 %v165_v58, 0.0  ;;  %v248_v39 = vmax.f32 %v184_v35, 0.0  ;;  %v142_v47 = vmul.f32 %v1211_v4, %v74_v45  ;;  %v197_v49 = vadd.f32 %v1216_v5, %v129_v43  ;;  %v52_v35 = vld [vmem:[%s2165_s0 + $0xf8] sm:$0xff] }
  0x22   :  { %1144 = vmatmul.msk.bf16.gmra.mxu2 %vm318_vm1, %v302_v19  ;;  %v208_v19 = vadd.f32 %v1216_v5, %v140_v11  ;;  %v290_v48 = vpack.c.bf16 %v232_v37, %v231_v36  ;;  %v209_v51 = vadd.f32 %v1216_v5, %v141_v46  ;;  %v118_v3 = vmul.f32 %v1211_v4, %v50_v61 }
  0x23   :  { %v210_v55 = vadd.f32 %v1216_v5, %v142_v47  ;;  %v261_v56 = vmax.f32 %v197_v49, 0.0  ;;  %v131_v17 = vmul.f32 %v1211_v4, %v63_v14  ;;  %v103_v36 = vmul.f32 %v1211_v4, %v35_v26 }
  0x24   :  { %v272_v23 = vmax.f32 %v208_v19, 0.0  ;;  %v273_v58 = vmax.f32 %v209_v51, 0.0  ;;  %v186_v9 = vadd.f32 %v1216_v5, %v118_v3  ;;  %v76_v19 = vld [vmem:[%s2165_s0 + $0x1b8] sm:$0xff]  ;;  %v104_v37 = vmul.f32 %v1211_v4, %v36_v27  ;;  %v66_v51 = vld [vmem:[%s2165_s0 + $0x168] sm:$0xff] }
  0x25   :  { %v274_v59 = vmax.f32 %v210_v55, 0.0  ;;  %v171_v42 = vadd.f32 %v1216_v5, %v103_v36  ;;  %v78_v55 = vld [vmem:[%s2165_s0 + $0x1c8] sm:$0xff] }
  0x26   :  { %v310_v29 = vpack.c.bf16 %v272_v23, %v271_v22  ;;  %v199_v23 = vadd.f32 %v1216_v5, %v131_v17  ;;  %v172_v43 = vadd.f32 %v1216_v5, %v104_v37 }
  0x27   :  { %v311_v1 = vpack.c.bf16 %v274_v59, %v273_v58  ;;  %v235_v46 = vmax.f32 %v171_v42, 0.0 }
  0x28   :  { %v263_v30 = vmax.f32 %v199_v23, 0.0  ;;  %v236_v47 = vmax.f32 %v172_v43, 0.0 }
  0x2a   :  { %v292_v58 = vpack.c.bf16 %v236_v47, %v235_v46 }
  0x2c   :  { %1129 = vmatmul.msk.bf16.gmra.mxu0 %vm318_vm1, %v287_v7  ;;  %v127_v7 = vmul.f32 %v1211_v4, %v59_v2  ;;  %v117_v2 = vmul.f32 %v1211_v4, %v49_v60 }
  0x2d   :  { %1152 = vmatmul.msk.bf16.gmra.mxu3 %vm318_vm1, %v310_v29 }
  0x2e   :  { %1137 = vmatmul.msk.bf16.gmra.mxu1 %vm318_vm1, %v295_v12  ;;  %v289_v12 = vpack.c.bf16 %v230_v63, %v229_v62  ;;  %v195_v13 = vadd.f32 %v1216_v5, %v127_v7  ;;  %v101_v62 = vmul.f32 %v1211_v4, %v33_v52  ;;  %v102_v63 = vmul.f32 %v1211_v4, %v34_v53  ;;  %v77_v52 = vld [vmem:[%s2165_s0 + $0x1c0] sm:$0xff] }
  0x2f   :  { %v185_v8 = vadd.f32 %v1216_v5, %v117_v2 }
  0x30   :  { %v259_v20 = vmax.f32 %v195_v13, 0.0  ;;  %v169_v6 = vadd.f32 %v1216_v5, %v101_v62  ;;  %v170_v7 = vadd.f32 %v1216_v5, %v102_v63  ;;  %v250_v13 = vmax.f32 %v186_v9, 0.0  ;;  %v68_v9 = vld [vmem:[%s2165_s0 + $0x178] sm:$0xff] }
  0x32   :  { %1145 = vmatmul.msk.bf16.gmra.mxu2 %vm318_vm1, %v303_v54  ;;  %v304_v28 = vpack.c.bf16 %v260_v21, %v259_v20  ;;  %v233_v10 = vmax.f32 %v169_v6, 0.0  ;;  %v234_v11 = vmax.f32 %v170_v7, 0.0  ;;  %v143_v20 = vmul.f32 %v1211_v4, %v75_v16 }
  0x33   :  { %v144_v21 = vmul.f32 %v1211_v4, %v76_v19 }
  0x34   :  { %v291_v22 = vpack.c.bf16 %v234_v11, %v233_v10  ;;  %v211_v25 = vadd.f32 %v1216_v5, %v143_v20  ;;  %v79_v10 = vld [vmem:[%s2165_s0 + $0x1d0] sm:$0xff] }
  0x35   :  { %v212_v29 = vadd.f32 %v1216_v5, %v144_v21  ;;  %v147_v14 = vmul.f32 %v1211_v4, %v79_v10 }
  0x36   :  { %v275_v32 = vmax.f32 %v211_v25, 0.0 }
  0x37   :  { %v276_v33 = vmax.f32 %v212_v29, 0.0 }
  0x3c   :  { %1130 = vmatmul.msk.bf16.gmra.mxu0 %vm318_vm1, %v288_v38  ;;  %v247_v38 = vmax.f32 %v183_v34, 0.0  ;;  %v51_v34 = vld [vmem:[%s2165_s0 + $0xf0] sm:$0xff] }
  0x3d   :  { %1153 = vmatmul.msk.bf16.gmra.mxu3 %vm318_vm1, %v311_v1  ;;  %v119_v40 = vmul.f32 %v1211_v4, %v51_v34 }
  0x3e   :  { %1138 = vmatmul.msk.bf16.gmra.mxu1 %vm318_vm1, %v296_v44  ;;  %v130_v44 = vmul.f32 %v1211_v4, %v62_v41  ;;  %v298_v54 = vpack.c.bf16 %v248_v39, %v247_v38  ;;  %v312_v39 = vpack.c.bf16 %v276_v33, %v275_v32  ;;  %v120_v41 = vmul.f32 %v1211_v4, %v52_v35 }
  0x40   :  { %v198_v50 = vadd.f32 %v1216_v5, %v130_v44  ;;  %v187_v44 = vadd.f32 %v1216_v5, %v119_v40  ;;  %v188_v45 = vadd.f32 %v1216_v5, %v120_v41 }
  0x42   :  { %1146 = vmatmul.msk.bf16.gmra.mxu2 %vm318_vm1, %v304_v28  ;;  %v262_v57 = vmax.f32 %v198_v50, 0.0  ;;  %v252_v49 = vmax.f32 %v188_v45, 0.0  ;;  %v65_v50 = vld [vmem:[%s2165_s0 + $0x160] sm:$0xff] }
  0x43   :  { %v133_v53 = vmul.f32 %v1211_v4, %v65_v50 }
  0x44   :  { %v305_v0 = vpack.c.bf16 %v262_v57, %v261_v56  ;;  %v145_v56 = vmul.f32 %v1211_v4, %v77_v52  ;;  %v146_v57 = vmul.f32 %v1211_v4, %v78_v55 }
  0x45   :  { %v201_v59 = vadd.f32 %v1216_v5, %v133_v53 }
  0x46   :  { %v213_v61 = vadd.f32 %v1216_v5, %v145_v56  ;;  %v214_v63 = vadd.f32 %v1216_v5, %v146_v57 }
  0x48   :  { %v277_v2 = vmax.f32 %v213_v61, 0.0  ;;  %v278_v3 = vmax.f32 %v214_v63, 0.0 }
  0x4a   :  { %v313_v7 = vpack.c.bf16 %v278_v3, %v277_v2 }
  0x4c   :  { %1131 = vmatmul.msk.bf16.gmra.mxu0 %vm318_vm1, %v289_v12  ;;  %v249_v12 = vmax.f32 %v185_v8, 0.0  ;;  %v67_v8 = vld [vmem:[%s2165_s0 + $0x170] sm:$0xff] }
  0x4d   :  { %1154 = vmatmul.msk.bf16.gmra.mxu3 %vm318_vm1, %v312_v39  ;;  %v135_v11 = vmul.f32 %v1211_v4, %v67_v8  ;;  %v82_v39 = vld [vmem:[%s2165_s0 + $0x1e8] sm:$0xff]  ;;  %v84_v8 = vld [vmem:[%s2165_s0 + $0x1f8] sm:$0xff] }
  0x4e   :  { %1139 = vmatmul.msk.bf16.gmra.mxu1 %vm318_vm1, %v297_v18  ;;  %v132_v18 = vmul.f32 %v1211_v4, %v64_v15  ;;  %v299_v28 = vpack.c.bf16 %v250_v13, %v249_v12  ;;  %v136_v12 = vmul.f32 %v1211_v4, %v68_v9  ;;  %v80_v13 = vld [vmem:[%s2165_s0 + $0x1d8] sm:$0xff]  ;;  %v150_v43 = vmul.f32 %v1211_v4, %v82_v39 }
  0x4f   :  { %v148_v15 = vmul.f32 %v1211_v4, %v80_v13  ;;  %v203_v16 = vadd.f32 %v1216_v5, %v135_v11 }
  0x50   :  { %v200_v24 = vadd.f32 %v1216_v5, %v132_v18  ;;  %v204_v17 = vadd.f32 %v1216_v5, %v136_v12  ;;  %v215_v18 = vadd.f32 %v1216_v5, %v147_v14  ;;  %v152_v12 = vmul.f32 %v1211_v4, %v84_v8 }
  0x51   :  { %v216_v20 = vadd.f32 %v1216_v5, %v148_v15  ;;  %v267_v23 = vmax.f32 %v203_v16, 0.0 }
  0x52   :  { %1147 = vmatmul.msk.bf16.gmra.mxu2 %vm318_vm1, %v305_v0  ;;  %v264_v31 = vmax.f32 %v200_v24, 0.0  ;;  %v265_v0 = vmax.f32 %v201_v59, 0.0  ;;  %v268_v24 = vmax.f32 %v204_v17, 0.0  ;;  %v279_v25 = vmax.f32 %v215_v18, 0.0 }
  0x53   :  { %v280_v27 = vmax.f32 %v216_v20, 0.0  ;;  %v220_v16 = vadd.f32 %v1216_v5, %v152_v12 }
  0x54   :  { %v306_v38 = vpack.c.bf16 %v264_v31, %v263_v30 }
  0x55   :  { %v314_v29 = vpack.c.bf16 %v280_v27, %v279_v25  ;;  %v284_v25 = vmax.f32 %v220_v16, 0.0 }
  0x5c   :  { %1132 = vmatmul.msk.bf16.gmra.mxu0 %vm318_vm1, %v290_v48  ;;  %v251_v48 = vmax.f32 %v187_v44, 0.0 }
  0x5d   :  { %1155 = vmatmul.msk.bf16.gmra.mxu3 %vm318_vm1, %v313_v7  ;;  %v83_v7 = vld [vmem:[%s2165_s0 + $0x1f0] sm:$0xff] }
  0x5e   :  { %1140 = vmatmul.msk.bf16.gmra.mxu1 %vm318_vm1, %v298_v54  ;;  %v134_v54 = vmul.f32 %v1211_v4, %v66_v51  ;;  %v300_v62 = vpack.c.bf16 %v252_v49, %v251_v48  ;;  %v218_v48 = vadd.f32 %v1216_v5, %v150_v43  ;;  %v151_v11 = vmul.f32 %v1211_v4, %v83_v7 }
  0x60   :  { %v202_v60 = vadd.f32 %v1216_v5, %v134_v54  ;;  %v282_v54 = vmax.f32 %v218_v48, 0.0  ;;  %v219_v15 = vadd.f32 %v1216_v5, %v151_v11 }
  0x62   :  { %1148 = vmatmul.msk.bf16.gmra.mxu2 %vm318_vm1, %v306_v38  ;;  %v266_v1 = vmax.f32 %v202_v60, 0.0  ;;  %v81_v38 = vld [vmem:[%s2165_s0 + $0x1e0] sm:$0xff] }
  0x63   :  { %v149_v42 = vmul.f32 %v1211_v4, %v81_v38 }
  0x64   :  { %v307_v6 = vpack.c.bf16 %v266_v1, %v265_v0 }
  0x65   :  { %v217_v47 = vadd.f32 %v1216_v5, %v149_v42 }
  0x67   :  { %v281_v53 = vmax.f32 %v217_v47, 0.0 }
  0x69   :  { %v315_v57 = vpack.c.bf16 %v282_v54, %v281_v53 }
  0x6c   :  { %1133 = vmatmul.msk.bf16.gmra.mxu0 %vm318_vm1, %v291_v22 }
  0x6d   :  { %1156 = vmatmul.msk.bf16.gmra.mxu3 %vm318_vm1, %v314_v29 }
  0x6e   :  { %1141 = vmatmul.msk.bf16.gmra.mxu1 %vm318_vm1, %v299_v28  ;;  %v308_v28 = vpack.c.bf16 %v268_v24, %v267_v23  ;;  %v283_v24 = vmax.f32 %v219_v15, 0.0 }
  0x70   :  { %v316_v5 = vpack.c.bf16 %v284_v25, %v283_v24 }
  0x72   :  { %1149 = vmatmul.msk.bf16.gmra.mxu2 %vm318_vm1, %v307_v6 }
  0x7c   :  { %1134 = vmatmul.msk.bf16.gmra.mxu0 %vm318_vm1, %v292_v58 }
  0x7d   :  { %1157 = vmatmul.msk.bf16.gmra.mxu3 %vm318_vm1, %v315_v57 }
  0x7e   :  { %1142 = vmatmul.msk.bf16.gmra.mxu1 %vm318_vm1, %v300_v62 }
  0x82   :  { %1150 = vmatmul.msk.bf16.gmra.mxu2 %vm318_vm1, %v308_v28 }
  0x89   :  { %v428_v19 = vpop.f32.mrf.mxu0 }
  0x8a   :  { %v588_v21 = vpack.c.bf16 %v428_v19, %v428_v19 }
  0x8b   :  { %v468_v22 = vpop.f32.mrf.mxu1 }
  0x8c   :  { %v1540_v26 = vpack.c.bf16 %v468_v22, %v468_v22  ;;  %653 = vst.msk [vmem:[%s2168_s4] sm:$0xf] %vm652_vm2, %v588_v21  ;;  %v717_v30 = vunpack.c.l.bf16 %v588_v21 }
  0x8d   :  { %1158 = vmatmul.msk.bf16.gmra.mxu3 %vm318_vm1, %v316_v5 }
  0x8e   :  { %669 = vst.msk [vmem:[%s2168_s4 + $0x40] sm:$0xf] %vm652_vm2, %v1540_v26  ;;  %v917_v35 = vmul.f32 %v717_v30, %v717_v30  ;;  %v782_v37 = vsel %vm781_vm3, %v717_v30, 0.0 }
  0x90   :  { %v981_v45 = vsel %vm781_vm3, %v917_v35, 0.0 }
  0x91   :  { %v430_v31 = vpop.f32.mrf.mxu0 }
  0x92   :  { %v589_v32 = vpack.c.bf16 %v430_v31, %v430_v31 }
  0x93   :  { %v470_v33 = vpop.f32.mrf.mxu1 }
  0x94   :  { %v1553_v34 = vpack.c.bf16 %v470_v33, %v470_v33  ;;  %654 = vst.msk [vmem:[%s2168_s4 + $0x4] sm:$0xf] %vm652_vm2, %v589_v32  ;;  %v718_v36 = vunpack.c.l.bf16 %v589_v32 }
  0x95   :  { %v508_v0 = vpop.f32.mrf.mxu2 }
  0x96   :  { %670 = vst.msk [vmem:[%s2168_s4 + $0x44] sm:$0xf] %vm652_vm2, %v1553_v34  ;;  %v783_v40 = vsel %vm781_vm3, %v718_v36, 0.0  ;;  %v918_v41 = vmul.f32 %v718_v36, %v718_v36  ;;  %v1615_v19 = vpack.c.bf16 %v508_v0, %v508_v0 }
  0x97   :  { %v784_v44 = vadd.f32 %v783_v40, %v782_v37 }
  0x98   :  { %v982_v46 = vsel %vm781_vm3, %v918_v41, 0.0  ;;  %685 = vst.msk [vmem:[%s2168_s4 + $0x80] sm:$0xf] %vm652_vm2, %v1615_v19 }
  0x99   :  { %v983_v49 = vadd.f32 %v982_v46, %v981_v45  ;;  %v433_v50 = vpop.f32.mrf.mxu0 }
  0x9a   :  { %v590_v51 = vpack.c.bf16 %v433_v50, %v433_v50 }
  0x9b   :  { %v473_v52 = vpop.f32.mrf.mxu1 }
  0x9c   :  { %v1578_v55 = vpack.c.bf16 %v473_v52, %v473_v52  ;;  %655 = vst.msk [vmem:[%s2168_s4 + $0x8] sm:$0xf] %vm652_vm2, %v590_v51  ;;  %v719_v56 = vunpack.c.l.bf16 %v590_v51 }
  0x9d   :  { %v510_v20 = vpop.f32.mrf.mxu2 }
  0x9e   :  { %671 = vst.msk [vmem:[%s2168_s4 + $0x48] sm:$0xf] %vm652_vm2, %v1578_v55  ;;  %v785_v58 = vsel %vm781_vm3, %v719_v56, 0.0  ;;  %v919_v59 = vmul.f32 %v719_v56, %v719_v56  ;;  %v1617_v23 = vpack.c.bf16 %v510_v20, %v510_v20 }
  0x9f   :  { %v786_v60 = vadd.f32 %v785_v58, %v784_v44 }
  0xa0   :  { %v984_v61 = vsel %vm781_vm3, %v919_v59, 0.0  ;;  %686 = vst.msk [vmem:[%s2168_s4 + $0x84] sm:$0xf] %vm652_vm2, %v1617_v23  ;;  %v548_v50 = vpop.f32.mrf.mxu3 }
  0xa1   :  { %v985_v62 = vadd.f32 %v984_v61, %v983_v49  ;;  %v435_v63 = vpop.f32.mrf.mxu0  ;;  %v1705_v58 = vpack.c.bf16 %v548_v50, %v548_v50 }
  0xa2   :  { %v591_v1 = vpack.c.bf16 %v435_v63, %v435_v63 }
  0xa3   :  { %v475_v2 = vpop.f32.mrf.mxu1  ;;  %701 = vst.msk [vmem:[%s2168_s4 + $0xc0] sm:$0xf] %vm652_vm2, %v1705_v58 }
  0xa4   :  { %v1592_v3 = vpack.c.bf16 %v475_v2, %v475_v2  ;;  %656 = vst.msk [vmem:[%s2168_s4 + $0xc] sm:$0xf] %vm652_vm2, %v591_v1  ;;  %v720_v6 = vunpack.c.l.bf16 %v591_v1 }
  0xa5   :  { %v513_v35 = vpop.f32.mrf.mxu2 }
  0xa6   :  { %672 = vst.msk [vmem:[%s2168_s4 + $0x4c] sm:$0xf] %vm652_vm2, %v1592_v3  ;;  %v787_v9 = vsel %vm781_vm3, %v720_v6, 0.0  ;;  %v920_v10 = vmul.f32 %v720_v6, %v720_v6  ;;  %v1661_v40 = vpack.c.bf16 %v513_v35, %v513_v35 }
  0xa7   :  { %v788_v13 = vadd.f32 %v787_v9, %v786_v60 }
  0xa8   :  { %v986_v14 = vsel %vm781_vm3, %v920_v10, 0.0  ;;  %687 = vst.msk [vmem:[%s2168_s4 + $0x88] sm:$0xf] %vm652_vm2, %v1661_v40  ;;  %v550_v59 = vpop.f32.mrf.mxu3 }
  0xa9   :  { %v987_v17 = vadd.f32 %v986_v14, %v985_v62  ;;  %v438_v18 = vpop.f32.mrf.mxu0  ;;  %v1720_v62 = vpack.c.bf16 %v550_v59, %v550_v59 }
  0xaa   :  { %v592_v21 = vpack.c.bf16 %v438_v18, %v438_v18 }
  0xab   :  { %v478_v22 = vpop.f32.mrf.mxu1  ;;  %702 = vst.msk [vmem:[%s2168_s4 + $0xc4] sm:$0xf] %vm652_vm2, %v1720_v62 }
  0xac   :  { %v1619_v27 = vpack.c.bf16 %v478_v22, %v478_v22  ;;  %657 = vst.msk [vmem:[%s2168_s4 + $0x10] sm:$0xf] %vm652_vm2, %v592_v21  ;;  %v721_v4 = vunpack.c.l.bf16 %v592_v21 }
  0xad   :  { %v515_v41 = vpop.f32.mrf.mxu2 }
  0xae   :  { %673 = vst.msk [vmem:[%s2168_s4 + $0x50] sm:$0xf] %vm652_vm2, %v1619_v27  ;;  %v789_v28 = vsel %vm781_vm3, %v721_v4, 0.0  ;;  %v921_v29 = vmul.f32 %v721_v4, %v721_v4  ;;  %v1665_v44 = vpack.c.bf16 %v515_v41, %v515_v41 }
  0xaf   :  { %v1641_v30 = vadd.f32 %v789_v28, %v788_v13 }
  0xb0   :  { %v988_v31 = vsel %vm781_vm3, %v921_v29, 0.0  ;;  %688 = vst.msk [vmem:[%s2168_s4 + $0x8c] sm:$0xf] %vm652_vm2, %v1665_v44  ;;  %v553_v6 = vpop.f32.mrf.mxu3 }
  0xb1   :  { %v1645_v32 = vadd.f32 %v988_v31, %v987_v17  ;;  %v440_v33 = vpop.f32.mrf.mxu0  ;;  %v1755_v13 = vpack.c.bf16 %v553_v6, %v553_v6 }
  0xb2   :  { %v1647_v36 = vpack.c.bf16 %v440_v33, %v440_v33 }
  0xb3   :  { %v480_v37 = vpop.f32.mrf.mxu1  ;;  %703 = vst.msk [vmem:[%s2168_s4 + $0xc8] sm:$0xf] %vm652_vm2, %v1755_v13 }
  0xb4   :  { %v1649_v38 = vpack.c.bf16 %v480_v37, %v480_v37  ;;  %658 = vst.msk [vmem:[%s2168_s4 + $0x14] sm:$0xf] %vm652_vm2, %v1647_v36  ;;  %v722_v4 = vunpack.c.l.bf16 %v1647_v36 }
  0xb5   :  { %v518_v47 = vpop.f32.mrf.mxu2 }
  0xb6   :  { %674 = vst.msk [vmem:[%s2168_s4 + $0x54] sm:$0xf] %vm652_vm2, %v1649_v38  ;;  %v1703_v53 = vpack.c.bf16 %v518_v47, %v518_v47 }
  0xb8   :  { %689 = vst.msk [vmem:[%s2168_s4 + $0x90] sm:$0xf] %vm652_vm2, %v1703_v53  ;;  %v555_v14 = vpop.f32.mrf.mxu3 }
  0xb9   :  { %v443_v39 = vpop.f32.mrf.mxu0  ;;  %v1770_v17 = vpack.c.bf16 %v555_v14, %v555_v14 }
  0xba   :  { %v1663_v42 = vpack.c.bf16 %v443_v39, %v443_v39 }
  0xbb   :  { %v483_v43 = vpop.f32.mrf.mxu1  ;;  %704 = vst.msk [vmem:[%s2168_s4 + $0xcc] sm:$0xf] %vm652_vm2, %v1770_v17 }
  0xbc   :  { %v1667_v45 = vpack.c.bf16 %v483_v43, %v483_v43  ;;  %659 = vst.msk [vmem:[%s2168_s4 + $0x18] sm:$0xf] %vm652_vm2, %v1663_v42  ;;  %v723_v29 = vunpack.c.l.bf16 %v1663_v42  ;;  %v922_v43 = vmul.f32 %v722_v4, %v722_v4 }
  0xbd   :  { %v520_v54 = vpop.f32.mrf.mxu2 }
  0xbe   :  { %675 = vst.msk [vmem:[%s2168_s4 + $0x58] sm:$0xf] %vm652_vm2, %v1667_v45  ;;  %v1714_v61 = vpack.c.bf16 %v520_v54, %v520_v54  ;;  %v923_v47 = vmul.f32 %v723_v29, %v723_v29  ;;  %v990_v50 = vsel %vm781_vm3, %v922_v43, 0.0  ;;  %v793_v59 = vsel %vm781_vm3, %v723_v29, 0.0 }
  0xc0   :  { %690 = vst.msk [vmem:[%s2168_s4 + $0x94] sm:$0xf] %vm652_vm2, %v1714_v61  ;;  %v558_v24 = vpop.f32.mrf.mxu3 }
  0xc1   :  { %v445_v46 = vpop.f32.mrf.mxu0  ;;  %v1809_v41 = vpack.c.bf16 %v558_v24, %v558_v24 }
  0xc2   :  { %v1689_v48 = vpack.c.bf16 %v445_v46, %v445_v46 }
  0xc3   :  { %v485_v49 = vpop.f32.mrf.mxu1  ;;  %705 = vst.msk [vmem:[%s2168_s4 + $0xd0] sm:$0xf] %vm652_vm2, %v1809_v41 }
  0xc4   :  { %v1691_v51 = vpack.c.bf16 %v485_v49, %v485_v49  ;;  %660 = vst.msk [vmem:[%s2168_s4 + $0x1c] sm:$0xf] %vm652_vm2, %v1689_v48  ;;  %v724_v46 = vunpack.c.l.bf16 %v1689_v48  ;;  %v791_v48 = vsel %vm781_vm3, %v722_v4, 0.0 }
  0xc5   :  { %v523_v0 = vpop.f32.mrf.mxu2 }
  0xc6   :  { %676 = vst.msk [vmem:[%s2168_s4 + $0x5c] sm:$0xf] %vm652_vm2, %v1691_v51  ;;  %v1753_v9 = vpack.c.bf16 %v523_v0, %v523_v0 }
  0xc8   :  { %691 = vst.msk [vmem:[%s2168_s4 + $0x98] sm:$0xf] %vm652_vm2, %v1753_v9  ;;  %v560_v37 = vpop.f32.mrf.mxu3 }
  0xc9   :  { %v448_v52 = vpop.f32.mrf.mxu0  ;;  %v1823_v42 = vpack.c.bf16 %v560_v37, %v560_v37 }
  0xca   :  { %v596_v56 = vpack.c.bf16 %v448_v52, %v448_v52  ;;  %v924_v52 = vmul.f32 %v724_v46, %v724_v46 }
  0xcb   :  { %v488_v57 = vpop.f32.mrf.mxu1  ;;  %706 = vst.msk [vmem:[%s2168_s4 + $0xd4] sm:$0xf] %vm652_vm2, %v1823_v42 }
  0xcc   :  { %v1707_v60 = vpack.c.bf16 %v488_v57, %v488_v57  ;;  %661 = vst.msk [vmem:[%s2168_s4 + $0x20] sm:$0xf] %vm652_vm2, %v596_v56  ;;  %v725_v49 = vunpack.c.l.bf16 %v596_v56 }
  0xcd   :  { %v525_v10 = vpop.f32.mrf.mxu2 }
  0xce   :  { %677 = vst.msk [vmem:[%s2168_s4 + $0x60] sm:$0xf] %vm652_vm2, %v1707_v60  ;;  %v1764_v16 = vpack.c.bf16 %v525_v10, %v525_v10  ;;  %v925_v0 = vmul.f32 %v725_v49, %v725_v49  ;;  %v792_v10 = vadd.f32 %v791_v48, %v1641_v30  ;;  %v797_v30 = vsel %vm781_vm3, %v725_v49, 0.0 }
  0xd0   :  { %692 = vst.msk [vmem:[%s2168_s4 + $0x9c] sm:$0xf] %vm652_vm2, %v1764_v16 }
  0xd1   :  { %v450_v63 = vpop.f32.mrf.mxu0 }
  0xd2   :  { %v597_v1 = vpack.c.bf16 %v450_v63, %v450_v63  ;;  %v992_v63 = vsel %vm781_vm3, %v923_v47, 0.0 }
  0xd3   :  { %v490_v2 = vpop.f32.mrf.mxu1 }
  0xd4   :  { %v1742_v7 = vpack.c.bf16 %v490_v2, %v490_v2  ;;  %662 = vst.msk [vmem:[%s2168_s4 + $0x24] sm:$0xf] %vm652_vm2, %v597_v1  ;;  %v726_v54 = vunpack.c.l.bf16 %v597_v1  ;;  %v991_v1 = vadd.f32 %v990_v50, %v1645_v32  ;;  %v996_v32 = vsel %vm781_vm3, %v925_v0, 0.0 }
  0xd5   :  { %v528_v20 = vpop.f32.mrf.mxu2 }
  0xd6   :  { %678 = vst.msk [vmem:[%s2168_s4 + $0x64] sm:$0xf] %vm652_vm2, %v1742_v7  ;;  %v1805_v35 = vpack.c.bf16 %v528_v20, %v528_v20  ;;  %v994_v20 = vsel %vm781_vm3, %v924_v52, 0.0  ;;  %v993_v24 = vadd.f32 %v992_v63, %v991_v1  ;;  %v926_v4 = vmul.f32 %v726_v54, %v726_v54 }
  0xd8   :  { %693 = vst.msk [vmem:[%s2168_s4 + $0xa0] sm:$0xf] %vm652_vm2, %v1805_v35  ;;  %v998_v47 = vsel %vm781_vm3, %v926_v4, 0.0 }
  0xd9   :  { %v453_v8 = vpop.f32.mrf.mxu0 }
  0xda   :  { %v598_v11 = vpack.c.bf16 %v453_v8, %v453_v8  ;;  %v563_v8 = vpop.f32.mrf.mxu3 }
  0xdb   :  { %v493_v12 = vpop.f32.mrf.mxu1 }
  0xdc   :  { %v1757_v15 = vpack.c.bf16 %v493_v12, %v493_v12  ;;  %663 = vst.msk [vmem:[%s2168_s4 + $0x28] sm:$0xf] %vm652_vm2, %v598_v11  ;;  %v727_v12 = vunpack.c.l.bf16 %v598_v11 }
  0xdd   :  { %v530_v28 = vpop.f32.mrf.mxu2 }
  0xde   :  { %679 = vst.msk [vmem:[%s2168_s4 + $0x68] sm:$0xf] %vm652_vm2, %v1757_v15  ;;  %v1816_v36 = vpack.c.bf16 %v530_v28, %v530_v28  ;;  %v995_v28 = vadd.f32 %v994_v20, %v993_v24  ;;  %v927_v29 = vmul.f32 %v727_v12, %v727_v12  ;;  %v801_v48 = vsel %vm781_vm3, %v727_v12, 0.0 }
  0xe0   :  { %694 = vst.msk [vmem:[%s2168_s4 + $0xa4] sm:$0xf] %vm652_vm2, %v1816_v36 }
  0xe1   :  { %v455_v18 = vpop.f32.mrf.mxu0 }
  0xe2   :  { %v599_v21 = vpack.c.bf16 %v455_v18, %v455_v18  ;;  %v795_v18 = vsel %vm781_vm3, %v724_v46, 0.0  ;;  %v997_v46 = vadd.f32 %v996_v32, %v995_v28 }
  0xe3   :  { %v495_v22 = vpop.f32.mrf.mxu1 }
  0xe4   :  { %v1792_v25 = vpack.c.bf16 %v495_v22, %v495_v22  ;;  %664 = vst.msk [vmem:[%s2168_s4 + $0x2c] sm:$0xf] %vm652_vm2, %v599_v21  ;;  %v794_v22 = vadd.f32 %v793_v59, %v792_v10  ;;  %v728_v11 = vunpack.c.l.bf16 %v599_v21  ;;  %v565_v21 = vpop.f32.mrf.mxu3  ;;  %v1000_v10 = vsel %vm781_vm3, %v927_v29, 0.0 }
  0xe5   :  { %v533_v57 = vpop.f32.mrf.mxu2 }
  0xe6   :  { %680 = vst.msk [vmem:[%s2168_s4 + $0x6c] sm:$0xf] %vm652_vm2, %v1792_v25  ;;  %v1869_v0 = vpack.c.bf16 %v533_v57, %v533_v57  ;;  %v803_v1 = vsel %vm781_vm3, %v728_v11, 0.0  ;;  %v999_v57 = vadd.f32 %v998_v47, %v997_v46 }
  0xe8   :  { %695 = vst.msk [vmem:[%s2168_s4 + $0xa8] sm:$0xf] %vm652_vm2, %v1869_v0 }
  0xe9   :  { %v458_v5 = vpop.f32.mrf.mxu0 }
  0xea   :  { %v600_v31 = vpack.c.bf16 %v458_v5, %v458_v5  ;;  %v796_v5 = vadd.f32 %v795_v18, %v794_v22 }
  0xeb   :  { %v498_v33 = vpop.f32.mrf.mxu1 }
  0xec   :  { %v1807_v39 = vpack.c.bf16 %v498_v33, %v498_v33  ;;  %665 = vst.msk [vmem:[%s2168_s4 + $0x30] sm:$0xf] %vm652_vm2, %v600_v31  ;;  %v799_v33 = vsel %vm781_vm3, %v726_v54, 0.0  ;;  %v729_v37 = vunpack.c.l.bf16 %v600_v31  ;;  %v798_v43 = vadd.f32 %v797_v30, %v796_v5 }
  0xed   :  { %v535_v52 = vpop.f32.mrf.mxu2  ;;  %v1874_v31 = vpack.c.bf16 %v563_v8, %v563_v8  ;;  %v1888_v8 = vpack.c.bf16 %v565_v21, %v565_v21  ;;  %v1001_v30 = vadd.f32 %v1000_v10, %v999_v57  ;;  %v734_v21 = vunpack.c.l.bf16 %v1553_v34 }
  0xee   :  { %681 = vst.msk [vmem:[%s2168_s4 + $0x70] sm:$0xf] %vm652_vm2, %v1807_v39  ;;  %v929_v18 = vmul.f32 %v729_v37, %v729_v37  ;;  %v1881_v12 = vpack.c.bf16 %v535_v52, %v535_v52  ;;  %v805_v24 = vsel %vm781_vm3, %v729_v37, 0.0  ;;  %v568_v52 = vpop.f32.mrf.mxu3 }
  0xef   :  { %707 = vst.msk [vmem:[%s2168_s4 + $0xd8] sm:$0xf] %vm652_vm2, %v1874_v31 }
  0xf0   :  { %v1004_v5 = vsel %vm781_vm3, %v929_v18, 0.0  ;;  %696 = vst.msk [vmem:[%s2168_s4 + $0xac] sm:$0xf] %vm652_vm2, %v1881_v12 }
  0xf1   :  { %v460_v56 = vpop.f32.mrf.mxu0  ;;  %708 = vst.msk [vmem:[%s2168_s4 + $0xdc] sm:$0xf] %vm652_vm2, %v1888_v8 }
  0xf2   :  { %v601_v2 = vpack.c.bf16 %v460_v56, %v460_v56  ;;  %v928_v56 = vmul.f32 %v728_v11, %v728_v11  ;;  %v733_v11 = vunpack.c.l.bf16 %v1540_v26 }
  0xf3   :  { %v500_v6 = vpop.f32.mrf.mxu1 }
  0xf4   :  { %v1851_v14 = vpack.c.bf16 %v500_v6, %v500_v6  ;;  %666 = vst.msk [vmem:[%s2168_s4 + $0x34] sm:$0xf] %vm652_vm2, %v601_v2  ;;  %v730_v59 = vunpack.c.l.bf16 %v601_v2  ;;  %v800_v6 = vadd.f32 %v799_v33, %v798_v43  ;;  %v1002_v22 = vsel %vm781_vm3, %v928_v56, 0.0 }
  0xf5   :  { %v1003_v33 = vadd.f32 %v1002_v22, %v1001_v30  ;;  %v538_v26 = vpop.f32.mrf.mxu2  ;;  %v934_v30 = vmul.f32 %v734_v21, %v734_v21 }
  0xf6   :  { %682 = vst.msk [vmem:[%s2168_s4 + $0x74] sm:$0xf] %vm652_vm2, %v1851_v14  ;;  %v802_v20 = vadd.f32 %v801_v48, %v800_v6  ;;  %v930_v4 = vmul.f32 %v730_v59, %v730_v59  ;;  %v807_v28 = vsel %vm781_vm3, %v730_v59, 0.0 }
  0xf7   :  { %v1005_v56 = vadd.f32 %v1004_v5, %v1003_v33  ;;  %v815_v5 = vsel %vm781_vm3, %v734_v21, 0.0 }
  0xf8   :  { %v804_v32 = vadd.f32 %v803_v1, %v802_v20  ;;  %v1006_v46 = vsel %vm781_vm3, %v930_v4, 0.0  ;;  %v735_v1 = vunpack.c.l.bf16 %v1578_v55  ;;  %v813_v20 = vsel %vm781_vm3, %v733_v11, 0.0 }
  0xf9   :  { %v463_v50 = vpop.f32.mrf.mxu0  ;;  %v1007_v18 = vadd.f32 %v1006_v46, %v1005_v56  ;;  %v736_v55 = vunpack.c.l.bf16 %v1592_v3  ;;  %v1938_v46 = vpack.c.bf16 %v538_v26, %v538_v26 }
  0xfa   :  { %v602_v49 = vpack.c.bf16 %v463_v50, %v463_v50  ;;  %v806_v37 = vadd.f32 %v805_v24, %v804_v32 }
  0xfb   :  { %v503_v63 = vpop.f32.mrf.mxu1  ;;  %v936_v21 = vmul.f32 %v736_v55, %v736_v55  ;;  %697 = vst.msk [vmem:[%s2168_s4 + $0xb0] sm:$0xf] %vm652_vm2, %v1938_v46 }
  0xfc   :  { %v1872_v54 = vpack.c.bf16 %v503_v63, %v503_v63  ;;  %667 = vst.msk [vmem:[%s2168_s4 + $0x38] sm:$0xf] %vm652_vm2, %v602_v49  ;;  %v731_v2 = vunpack.c.l.bf16 %v602_v49  ;;  %v808_v59 = vadd.f32 %v807_v28, %v806_v37  ;;  %v933_v63 = vmul.f32 %v733_v11, %v733_v11 }
  0xfd   :  { %v935_v28 = vmul.f32 %v735_v1, %v735_v1  ;;  %v540_v37 = vpop.f32.mrf.mxu2  ;;  %v1940_v11 = vpack.c.bf16 %v568_v52, %v568_v52 }
  0xfe   :  { %683 = vst.msk [vmem:[%s2168_s4 + $0x78] sm:$0xf] %vm652_vm2, %v1872_v54  ;;  %v931_v29 = vmul.f32 %v731_v2, %v731_v2  ;;  %v809_v47 = vsel %vm781_vm3, %v731_v2, 0.0  ;;  %v1012_v4 = vsel %vm781_vm3, %v933_v63, 0.0  ;;  %v817_v63 = vsel %vm781_vm3, %v735_v1, 0.0 }
  0xff   :  { %v810_v2 = vadd.f32 %v809_v47, %v808_v59  ;;  %v1942_v47 = vpack.c.bf16 %v540_v37, %v540_v37  ;;  %v1014_v59 = vsel %vm781_vm3, %v934_v30, 0.0  ;;  %709 = vst.msk [vmem:[%s2168_s4 + $0xe0] sm:$0xf] %vm652_vm2, %v1940_v11  ;;  %v1016_v52 = vsel %vm781_vm3, %v935_v28, 0.0 }
 0x100   :  { %v1008_v6 = vsel %vm781_vm3, %v931_v29, 0.0 }
 0x101   :  { %v465_v43 = vpop.f32.mrf.mxu0  ;;  %v1009_v22 = vadd.f32 %v1008_v6, %v1007_v18  ;;  %v738_v6 = vunpack.c.l.bf16 %v1649_v38  ;;  %v739_v38 = vunpack.c.l.bf16 %v1667_v45  ;;  %698 = vst.msk [vmem:[%s2168_s4 + $0xb4] sm:$0xf] %vm652_vm2, %v1942_v47  ;;  %v740_v18 = vunpack.c.l.bf16 %v1691_v51 }
 0x102   :  { %v603_v48 = vpack.c.bf16 %v465_v43, %v465_v43  ;;  %v737_v43 = vunpack.c.l.bf16 %v1619_v27 }
 0x103   :  { %v505_v50 = vpop.f32.mrf.mxu1  ;;  %v940_v28 = vmul.f32 %v740_v18, %v740_v18 }
 0x104   :  { %v1917_v49 = vpack.c.bf16 %v505_v50, %v505_v50  ;;  %668 = vst.msk [vmem:[%s2168_s4 + $0x3c] sm:$0xf] %vm652_vm2, %v603_v48  ;;  %v732_v10 = vunpack.c.l.bf16 %v603_v48  ;;  %v570_v48 = vpop.f32.mrf.mxu3  ;;  %v937_v1 = vmul.f32 %v737_v43, %v737_v43  ;;  %v821_v45 = vsel %vm781_vm3, %v737_v43, 0.0 }
 0x105   :  { %v1944_v3 = vpack.c.bf16 %v570_v48, %v570_v48  ;;  %v543_v30 = vpop.f32.mrf.mxu2  ;;  %v825_v48 = vsel %vm781_vm3, %v739_v38, 0.0 }
 0x106   :  { %684 = vst.msk [vmem:[%s2168_s4 + $0x7c] sm:$0xf] %vm652_vm2, %v1917_v49  ;;  %v811_v34 = vsel %vm781_vm3, %v732_v10, 0.0  ;;  %v932_v57 = vmul.f32 %v732_v10, %v732_v10  ;;  %v819_v10 = vsel %vm781_vm3, %v736_v55, 0.0  ;;  %v1020_v51 = vsel %vm781_vm3, %v937_v1, 0.0 }
 0x107   :  { %v812_v24 = vadd.f32 %v811_v34, %v810_v2  ;;  %710 = vst.msk [vmem:[%s2168_s4 + $0xe4] sm:$0xf] %vm652_vm2, %v1944_v3  ;;  %v823_v55 = vsel %vm781_vm3, %v738_v6, 0.0 }
 0x108   :  { %v1010_v32 = vsel %vm781_vm3, %v932_v57, 0.0  ;;  %v1018_v57 = vsel %vm781_vm3, %v936_v21, 0.0  ;;  %v827_v21 = vsel %vm781_vm3, %v740_v18, 0.0  ;;  %v1990_v18 = vpack.c.bf16 %v543_v30, %v543_v30 }
 0x109   :  { %v814_v29 = vadd.f32 %v813_v20, %v812_v24  ;;  %v1011_v33 = vadd.f32 %v1010_v32, %v1009_v22  ;;  %v938_v20 = vmul.f32 %v738_v6, %v738_v6  ;;  %v741_v22 = vunpack.c.l.bf16 %v1707_v60 }
 0x10a   :  { %v939_v32 = vmul.f32 %v739_v38, %v739_v38  ;;  %v743_v60 = vunpack.c.l.bf16 %v1757_v15  ;;  %v1026_v6 = vsel %vm781_vm3, %v940_v28, 0.0  ;;  %v744_v38 = vunpack.c.l.bf16 %v1792_v25  ;;  %699 = vst.msk [vmem:[%s2168_s4 + $0xb8] sm:$0xf] %vm652_vm2, %v1990_v18 }
 0x10b   :  { %v816_v50 = vadd.f32 %v815_v5, %v814_v29  ;;  %v1013_v56 = vadd.f32 %v1012_v4, %v1011_v33  ;;  %v1022_v37 = vsel %vm781_vm3, %v938_v20, 0.0  ;;  %v941_v43 = vmul.f32 %v741_v22, %v741_v22 }
 0x10c   :  { %v573_v5 = vpop.f32.mrf.mxu3  ;;  %v943_v15 = vmul.f32 %v743_v60, %v743_v60  ;;  %v944_v28 = vmul.f32 %v744_v38, %v744_v38 }
 0x10d   :  { %v818_v27 = vadd.f32 %v817_v63, %v816_v50  ;;  %v1015_v26 = vadd.f32 %v1014_v59, %v1013_v56  ;;  %v742_v50 = vunpack.c.l.bf16 %v1742_v7  ;;  %v1024_v63 = vsel %vm781_vm3, %v939_v32, 0.0 }
 0x10e   :  { %v1992_v20 = vpack.c.bf16 %v573_v5, %v573_v5  ;;  %v833_v32 = vsel %vm781_vm3, %v743_v60, 0.0  ;;  %v1032_v5 = vsel %vm781_vm3, %v943_v15, 0.0 }
 0x10f   :  { %v820_v2 = vadd.f32 %v819_v10, %v818_v27  ;;  %v1017_v34 = vadd.f32 %v1016_v52, %v1015_v26  ;;  %v829_v52 = vsel %vm781_vm3, %v741_v22, 0.0  ;;  %v1028_v10 = vsel %vm781_vm3, %v941_v43, 0.0 }
 0x110   :  { %v942_v1 = vmul.f32 %v742_v50, %v742_v50  ;;  %v831_v7 = vsel %vm781_vm3, %v742_v50, 0.0  ;;  %711 = vst.msk [vmem:[%s2168_s4 + $0xe8] sm:$0xf] %vm652_vm2, %v1992_v20  ;;  %v1034_v50 = vsel %vm781_vm3, %v944_v28, 0.0 }
 0x111   :  { %v822_v24 = vadd.f32 %v821_v45, %v820_v2  ;;  %v1019_v4 = vadd.f32 %v1018_v57, %v1017_v34  ;;  %v545_v57 = vpop.f32.mrf.mxu2  ;;  %v745_v45 = vunpack.c.l.bf16 %v1807_v39 }
 0x112   :  { %v1030_v25 = vsel %vm781_vm3, %v942_v1, 0.0 }
 0x113   :  { %v824_v29 = vadd.f32 %v823_v55, %v822_v24  ;;  %v1021_v33 = vadd.f32 %v1020_v51, %v1019_v4  ;;  %v1994_v24 = vpack.c.bf16 %v545_v57, %v545_v57  ;;  %v837_v60 = vsel %vm781_vm3, %v745_v45, 0.0 }
 0x114   :  { %v575_v22 = vpop.f32.mrf.mxu3 }
 0x115   :  { %v1023_v56 = vadd.f32 %v1022_v37, %v1021_v33  ;;  %v826_v59 = vadd.f32 %v825_v48, %v824_v29  ;;  %v1996_v55 = vpack.c.bf16 %v575_v22, %v575_v22  ;;  %v746_v29 = vunpack.c.l.bf16 %v1851_v14  ;;  %700 = vst.msk [vmem:[%s2168_s4 + $0xbc] sm:$0xf] %vm652_vm2, %v1994_v24 }
 0x116   :  { %v835_v33 = vsel %vm781_vm3, %v744_v38, 0.0  ;;  %v945_v37 = vmul.f32 %v745_v45, %v745_v45  ;;  %v747_v14 = vunpack.c.l.bf16 %v1872_v54  ;;  %v748_v54 = vunpack.c.l.bf16 %v1917_v49 }
 0x117   :  { %v828_v27 = vadd.f32 %v827_v21, %v826_v59  ;;  %v1025_v26 = vadd.f32 %v1024_v63, %v1023_v56  ;;  %712 = vst.msk [vmem:[%s2168_s4 + $0xec] sm:$0xf] %vm652_vm2, %v1996_v55  ;;  %v946_v56 = vmul.f32 %v746_v29, %v746_v29  ;;  %v749_v21 = vunpack.c.l.bf16 %v1615_v19 }
 0x118   :  { %v750_v38 = vunpack.c.l.bf16 %v1617_v23  ;;  %v841_v15 = vsel %vm781_vm3, %v747_v14, 0.0  ;;  %v751_v19 = vunpack.c.l.bf16 %v1661_v40  ;;  %v843_v22 = vsel %vm781_vm3, %v748_v54, 0.0 }
 0x119   :  { %v830_v2 = vadd.f32 %v829_v52, %v828_v27  ;;  %v1027_v34 = vadd.f32 %v1026_v6, %v1025_v26  ;;  %v1036_v6 = vsel %vm781_vm3, %v945_v37, 0.0  ;;  %v839_v27 = vsel %vm781_vm3, %v746_v29, 0.0 }
 0x11a   :  { %v947_v26 = vmul.f32 %v747_v14, %v747_v14  ;;  %v949_v57 = vmul.f32 %v749_v21, %v749_v21  ;;  %v752_v23 = vunpack.c.l.bf16 %v1665_v44  ;;  %v847_v29 = vsel %vm781_vm3, %v750_v38, 0.0 }
 0x11b   :  { %v832_v4 = vadd.f32 %v831_v7, %v830_v2  ;;  %v1029_v51 = vadd.f32 %v1028_v10, %v1027_v34  ;;  %v1038_v7 = vsel %vm781_vm3, %v946_v56, 0.0  ;;  %v948_v2 = vmul.f32 %v748_v54, %v748_v54 }
 0x11c   :  { %v578_v52 = vpop.f32.mrf.mxu3  ;;  %v1040_v45 = vsel %vm781_vm3, %v947_v26, 0.0  ;;  %v951_v40 = vmul.f32 %v751_v19, %v751_v19  ;;  %v952_v56 = vmul.f32 %v752_v23, %v752_v23  ;;  %v754_v54 = vunpack.c.l.bf16 %v1714_v61 }
 0x11d   :  { %v834_v39 = vadd.f32 %v833_v32, %v832_v4  ;;  %v1031_v30 = vadd.f32 %v1030_v25, %v1029_v51  ;;  %v845_v25 = vsel %vm781_vm3, %v749_v21, 0.0  ;;  %v950_v32 = vmul.f32 %v750_v38, %v750_v38 }
 0x11e   :  { %v1042_v28 = vsel %vm781_vm3, %v948_v2, 0.0  ;;  %v2042_v37 = vpack.c.bf16 %v578_v52, %v578_v52  ;;  %v851_v21 = vsel %vm781_vm3, %v752_v23, 0.0  ;;  %v755_v61 = vunpack.c.l.bf16 %v1753_v9 }
 0x11f   :  { %v836_v48 = vadd.f32 %v835_v33, %v834_v39  ;;  %v1033_v43 = vadd.f32 %v1032_v5, %v1031_v30  ;;  %v1044_v5 = vsel %vm781_vm3, %v949_v57, 0.0  ;;  %v753_v33 = vunpack.c.l.bf16 %v1703_v53 }
 0x120   :  { %v1046_v44 = vsel %vm781_vm3, %v950_v32, 0.0  ;;  %713 = vst.msk [vmem:[%s2168_s4 + $0xf0] sm:$0xf] %vm652_vm2, %v2042_v37  ;;  %v1050_v52 = vsel %vm781_vm3, %v952_v56, 0.0  ;;  %v756_v38 = vunpack.c.l.bf16 %v1764_v16  ;;  %v955_v57 = vmul.f32 %v755_v61, %v755_v61 }
 0x121   :  { %v838_v59 = vadd.f32 %v837_v60, %v836_v48  ;;  %v1035_v63 = vadd.f32 %v1034_v50, %v1033_v43  ;;  %v849_v60 = vsel %vm781_vm3, %v751_v19, 0.0  ;;  %v761_v56 = vunpack.c.l.bf16 %v1938_v46 }
 0x122   :  { %v1056_v23 = vsel %vm781_vm3, %v955_v57, 0.0 }
 0x123   :  { %v1037_v10 = vadd.f32 %v1036_v6, %v1035_v63  ;;  %v840_v1 = vadd.f32 %v839_v27, %v838_v59  ;;  %v1048_v63 = vsel %vm781_vm3, %v951_v40, 0.0  ;;  %v953_v6 = vmul.f32 %v753_v33, %v753_v33 }
 0x124   :  { %v580_v14 = vpop.f32.mrf.mxu3 }
 0x125   :  { %v1039_v49 = vadd.f32 %v1038_v7, %v1037_v10  ;;  %v842_v34 = vadd.f32 %v841_v15, %v840_v1  ;;  %v2044_v50 = vpack.c.bf16 %v580_v14, %v580_v14  ;;  %v853_v10 = vsel %vm781_vm3, %v753_v33, 0.0 }
 0x126   :  { %v954_v1 = vmul.f32 %v754_v54, %v754_v54  ;;  %v757_v7 = vunpack.c.l.bf16 %v1805_v35  ;;  %v760_v14 = vunpack.c.l.bf16 %v1881_v12 }
 0x127   :  { %v1041_v4 = vadd.f32 %v1040_v45, %v1039_v49  ;;  %v844_v51 = vadd.f32 %v843_v22, %v842_v34  ;;  %714 = vst.msk [vmem:[%s2168_s4 + $0xf4] sm:$0xf] %vm652_vm2, %v2044_v50  ;;  %v1052_v49 = vsel %vm781_vm3, %v953_v6, 0.0  ;;  %v855_v34 = vsel %vm781_vm3, %v754_v54, 0.0 }
 0x128   :  { %v1054_v22 = vsel %vm781_vm3, %v954_v1, 0.0  ;;  %v957_v16 = vmul.f32 %v757_v7, %v757_v7  ;;  %v861_v40 = vsel %vm781_vm3, %v757_v7, 0.0  ;;  %v960_v6 = vmul.f32 %v760_v14, %v760_v14 }
 0x129   :  { %v846_v39 = vadd.f32 %v845_v25, %v844_v51  ;;  %v1043_v30 = vadd.f32 %v1042_v28, %v1041_v4  ;;  %v857_v4 = vsel %vm781_vm3, %v755_v61, 0.0  ;;  %v956_v51 = vmul.f32 %v756_v38, %v756_v38 }
 0x12a   :  { %v758_v25 = vunpack.c.l.bf16 %v1816_v36  ;;  %v859_v28 = vsel %vm781_vm3, %v756_v38, 0.0  ;;  %v1060_v36 = vsel %vm781_vm3, %v957_v16, 0.0  ;;  %v762_v61 = vunpack.c.l.bf16 %v1942_v47 }
 0x12b   :  { %v848_v48 = vadd.f32 %v847_v29, %v846_v39  ;;  %v1045_v43 = vadd.f32 %v1044_v5, %v1043_v30  ;;  %v759_v29 = vunpack.c.l.bf16 %v1869_v0  ;;  %v1058_v5 = vsel %vm781_vm3, %v956_v51, 0.0 }
 0x12c   :  { %v583_v19 = vpop.f32.mrf.mxu3  ;;  %v958_v33 = vmul.f32 %v758_v25, %v758_v25  ;;  %v763_v47 = vunpack.c.l.bf16 %v1990_v18  ;;  %v1066_v7 = vsel %vm781_vm3, %v960_v6, 0.0  ;;  %v766_v51 = vunpack.c.l.bf16 %v1720_v62 }
 0x12d   :  { %v850_v53 = vadd.f32 %v849_v60, %v848_v48  ;;  %v1047_v59 = vadd.f32 %v1046_v44, %v1045_v43  ;;  %v863_v44 = vsel %vm781_vm3, %v758_v25, 0.0  ;;  %v959_v60 = vmul.f32 %v759_v29, %v759_v29 }
 0x12e   :  { %v2080_v54 = vpack.c.bf16 %v583_v19, %v583_v19  ;;  %v865_v12 = vsel %vm781_vm3, %v759_v29, 0.0  ;;  %v765_v19 = vunpack.c.l.bf16 %v1705_v58  ;;  %v873_v16 = vsel %vm781_vm3, %v763_v47, 0.0 }
 0x12f   :  { %v852_v27 = vadd.f32 %v851_v21, %v850_v53  ;;  %v1049_v26 = vadd.f32 %v1048_v63, %v1047_v59  ;;  %v1062_v21 = vsel %vm781_vm3, %v958_v33, 0.0  ;;  %v768_v62 = vunpack.c.l.bf16 %v1770_v17 }
 0x130   :  { %715 = vst.msk [vmem:[%s2168_s4 + $0xf8] sm:$0xf] %vm652_vm2, %v2080_v54  ;;  %v770_v17 = vunpack.c.l.bf16 %v1823_v42 }
 0x131   :  { %v854_v15 = vadd.f32 %v853_v10, %v852_v27  ;;  %v1051_v2 = vadd.f32 %v1050_v52, %v1049_v26  ;;  %v1064_v26 = vsel %vm781_vm3, %v959_v60, 0.0  ;;  %v867_v52 = vsel %vm781_vm3, %v760_v14, 0.0 }
 0x132   :  { %v961_v10 = vmul.f32 %v761_v56, %v761_v56 }
 0x133   :  { %v856_v9 = vadd.f32 %v855_v34, %v854_v15  ;;  %v1053_v45 = vadd.f32 %v1052_v49, %v1051_v2  ;;  %v869_v15 = vsel %vm781_vm3, %v761_v56, 0.0  ;;  %v962_v2 = vmul.f32 %v762_v61, %v762_v61 }
 0x134   :  { %v585_v0 = vpop.f32.mrf.mxu3  ;;  %v764_v49 = vunpack.c.l.bf16 %v1994_v24 }
 0x135   :  { %v1055_v32 = vadd.f32 %v1054_v22, %v1053_v45  ;;  %v858_v35 = vadd.f32 %v857_v4, %v856_v9  ;;  %v2082_v63 = vpack.c.bf16 %v585_v0, %v585_v0  ;;  %v1068_v9 = vsel %vm781_vm3, %v961_v10, 0.0 }
 0x136   :  { %v871_v45 = vsel %vm781_vm3, %v762_v61, 0.0  ;;  %v963_v22 = vmul.f32 %v763_v47, %v763_v47  ;;  %v1070_v25 = vsel %vm781_vm3, %v962_v2, 0.0  ;;  %v875_v29 = vsel %vm781_vm3, %v764_v49, 0.0 }
 0x137   :  { %v860_v39 = vadd.f32 %v859_v28, %v858_v35  ;;  %v1057_v30 = vadd.f32 %v1056_v23, %v1055_v32  ;;  %716 = vst.msk [vmem:[%s2168_s4 + $0xfc] sm:$0xf] %vm652_vm2, %v2082_v63  ;;  %v964_v32 = vmul.f32 %v764_v49, %v764_v49  ;;  %v965_v23 = vmul.f32 %v765_v19, %v765_v19 }
 0x138   :  { %v767_v28 = vunpack.c.l.bf16 %v1755_v13  ;;  %v1072_v58 = vsel %vm781_vm3, %v963_v22, 0.0  ;;  %v883_v61 = vsel %vm781_vm3, %v768_v62, 0.0  ;;  %v970_v47 = vmul.f32 %v770_v17, %v770_v17 }
 0x139   :  { %v862_v48 = vadd.f32 %v861_v40, %v860_v39  ;;  %v1059_v43 = vadd.f32 %v1058_v5, %v1057_v30  ;;  %v877_v5 = vsel %vm781_vm3, %v765_v19, 0.0  ;;  %v966_v40 = vmul.f32 %v766_v51, %v766_v51 }
 0x13a   :  { %v1074_v33 = vsel %vm781_vm3, %v964_v32, 0.0  ;;  %v967_v13 = vmul.f32 %v767_v28, %v767_v28  ;;  %v773_v49 = vunpack.c.l.bf16 %v1940_v11 }
 0x13b   :  { %v864_v53 = vadd.f32 %v863_v44, %v862_v48  ;;  %v1061_v59 = vadd.f32 %v1060_v36, %v1059_v43  ;;  %v1076_v48 = vsel %vm781_vm3, %v965_v23, 0.0  ;;  %v879_v43 = vsel %vm781_vm3, %v766_v51, 0.0 }
 0x13c   :  { %v769_v44 = vunpack.c.l.bf16 %v1809_v41  ;;  %v1078_v0 = vsel %vm781_vm3, %v966_v40, 0.0  ;;  %v1080_v6 = vsel %vm781_vm3, %v967_v13, 0.0  ;;  %v973_v51 = vmul.f32 %v773_v49, %v773_v49 }
 0x13d   :  { %v866_v46 = vadd.f32 %v865_v12, %v864_v53  ;;  %v1063_v27 = vadd.f32 %v1062_v21, %v1061_v59  ;;  %v881_v53 = vsel %vm781_vm3, %v767_v28, 0.0  ;;  %v968_v59 = vmul.f32 %v768_v62, %v768_v62 }
 0x13e   :  { %v885_v10 = vsel %vm781_vm3, %v769_v44, 0.0  ;;  %v776_v23 = vunpack.c.l.bf16 %v1996_v55 }
 0x13f   :  { %v868_v1 = vadd.f32 %v867_v52, %v866_v46  ;;  %v1065_v38 = vadd.f32 %v1064_v26, %v1063_v27  ;;  %v969_v46 = vmul.f32 %v769_v44, %v769_v44  ;;  %v771_v27 = vunpack.c.l.bf16 %v1874_v31 }
 0x140   :  { %v1082_v52 = vsel %vm781_vm3, %v968_v59, 0.0  ;;  %v779_v44 = vunpack.c.l.bf16 %v2080_v54  ;;  %v780_v59 = vunpack.c.l.bf16 %v2082_v63 }
 0x141   :  { %v1067_v34 = vadd.f32 %v1066_v7, %v1065_v38  ;;  %v870_v57 = vadd.f32 %v869_v15, %v868_v1  ;;  %v772_v1 = vunpack.c.l.bf16 %v1888_v8  ;;  %v1084_v7 = vsel %vm781_vm3, %v969_v46, 0.0 }
 0x142   :  { %v887_v15 = vsel %vm781_vm3, %v770_v17, 0.0  ;;  %v971_v2 = vmul.f32 %v771_v27, %v771_v27  ;;  %v889_v19 = vsel %vm781_vm3, %v771_v27, 0.0  ;;  %v905_v27 = vsel %vm781_vm3, %v779_v44, 0.0 }
 0x143   :  { %v1069_v4 = vadd.f32 %v1068_v9, %v1067_v34  ;;  %v872_v18 = vadd.f32 %v871_v45, %v870_v57  ;;  %v1086_v57 = vsel %vm781_vm3, %v970_v47, 0.0  ;;  %v972_v9 = vmul.f32 %v772_v1, %v772_v1 }
 0x144   :  { %v774_v45 = vunpack.c.l.bf16 %v1944_v3  ;;  %v907_v63 = vsel %vm781_vm3, %v780_v59, 0.0 }
 0x145   :  { %v1071_v35 = vadd.f32 %v1070_v25, %v1069_v4  ;;  %v874_v24 = vadd.f32 %v873_v16, %v872_v18  ;;  %v1088_v4 = vsel %vm781_vm3, %v971_v2, 0.0  ;;  %v891_v18 = vsel %vm781_vm3, %v772_v1, 0.0 }
 0x146   :  { %v775_v25 = vunpack.c.l.bf16 %v1992_v20  ;;  %v1090_v32 = vsel %vm781_vm3, %v972_v9, 0.0 }
 0x147   :  { %v1073_v39 = vadd.f32 %v1072_v58, %v1071_v35  ;;  %v876_v30 = vadd.f32 %v875_v29, %v874_v24  ;;  %v893_v35 = vsel %vm781_vm3, %v773_v49, 0.0  ;;  %v974_v24 = vmul.f32 %v774_v45, %v774_v45 }
 0x148   :  { %v1092_v58 = vsel %vm781_vm3, %v973_v51, 0.0  ;;  %v895_v29 = vsel %vm781_vm3, %v774_v45, 0.0  ;;  %v897_v62 = vsel %vm781_vm3, %v775_v25, 0.0 }
 0x149   :  { %v878_v14 = vadd.f32 %v877_v5, %v876_v30  ;;  %v1075_v36 = vadd.f32 %v1074_v33, %v1073_v39  ;;  %v975_v39 = vmul.f32 %v775_v25, %v775_v25  ;;  %v777_v30 = vunpack.c.l.bf16 %v2042_v37 }
 0x14a   :  { %v1094_v40 = vsel %vm781_vm3, %v974_v24, 0.0  ;;  %v976_v33 = vmul.f32 %v776_v23, %v776_v23 }
 0x14b   :  { %v880_v60 = vadd.f32 %v879_v43, %v878_v14  ;;  %v1077_v56 = vadd.f32 %v1076_v48, %v1075_v36  ;;  %v778_v14 = vunpack.c.l.bf16 %v2044_v50  ;;  %v1096_v48 = vsel %vm781_vm3, %v975_v39, 0.0 }
 0x14c   :  { %v899_v43 = vsel %vm781_vm3, %v776_v23, 0.0  ;;  %v977_v13 = vmul.f32 %v777_v30, %v777_v30 }
 0x14d   :  { %v882_v21 = vadd.f32 %v881_v53, %v880_v60  ;;  %v1079_v12 = vadd.f32 %v1078_v0, %v1077_v56  ;;  %v1098_v56 = vsel %vm781_vm3, %v976_v33, 0.0  ;;  %v901_v0 = vsel %vm781_vm3, %v777_v30, 0.0 }
 0x14e   :  { %v978_v53 = vmul.f32 %v778_v14, %v778_v14 }
 0x14f   :  { %v884_v26 = vadd.f32 %v883_v61, %v882_v21  ;;  %v1081_v41 = vadd.f32 %v1080_v6, %v1079_v12  ;;  %v1100_v21 = vsel %vm781_vm3, %v977_v13, 0.0  ;;  %v903_v12 = vsel %vm781_vm3, %v778_v14, 0.0 }
 0x150   :  { %v979_v6 = vmul.f32 %v779_v44, %v779_v44  ;;  %v1102_v54 = vsel %vm781_vm3, %v978_v53, 0.0 }
 0x151   :  { %v886_v38 = vadd.f32 %v885_v10, %v884_v26  ;;  %v1083_v42 = vadd.f32 %v1082_v52, %v1081_v41  ;;  %v980_v26 = vmul.f32 %v780_v59, %v780_v59 }
 0x152   :  { %v1104_v10 = vsel %vm781_vm3, %v979_v6, 0.0 }
 0x153   :  { %v888_v34 = vadd.f32 %v887_v15, %v886_v38  ;;  %v1085_v31 = vadd.f32 %v1084_v7, %v1083_v42  ;;  %v1106_v38 = vsel %vm781_vm3, %v980_v26, 0.0 }
 0x155   :  { %v1087_v22 = vadd.f32 %v1086_v57, %v1085_v31  ;;  %v890_v8 = vadd.f32 %v889_v19, %v888_v34 }
 0x157   :  { %v892_v16 = vadd.f32 %v891_v18, %v890_v8  ;;  %v1089_v11 = vadd.f32 %v1088_v4, %v1087_v22 }
 0x159   :  { %v894_v28 = vadd.f32 %v893_v35, %v892_v16  ;;  %v1091_v3 = vadd.f32 %v1090_v32, %v1089_v11 }
 0x15b   :  { %v896_v5 = vadd.f32 %v895_v29, %v894_v28  ;;  %v1093_v20 = vadd.f32 %v1092_v58, %v1091_v3 }
 0x15d   :  { %v898_v36 = vadd.f32 %v897_v62, %v896_v5  ;;  %v1095_v55 = vadd.f32 %v1094_v40, %v1093_v20 }
 0x15f   :  { %v900_v60 = vadd.f32 %v899_v43, %v898_v36  ;;  %v1097_v37 = vadd.f32 %v1096_v48, %v1095_v55 }
 0x161   :  { %v1099_v17 = vadd.f32 %v1098_v56, %v1097_v37  ;;  %v902_v50 = vadd.f32 %v901_v0, %v900_v60 }
 0x163   :  { %v1101_v61 = vadd.f32 %v1100_v21, %v1099_v17  ;;  %v904_v46 = vadd.f32 %v903_v12, %v902_v50 }
 0x165   :  { %v1103_v41 = vadd.f32 %v1102_v54, %v1101_v61  ;;  %v906_v52 = vadd.f32 %v905_v27, %v904_v46 }
 0x167   :  { %v1105_v47 = vadd.f32 %v1104_v10, %v1103_v41  ;;  %v908_v1 = vadd.f32 %v907_v63, %v906_v52 }
 0x169   :  { %v909_v42 = vrot.slane %v908_v1, 4  ;;  %v1107_v7 = vadd.f32 %v1106_v38, %v1105_v47 }
 0x16b   :  { %v910_v15 = vadd.f32 %v909_v42, %v908_v1  ;;  %v1108_v2 = vrot.slane %v1107_v7, 4 }
 0x16d   :  { %v911_v49 = vrot.slane %v910_v15, 2  ;;  %v1109_v34 = vadd.f32 %v1108_v2, %v1107_v7 }
 0x16f   :  { %v912_v31 = vadd.f32 %v911_v49, %v910_v15  ;;  %v1110_v57 = vrot.slane %v1109_v34, 2 }
 0x171   :  { %v913_v19 = vrot.slane %v912_v31, 1  ;;  %v1111_v9 = vadd.f32 %v1110_v57, %v1109_v34 }
 0x173   :  { %v914_v45 = vadd.f32 %v913_v19, %v912_v31  ;;  %v1112_v22 = vrot.slane %v1111_v9, 1 }
 0x175   :  { %916 = vst.msk [vmem:[%s2169_s5] sm:$0x1] %vm915_vm4, %v914_v45  ;;  %v1113_v8 = vadd.f32 %v1112_v22, %v1111_v9 }
 0x177   :  { %1114 = vst.msk [vmem:[%s2170_s6] sm:$0x1] %vm915_vm4, %v1113_v8 }

// kernel: _lambda_.10
= control target key start
LH: loop header
LB: loop body
LE: loop exit
PB: predicated region body
PF: predicated region fallthrough
CT: control target
= control target key end

     0   :  { %vm546_vm0 = vcmask 1041408   ;;  %vm449_vm1 = vcmask 31744   ;;  %vm783_vm2 = vcmask 60416   ;;  %vm912_vm3 = vcmask 64512   ;;  %s2571_s3 = inlined_call_operand.vmem [shape: bf16[4,8], index: 3, kind: input, shape index: {}]   ;;  %s2572_s0 = inlined_call_operand.vmem [shape: bf16[512,4], index: 0, kind: input, shape index: {}]   ;;  %s2573_s1 = inlined_call_operand.vmem [shape: f32[1,4], index: 1, kind: input, shape index: {}]   ;;  %s2574_s2 = inlined_call_operand.vmem [shape: f32[1,4], index: 2, kind: input, shape index: {}]   ;;  %s2575_s4 = inlined_call_operand.vmem [shape: f32[512,8], index: 4, kind: input, shape index: {}]   ;;  %s2576_s5 = inlined_call_operand.vmem [shape: bf16[512,8], index: 5, kind: output, shape index: {0}]   ;;  %s2577_s6 = inlined_call_operand.vmem [shape: f32[1,1,8], index: 6, kind: output, shape index: {1}]   ;;  %s2578_s7 = inlined_call_operand.vmem [shape: f32[1,1,8], index: 7, kind: output, shape index: {2}]  }
   0x1   :  { %v384_v0 = vld [vmem:[%s2571_s3] sm:$0x3]  ;;  %v1418_v10 = vld [vmem:[%s2572_s0 + $0x8] sm:$0xff]   ;;  %v1419_v41 = vld [vmem:[%s2572_s0 + $0x10] sm:$0xff]   ;;  %vm1046_vm4 = vcmask 57344  }
   0x2   :  { %v1291_v1 = vld [vmem:[%s2572_s0] sm:$0xff]   ;;  %v548_v2 = vsel %vm546_vm0, %v384_v0, 0  ;;  %v1296_v17 = vunpack.c.l.bf16 %v1418_v10  ;;  %v1297_v18 = vunpack.c.h.bf16 %v1418_v10  ;;  %v1426_v23 = vld [vmem:[%s2572_s0 + $0x48] sm:$0xff]   ;;  %v1300_v48 = vunpack.c.l.bf16 %v1419_v41  ;;  %v1427_v54 = vld [vmem:[%s2572_s0 + $0x50] sm:$0xff]  }
   0x3   :  { %v1292_v3 = vunpack.c.l.bf16 %v1291_v1  ;;  %v1293_v4 = vunpack.c.h.bf16 %v1291_v1  ;;  %v1503_v5 = vld [vmem:[%s2573_s1] ss:$0 sm:$0xff]  ;;  %557 = vmatpush.bf16.msra.mxu0 %v548_v2  ;;  %1449 = vmatpush.bf16.msra.mxu1 %v548_v2  ;;  %v1328_v27 = vunpack.c.l.bf16 %v1426_v23  ;;  %v1329_v28 = vunpack.c.h.bf16 %v1426_v23 }
   0x4   :  { %v1508_v6 = vld [vmem:[%s2574_s2] ss:$0 sm:$0xff]  ;;  %1450 = vmatpush.bf16.msra.mxu2 %v548_v2  ;;  %1451 = vmatpush.bf16.msra.mxu3 %v548_v2  ;;  %v158_v29 = vmul.f32 %v1503_v5, %v1296_v17  ;;  %v159_v30 = vmul.f32 %v1503_v5, %v1297_v18  ;;  %v1301_v50 = vunpack.c.h.bf16 %v1419_v41  ;;  %v1332_v57 = vunpack.c.l.bf16 %v1427_v54 }
   0x5   :  { %v1425_v7 = vld [vmem:[%s2572_s0 + $0x40] sm:$0xff]   ;;  %v156_v8 = vmul.f32 %v1503_v5, %v1292_v3  ;;  %v157_v9 = vmul.f32 %v1503_v5, %v1293_v4  ;;  %v174_v32 = vmul.f32 %v1503_v5, %v1328_v27  ;;  %v175_v33 = vmul.f32 %v1503_v5, %v1329_v28  ;;  %v1434_v4 = vld [vmem:[%s2572_s0 + $0x88] sm:$0xff]  }
   0x6   :  { %v1324_v11 = vunpack.c.l.bf16 %v1425_v7  ;;  %v1325_v12 = vunpack.c.h.bf16 %v1425_v7  ;;  %v226_v34 = vadd.f32 %v1508_v6, %v158_v29  ;;  %v227_v35 = vadd.f32 %v1508_v6, %v159_v30  ;;  %v1433_v38 = vld [vmem:[%s2572_s0 + $0x80] sm:$0xff]  }
   0x7   :  { %v224_v13 = vadd.f32 %v1508_v6, %v156_v8  ;;  %v225_v14 = vadd.f32 %v1508_v6, %v157_v9  ;;  %v242_v36 = vadd.f32 %v1508_v6, %v174_v32  ;;  %v243_v37 = vadd.f32 %v1508_v6, %v175_v33  ;;  %v1420_v9 = vld [vmem:[%s2572_s0 + $0x18] sm:$0xff]  }
   0x8   :  { %v172_v15 = vmul.f32 %v1503_v5, %v1324_v11  ;;  %v173_v16 = vmul.f32 %v1503_v5, %v1325_v12  ;;  %v290_v39 = vmax.f32 %v226_v34, 0.0  ;;  %v291_v40 = vmax.f32 %v227_v35, 0.0 }
   0x9   :  { %v288_v19 = vmax.f32 %v224_v13, 0.0  ;;  %v289_v20 = vmax.f32 %v225_v14, 0.0  ;;  %v1356_v42 = vunpack.c.l.bf16 %v1433_v38  ;;  %v1357_v43 = vunpack.c.h.bf16 %v1433_v38  ;;  %v1435_v38 = vld [vmem:[%s2572_s0 + $0x90] sm:$0xff]  }
   0xa   :  { %v240_v21 = vadd.f32 %v1508_v6, %v172_v15  ;;  %v241_v22 = vadd.f32 %v1508_v6, %v173_v16  ;;  %v306_v44 = vmax.f32 %v242_v36, 0.0  ;;  %v307_v45 = vmax.f32 %v243_v37, 0.0 }
   0xb   :  { %v352_v24 = vpack.c.bf16 %v289_v20, %v288_v19  ;;  %v188_v46 = vmul.f32 %v1503_v5, %v1356_v42  ;;  %v189_v47 = vmul.f32 %v1503_v5, %v1357_v43  ;;  %v353_v49 = vpack.c.bf16 %v291_v40, %v290_v39  ;;  %v1441_v39 = vld [vmem:[%s2572_s0 + $0xc0] sm:$0xff]  }
   0xc   :  { %v304_v25 = vmax.f32 %v240_v21, 0.0  ;;  %v305_v26 = vmax.f32 %v241_v22, 0.0  ;;  %v361_v53 = vpack.c.bf16 %v307_v45, %v306_v44  ;;  %v1333_v58 = vunpack.c.h.bf16 %v1427_v54  ;;  %v1428_v22 = vld [vmem:[%s2572_s0 + $0x58] sm:$0xff]   ;;  %v1421_v40 = vld [vmem:[%s2572_s0 + $0x20] sm:$0xff]  }
   0xd   :  { %1258 = vmatmul.msk.bf16.vlgmr.msra.gmra.mxu0 %vm449_vm1, %v352_v24  ;;  %v256_v51 = vadd.f32 %v1508_v6, %v188_v46  ;;  %v257_v52 = vadd.f32 %v1508_v6, %v189_v47  ;;  %v160_v59 = vmul.f32 %v1503_v5, %v1300_v48  ;;  %v161_v60 = vmul.f32 %v1503_v5, %v1301_v50 }
   0xe   :  { %v360_v31 = vpack.c.bf16 %v305_v26, %v304_v25  ;;  %v176_v62 = vmul.f32 %v1503_v5, %v1332_v57  ;;  %v177_v63 = vmul.f32 %v1503_v5, %v1333_v58  ;;  %v1360_v10 = vunpack.c.l.bf16 %v1434_v4 }
   0xf   :  { %v320_v55 = vmax.f32 %v256_v51, 0.0  ;;  %v321_v56 = vmax.f32 %v257_v52, 0.0  ;;  %v228_v0 = vadd.f32 %v1508_v6, %v160_v59  ;;  %v229_v1 = vadd.f32 %v1508_v6, %v161_v60  ;;  %v1429_v59 = vld [vmem:[%s2572_s0 + $0x60] sm:$0xff]  }
  0x10   :  { %1266 = vmatmul.msk.bf16.vlgmr.msra.gmra.mxu1 %vm449_vm1, %v360_v31  ;;  %v244_v2 = vadd.f32 %v1508_v6, %v176_v62  ;;  %v245_v3 = vadd.f32 %v1508_v6, %v177_v63  ;;  %v1361_v11 = vunpack.c.h.bf16 %v1434_v4  ;;  %v190_v14 = vmul.f32 %v1503_v5, %v1360_v10 }
  0x11   :  { %v368_v61 = vpack.c.bf16 %v321_v56, %v320_v55  ;;  %v292_v7 = vmax.f32 %v228_v0, 0.0  ;;  %v293_v8 = vmax.f32 %v229_v1, 0.0  ;;  %v1304_v16 = vunpack.c.l.bf16 %v1420_v9 }
  0x12   :  { %v308_v12 = vmax.f32 %v244_v2, 0.0  ;;  %v309_v13 = vmax.f32 %v245_v3, 0.0  ;;  %v191_v15 = vmul.f32 %v1503_v5, %v1361_v11  ;;  %v1305_v17 = vunpack.c.h.bf16 %v1420_v9 }
  0x13   :  { %1274 = vmatmul.msk.bf16.vlgmr.msra.gmra.mxu2 %vm449_vm1, %v368_v61  ;;  %v354_v18 = vpack.c.bf16 %v293_v8, %v292_v7  ;;  %v258_v19 = vadd.f32 %v1508_v6, %v190_v14  ;;  %v1336_v25 = vunpack.c.l.bf16 %v1428_v22  ;;  %v1337_v26 = vunpack.c.h.bf16 %v1428_v22 }
  0x14   :  { %v259_v20 = vadd.f32 %v1508_v6, %v191_v15  ;;  %v362_v21 = vpack.c.bf16 %v309_v13, %v308_v12  ;;  %v162_v27 = vmul.f32 %v1503_v5, %v1304_v16  ;;  %v163_v28 = vmul.f32 %v1503_v5, %v1305_v17  ;;  %v1436_v16 = vld [vmem:[%s2572_s0 + $0x98] sm:$0xff]   ;;  %v1442_v17 = vld [vmem:[%s2572_s0 + $0xc8] sm:$0xff]  }
  0x15   :  { %v322_v23 = vmax.f32 %v258_v19, 0.0  ;;  %v178_v30 = vmul.f32 %v1503_v5, %v1336_v25  ;;  %v179_v31 = vmul.f32 %v1503_v5, %v1337_v26  ;;  %v1364_v41 = vunpack.c.l.bf16 %v1435_v38 }
  0x16   :  { %v323_v24 = vmax.f32 %v259_v20, 0.0  ;;  %v230_v32 = vadd.f32 %v1508_v6, %v162_v27  ;;  %v231_v33 = vadd.f32 %v1508_v6, %v163_v28  ;;  %v1365_v42 = vunpack.c.h.bf16 %v1435_v38 }
  0x17   :  { %v246_v34 = vadd.f32 %v1508_v6, %v178_v30  ;;  %v247_v35 = vadd.f32 %v1508_v6, %v179_v31  ;;  %v1388_v43 = vunpack.c.l.bf16 %v1441_v39  ;;  %v1389_v44 = vunpack.c.h.bf16 %v1441_v39 }
  0x18   :  { %v369_v29 = vpack.c.bf16 %v323_v24, %v322_v23  ;;  %v294_v36 = vmax.f32 %v230_v32, 0.0  ;;  %v295_v37 = vmax.f32 %v231_v33, 0.0  ;;  %v192_v47 = vmul.f32 %v1503_v5, %v1364_v41 }
  0x19   :  { %v310_v45 = vmax.f32 %v246_v34, 0.0  ;;  %v311_v46 = vmax.f32 %v247_v35, 0.0  ;;  %v193_v48 = vmul.f32 %v1503_v5, %v1365_v42  ;;  %v205_v50 = vmul.f32 %v1503_v5, %v1389_v44 }
  0x1a   :  { %v355_v51 = vpack.c.bf16 %v295_v37, %v294_v36  ;;  %v1308_v52 = vunpack.c.l.bf16 %v1421_v40  ;;  %v260_v54 = vadd.f32 %v1508_v6, %v192_v47  ;;  %v1340_v2 = vunpack.c.l.bf16 %v1429_v59  ;;  %v1430_v37 = vld [vmem:[%s2572_s0 + $0x68] sm:$0xff]  }
  0x1b   :  { %v261_v55 = vadd.f32 %v1508_v6, %v193_v48  ;;  %v273_v57 = vadd.f32 %v1508_v6, %v205_v50  ;;  %v363_v58 = vpack.c.bf16 %v311_v46, %v310_v45  ;;  %v1341_v3 = vunpack.c.h.bf16 %v1429_v59 }
  0x1c   :  { %v324_v60 = vmax.f32 %v260_v54, 0.0  ;;  %v164_v0 = vmul.f32 %v1503_v5, %v1308_v52  ;;  %v180_v8 = vmul.f32 %v1503_v5, %v1340_v2  ;;  %v1368_v19 = vunpack.c.l.bf16 %v1436_v16 }
  0x1d   :  { %1259 = vmatmul.msk.bf16.gmra.mxu0 %vm449_vm1, %v353_v49  ;;  %v204_v49 = vmul.f32 %v1503_v5, %v1388_v43  ;;  %v325_v61 = vmax.f32 %v261_v55, 0.0  ;;  %v337_v63 = vmax.f32 %v273_v57, 0.0  ;;  %v181_v9 = vmul.f32 %v1503_v5, %v1341_v3  ;;  %v1443_v57 = vld [vmem:[%s2572_s0 + $0xd0] sm:$0xff]  }
  0x1e   :  { %v232_v10 = vadd.f32 %v1508_v6, %v164_v0  ;;  %v248_v12 = vadd.f32 %v1508_v6, %v180_v8  ;;  %v1369_v20 = vunpack.c.h.bf16 %v1436_v16  ;;  %v1393_v22 = vunpack.c.h.bf16 %v1442_v17 }
  0x1f   :  { %v272_v56 = vadd.f32 %v1508_v6, %v204_v49  ;;  %v370_v4 = vpack.c.bf16 %v325_v61, %v324_v60  ;;  %v249_v13 = vadd.f32 %v1508_v6, %v181_v9  ;;  %v194_v25 = vmul.f32 %v1503_v5, %v1368_v19 }
  0x20   :  { %1267 = vmatmul.msk.bf16.gmra.mxu1 %vm449_vm1, %v361_v53  ;;  %v1309_v53 = vunpack.c.h.bf16 %v1421_v40  ;;  %v296_v14 = vmax.f32 %v232_v10, 0.0  ;;  %v312_v23 = vmax.f32 %v248_v12, 0.0  ;;  %v195_v26 = vmul.f32 %v1503_v5, %v1369_v20 }
  0x21   :  { %v336_v62 = vmax.f32 %v272_v56, 0.0  ;;  %v313_v24 = vmax.f32 %v249_v13, 0.0  ;;  %v207_v28 = vmul.f32 %v1503_v5, %v1393_v22  ;;  %v262_v32 = vadd.f32 %v1508_v6, %v194_v25  ;;  %v1437_v56 = vld [vmem:[%s2572_s0 + $0xa0] sm:$0xff]  }
  0x22   :  { %v165_v1 = vmul.f32 %v1503_v5, %v1309_v53  ;;  %v263_v33 = vadd.f32 %v1508_v6, %v195_v26  ;;  %v1344_v44 = vunpack.c.l.bf16 %v1430_v37  ;;  %v1345_v45 = vunpack.c.h.bf16 %v1430_v37 }
  0x23   :  { %1275 = vmatmul.msk.bf16.gmra.mxu2 %vm449_vm1, %v369_v29  ;;  %v376_v7 = vpack.c.bf16 %v337_v63, %v336_v62  ;;  %v275_v35 = vadd.f32 %v1508_v6, %v207_v28  ;;  %v364_v36 = vpack.c.bf16 %v313_v24, %v312_v23  ;;  %v326_v38 = vmax.f32 %v262_v32, 0.0 }
  0x24   :  { %v233_v11 = vadd.f32 %v1508_v6, %v165_v1  ;;  %v327_v39 = vmax.f32 %v263_v33, 0.0  ;;  %v182_v48 = vmul.f32 %v1503_v5, %v1344_v44  ;;  %v183_v49 = vmul.f32 %v1503_v5, %v1345_v45 }
  0x25   :  { %1282 = vmatmul.msk.bf16.vlgmr.msra.gmra.mxu3 %vm449_vm1, %v376_v7  ;;  %v339_v41 = vmax.f32 %v275_v35, 0.0  ;;  %v1372_v59 = vunpack.c.l.bf16 %v1437_v56  ;;  %v1373_v60 = vunpack.c.h.bf16 %v1437_v56  ;;  %v1396_v61 = vunpack.c.l.bf16 %v1443_v57  ;;  %v1444_v35 = vld [vmem:[%s2572_s0 + $0xd8] sm:$0xff]  }
  0x26   :  { %v297_v15 = vmax.f32 %v233_v11, 0.0  ;;  %v371_v46 = vpack.c.bf16 %v327_v39, %v326_v38  ;;  %v250_v52 = vadd.f32 %v1508_v6, %v182_v48  ;;  %v251_v53 = vadd.f32 %v1508_v6, %v183_v49 }
  0x27   :  { %v1397_v62 = vunpack.c.h.bf16 %v1443_v57  ;;  %v196_v1 = vmul.f32 %v1503_v5, %v1372_v59  ;;  %v197_v2 = vmul.f32 %v1503_v5, %v1373_v60  ;;  %v208_v3 = vmul.f32 %v1503_v5, %v1396_v61 }
  0x28   :  { %v356_v29 = vpack.c.bf16 %v297_v15, %v296_v14  ;;  %v314_v63 = vmax.f32 %v250_v52, 0.0  ;;  %v315_v0 = vmax.f32 %v251_v53, 0.0  ;;  %v1431_v15 = vld [vmem:[%s2572_s0 + $0x70] sm:$0xff]   ;;  %v1400_v39 = vunpack.c.l.bf16 %v1444_v35 }
  0x29   :  { %v264_v10 = vadd.f32 %v1508_v6, %v196_v1  ;;  %v265_v11 = vadd.f32 %v1508_v6, %v197_v2  ;;  %v276_v12 = vadd.f32 %v1508_v6, %v208_v3  ;;  %v1348_v22 = vunpack.c.l.bf16 %v1431_v15 }
  0x2a   :  { %v365_v14 = vpack.c.bf16 %v315_v0, %v314_v63  ;;  %v1349_v23 = vunpack.c.h.bf16 %v1431_v15  ;;  %v210_v45 = vmul.f32 %v1503_v5, %v1400_v39 }
  0x2b   :  { %v328_v16 = vmax.f32 %v264_v10, 0.0  ;;  %v184_v26 = vmul.f32 %v1503_v5, %v1348_v22 }
  0x2c   :  { %v278_v52 = vadd.f32 %v1508_v6, %v210_v45 }
  0x2d   :  { %1260 = vmatmul.msk.bf16.gmra.mxu0 %vm449_vm1, %v354_v18  ;;  %v1422_v18 = vld [vmem:[%s2572_s0 + $0x28] sm:$0xff]  }
  0x2e   :  { %v1312_v30 = vunpack.c.l.bf16 %v1422_v18  ;;  %v1313_v31 = vunpack.c.h.bf16 %v1422_v18  ;;  %v340_v18 = vmax.f32 %v276_v12, 0.0  ;;  %v1439_v12 = vld [vmem:[%s2572_s0 + $0xb0] sm:$0xff]  }
  0x2f   :  { %v1381_v15 = vunpack.c.h.bf16 %v1439_v12 }
  0x30   :  { %1268 = vmatmul.msk.bf16.gmra.mxu1 %vm449_vm1, %v362_v21  ;;  %v1392_v21 = vunpack.c.l.bf16 %v1442_v17  ;;  %v166_v42 = vmul.f32 %v1503_v5, %v1312_v30  ;;  %v167_v43 = vmul.f32 %v1503_v5, %v1313_v31  ;;  %v329_v17 = vmax.f32 %v265_v11, 0.0 }
  0x31   :  { %v252_v30 = vadd.f32 %v1508_v6, %v184_v26 }
  0x32   :  { %v206_v27 = vmul.f32 %v1503_v5, %v1392_v21  ;;  %v234_v50 = vadd.f32 %v1508_v6, %v166_v42  ;;  %v372_v24 = vpack.c.bf16 %v329_v17, %v328_v16 }
  0x33   :  { %1276 = vmatmul.msk.bf16.gmra.mxu2 %vm449_vm1, %v370_v4  ;;  %v209_v4 = vmul.f32 %v1503_v5, %v1397_v62 }
  0x34   :  { %v274_v34 = vadd.f32 %v1508_v6, %v206_v27  ;;  %v298_v54 = vmax.f32 %v234_v50, 0.0  ;;  %v185_v27 = vmul.f32 %v1503_v5, %v1349_v23 }
  0x35   :  { %v277_v13 = vadd.f32 %v1508_v6, %v209_v4 }
  0x36   :  { %v338_v40 = vmax.f32 %v274_v34, 0.0  ;;  %v253_v31 = vadd.f32 %v1508_v6, %v185_v27  ;;  %v1438_v34 = vld [vmem:[%s2572_s0 + $0xa8] sm:$0xff]  }
  0x37   :  { %v341_v19 = vmax.f32 %v277_v13, 0.0  ;;  %v1376_v37 = vunpack.c.l.bf16 %v1438_v34  ;;  %v1377_v38 = vunpack.c.h.bf16 %v1438_v34  ;;  %v1445_v13 = vld [vmem:[%s2572_s0 + $0xe0] sm:$0xff]  }
  0x38   :  { %v377_v47 = vpack.c.bf16 %v339_v41, %v338_v40  ;;  %v1401_v40 = vunpack.c.h.bf16 %v1444_v35  ;;  %v316_v41 = vmax.f32 %v252_v30, 0.0  ;;  %v317_v42 = vmax.f32 %v253_v31, 0.0 }
  0x39   :  { %v378_v25 = vpack.c.bf16 %v341_v19, %v340_v18  ;;  %v199_v44 = vmul.f32 %v1503_v5, %v1377_v38  ;;  %v1404_v16 = vunpack.c.l.bf16 %v1445_v13  ;;  %v1405_v17 = vunpack.c.h.bf16 %v1445_v13 }
  0x3a   :  { %1283 = vmatmul.msk.bf16.gmra.mxu3 %vm449_vm1, %v377_v47 }
  0x3b   :  { %v212_v22 = vmul.f32 %v1503_v5, %v1404_v16  ;;  %v213_v23 = vmul.f32 %v1503_v5, %v1405_v17  ;;  %v387_v17 = vld [vmem:[%s2575_s4 + $0x10] sm:$0xff] }
  0x3d   :  { %1261 = vmatmul.msk.bf16.gmra.mxu0 %vm449_vm1, %v355_v51  ;;  %v235_v51 = vadd.f32 %v1508_v6, %v167_v43  ;;  %v198_v43 = vmul.f32 %v1503_v5, %v1376_v37  ;;  %v280_v27 = vadd.f32 %v1508_v6, %v212_v22  ;;  %v1446_v37 = vld [vmem:[%s2572_s0 + $0xe8] sm:$0xff]  }
  0x3f   :  { %v299_v55 = vmax.f32 %v235_v51, 0.0  ;;  %v266_v50 = vadd.f32 %v1508_v6, %v198_v43  ;;  %v267_v51 = vadd.f32 %v1508_v6, %v199_v44 }
  0x40   :  { %1269 = vmatmul.msk.bf16.gmra.mxu1 %vm449_vm1, %v363_v58  ;;  %v1423_v58 = vld [vmem:[%s2572_s0 + $0x30] sm:$0xff]  }
  0x41   :  { %v357_v7 = vpack.c.bf16 %v299_v55, %v298_v54  ;;  %v1316_v8 = vunpack.c.l.bf16 %v1423_v58  ;;  %v1317_v9 = vunpack.c.h.bf16 %v1423_v58  ;;  %v366_v54 = vpack.c.bf16 %v317_v42, %v316_v41  ;;  %v1432_v55 = vld [vmem:[%s2572_s0 + $0x78] sm:$0xff]  }
  0x42   :  { %v330_v56 = vmax.f32 %v266_v50, 0.0  ;;  %v331_v57 = vmax.f32 %v267_v51, 0.0  ;;  %v342_v58 = vmax.f32 %v278_v52, 0.0  ;;  %v1352_v62 = vunpack.c.l.bf16 %v1432_v55  ;;  %v401_v52 = vld [vmem:[%s2575_s4 + $0x80] sm:$0xff] }
  0x43   :  { %1277 = vmatmul.msk.bf16.gmra.mxu2 %vm449_vm1, %v371_v46  ;;  %v168_v20 = vmul.f32 %v1503_v5, %v1316_v8  ;;  %v169_v21 = vmul.f32 %v1503_v5, %v1317_v9  ;;  %v211_v46 = vmul.f32 %v1503_v5, %v1401_v40  ;;  %v1353_v63 = vunpack.c.h.bf16 %v1432_v55 }
  0x44   :  { %v373_v0 = vpack.c.bf16 %v331_v57, %v330_v56  ;;  %v186_v2 = vmul.f32 %v1503_v5, %v1352_v62  ;;  %v1408_v40 = vunpack.c.l.bf16 %v1446_v37  ;;  %v1409_v41 = vunpack.c.h.bf16 %v1446_v37 }
  0x45   :  { %v236_v28 = vadd.f32 %v1508_v6, %v168_v20  ;;  %v279_v53 = vadd.f32 %v1508_v6, %v211_v46  ;;  %v187_v3 = vmul.f32 %v1503_v5, %v1353_v63  ;;  %v385_v46 = vld [vmem:[%s2575_s4] sm:$0xff] }
  0x46   :  { %v254_v8 = vadd.f32 %v1508_v6, %v186_v2  ;;  %v214_v44 = vmul.f32 %v1503_v5, %v1408_v40  ;;  %v215_v45 = vmul.f32 %v1503_v5, %v1409_v41  ;;  %v402_v2 = vld [vmem:[%s2575_s4 + $0x88] sm:$0xff] }
  0x47   :  { %v300_v32 = vmax.f32 %v236_v28, 0.0  ;;  %v343_v59 = vmax.f32 %v279_v53, 0.0  ;;  %v255_v9 = vadd.f32 %v1508_v6, %v187_v3  ;;  %v281_v28 = vadd.f32 %v1508_v6, %v213_v23 }
  0x48   :  { %v318_v18 = vmax.f32 %v254_v8, 0.0  ;;  %v283_v50 = vadd.f32 %v1508_v6, %v215_v45  ;;  %v1447_v8 = vld [vmem:[%s2572_s0 + $0xf0] sm:$0xff]  }
  0x49   :  { %v379_v1 = vpack.c.bf16 %v343_v59, %v342_v58  ;;  %v319_v19 = vmax.f32 %v255_v9, 0.0 }
  0x4a   :  { %1284 = vmatmul.msk.bf16.gmra.mxu3 %vm449_vm1, %v378_v25  ;;  %v347_v58 = vmax.f32 %v283_v50, 0.0  ;;  %v1448_v50 = vld [vmem:[%s2572_s0 + $0xf8] sm:$0xff]  }
  0x4d   :  { %1262 = vmatmul.msk.bf16.gmra.mxu0 %vm449_vm1, %v356_v29  ;;  %v237_v29 = vadd.f32 %v1508_v6, %v169_v21  ;;  %v201_v21 = vmul.f32 %v1503_v5, %v1381_v15 }
  0x4f   :  { %v301_v33 = vmax.f32 %v237_v29, 0.0  ;;  %v269_v26 = vadd.f32 %v1508_v6, %v201_v21  ;;  %v367_v29 = vpack.c.bf16 %v319_v19, %v318_v18 }
  0x50   :  { %1270 = vmatmul.msk.bf16.gmra.mxu1 %vm449_vm1, %v364_v36  ;;  %v1424_v36 = vld [vmem:[%s2572_s0 + $0x38] sm:$0xff]  }
  0x51   :  { %v358_v47 = vpack.c.bf16 %v301_v33, %v300_v32  ;;  %v1320_v48 = vunpack.c.l.bf16 %v1424_v36  ;;  %v1321_v49 = vunpack.c.h.bf16 %v1424_v36  ;;  %v333_v31 = vmax.f32 %v269_v26, 0.0  ;;  %v1440_v36 = vld [vmem:[%s2572_s0 + $0xb8] sm:$0xff]  }
  0x52   :  { %v344_v32 = vmax.f32 %v280_v27, 0.0  ;;  %v345_v33 = vmax.f32 %v281_v28, 0.0  ;;  %v1384_v38 = vunpack.c.l.bf16 %v1440_v36  ;;  %v1385_v39 = vunpack.c.h.bf16 %v1440_v36 }
  0x53   :  { %1278 = vmatmul.msk.bf16.gmra.mxu2 %vm449_vm1, %v372_v24  ;;  %v170_v60 = vmul.f32 %v1503_v5, %v1320_v48  ;;  %v171_v61 = vmul.f32 %v1503_v5, %v1321_v49  ;;  %v282_v49 = vadd.f32 %v1508_v6, %v214_v44  ;;  %v404_v44 = vld [vmem:[%s2575_s4 + $0x98] sm:$0xff] }
  0x54   :  { %v380_v35 = vpack.c.bf16 %v345_v33, %v344_v32  ;;  %v202_v42 = vmul.f32 %v1503_v5, %v1384_v38  ;;  %v203_v43 = vmul.f32 %v1503_v5, %v1385_v39  ;;  %v388_v39 = vld [vmem:[%s2575_s4 + $0x18] sm:$0xff] }
  0x55   :  { %v238_v4 = vadd.f32 %v1508_v6, %v170_v60  ;;  %v346_v56 = vmax.f32 %v282_v49, 0.0 }
  0x56   :  { %v271_v48 = vadd.f32 %v1508_v6, %v203_v43 }
  0x57   :  { %v302_v10 = vmax.f32 %v238_v4, 0.0  ;;  %v381_v62 = vpack.c.bf16 %v347_v58, %v346_v56  ;;  %v389_v58 = vld [vmem:[%s2575_s4 + $0x20] sm:$0xff] }
  0x58   :  { %v335_v55 = vmax.f32 %v271_v48, 0.0 }
  0x5a   :  { %1285 = vmatmul.msk.bf16.gmra.mxu3 %vm449_vm1, %v379_v1 }
  0x5d   :  { %1263 = vmatmul.msk.bf16.gmra.mxu0 %vm449_vm1, %v357_v7  ;;  %v239_v7 = vadd.f32 %v1508_v6, %v171_v61 }
  0x5f   :  { %v303_v11 = vmax.f32 %v239_v7, 0.0 }
  0x60   :  { %1271 = vmatmul.msk.bf16.gmra.mxu1 %vm449_vm1, %v365_v14  ;;  %v1380_v14 = vunpack.c.l.bf16 %v1439_v12  ;;  %v1413_v12 = vunpack.c.h.bf16 %v1447_v8 }
  0x61   :  { %v359_v24 = vpack.c.bf16 %v303_v11, %v302_v10  ;;  %v1412_v11 = vunpack.c.l.bf16 %v1447_v8 }
  0x62   :  { %v200_v20 = vmul.f32 %v1503_v5, %v1380_v14  ;;  %v217_v18 = vmul.f32 %v1503_v5, %v1413_v12 }
  0x63   :  { %1279 = vmatmul.msk.bf16.gmra.mxu2 %vm449_vm1, %v373_v0  ;;  %v386_v0 = vld [vmem:[%s2575_s4 + $0x8] sm:$0xff]  ;;  %v216_v16 = vmul.f32 %v1503_v5, %v1412_v11 }
  0x64   :  { %v268_v25 = vadd.f32 %v1508_v6, %v200_v20  ;;  %v285_v26 = vadd.f32 %v1508_v6, %v217_v18 }
  0x65   :  { %v284_v22 = vadd.f32 %v1508_v6, %v216_v16 }
  0x66   :  { %v332_v30 = vmax.f32 %v268_v25, 0.0  ;;  %v403_v25 = vld [vmem:[%s2575_s4 + $0x90] sm:$0xff]  ;;  %v349_v33 = vmax.f32 %v285_v26, 0.0 }
  0x67   :  { %v348_v32 = vmax.f32 %v284_v22, 0.0 }
  0x68   :  { %v374_v34 = vpack.c.bf16 %v333_v31, %v332_v30 }
  0x69   :  { %v382_v36 = vpack.c.bf16 %v349_v33, %v348_v32 }
  0x6a   :  { %1286 = vmatmul.msk.bf16.gmra.mxu3 %vm449_vm1, %v380_v35 }
  0x6d   :  { %1264 = vmatmul.msk.bf16.gmra.mxu0 %vm449_vm1, %v358_v47  ;;  %v270_v47 = vadd.f32 %v1508_v6, %v202_v42 }
  0x70   :  { %1272 = vmatmul.msk.bf16.gmra.mxu1 %vm449_vm1, %v366_v54  ;;  %v334_v54 = vmax.f32 %v270_v47, 0.0 }
  0x72   :  { %v375_v61 = vpack.c.bf16 %v335_v55, %v334_v54  ;;  %v1417_v54 = vunpack.c.h.bf16 %v1448_v50 }
  0x73   :  { %1280 = vmatmul.msk.bf16.gmra.mxu2 %vm449_vm1, %v374_v34 }
  0x7a   :  { %1287 = vmatmul.msk.bf16.gmra.mxu3 %vm449_vm1, %v381_v62 }
  0x7d   :  { %1265 = vmatmul.msk.bf16.gmra.mxu0 %vm449_vm1, %v359_v24 }
  0x80   :  { %1273 = vmatmul.msk.bf16.gmra.mxu1 %vm449_vm1, %v367_v29 }
  0x83   :  { %1281 = vmatmul.msk.bf16.gmra.mxu2 %vm449_vm1, %v375_v61 }
  0x8a   :  { %v559_v51 = vpop.f32.mrf.mxu0  ;;  %1288 = vmatmul.msk.bf16.gmra.mxu3 %vm449_vm1, %v382_v36 }
  0x8b   :  { %v560_v53 = vadd.f32 %v559_v51, %v385_v46 }
  0x8d   :  { %v599_v57 = vpop.f32.mrf.mxu1  ;;  %v719_v59 = vpack.c.bf16 %v560_v53, %v560_v53  ;;  %v1416_v53 = vunpack.c.l.bf16 %v1448_v50 }
  0x8e   :  { %v600_v60 = vadd.f32 %v599_v57, %v401_v52 }
  0x8f   :  { %784 = vst.msk [vmem:[%s2576_s5] sm:$0xf] %vm783_vm2, %v719_v59  ;;  %v848_v3 = vunpack.c.l.bf16 %v719_v59  ;;  %v218_v57 = vmul.f32 %v1503_v5, %v1416_v53  ;;  %v219_v59 = vmul.f32 %v1503_v5, %v1417_v54  ;;  %v417_v5 = vld [vmem:[%s2575_s4 + $0x100] sm:$0xff]  ;;  %v392_v53 = vld [vmem:[%s2575_s4 + $0x38] sm:$0xff] }
  0x90   :  { %v1755_v63 = vpack.c.bf16 %v600_v60, %v600_v60 }
  0x91   :  { %v1048_v13 = vmul.f32 %v848_v3, %v848_v3  ;;  %v913_v19 = vsel %vm912_vm3, %v848_v3, 0.0  ;;  %v286_v62 = vadd.f32 %v1508_v6, %v218_v57 }
  0x92   :  { %800 = vst.msk [vmem:[%s2576_s5 + $0x40] sm:$0xf] %vm783_vm2, %v1755_v63  ;;  %v561_v1 = vpop.f32.mrf.mxu0 }
  0x93   :  { %v562_v4 = vadd.f32 %v561_v1, %v386_v0  ;;  %v1112_v27 = vsel %vm912_vm3, %v1048_v13, 0.0 }
  0x95   :  { %v601_v7 = vpop.f32.mrf.mxu1  ;;  %v720_v9 = vpack.c.bf16 %v562_v4, %v562_v4  ;;  %v287_v4 = vadd.f32 %v1508_v6, %v219_v59 }
  0x96   :  { %v602_v10 = vadd.f32 %v601_v7, %v402_v2  ;;  %v639_v45 = vpop.f32.mrf.mxu2  ;;  %v405_v2 = vld [vmem:[%s2575_s4 + $0xa0] sm:$0xff] }
  0x97   :  { %785 = vst.msk [vmem:[%s2576_s5 + $0x4] sm:$0xf] %vm783_vm2, %v720_v9  ;;  %v849_v14 = vunpack.c.l.bf16 %v720_v9  ;;  %v418_v9 = vld [vmem:[%s2575_s4 + $0x108] sm:$0xff]  ;;  %v640_v12 = vadd.f32 %v639_v45, %v417_v5  ;;  %v351_v18 = vmax.f32 %v287_v4, 0.0  ;;  %v409_v5 = vld [vmem:[%s2575_s4 + $0xc0] sm:$0xff] }
  0x98   :  { %v1777_v15 = vpack.c.bf16 %v602_v10, %v602_v10  ;;  %v433_v4 = vld [vmem:[%s2575_s4 + $0x180] sm:$0xff] }
  0x99   :  { %v914_v20 = vsel %vm912_vm3, %v849_v14, 0.0  ;;  %v1049_v21 = vmul.f32 %v849_v14, %v849_v14  ;;  %v350_v14 = vmax.f32 %v286_v62, 0.0 }
  0x9a   :  { %801 = vst.msk [vmem:[%s2576_s5 + $0x44] sm:$0xf] %vm783_vm2, %v1777_v15  ;;  %v915_v23 = vadd.f32 %v914_v20, %v913_v19  ;;  %v564_v24 = vpop.f32.mrf.mxu0  ;;  %v1850_v19 = vpack.c.bf16 %v640_v12, %v640_v12 }
  0x9b   :  { %v1113_v28 = vsel %vm912_vm3, %v1049_v21, 0.0  ;;  %v565_v29 = vadd.f32 %v564_v24, %v387_v17  ;;  %v383_v22 = vpack.c.bf16 %v351_v18, %v350_v14 }
  0x9c   :  { %v1114_v30 = vadd.f32 %v1113_v28, %v1112_v27  ;;  %816 = vst.msk [vmem:[%s2576_s5 + $0x80] sm:$0xf] %vm783_vm2, %v1850_v19  ;;  %v406_v28 = vld [vmem:[%s2575_s4 + $0xa8] sm:$0xff] }
  0x9d   :  { %v604_v31 = vpop.f32.mrf.mxu1  ;;  %v721_v34 = vpack.c.bf16 %v565_v29, %v565_v29  ;;  %1289 = vmatmul.msk.bf16.gmra.mxu3 %vm449_vm1, %v383_v22 }
  0x9e   :  { %v605_v35 = vadd.f32 %v604_v31, %v403_v25  ;;  %v641_v3 = vpop.f32.mrf.mxu2 }
  0x9f   :  { %786 = vst.msk [vmem:[%s2576_s5 + $0x8] sm:$0xf] %vm783_vm2, %v721_v34  ;;  %v850_v37 = vunpack.c.l.bf16 %v721_v34  ;;  %v642_v13 = vadd.f32 %v641_v3, %v418_v9  ;;  %v421_v3 = vld [vmem:[%s2575_s4 + $0x120] sm:$0xff]  ;;  %v422_v9 = vld [vmem:[%s2575_s4 + $0x128] sm:$0xff] }
  0xa0   :  { %v1802_v38 = vpack.c.bf16 %v605_v35, %v605_v35 }
  0xa1   :  { %v916_v40 = vsel %vm912_vm3, %v850_v37, 0.0  ;;  %v1050_v41 = vmul.f32 %v850_v37, %v850_v37  ;;  %v1852_v20 = vpack.c.bf16 %v642_v13, %v642_v13  ;;  %v391_v37 = vld [vmem:[%s2575_s4 + $0x30] sm:$0xff] }
  0xa2   :  { %802 = vst.msk [vmem:[%s2576_s5 + $0x48] sm:$0xf] %vm783_vm2, %v1802_v38  ;;  %v917_v42 = vadd.f32 %v916_v40, %v915_v23  ;;  %v566_v43 = vpop.f32.mrf.mxu0  ;;  %v390_v23 = vld [vmem:[%s2575_s4 + $0x28] sm:$0xff]  ;;  %v407_v40 = vld [vmem:[%s2575_s4 + $0xb0] sm:$0xff] }
  0xa3   :  { %v1115_v46 = vsel %vm912_vm3, %v1050_v41, 0.0  ;;  %v567_v47 = vadd.f32 %v566_v43, %v388_v39  ;;  %817 = vst.msk [vmem:[%s2576_s5 + $0x84] sm:$0xf] %vm783_vm2, %v1852_v20  ;;  %v419_v41 = vld [vmem:[%s2575_s4 + $0x110] sm:$0xff] }
  0xa4   :  { %v1116_v48 = vadd.f32 %v1115_v46, %v1114_v30 }
  0xa5   :  { %v606_v49 = vpop.f32.mrf.mxu1  ;;  %v722_v51 = vpack.c.bf16 %v567_v47, %v567_v47 }
  0xa6   :  { %v607_v52 = vadd.f32 %v606_v49, %v404_v44  ;;  %v644_v29 = vpop.f32.mrf.mxu2  ;;  %v420_v44 = vld [vmem:[%s2575_s4 + $0x118] sm:$0xff] }
  0xa7   :  { %787 = vst.msk [vmem:[%s2576_s5 + $0xc] sm:$0xf] %vm783_vm2, %v722_v51  ;;  %v851_v55 = vunpack.c.l.bf16 %v722_v51  ;;  %v645_v46 = vadd.f32 %v644_v29, %v419_v41 }
  0xa8   :  { %v1825_v56 = vpack.c.bf16 %v607_v52, %v607_v52  ;;  %v679_v59 = vpop.f32.mrf.mxu3 }
  0xa9   :  { %v918_v60 = vsel %vm912_vm3, %v851_v55, 0.0  ;;  %v1051_v61 = vmul.f32 %v851_v55, %v851_v55  ;;  %v1916_v50 = vpack.c.bf16 %v645_v46, %v645_v46  ;;  %v408_v55 = vld [vmem:[%s2575_s4 + $0xb8] sm:$0xff]  ;;  %v680_v13 = vadd.f32 %v679_v59, %v433_v4  ;;  %v435_v46 = vld [vmem:[%s2575_s4 + $0x190] sm:$0xff] }
  0xaa   :  { %803 = vst.msk [vmem:[%s2576_s5 + $0x4c] sm:$0xf] %vm783_vm2, %v1825_v56  ;;  %v919_v0 = vadd.f32 %v918_v60, %v917_v42  ;;  %v569_v1 = vpop.f32.mrf.mxu0 }
  0xab   :  { %v1117_v7 = vsel %vm912_vm3, %v1051_v61, 0.0  ;;  %v570_v8 = vadd.f32 %v569_v1, %v389_v58  ;;  %818 = vst.msk [vmem:[%s2576_s5 + $0x88] sm:$0xf] %vm783_vm2, %v1916_v50  ;;  %v393_v1 = vld [vmem:[%s2575_s4 + $0x40] sm:$0xff] }
  0xac   :  { %v1118_v10 = vadd.f32 %v1117_v7, %v1116_v48 }
  0xad   :  { %v609_v11 = vpop.f32.mrf.mxu1  ;;  %v723_v16 = vpack.c.bf16 %v570_v8, %v570_v8 }
  0xae   :  { %v610_v17 = vadd.f32 %v609_v11, %v405_v2  ;;  %v646_v42 = vpop.f32.mrf.mxu2 }
  0xaf   :  { %788 = vst.msk [vmem:[%s2576_s5 + $0x10] sm:$0xf] %vm783_vm2, %v723_v16  ;;  %v852_v6 = vunpack.c.l.bf16 %v723_v16  ;;  %v647_v47 = vadd.f32 %v646_v42, %v420_v44  ;;  %v434_v16 = vld [vmem:[%s2575_s4 + $0x188] sm:$0xff]  ;;  %v395_v42 = vld [vmem:[%s2575_s4 + $0x50] sm:$0xff] }
  0xb0   :  { %v1858_v21 = vpack.c.bf16 %v610_v17, %v610_v17  ;;  %v411_v44 = vld [vmem:[%s2575_s4 + $0xd0] sm:$0xff] }
  0xb1   :  { %v920_v24 = vsel %vm912_vm3, %v852_v6, 0.0  ;;  %v1052_v25 = vmul.f32 %v852_v6, %v852_v6  ;;  %v1918_v51 = vpack.c.bf16 %v647_v47, %v647_v47 }
  0xb2   :  { %804 = vst.msk [vmem:[%s2576_s5 + $0x50] sm:$0xf] %vm783_vm2, %v1858_v21  ;;  %v1875_v26 = vadd.f32 %v920_v24, %v919_v0  ;;  %v571_v27 = vpop.f32.mrf.mxu0 }
  0xb3   :  { %v1119_v30 = vsel %vm912_vm3, %v1052_v25, 0.0  ;;  %v572_v31 = vadd.f32 %v571_v27, %v390_v23  ;;  %819 = vst.msk [vmem:[%s2576_s5 + $0x8c] sm:$0xf] %vm783_vm2, %v1918_v51  ;;  %v1984_v23 = vpack.c.bf16 %v680_v13, %v680_v13  ;;  %v394_v27 = vld [vmem:[%s2575_s4 + $0x48] sm:$0xff] }
  0xb4   :  { %v1886_v32 = vadd.f32 %v1119_v30, %v1118_v10  ;;  %v681_v10 = vpop.f32.mrf.mxu3  ;;  %v410_v30 = vld [vmem:[%s2575_s4 + $0xc8] sm:$0xff] }
  0xb5   :  { %v611_v33 = vpop.f32.mrf.mxu1  ;;  %v1888_v34 = vpack.c.bf16 %v572_v31, %v572_v31  ;;  %v682_v6 = vadd.f32 %v681_v10, %v434_v16  ;;  %832 = vst.msk [vmem:[%s2576_s5 + $0xc0] sm:$0xf] %vm783_vm2, %v1984_v23 }
  0xb6   :  { %v612_v35 = vadd.f32 %v611_v33, %v406_v28  ;;  %v649_v57 = vpop.f32.mrf.mxu2 }
  0xb7   :  { %789 = vst.msk [vmem:[%s2576_s5 + $0x14] sm:$0xf] %vm783_vm2, %v1888_v34  ;;  %v650_v12 = vadd.f32 %v649_v57, %v421_v3  ;;  %v2003_v28 = vpack.c.bf16 %v682_v6, %v682_v6 }
  0xb8   :  { %v1895_v36 = vpack.c.bf16 %v612_v35, %v612_v35 }
  0xb9   :  { %v1982_v22 = vpack.c.bf16 %v650_v12, %v650_v12  ;;  %833 = vst.msk [vmem:[%s2576_s5 + $0xc4] sm:$0xf] %vm783_vm2, %v2003_v28 }
  0xba   :  { %805 = vst.msk [vmem:[%s2576_s5 + $0x54] sm:$0xf] %vm783_vm2, %v1895_v36  ;;  %v574_v39 = vpop.f32.mrf.mxu0 }
  0xbb   :  { %v575_v43 = vadd.f32 %v574_v39, %v391_v37  ;;  %820 = vst.msk [vmem:[%s2576_s5 + $0x90] sm:$0xf] %vm783_vm2, %v1982_v22 }
  0xbd   :  { %v614_v45 = vpop.f32.mrf.mxu1  ;;  %v1914_v48 = vpack.c.bf16 %v575_v43, %v575_v43  ;;  %v684_v35 = vpop.f32.mrf.mxu3 }
  0xbe   :  { %v615_v49 = vadd.f32 %v614_v45, %v407_v40  ;;  %v651_v7 = vpop.f32.mrf.mxu2  ;;  %v423_v45 = vld [vmem:[%s2575_s4 + $0x130] sm:$0xff] }
  0xbf   :  { %790 = vst.msk [vmem:[%s2576_s5 + $0x18] sm:$0xf] %vm783_vm2, %v1914_v48  ;;  %v652_v14 = vadd.f32 %v651_v7, %v422_v9 }
  0xc0   :  { %v1925_v52 = vpack.c.bf16 %v615_v49, %v615_v49 }
  0xc1   :  { %v1993_v25 = vpack.c.bf16 %v652_v14, %v652_v14 }
  0xc2   :  { %806 = vst.msk [vmem:[%s2576_s5 + $0x58] sm:$0xf] %vm783_vm2, %v1925_v52  ;;  %v576_v54 = vpop.f32.mrf.mxu0 }
  0xc3   :  { %v577_v58 = vadd.f32 %v576_v54, %v392_v53  ;;  %821 = vst.msk [vmem:[%s2576_s5 + $0x94] sm:$0xf] %vm783_vm2, %v1993_v25  ;;  %v424_v53 = vld [vmem:[%s2575_s4 + $0x138] sm:$0xff] }
  0xc5   :  { %v616_v60 = vpop.f32.mrf.mxu1  ;;  %v1948_v61 = vpack.c.bf16 %v577_v58, %v577_v58  ;;  %v686_v54 = vpop.f32.mrf.mxu3  ;;  %v685_v58 = vadd.f32 %v684_v35, %v435_v46  ;;  %v413_v35 = vld [vmem:[%s2575_s4 + $0xe0] sm:$0xff] }
  0xc6   :  { %v617_v62 = vadd.f32 %v616_v60, %v408_v55  ;;  %v654_v31 = vpop.f32.mrf.mxu2  ;;  %v436_v60 = vld [vmem:[%s2575_s4 + $0x198] sm:$0xff] }
  0xc7   :  { %791 = vst.msk [vmem:[%s2576_s5 + $0x1c] sm:$0xf] %vm783_vm2, %v1948_v61  ;;  %v655_v57 = vadd.f32 %v654_v31, %v423_v45  ;;  %v2064_v3 = vpack.c.bf16 %v685_v58, %v685_v58  ;;  %v854_v31 = vunpack.c.l.bf16 %v1914_v48  ;;  %v438_v48 = vld [vmem:[%s2575_s4 + $0x1a8] sm:$0xff] }
  0xc8   :  { %v1955_v0 = vpack.c.bf16 %v617_v62, %v617_v62 }
  0xc9   :  { %834 = vst.msk [vmem:[%s2576_s5 + $0xc8] sm:$0xf] %vm783_vm2, %v2064_v3 }
  0xca   :  { %807 = vst.msk [vmem:[%s2576_s5 + $0x5c] sm:$0xf] %vm783_vm2, %v1955_v0  ;;  %v579_v2 = vpop.f32.mrf.mxu0 }
  0xcb   :  { %v580_v8 = vadd.f32 %v579_v2, %v393_v1  ;;  %v687_v2 = vadd.f32 %v686_v54, %v436_v60  ;;  %v855_v54 = vunpack.c.l.bf16 %v1948_v61 }
  0xcd   :  { %v619_v11 = vpop.f32.mrf.mxu1  ;;  %v1980_v17 = vpack.c.bf16 %v580_v8, %v580_v8  ;;  %v396_v8 = vld [vmem:[%s2575_s4 + $0x58] sm:$0xff]  ;;  %v2083_v9 = vpack.c.bf16 %v687_v2, %v687_v2  ;;  %v689_v14 = vpop.f32.mrf.mxu3 }
  0xce   :  { %v620_v18 = vadd.f32 %v619_v11, %v409_v5  ;;  %v656_v47 = vpop.f32.mrf.mxu2  ;;  %v2062_v5 = vpack.c.bf16 %v655_v57, %v655_v57  ;;  %v412_v11 = vld [vmem:[%s2575_s4 + $0xd8] sm:$0xff] }
  0xcf   :  { %792 = vst.msk [vmem:[%s2576_s5 + $0x20] sm:$0xf] %vm783_vm2, %v1980_v17  ;;  %v657_v59 = vadd.f32 %v656_v47, %v424_v53 }
  0xd0   :  { %v1991_v24 = vpack.c.bf16 %v620_v18, %v620_v18  ;;  %822 = vst.msk [vmem:[%s2576_s5 + $0x98] sm:$0xf] %vm783_vm2, %v2062_v5 }
  0xd1   :  { %v2073_v7 = vpack.c.bf16 %v657_v59, %v657_v59  ;;  %835 = vst.msk [vmem:[%s2576_s5 + $0xcc] sm:$0xf] %vm783_vm2, %v2083_v9  ;;  %v1054_v59 = vmul.f32 %v854_v31, %v854_v31 }
  0xd2   :  { %808 = vst.msk [vmem:[%s2576_s5 + $0x60] sm:$0xf] %vm783_vm2, %v1991_v24  ;;  %v581_v29 = vpop.f32.mrf.mxu0 }
  0xd3   :  { %v582_v33 = vadd.f32 %v581_v29, %v394_v27  ;;  %823 = vst.msk [vmem:[%s2576_s5 + $0x9c] sm:$0xf] %vm783_vm2, %v2073_v7  ;;  %v853_v29 = vunpack.c.l.bf16 %v1888_v34  ;;  %v425_v34 = vld [vmem:[%s2575_s4 + $0x140] sm:$0xff] }
  0xd5   :  { %v621_v37 = vpop.f32.mrf.mxu1  ;;  %v2028_v39 = vpack.c.bf16 %v582_v33, %v582_v33  ;;  %v1053_v45 = vmul.f32 %v853_v29, %v853_v29  ;;  %v922_v2 = vsel %vm912_vm3, %v853_v29, 0.0 }
  0xd6   :  { %v622_v40 = vadd.f32 %v621_v37, %v410_v30  ;;  %v659_v12 = vpop.f32.mrf.mxu2  ;;  %v397_v30 = vld [vmem:[%s2575_s4 + $0x60] sm:$0xff] }
  0xd7   :  { %793 = vst.msk [vmem:[%s2576_s5 + $0x24] sm:$0xf] %vm783_vm2, %v2028_v39  ;;  %v437_v37 = vld [vmem:[%s2575_s4 + $0x1a0] sm:$0xff]  ;;  %v660_v47 = vadd.f32 %v659_v12, %v425_v34  ;;  %v1121_v12 = vsel %vm912_vm3, %v1053_v45, 0.0  ;;  %v857_v34 = vunpack.c.l.bf16 %v2028_v39 }
  0xd8   :  { %v2035_v41 = vpack.c.bf16 %v622_v40, %v622_v40 }
  0xd9   :  { %v2143_v60 = vpack.c.bf16 %v660_v47, %v660_v47 }
  0xda   :  { %809 = vst.msk [vmem:[%s2576_s5 + $0x64] sm:$0xf] %vm783_vm2, %v2035_v41  ;;  %v584_v43 = vpop.f32.mrf.mxu0 }
  0xdb   :  { %v585_v49 = vadd.f32 %v584_v43, %v395_v42  ;;  %v426_v43 = vld [vmem:[%s2575_s4 + $0x148] sm:$0xff]  ;;  %824 = vst.msk [vmem:[%s2576_s5 + $0xa0] sm:$0xf] %vm783_vm2, %v2143_v60 }
  0xdd   :  { %v624_v55 = vpop.f32.mrf.mxu1  ;;  %v2060_v62 = vpack.c.bf16 %v585_v49, %v585_v49  ;;  %v690_v49 = vadd.f32 %v689_v14, %v437_v37  ;;  %v1055_v14 = vmul.f32 %v855_v54, %v855_v54 }
  0xde   :  { %v625_v1 = vadd.f32 %v624_v55, %v411_v44  ;;  %v661_v40 = vpop.f32.mrf.mxu2  ;;  %v691_v44 = vpop.f32.mrf.mxu3 }
  0xdf   :  { %794 = vst.msk [vmem:[%s2576_s5 + $0x28] sm:$0xf] %vm783_vm2, %v2060_v62  ;;  %v662_v53 = vadd.f32 %v661_v40, %v426_v43  ;;  %v692_v58 = vadd.f32 %v691_v44, %v438_v48  ;;  %v1122_v40 = vadd.f32 %v1121_v12, %v1886_v32  ;;  %v1125_v39 = vsel %vm912_vm3, %v1055_v14, 0.0  ;;  %v415_v14 = vld [vmem:[%s2575_s4 + $0xf0] sm:$0xff] }
  0xe0   :  { %v2071_v4 = vpack.c.bf16 %v625_v1, %v625_v1  ;;  %v2145_v1 = vpack.c.bf16 %v690_v49, %v690_v49  ;;  %v858_v49 = vunpack.c.l.bf16 %v2060_v62  ;;  %v399_v62 = vld [vmem:[%s2575_s4 + $0x70] sm:$0xff] }
  0xe1   :  { %v2155_v61 = vpack.c.bf16 %v662_v53, %v662_v53  ;;  %v930_v53 = vsel %vm912_vm3, %v857_v34, 0.0 }
  0xe2   :  { %810 = vst.msk [vmem:[%s2576_s5 + $0x68] sm:$0xf] %vm783_vm2, %v2071_v4  ;;  %v586_v10 = vpop.f32.mrf.mxu0  ;;  %v1058_v12 = vmul.f32 %v858_v49, %v858_v49 }
  0xe3   :  { %v587_v13 = vadd.f32 %v586_v10, %v396_v8  ;;  %v856_v8 = vunpack.c.l.bf16 %v1980_v17  ;;  %v2165_v17 = vpack.c.bf16 %v692_v58, %v692_v58  ;;  %836 = vst.msk [vmem:[%s2576_s5 + $0xd0] sm:$0xf] %vm783_vm2, %v2145_v1 }
  0xe4   :  { %825 = vst.msk [vmem:[%s2576_s5 + $0xa4] sm:$0xf] %vm783_vm2, %v2155_v61 }
  0xe5   :  { %v626_v16 = vpop.f32.mrf.mxu1  ;;  %v2108_v18 = vpack.c.bf16 %v587_v13, %v587_v13  ;;  %v924_v13 = vsel %vm912_vm3, %v854_v31, 0.0  ;;  %837 = vst.msk [vmem:[%s2576_s5 + $0xd4] sm:$0xf] %vm783_vm2, %v2165_v17  ;;  %v928_v48 = vsel %vm912_vm3, %v856_v8, 0.0 }
  0xe6   :  { %v627_v6 = vadd.f32 %v626_v16, %v412_v11  ;;  %v398_v11 = vld [vmem:[%s2575_s4 + $0x68] sm:$0xff]  ;;  %v923_v16 = vadd.f32 %v922_v2, %v1875_v26  ;;  %v664_v31 = vpop.f32.mrf.mxu2  ;;  %v694_v37 = vpop.f32.mrf.mxu3 }
  0xe7   :  { %795 = vst.msk [vmem:[%s2576_s5 + $0x2c] sm:$0xf] %vm783_vm2, %v2108_v18  ;;  %v859_v2 = vunpack.c.l.bf16 %v2108_v18  ;;  %v427_v18 = vld [vmem:[%s2575_s4 + $0x150] sm:$0xff] }
  0xe8   :  { %v2115_v27 = vpack.c.bf16 %v627_v6, %v627_v6  ;;  %v1123_v6 = vsel %vm912_vm3, %v1054_v59, 0.0 }
  0xea   :  { %811 = vst.msk [vmem:[%s2576_s5 + $0x6c] sm:$0xf] %vm783_vm2, %v2115_v27  ;;  %v589_v33 = vpop.f32.mrf.mxu0 }
  0xeb   :  { %v590_v42 = vadd.f32 %v589_v33, %v397_v30  ;;  %v414_v30 = vld [vmem:[%s2575_s4 + $0xe8] sm:$0xff]  ;;  %v926_v33 = vsel %vm912_vm3, %v855_v54, 0.0  ;;  %v1057_v54 = vmul.f32 %v857_v34, %v857_v34  ;;  %v428_v34 = vld [vmem:[%s2575_s4 + $0x158] sm:$0xff] }
  0xed   :  { %v629_v46 = vpop.f32.mrf.mxu1  ;;  %v731_v55 = vpack.c.bf16 %v590_v42, %v590_v42  ;;  %v925_v42 = vadd.f32 %v924_v13, %v923_v16  ;;  %v439_v16 = vld [vmem:[%s2575_s4 + $0x1b0] sm:$0xff] }
  0xee   :  { %v630_v57 = vadd.f32 %v629_v46, %v413_v35  ;;  %v1056_v35 = vmul.f32 %v856_v8, %v856_v8  ;;  %v1124_v46 = vadd.f32 %v1123_v6, %v1122_v40  ;;  %v666_v6 = vpop.f32.mrf.mxu2  ;;  %v696_v40 = vpop.f32.mrf.mxu3 }
  0xef   :  { %796 = vst.msk [vmem:[%s2576_s5 + $0x30] sm:$0xf] %vm783_vm2, %v731_v55  ;;  %v927_v47 = vadd.f32 %v926_v33, %v925_v42  ;;  %v860_v33 = vunpack.c.l.bf16 %v731_v55  ;;  %v1059_v42 = vmul.f32 %v859_v2, %v859_v2  ;;  %v1131_v55 = vsel %vm912_vm3, %v1058_v12, 0.0 }
  0xf0   :  { %v2153_v10 = vpack.c.bf16 %v630_v57, %v630_v57  ;;  %v1127_v32 = vsel %vm912_vm3, %v1056_v35, 0.0  ;;  %v1126_v58 = vadd.f32 %v1125_v39, %v1124_v46  ;;  %v665_v39 = vadd.f32 %v664_v31, %v427_v18 }
  0xf1   :  { %v929_v59 = vadd.f32 %v928_v48, %v927_v47  ;;  %v695_v48 = vadd.f32 %v694_v37, %v439_v16  ;;  %v936_v18 = vsel %vm912_vm3, %v860_v33, 0.0 }
  0xf2   :  { %812 = vst.msk [vmem:[%s2576_s5 + $0x70] sm:$0xf] %vm783_vm2, %v2153_v10  ;;  %v591_v29 = vpop.f32.mrf.mxu0  ;;  %v1128_v8 = vadd.f32 %v1127_v32, %v1126_v58 }
  0xf3   :  { %v592_v26 = vadd.f32 %v591_v29, %v398_v11  ;;  %v931_v11 = vadd.f32 %v930_v53, %v929_v59  ;;  %v1129_v29 = vsel %vm912_vm3, %v1057_v54, 0.0  ;;  %v934_v53 = vsel %vm912_vm3, %v859_v2, 0.0  ;;  %v400_v2 = vld [vmem:[%s2575_s4 + $0x78] sm:$0xff] }
  0xf4   :  { %v2236_v54 = vpack.c.bf16 %v665_v39, %v665_v39  ;;  %v2238_v58 = vpack.c.bf16 %v695_v48, %v695_v48  ;;  %v1060_v59 = vmul.f32 %v860_v33, %v860_v33 }
  0xf5   :  { %v631_v43 = vpop.f32.mrf.mxu1  ;;  %v732_v44 = vpack.c.bf16 %v592_v26, %v592_v26  ;;  %v440_v26 = vld [vmem:[%s2575_s4 + $0x1b8] sm:$0xff] }
  0xf6   :  { %v632_v45 = vadd.f32 %v631_v43, %v414_v30  ;;  %v932_v30 = vsel %vm912_vm3, %v858_v49, 0.0  ;;  %v697_v49 = vadd.f32 %v696_v40, %v440_v26  ;;  %826 = vst.msk [vmem:[%s2576_s5 + $0xa8] sm:$0xf] %vm783_vm2, %v2236_v54  ;;  %v669_v33 = vpop.f32.mrf.mxu2  ;;  %v699_v40 = vpop.f32.mrf.mxu3 }
  0xf7   :  { %797 = vst.msk [vmem:[%s2576_s5 + $0x34] sm:$0xf] %vm783_vm2, %v732_v44  ;;  %v861_v46 = vunpack.c.l.bf16 %v732_v44 }
  0xf8   :  { %v2206_v57 = vpack.c.bf16 %v632_v45, %v632_v45  ;;  %v667_v45 = vadd.f32 %v666_v6, %v428_v34  ;;  %v2256_v12 = vpack.c.bf16 %v697_v49, %v697_v49  ;;  %838 = vst.msk [vmem:[%s2576_s5 + $0xd8] sm:$0xf] %vm783_vm2, %v2238_v58 }
  0xf9   :  { %v1061_v16 = vmul.f32 %v861_v46, %v861_v46  ;;  %v938_v34 = vsel %vm912_vm3, %v861_v46, 0.0 }
  0xfa   :  { %813 = vst.msk [vmem:[%s2576_s5 + $0x74] sm:$0xf] %vm783_vm2, %v2206_v57  ;;  %v594_v13 = vpop.f32.mrf.mxu0  ;;  %v2246_v44 = vpack.c.bf16 %v667_v45, %v667_v45 }
  0xfb   :  { %v595_v35 = vadd.f32 %v594_v13, %v399_v62  ;;  %v1130_v62 = vadd.f32 %v1129_v29, %v1128_v8  ;;  %v933_v13 = vadd.f32 %v932_v30, %v931_v11  ;;  %v864_v8 = vunpack.c.l.bf16 %v1755_v63  ;;  %v416_v30 = vld [vmem:[%s2575_s4 + $0xf8] sm:$0xff]  ;;  %839 = vst.msk [vmem:[%s2576_s5 + $0xdc] sm:$0xf] %vm783_vm2, %v2256_v12 }
  0xfc   :  { %827 = vst.msk [vmem:[%s2576_s5 + $0xac] sm:$0xf] %vm783_vm2, %v2246_v44  ;;  %v1137_v45 = vsel %vm912_vm3, %v1061_v16, 0.0 }
  0xfd   :  { %v634_v43 = vpop.f32.mrf.mxu1  ;;  %v733_v47 = vpack.c.bf16 %v595_v35, %v595_v35  ;;  %v1132_v11 = vadd.f32 %v1131_v55, %v1130_v62  ;;  %v935_v6 = vadd.f32 %v934_v53, %v933_v13  ;;  %v1135_v35 = vsel %vm912_vm3, %v1060_v59, 0.0 }
  0xfe   :  { %v635_v32 = vadd.f32 %v634_v43, %v415_v14  ;;  %v1133_v14 = vsel %vm912_vm3, %v1059_v42, 0.0  ;;  %v865_v42 = vunpack.c.l.bf16 %v1777_v15  ;;  %v1064_v49 = vmul.f32 %v864_v8, %v864_v8 }
  0xff   :  { %798 = vst.msk [vmem:[%s2576_s5 + $0x38] sm:$0xf] %vm783_vm2, %v733_v47  ;;  %v862_v31 = vunpack.c.l.bf16 %v733_v47  ;;  %v1134_v43 = vadd.f32 %v1133_v14, %v1132_v11  ;;  %v937_v39 = vadd.f32 %v936_v18, %v935_v6  ;;  %v866_v15 = vunpack.c.l.bf16 %v1802_v38 }
 0x100   :  { %v2244_v37 = vpack.c.bf16 %v635_v32, %v635_v32  ;;  %v1065_v18 = vmul.f32 %v865_v42, %v865_v42  ;;  %v1143_v38 = vsel %vm912_vm3, %v1064_v49, 0.0  ;;  %v946_v6 = vsel %vm912_vm3, %v865_v42, 0.0 }
 0x101   :  { %v1062_v26 = vmul.f32 %v862_v31, %v862_v31  ;;  %v940_v46 = vsel %vm912_vm3, %v862_v31, 0.0  ;;  %v1136_v55 = vadd.f32 %v1135_v35, %v1134_v43  ;;  %v939_v53 = vadd.f32 %v938_v34, %v937_v39  ;;  %v441_v35 = vld [vmem:[%s2575_s4 + $0x1c0] sm:$0xff]  ;;  %v430_v34 = vld [vmem:[%s2575_s4 + $0x168] sm:$0xff] }
 0x102   :  { %814 = vst.msk [vmem:[%s2576_s5 + $0x78] sm:$0xf] %vm783_vm2, %v2244_v37  ;;  %v596_v29 = vpop.f32.mrf.mxu0  ;;  %v944_v31 = vsel %vm912_vm3, %v864_v8, 0.0  ;;  %v429_v8 = vld [vmem:[%s2575_s4 + $0x160] sm:$0xff]  ;;  %v867_v43 = vunpack.c.l.bf16 %v1825_v56 }
 0x103   :  { %v597_v63 = vadd.f32 %v596_v29, %v400_v2  ;;  %v1139_v59 = vsel %vm912_vm3, %v1062_v26, 0.0  ;;  %v1138_v2 = vadd.f32 %v1137_v45, %v1136_v55  ;;  %v941_v14 = vadd.f32 %v940_v46, %v939_v53  ;;  %v671_v26 = vpop.f32.mrf.mxu2  ;;  %v701_v45 = vpop.f32.mrf.mxu3 }
 0x104   :  { %v670_v39 = vadd.f32 %v669_v33, %v429_v8  ;;  %v672_v49 = vadd.f32 %v671_v26, %v430_v34  ;;  %v1145_v55 = vsel %vm912_vm3, %v1065_v18, 0.0  ;;  %v868_v53 = vunpack.c.l.bf16 %v1858_v21 }
 0x105   :  { %v636_v48 = vpop.f32.mrf.mxu1  ;;  %v734_v47 = vpack.c.bf16 %v597_v63, %v597_v63  ;;  %v1140_v29 = vadd.f32 %v1139_v59, %v1138_v2  ;;  %v1066_v63 = vmul.f32 %v866_v15, %v866_v15  ;;  %v870_v18 = vunpack.c.l.bf16 %v1925_v52 }
 0x106   :  { %v637_v32 = vadd.f32 %v636_v48, %v416_v30  ;;  %v442_v48 = vld [vmem:[%s2575_s4 + $0x1c8] sm:$0xff]  ;;  %v2322_v59 = vpack.c.bf16 %v670_v39, %v670_v39  ;;  %v2326_v33 = vpack.c.bf16 %v672_v49, %v672_v49 }
 0x107   :  { %799 = vst.msk [vmem:[%s2576_s5 + $0x3c] sm:$0xf] %vm783_vm2, %v734_v47  ;;  %v863_v62 = vunpack.c.l.bf16 %v734_v47 }
 0x108   :  { %v2295_v13 = vpack.c.bf16 %v637_v32, %v637_v32  ;;  %v700_v32 = vadd.f32 %v699_v40, %v441_v35  ;;  %828 = vst.msk [vmem:[%s2576_s5 + $0xb0] sm:$0xf] %vm783_vm2, %v2322_v59  ;;  %v1147_v40 = vsel %vm912_vm3, %v1066_v63, 0.0  ;;  %v1070_v63 = vmul.f32 %v870_v18, %v870_v18 }
 0x109   :  { %v942_v16 = vsel %vm912_vm3, %v863_v62, 0.0  ;;  %v1063_v11 = vmul.f32 %v863_v62, %v863_v62  ;;  %v702_v62 = vadd.f32 %v701_v45, %v442_v48  ;;  %829 = vst.msk [vmem:[%s2576_s5 + $0xb4] sm:$0xf] %vm783_vm2, %v2326_v33 }
 0x10a   :  { %815 = vst.msk [vmem:[%s2576_s5 + $0x7c] sm:$0xf] %vm783_vm2, %v2295_v13  ;;  %v943_v30 = vadd.f32 %v942_v16, %v941_v14  ;;  %v2324_v14 = vpack.c.bf16 %v700_v32, %v700_v32  ;;  %v948_v16 = vsel %vm912_vm3, %v866_v15, 0.0  ;;  %v1068_v15 = vmul.f32 %v868_v53, %v868_v53 }
 0x10b   :  { %v1141_v42 = vsel %vm912_vm3, %v1063_v11, 0.0  ;;  %v1067_v11 = vmul.f32 %v867_v43, %v867_v43  ;;  %v2335_v21 = vpack.c.bf16 %v702_v62, %v702_v62  ;;  %v674_v35 = vpop.f32.mrf.mxu2  ;;  %v704_v26 = vpop.f32.mrf.mxu3  ;;  %v956_v62 = vsel %vm912_vm3, %v870_v18, 0.0  ;;  %v431_v18 = vld [vmem:[%s2575_s4 + $0x170] sm:$0xff] }
 0x10c   :  { %v945_v46 = vadd.f32 %v944_v31, %v943_v30  ;;  %v1142_v47 = vadd.f32 %v1141_v42, %v1140_v29  ;;  %v869_v31 = vunpack.c.l.bf16 %v1895_v36  ;;  %840 = vst.msk [vmem:[%s2576_s5 + $0xe0] sm:$0xf] %vm783_vm2, %v2324_v14  ;;  %v950_v36 = vsel %vm912_vm3, %v867_v43, 0.0 }
 0x10d   :  { %v871_v29 = vunpack.c.l.bf16 %v1955_v0  ;;  %v872_v30 = vunpack.c.l.bf16 %v1991_v24  ;;  %841 = vst.msk [vmem:[%s2576_s5 + $0xe4] sm:$0xf] %vm783_vm2, %v2335_v21  ;;  %v1149_v34 = vsel %vm912_vm3, %v1067_v11, 0.0  ;;  %v952_v0 = vsel %vm912_vm3, %v868_v53, 0.0 }
 0x10e   :  { %v947_v56 = vadd.f32 %v946_v6, %v945_v46  ;;  %v1144_v2 = vadd.f32 %v1143_v38, %v1142_v47  ;;  %v1069_v24 = vmul.f32 %v869_v31, %v869_v31  ;;  %v1151_v39 = vsel %vm912_vm3, %v1068_v15, 0.0 }
 0x10f   :  { %v954_v48 = vsel %vm912_vm3, %v869_v31, 0.0  ;;  %v1071_v45 = vmul.f32 %v871_v29, %v871_v29  ;;  %v1072_v46 = vmul.f32 %v872_v30, %v872_v30  ;;  %v873_v47 = vunpack.c.l.bf16 %v2035_v41 }
 0x110   :  { %v949_v38 = vadd.f32 %v948_v16, %v947_v56  ;;  %v1146_v6 = vadd.f32 %v1145_v55, %v1144_v2  ;;  %v1153_v55 = vsel %vm912_vm3, %v1069_v24, 0.0  ;;  %v1155_v53 = vsel %vm912_vm3, %v1070_v63, 0.0  ;;  %v444_v24 = vld [vmem:[%s2575_s4 + $0x1d8] sm:$0xff] }
 0x111   :  { %v874_v56 = vunpack.c.l.bf16 %v2071_v4  ;;  %v958_v11 = vsel %vm912_vm3, %v871_v29, 0.0  ;;  %v1157_v31 = vsel %vm912_vm3, %v1071_v45, 0.0  ;;  %v1159_v41 = vsel %vm912_vm3, %v1072_v46, 0.0  ;;  %v443_v4 = vld [vmem:[%s2575_s4 + $0x1d0] sm:$0xff]  ;;  %v432_v29 = vld [vmem:[%s2575_s4 + $0x178] sm:$0xff] }
 0x112   :  { %v951_v52 = vadd.f32 %v950_v36, %v949_v38  ;;  %v1148_v8 = vadd.f32 %v1147_v40, %v1146_v6  ;;  %v960_v40 = vsel %vm912_vm3, %v872_v30, 0.0  ;;  %v962_v38 = vsel %vm912_vm3, %v873_v47, 0.0 }
 0x113   :  { %v1073_v6 = vmul.f32 %v873_v47, %v873_v47  ;;  %v676_v30 = vpop.f32.mrf.mxu2  ;;  %v706_v63 = vpop.f32.mrf.mxu3  ;;  %v876_v45 = vunpack.c.l.bf16 %v2153_v10 }
 0x114   :  { %v953_v43 = vadd.f32 %v952_v0, %v951_v52  ;;  %v1150_v42 = vadd.f32 %v1149_v34, %v1148_v8  ;;  %v875_v52 = vunpack.c.l.bf16 %v2115_v27  ;;  %v675_v8 = vadd.f32 %v674_v35, %v431_v18 }
 0x115   :  { %v705_v34 = vadd.f32 %v704_v26, %v443_v4  ;;  %v677_v0 = vadd.f32 %v676_v30, %v432_v29  ;;  %v880_v4 = vunpack.c.l.bf16 %v1850_v19 }
 0x116   :  { %v955_v32 = vadd.f32 %v954_v48, %v953_v43  ;;  %v1152_v49 = vadd.f32 %v1151_v39, %v1150_v42  ;;  %v1074_v43 = vmul.f32 %v874_v56, %v874_v56  ;;  %v707_v48 = vadd.f32 %v706_v63, %v444_v24 }
 0x117   :  { %v2385_v46 = vpack.c.bf16 %v675_v8, %v675_v8  ;;  %v2387_v47 = vpack.c.bf16 %v705_v34, %v705_v34 }
 0x118   :  { %v1154_v2 = vadd.f32 %v1153_v55, %v1152_v49  ;;  %v957_v16 = vadd.f32 %v956_v62, %v955_v32  ;;  %v2389_v32 = vpack.c.bf16 %v677_v0, %v677_v0  ;;  %v2391_v26 = vpack.c.bf16 %v707_v48, %v707_v48 }
 0x119   :  { %v1161_v49 = vsel %vm912_vm3, %v1073_v6, 0.0  ;;  %v964_v55 = vsel %vm912_vm3, %v874_v56, 0.0  ;;  %v1075_v62 = vmul.f32 %v875_v52, %v875_v52  ;;  %830 = vst.msk [vmem:[%s2576_s5 + $0xb8] sm:$0xf] %vm783_vm2, %v2385_v46  ;;  %v966_v56 = vsel %vm912_vm3, %v875_v52, 0.0 }
 0x11a   :  { %v959_v36 = vadd.f32 %v958_v11, %v957_v16  ;;  %v1156_v15 = vadd.f32 %v1155_v53, %v1154_v2  ;;  %v877_v53 = vunpack.c.l.bf16 %v2206_v57  ;;  %842 = vst.msk [vmem:[%s2576_s5 + $0xe8] sm:$0xf] %vm783_vm2, %v2387_v47  ;;  %v1163_v16 = vsel %vm912_vm3, %v1074_v43, 0.0 }
 0x11b   :  { %v1076_v11 = vmul.f32 %v876_v45, %v876_v45  ;;  %v878_v57 = vunpack.c.l.bf16 %v2244_v37  ;;  %831 = vst.msk [vmem:[%s2576_s5 + $0xbc] sm:$0xf] %vm783_vm2, %v2389_v32  ;;  %v879_v37 = vunpack.c.l.bf16 %v2295_v13  ;;  %v881_v0 = vunpack.c.l.bf16 %v1852_v20  ;;  %v445_v20 = vld [vmem:[%s2575_s4 + $0x1e0] sm:$0xff] }
 0x11c   :  { %v961_v42 = vadd.f32 %v960_v40, %v959_v36  ;;  %v1158_v39 = vadd.f32 %v1157_v31, %v1156_v15  ;;  %843 = vst.msk [vmem:[%s2576_s5 + $0xec] sm:$0xf] %vm783_vm2, %v2391_v26  ;;  %v1077_v6 = vmul.f32 %v877_v53, %v877_v53  ;;  %v709_v36 = vpop.f32.mrf.mxu3  ;;  %v970_v30 = vsel %vm912_vm3, %v877_v53, 0.0 }
 0x11d   :  { %v1167_v29 = vsel %vm912_vm3, %v1076_v11, 0.0  ;;  %v1078_v52 = vmul.f32 %v878_v57, %v878_v57  ;;  %v972_v63 = vsel %vm912_vm3, %v878_v57, 0.0  ;;  %v1079_v43 = vmul.f32 %v879_v37, %v879_v37 }
 0x11e   :  { %v963_v27 = vadd.f32 %v962_v38, %v961_v42  ;;  %v1160_v35 = vadd.f32 %v1159_v41, %v1158_v39  ;;  %v1165_v41 = vsel %vm912_vm3, %v1075_v62, 0.0  ;;  %v968_v38 = vsel %vm912_vm3, %v876_v45, 0.0 }
 0x11f   :  { %v1169_v24 = vsel %vm912_vm3, %v1077_v6, 0.0  ;;  %v1080_v39 = vmul.f32 %v880_v4, %v880_v4  ;;  %v882_v48 = vunpack.c.l.bf16 %v1916_v50  ;;  %v1171_v19 = vsel %vm912_vm3, %v1078_v52, 0.0 }
 0x120   :  { %v965_v10 = vadd.f32 %v964_v55, %v963_v27  ;;  %v1162_v2 = vadd.f32 %v1161_v49, %v1160_v35  ;;  %v974_v45 = vsel %vm912_vm3, %v879_v37, 0.0  ;;  %v976_v27 = vsel %vm912_vm3, %v880_v4, 0.0  ;;  %v446_v55 = vld [vmem:[%s2575_s4 + $0x1e8] sm:$0xff] }
 0x121   :  { %v1081_v62 = vmul.f32 %v881_v0, %v881_v0  ;;  %v883_v53 = vunpack.c.l.bf16 %v1918_v51  ;;  %v1173_v50 = vsel %vm912_vm3, %v1079_v43, 0.0  ;;  %v885_v4 = vunpack.c.l.bf16 %v1993_v25 }
 0x122   :  { %v967_v31 = vadd.f32 %v966_v56, %v965_v10  ;;  %v1164_v40 = vadd.f32 %v1163_v16, %v1162_v2  ;;  %v710_v10 = vadd.f32 %v709_v36, %v445_v20  ;;  %v978_v16 = vsel %vm912_vm3, %v881_v0, 0.0 }
 0x123   :  { %v1177_v51 = vsel %vm912_vm3, %v1081_v62, 0.0  ;;  %v980_v36 = vsel %vm912_vm3, %v882_v48, 0.0  ;;  %v982_v52 = vsel %vm912_vm3, %v883_v53, 0.0  ;;  %v886_v25 = vunpack.c.l.bf16 %v2062_v5 }
 0x124   :  { %v969_v15 = vadd.f32 %v968_v38, %v967_v31  ;;  %v1166_v18 = vadd.f32 %v1165_v41, %v1164_v40  ;;  %v711_v2 = vpop.f32.mrf.mxu3  ;;  %v1175_v31 = vsel %vm912_vm3, %v1080_v39, 0.0  ;;  %v1082_v40 = vmul.f32 %v882_v48, %v882_v48 }
 0x125   :  { %v712_v57 = vadd.f32 %v711_v2, %v446_v55  ;;  %v884_v41 = vunpack.c.l.bf16 %v1982_v22  ;;  %v2443_v38 = vpack.c.bf16 %v710_v10, %v710_v10  ;;  %v1085_v43 = vmul.f32 %v885_v4, %v885_v4 }
 0x126   :  { %v1168_v8 = vadd.f32 %v1167_v29, %v1166_v18  ;;  %v971_v34 = vadd.f32 %v970_v30, %v969_v15  ;;  %v1083_v18 = vmul.f32 %v883_v53, %v883_v53  ;;  %v1179_v30 = vsel %vm912_vm3, %v1082_v40, 0.0 }
 0x127   :  { %v2445_v15 = vpack.c.bf16 %v712_v57, %v712_v57  ;;  %844 = vst.msk [vmem:[%s2576_s5 + $0xf0] sm:$0xf] %vm783_vm2, %v2443_v38  ;;  %v889_v5 = vunpack.c.l.bf16 %v2155_v61  ;;  %v1185_v55 = vsel %vm912_vm3, %v1085_v43, 0.0  ;;  %v988_v62 = vsel %vm912_vm3, %v886_v25, 0.0  ;;  %v447_v61 = vld [vmem:[%s2575_s4 + $0x1f0] sm:$0xff] }
 0x128   :  { %v1170_v13 = vadd.f32 %v1169_v24, %v1168_v8  ;;  %v973_v42 = vadd.f32 %v972_v63, %v971_v34  ;;  %v1084_v8 = vmul.f32 %v884_v41, %v884_v41  ;;  %v1181_v24 = vsel %vm912_vm3, %v1083_v18, 0.0 }
 0x129   :  { %845 = vst.msk [vmem:[%s2576_s5 + $0xf4] sm:$0xf] %vm783_vm2, %v2445_v15  ;;  %v984_v63 = vsel %vm912_vm3, %v884_v41, 0.0 }
 0x12a   :  { %v1172_v35 = vadd.f32 %v1171_v19, %v1170_v13  ;;  %v975_v49 = vadd.f32 %v974_v45, %v973_v42  ;;  %v887_v13 = vunpack.c.l.bf16 %v2073_v7  ;;  %v888_v42 = vunpack.c.l.bf16 %v2143_v60 }
 0x12b   :  { %v1183_v45 = vsel %vm912_vm3, %v1084_v8, 0.0 }
 0x12c   :  { %v977_v56 = vadd.f32 %v976_v27, %v975_v49  ;;  %v1174_v11 = vadd.f32 %v1173_v50, %v1172_v35  ;;  %v714_v19 = vpop.f32.mrf.mxu3  ;;  %v986_v27 = vsel %vm912_vm3, %v885_v4, 0.0  ;;  %v1086_v35 = vmul.f32 %v886_v25, %v886_v25 }
 0x12d   :  { %v1087_v53 = vmul.f32 %v887_v13, %v887_v13  ;;  %v1088_v7 = vmul.f32 %v888_v42, %v888_v42  ;;  %v990_v2 = vsel %vm912_vm3, %v887_v13, 0.0  ;;  %v992_v41 = vsel %vm912_vm3, %v888_v42, 0.0 }
 0x12e   :  { %v979_v6 = vadd.f32 %v978_v16, %v977_v56  ;;  %v1176_v37 = vadd.f32 %v1175_v31, %v1174_v11  ;;  %v1187_v10 = vsel %vm912_vm3, %v1086_v35, 0.0  ;;  %v890_v16 = vunpack.c.l.bf16 %v2236_v54  ;;  %v448_v31 = vld [vmem:[%s2575_s4 + $0x1f8] sm:$0xff] }
 0x12f   :  { %v1089_v56 = vmul.f32 %v889_v5, %v889_v5  ;;  %v1189_v40 = vsel %vm912_vm3, %v1087_v53, 0.0  ;;  %v1191_v54 = vsel %vm912_vm3, %v1088_v7, 0.0 }
 0x130   :  { %v981_v22 = vadd.f32 %v980_v36, %v979_v6  ;;  %v1178_v29 = vadd.f32 %v1177_v51, %v1176_v37  ;;  %v891_v6 = vunpack.c.l.bf16 %v2246_v44  ;;  %v715_v37 = vadd.f32 %v714_v19, %v447_v61 }
 0x131   :  { %v994_v51 = vsel %vm912_vm3, %v889_v5, 0.0  ;;  %v1193_v8 = vsel %vm912_vm3, %v1089_v56, 0.0  ;;  %v996_v44 = vsel %vm912_vm3, %v890_v16, 0.0  ;;  %v895_v5 = vunpack.c.l.bf16 %v2389_v32 }
 0x132   :  { %v983_v34 = vadd.f32 %v982_v52, %v981_v22  ;;  %v1180_v0 = vadd.f32 %v1179_v30, %v1178_v29  ;;  %v1090_v22 = vmul.f32 %v890_v16, %v890_v16  ;;  %v892_v29 = vunpack.c.l.bf16 %v2322_v59 }
 0x133   :  { %v2487_v30 = vpack.c.bf16 %v715_v37, %v715_v37  ;;  %v998_v42 = vsel %vm912_vm3, %v891_v6, 0.0  ;;  %v1095_v16 = vmul.f32 %v895_v5, %v895_v5  ;;  %v1006_v61 = vsel %vm912_vm3, %v895_v5, 0.0 }
 0x134   :  { %v985_v39 = vadd.f32 %v984_v63, %v983_v34  ;;  %v1182_v48 = vadd.f32 %v1181_v24, %v1180_v0  ;;  %v716_v4 = vpop.f32.mrf.mxu3  ;;  %v1091_v0 = vmul.f32 %v891_v6, %v891_v6  ;;  %v893_v24 = vunpack.c.l.bf16 %v2326_v33 }
 0x135   :  { %v717_v52 = vadd.f32 %v716_v4, %v448_v31  ;;  %846 = vst.msk [vmem:[%s2576_s5 + $0xf8] sm:$0xf] %vm783_vm2, %v2487_v30  ;;  %v1195_v13 = vsel %vm912_vm3, %v1090_v22, 0.0  ;;  %v1205_v37 = vsel %vm912_vm3, %v1095_v16, 0.0  ;;  %v900_v4 = vunpack.c.l.bf16 %v2145_v1 }
 0x136   :  { %v1184_v49 = vadd.f32 %v1183_v45, %v1182_v48  ;;  %v987_v20 = vadd.f32 %v986_v27, %v985_v39  ;;  %v1092_v39 = vmul.f32 %v892_v29, %v892_v29  ;;  %v894_v48 = vunpack.c.l.bf16 %v2385_v46 }
 0x137   :  { %v2497_v63 = vpack.c.bf16 %v717_v52, %v717_v52  ;;  %v1197_v45 = vsel %vm912_vm3, %v1091_v0, 0.0  ;;  %v1000_v27 = vsel %vm912_vm3, %v892_v29, 0.0  ;;  %v1093_v35 = vmul.f32 %v893_v24, %v893_v24 }
 0x138   :  { %v989_v50 = vadd.f32 %v988_v62, %v987_v20  ;;  %v1186_v60 = vadd.f32 %v1185_v55, %v1184_v49  ;;  %v896_v55 = vunpack.c.l.bf16 %v1984_v23  ;;  %v1199_v46 = vsel %vm912_vm3, %v1092_v39, 0.0 }
 0x139   :  { %847 = vst.msk [vmem:[%s2576_s5 + $0xfc] sm:$0xf] %vm783_vm2, %v2497_v63  ;;  %v1002_v62 = vsel %vm912_vm3, %v893_v24, 0.0  ;;  %v1094_v53 = vmul.f32 %v894_v48, %v894_v48  ;;  %v1016_v39 = vsel %vm912_vm3, %v900_v4, 0.0  ;;  %v904_v5 = vunpack.c.l.bf16 %v2324_v14 }
 0x13a   :  { %v991_v11 = vadd.f32 %v990_v2, %v989_v50  ;;  %v1188_v57 = vadd.f32 %v1187_v10, %v1186_v60  ;;  %v897_v60 = vunpack.c.l.bf16 %v2003_v28  ;;  %v1201_v10 = vsel %vm912_vm3, %v1093_v35, 0.0 }
 0x13b   :  { %v1004_v2 = vsel %vm912_vm3, %v894_v48, 0.0  ;;  %v1203_v23 = vsel %vm912_vm3, %v1094_v53, 0.0  ;;  %v899_v28 = vunpack.c.l.bf16 %v2083_v9  ;;  %v901_v9 = vunpack.c.l.bf16 %v2165_v17 }
 0x13c   :  { %v993_v36 = vadd.f32 %v992_v41, %v991_v11  ;;  %v1190_v18 = vadd.f32 %v1189_v40, %v1188_v57  ;;  %v1096_v11 = vmul.f32 %v896_v55, %v896_v55  ;;  %v898_v57 = vunpack.c.l.bf16 %v2064_v3 }
 0x13d   :  { %v1008_v41 = vsel %vm912_vm3, %v896_v55, 0.0  ;;  %v1097_v6 = vmul.f32 %v897_v60, %v897_v60  ;;  %v1014_v24 = vsel %vm912_vm3, %v899_v28, 0.0  ;;  %v1101_v48 = vmul.f32 %v901_v9, %v901_v9 }
 0x13e   :  { %v995_v25 = vadd.f32 %v994_v51, %v993_v36  ;;  %v1192_v34 = vadd.f32 %v1191_v54, %v1190_v18  ;;  %v1207_v36 = vsel %vm912_vm3, %v1096_v11, 0.0  ;;  %v1010_v18 = vsel %vm912_vm3, %v897_v60, 0.0 }
 0x13f   :  { %v1098_v3 = vmul.f32 %v898_v57, %v898_v57  ;;  %v1209_v52 = vsel %vm912_vm3, %v1097_v6, 0.0  ;;  %v1104_v60 = vmul.f32 %v904_v5, %v904_v5  ;;  %v907_v11 = vunpack.c.l.bf16 %v2391_v26 }
 0x140   :  { %v997_v59 = vadd.f32 %v996_v44, %v995_v25  ;;  %v1194_v43 = vadd.f32 %v1193_v8, %v1192_v34  ;;  %v1012_v8 = vsel %vm912_vm3, %v898_v57, 0.0  ;;  %v1099_v25 = vmul.f32 %v899_v28, %v899_v28 }
 0x141   :  { %v1211_v0 = vsel %vm912_vm3, %v1098_v3, 0.0 }
 0x142   :  { %v999_v33 = vadd.f32 %v998_v42, %v997_v59  ;;  %v1196_v19 = vadd.f32 %v1195_v13, %v1194_v43  ;;  %v1100_v59 = vmul.f32 %v900_v4, %v900_v4  ;;  %v902_v43 = vunpack.c.l.bf16 %v2238_v58 }
 0x143   :  { %v1213_v42 = vsel %vm912_vm3, %v1099_v25, 0.0  ;;  %v910_v4 = vunpack.c.l.bf16 %v2487_v30  ;;  %v911_v25 = vunpack.c.l.bf16 %v2497_v63 }
 0x144   :  { %v1198_v49 = vadd.f32 %v1197_v45, %v1196_v19  ;;  %v1001_v20 = vadd.f32 %v1000_v27, %v999_v33  ;;  %v903_v33 = vunpack.c.l.bf16 %v2256_v12  ;;  %v1215_v45 = vsel %vm912_vm3, %v1100_v59, 0.0 }
 0x145   :  { %v1018_v27 = vsel %vm912_vm3, %v901_v9, 0.0  ;;  %v1102_v35 = vmul.f32 %v902_v43, %v902_v43  ;;  %v1020_v55 = vsel %vm912_vm3, %v902_v43, 0.0  ;;  %v1036_v43 = vsel %vm912_vm3, %v910_v4, 0.0 }
 0x146   :  { %v1200_v7 = vadd.f32 %v1199_v46, %v1198_v49  ;;  %v1003_v50 = vadd.f32 %v1002_v62, %v1001_v20  ;;  %v1217_v20 = vsel %vm912_vm3, %v1101_v48, 0.0  ;;  %v1103_v46 = vmul.f32 %v903_v33, %v903_v33 }
 0x147   :  { %v905_v62 = vunpack.c.l.bf16 %v2335_v21  ;;  %v1038_v63 = vsel %vm912_vm3, %v911_v25, 0.0 }
 0x148   :  { %v1202_v56 = vadd.f32 %v1201_v10, %v1200_v7  ;;  %v1005_v32 = vadd.f32 %v1004_v2, %v1003_v50  ;;  %v1219_v7 = vsel %vm912_vm3, %v1102_v35, 0.0  ;;  %v1022_v50 = vsel %vm912_vm3, %v903_v33, 0.0 }
 0x149   :  { %v906_v10 = vunpack.c.l.bf16 %v2387_v47  ;;  %v1221_v16 = vsel %vm912_vm3, %v1103_v46, 0.0 }
 0x14a   :  { %v1204_v31 = vadd.f32 %v1203_v23, %v1202_v56  ;;  %v1007_v40 = vadd.f32 %v1006_v61, %v1005_v32  ;;  %v1024_v56 = vsel %vm912_vm3, %v904_v5, 0.0  ;;  %v1105_v32 = vmul.f32 %v905_v62, %v905_v62 }
 0x14b   :  { %v1223_v23 = vsel %vm912_vm3, %v1104_v60, 0.0  ;;  %v1026_v61 = vsel %vm912_vm3, %v905_v62, 0.0  ;;  %v1028_v28 = vsel %vm912_vm3, %v906_v10, 0.0 }
 0x14c   :  { %v1009_v54 = vadd.f32 %v1008_v41, %v1007_v40  ;;  %v1206_v51 = vadd.f32 %v1205_v37, %v1204_v31  ;;  %v1106_v31 = vmul.f32 %v906_v10, %v906_v10  ;;  %v908_v40 = vunpack.c.l.bf16 %v2443_v38 }
 0x14d   :  { %v1225_v6 = vsel %vm912_vm3, %v1105_v32, 0.0  ;;  %v1107_v37 = vmul.f32 %v907_v11, %v907_v11 }
 0x14e   :  { %v1011_v22 = vadd.f32 %v1010_v18, %v1009_v54  ;;  %v1208_v29 = vadd.f32 %v1207_v36, %v1206_v51  ;;  %v909_v54 = vunpack.c.l.bf16 %v2445_v15  ;;  %v1227_v36 = vsel %vm912_vm3, %v1106_v31, 0.0 }
 0x14f   :  { %v1030_v18 = vsel %vm912_vm3, %v907_v11, 0.0  ;;  %v1108_v3 = vmul.f32 %v908_v40, %v908_v40 }
 0x150   :  { %v1013_v34 = vadd.f32 %v1012_v8, %v1011_v22  ;;  %v1210_v44 = vadd.f32 %v1209_v52, %v1208_v29  ;;  %v1229_v29 = vsel %vm912_vm3, %v1107_v37, 0.0  ;;  %v1032_v52 = vsel %vm912_vm3, %v908_v40, 0.0 }
 0x151   :  { %v1109_v8 = vmul.f32 %v909_v54, %v909_v54 }
 0x152   :  { %v1015_v13 = vadd.f32 %v1014_v24, %v1013_v34  ;;  %v1212_v1 = vadd.f32 %v1211_v0, %v1210_v44  ;;  %v1231_v34 = vsel %vm912_vm3, %v1108_v3, 0.0  ;;  %v1034_v44 = vsel %vm912_vm3, %v909_v54, 0.0 }
 0x153   :  { %v1110_v0 = vmul.f32 %v910_v4, %v910_v4  ;;  %v1233_v30 = vsel %vm912_vm3, %v1109_v8, 0.0 }
 0x154   :  { %v1017_v19 = vadd.f32 %v1016_v39, %v1015_v13  ;;  %v1214_v17 = vadd.f32 %v1213_v42, %v1212_v1  ;;  %v1111_v13 = vmul.f32 %v911_v25, %v911_v25 }
 0x155   :  { %v1235_v39 = vsel %vm912_vm3, %v1110_v0, 0.0 }
 0x156   :  { %v1216_v49 = vadd.f32 %v1215_v45, %v1214_v17  ;;  %v1019_v58 = vadd.f32 %v1018_v27, %v1017_v19  ;;  %v1237_v19 = vsel %vm912_vm3, %v1111_v13, 0.0 }
 0x158   :  { %v1021_v53 = vadd.f32 %v1020_v55, %v1019_v58  ;;  %v1218_v12 = vadd.f32 %v1217_v20, %v1216_v49 }
 0x15a   :  { %v1023_v2 = vadd.f32 %v1022_v50, %v1021_v53  ;;  %v1220_v14 = vadd.f32 %v1219_v7, %v1218_v12 }
 0x15c   :  { %v1025_v57 = vadd.f32 %v1024_v56, %v1023_v2  ;;  %v1222_v21 = vadd.f32 %v1221_v16, %v1220_v14 }
 0x15e   :  { %v1027_v41 = vadd.f32 %v1026_v61, %v1025_v57  ;;  %v1224_v47 = vadd.f32 %v1223_v23, %v1222_v21 }
 0x160   :  { %v1029_v51 = vadd.f32 %v1028_v28, %v1027_v41  ;;  %v1226_v26 = vadd.f32 %v1225_v6, %v1224_v47 }
 0x162   :  { %v1031_v22 = vadd.f32 %v1030_v18, %v1029_v51  ;;  %v1228_v38 = vadd.f32 %v1227_v36, %v1226_v26 }
 0x164   :  { %v1230_v9 = vadd.f32 %v1229_v29, %v1228_v38  ;;  %v1033_v15 = vadd.f32 %v1032_v52, %v1031_v22 }
 0x166   :  { %v1232_v24 = vadd.f32 %v1231_v34, %v1230_v9  ;;  %v1035_v59 = vadd.f32 %v1034_v44, %v1033_v15 }
 0x168   :  { %v1234_v1 = vadd.f32 %v1233_v30, %v1232_v24  ;;  %v1037_v42 = vadd.f32 %v1036_v43, %v1035_v59 }
 0x16a   :  { %v1236_v48 = vadd.f32 %v1235_v39, %v1234_v1  ;;  %v1039_v33 = vadd.f32 %v1038_v63, %v1037_v42 }
 0x16c   :  { %v1040_v17 = vrot.slane %v1039_v33, 4  ;;  %v1238_v45 = vadd.f32 %v1237_v19, %v1236_v48 }
 0x16e   :  { %v1041_v27 = vadd.f32 %v1040_v17, %v1039_v33  ;;  %v1239_v35 = vrot.slane %v1238_v45, 4 }
 0x170   :  { %v1042_v5 = vrot.slane %v1041_v27, 2  ;;  %v1240_v49 = vadd.f32 %v1239_v35, %v1238_v45 }
 0x172   :  { %v1043_v58 = vadd.f32 %v1042_v5, %v1041_v27  ;;  %v1241_v20 = vrot.slane %v1240_v49, 2 }
 0x174   :  { %v1044_v55 = vrot.slane %v1043_v58, 1  ;;  %v1242_v46 = vadd.f32 %v1241_v20, %v1240_v49 }
 0x176   :  { %v1045_v62 = vadd.f32 %v1044_v55, %v1043_v58  ;;  %v1243_v53 = vrot.slane %v1242_v46, 1 }
 0x178   :  { %1047 = vst.msk [vmem:[%s2577_s6] sm:$0x1] %vm1046_vm4, %v1045_v62  ;;  %v1244_v12 = vadd.f32 %v1243_v53, %v1242_v46 }
 0x17a   :  { %1245 = vst.msk [vmem:[%s2578_s7] sm:$0x1] %vm1046_vm4, %v1244_v12 }

// kernel: _lambda_.9
= control target key start
LH: loop header
LB: loop body
LE: loop exit
PB: predicated region body
PF: predicated region fallthrough
CT: control target
= control target key end

     0   :  { %s3796_s21 = smov 0   ;;  %s5094_s0 = inlined_call_operand.vmem [shape: bf16[2,256,4], index: 0, kind: input, shape index: {}]   ;;  %s5095_s1 = inlined_call_operand.vmem [shape: f32[1,4], index: 1, kind: input, shape index: {}]   ;;  %s5096_s2 = inlined_call_operand.vmem [shape: f32[1,4], index: 2, kind: input, shape index: {}]   ;;  %s5097_s3 = inlined_call_operand.vmem [shape: bf16[9,4,4], index: 3, kind: input, shape index: {}]   ;;  %s5098_s4 = inlined_call_operand.vmem [shape: bf16[2,256,4], index: 4, kind: output, shape index: {0}]   ;;  %s5099_s5 = inlined_call_operand.vmem [shape: f32[2,1,4], index: 5, kind: output, shape index: {1}]   ;;  %s5100_s6 = inlined_call_operand.vmem [shape: f32[2,1,4], index: 6, kind: output, shape index: {2}]  }
   0x1 LB: > { %s3432_s22 = sadd.s32 4294967295, %s3757_s21   ;;  %p3436_p0 = scmp.ge.s32.totalorder %s3757_s21, 1  ;;  %s3757_s21 = sphi %s3796_s21, %s17_s21  }
   0x2   : > { %p217_p1 = scmp.lt.s32.totalorder %s3757_s21, 3 }
   0x4   : > { %p218_p2 = pnand %p3436_p0, %p217_p1 }
   0x6   : > { %221 = sbr.rel (%p218_p2) target bundleno = 760 (0x2f8), region = 36 }
   0xb   : > { %v3505_v0 = vld [vmem:[%s5097_s3 + $0x2] sm:$0x3]  ;;  %vm1892_vm0 = vcmask 1041408   ;;  %p253_p3 = scmp.lt.s32.totalorder %s3432_s22, 1  ;;  %v3536_v2 = vld [vmem:[%s5097_s3 + $0x4] sm:$0x3] }
   0xc   : > { %v1894_v1 = vsel %vm1892_vm0, %v3505_v0, 0  ;;  %v2170_v3 = vsel %vm1892_vm0, %v3536_v2, 0  ;;  %v3552_v4 = vld [vmem:[%s5097_s3 + $0x6] sm:$0x3]  ;;  %v1855_v5 = vld [vmem:[%s5097_s3] sm:$0x3] }
   0xd   : > { %3734 = vmatpush.bf16.msra.mxu1 %v1894_v1  ;;  %3735 = vmatpush.bf16.msra.mxu2 %v1894_v1  ;;  %s5267_s22 = smov (!%p253_p3, %s3432_s22), 1  ;;  %v2299_v6 = vsel %vm1892_vm0, %v3552_v4, 0  ;;  %v2031_v7 = vsel %vm1892_vm0, %v1855_v5, 0  ;;  %v3569_v8 = vld [vmem:[%s5097_s3 + $0x8] sm:$0x3]  ;;  %v5101_v14 = vmov 0  }
   0xe   : > { %3736 = vmatpush.bf16.msra.mxu3 %v1894_v1  ;;  %1903 = vmatpush.bf16.msra.mxu0 %v1894_v1  ;;  %s3653_s7 = sshll.u32 %s5267_s22, 7  ;;  %v3836_v9 = vld [vmem:[%s5095_s1] ss:$0 sm:$0xff]  ;;  %v2427_v10 = vsel %vm1892_vm0, %v3569_v8, 0  ;;  %vm1858_vm1 = vcmask 31744   ;;  %vm3760_vm4 = vmmov 0   ;;  %s268_s15 = scalar_lea.vmem %s5100_s6, %s5267_s22 }
   0xf   : > { %s3831_s12 = scalar_lea.vmem %s5094_s0, %s3653_s7  ;;  %v3846_v17 = vld [vmem:[%s5096_s2] ss:$0 sm:$0xff]  ;;  %vm1213_vm5 = vmpackc.low %vm3760_vm4, %vm3760_vm4  ;;  %vm1001_vm6 = vsmask.f32 256  ;;  %vm1145_vm7 = vcmask 1040384   ;;  %s4856_s10 = scalar_lea.vmem %s5098_s4, %s3653_s7 }
  0x10   : > { %v3721_v11 = vld [vmem:[%s3831_s12 + $0x18] sm:$0xff]   ;;  %v3722_v20 = vld [vmem:[%s3831_s12 + $0x20] sm:$0xff]   ;;  %vm1146_vm9 = vmand %vm1145_vm7, %vm1001_vm6  ;;  %vm1484_vm4 = vsmask.f32 7424 }
  0x11   : > { %2179 = vmatpush.bf16.msrb.mxu2 %v2170_v3  ;;  %2040 = vmatpush.bf16.msrb.mxu1 %v2031_v7  ;;  %v3725_v12 = vld [vmem:[%s3831_s12 + $0x38] sm:$0xff]   ;;  %v3669_v15 = vunpack.c.l.bf16 %v3721_v11  ;;  %v3670_v16 = vunpack.c.h.bf16 %v3721_v11  ;;  %v3673_v23 = vunpack.c.l.bf16 %v3722_v20  ;;  %v3674_v24 = vunpack.c.h.bf16 %v3722_v20  ;;  %v3726_v56 = vld [vmem:[%s3831_s12 + $0x40] sm:$0xff]  }
  0x12   : > { %2308 = vmatpush.bf16.msrb.mxu3 %v2299_v6  ;;  %v3729_v13 = vld [vmem:[%s3831_s12 + $0x58] sm:$0xff]   ;;  %1904 = vmatmul.bf16.vlgmr.msra.gmra.mxu0 %v5101_v14  ;;  %v3685_v18 = vunpack.c.l.bf16 %v3725_v12  ;;  %v3686_v19 = vunpack.c.h.bf16 %v3725_v12  ;;  %v3730_v61 = vld [vmem:[%s3831_s12 + $0x60] sm:$0xff]   ;;  %v3689_v4 = vunpack.c.l.bf16 %v3726_v56  ;;  %v3690_v5 = vunpack.c.h.bf16 %v3726_v56  ;;  %v3723_v6 = vld [vmem:[%s3831_s12 + $0x28] sm:$0xff]  }
  0x13   : > { %2436 = vmatpush.bf16.msrb.mxu0 %v2427_v10  ;;  %v3701_v21 = vunpack.c.l.bf16 %v3729_v13  ;;  %v3702_v22 = vunpack.c.h.bf16 %v3729_v13  ;;  %v346_v25 = vmul.f32 %v3836_v9, %v3669_v15  ;;  %v347_v26 = vmul.f32 %v3836_v9, %v3670_v16  ;;  %v3656_v1 = vld [vmem:[%s3831_s12] sm:$0xff]  }
  0x14   : > { %v354_v27 = vmul.f32 %v3836_v9, %v3685_v18  ;;  %v355_v28 = vmul.f32 %v3836_v9, %v3686_v19  ;;  %v348_v31 = vmul.f32 %v3836_v9, %v3673_v23  ;;  %v349_v32 = vmul.f32 %v3836_v9, %v3674_v24 }
  0x15   : > { %v362_v29 = vmul.f32 %v3836_v9, %v3701_v21  ;;  %v363_v30 = vmul.f32 %v3836_v9, %v3702_v22  ;;  %v382_v33 = vadd.f32 %v3846_v17, %v346_v25  ;;  %v383_v34 = vadd.f32 %v3846_v17, %v347_v26 }
  0x16   : > { %v390_v35 = vadd.f32 %v3846_v17, %v354_v27  ;;  %v391_v36 = vadd.f32 %v3846_v17, %v355_v28  ;;  %v384_v39 = vadd.f32 %v3846_v17, %v348_v31  ;;  %v385_v40 = vadd.f32 %v3846_v17, %v349_v32 }
  0x17   : > { %v398_v37 = vadd.f32 %v3846_v17, %v362_v29  ;;  %v399_v38 = vadd.f32 %v3846_v17, %v363_v30  ;;  %v414_v41 = vmax.f32 %v382_v33, 0.0  ;;  %v415_v42 = vmax.f32 %v383_v34, 0.0 }
  0x18   : > { %v422_v43 = vmax.f32 %v390_v35, 0.0  ;;  %v423_v44 = vmax.f32 %v391_v36, 0.0  ;;  %v416_v47 = vmax.f32 %v384_v39, 0.0  ;;  %v417_v48 = vmax.f32 %v385_v40, 0.0 }
  0x19   : > { %v430_v45 = vmax.f32 %v398_v37, 0.0  ;;  %v431_v46 = vmax.f32 %v399_v38, 0.0  ;;  %v446_v49 = vpack.c.bf16 %v414_v41, %v414_v41  ;;  %v447_v50 = vpack.c.bf16 %v415_v42, %v415_v42 }
  0x1a   : > { %v454_v51 = vpack.c.bf16 %v422_v43, %v422_v43  ;;  %v455_v52 = vpack.c.bf16 %v423_v44, %v423_v44  ;;  %v3865_v55 = vpack.c.bf16 %v416_v47, %v416_v47  ;;  %v449_v0 = vpack.c.bf16 %v417_v48, %v417_v48 }
  0x1b   : > { %v462_v53 = vpack.c.bf16 %v430_v45, %v430_v45  ;;  %v463_v54 = vpack.c.bf16 %v431_v46, %v431_v46  ;;  %v959_v57 = vunpack.c.l.b16 %v446_v49  ;;  %v960_v58 = vunpack.c.l.b16 %v447_v50  ;;  %v3727_v46 = vld [vmem:[%s3831_s12 + $0x48] sm:$0xff]  }
  0x1c   : > { %v967_v59 = vunpack.c.l.b16 %v454_v51  ;;  %v968_v60 = vunpack.c.l.b16 %v455_v52  ;;  %v961_v8 = vunpack.c.l.b16 %v3865_v55  ;;  %v3705_v10 = vunpack.c.l.bf16 %v3730_v61 }
  0x1d   : > { %v975_v62 = vunpack.c.l.b16 %v462_v53  ;;  %v976_v63 = vunpack.c.l.b16 %v463_v54  ;;  %v3870_v2 = vpack.c.b16 %v960_v58, %v959_v57  ;;  %v3706_v11 = vunpack.c.h.bf16 %v3730_v61  ;;  %v3731_v53 = vld [vmem:[%s3831_s12 + $0x68] sm:$0xff]  }
  0x1e   : > { %v3872_v3 = vpack.c.b16 %v968_v60, %v967_v59  ;;  %v356_v12 = vmul.f32 %v3836_v9, %v3689_v4  ;;  %v357_v13 = vmul.f32 %v3836_v9, %v3690_v5  ;;  %v3657_v15 = vunpack.c.l.bf16 %v3656_v1  ;;  %v3719_v58 = vld [vmem:[%s3831_s12 + $0x8] sm:$0xff]   ;;  %v3724_v5 = vld [vmem:[%s3831_s12 + $0x30] sm:$0xff]  }
  0x1f   : > { %5133 = vst [vmem:[#allocation2_spill] sm:$0xff] %v3870_v2  ;;  %v3875_v7 = vpack.c.b16 %v976_v63, %v975_v62  ;;  %3509 = vmatmul.msk.bf16.vlgmr.msra.gmra.mxu1 %vm1858_vm1, %v3870_v2  ;;  %v3658_v16 = vunpack.c.h.bf16 %v3656_v1  ;;  %v364_v18 = vmul.f32 %v3836_v9, %v3705_v10  ;;  %v365_v19 = vmul.f32 %v3836_v9, %v3706_v11 }
  0x20   : > { %5134 = vst [vmem:[#allocation3_spill] sm:$0xff] %v3872_v3  ;;  %3513 = vmatmul.msk.bf16.vlgmr.msra.gmra.mxu2 %vm1858_vm1, %v3872_v3  ;;  %v3677_v20 = vunpack.c.l.bf16 %v3723_v6  ;;  %v3678_v21 = vunpack.c.h.bf16 %v3723_v6  ;;  %v392_v22 = vadd.f32 %v3846_v17, %v356_v12  ;;  %v393_v23 = vadd.f32 %v3846_v17, %v357_v13 }
  0x21   : > { %5135 = vst [vmem:[#allocation4_spill] sm:$0xff] %v3875_v7  ;;  %3517 = vmatmul.msk.bf16.vlgmr.msra.gmra.mxu3 %vm1858_vm1, %v3875_v7  ;;  %v340_v24 = vmul.f32 %v3836_v9, %v3657_v15  ;;  %v341_v25 = vmul.f32 %v3836_v9, %v3658_v16  ;;  %v400_v26 = vadd.f32 %v3846_v17, %v364_v18  ;;  %v962_v42 = vunpack.c.l.b16 %v449_v0 }
  0x22   : > { %v401_v27 = vadd.f32 %v3846_v17, %v365_v19  ;;  %v350_v28 = vmul.f32 %v3836_v9, %v3677_v20  ;;  %v351_v29 = vmul.f32 %v3836_v9, %v3678_v21  ;;  %v424_v30 = vmax.f32 %v392_v22, 0.0 }
  0x23   : > { %v425_v31 = vmax.f32 %v393_v23, 0.0  ;;  %v376_v32 = vadd.f32 %v3846_v17, %v340_v24  ;;  %v377_v33 = vadd.f32 %v3846_v17, %v341_v25  ;;  %v432_v34 = vmax.f32 %v400_v26, 0.0 }
  0x24   : > { %v433_v35 = vmax.f32 %v401_v27, 0.0  ;;  %v386_v36 = vadd.f32 %v3846_v17, %v350_v28  ;;  %v387_v37 = vadd.f32 %v3846_v17, %v351_v29  ;;  %v456_v38 = vpack.c.bf16 %v424_v30, %v424_v30 }
  0x25   : > { %v457_v39 = vpack.c.bf16 %v425_v31, %v425_v31  ;;  %v408_v40 = vmax.f32 %v376_v32, 0.0  ;;  %v409_v41 = vmax.f32 %v377_v33, 0.0  ;;  %v464_v43 = vpack.c.bf16 %v432_v34, %v432_v34 }
  0x26   : > { %v465_v44 = vpack.c.bf16 %v433_v35, %v433_v35  ;;  %v418_v45 = vmax.f32 %v386_v36, 0.0  ;;  %v969_v47 = vunpack.c.l.b16 %v456_v38  ;;  %v419_v56 = vmax.f32 %v387_v37, 0.0  ;;  %v3728_v37 = vld [vmem:[%s3831_s12 + $0x50] sm:$0xff]  }
  0x27   : > { %v970_v48 = vunpack.c.l.b16 %v457_v39  ;;  %v440_v49 = vpack.c.bf16 %v408_v40, %v408_v40  ;;  %v441_v50 = vpack.c.bf16 %v409_v41, %v409_v41  ;;  %v977_v51 = vunpack.c.l.b16 %v464_v43 }
  0x28   : > { %v978_v52 = vunpack.c.l.b16 %v465_v44  ;;  %v3693_v57 = vunpack.c.l.bf16 %v3727_v46  ;;  %v3903_v59 = vpack.c.b16 %v962_v42, %v961_v8  ;;  %v450_v61 = vpack.c.bf16 %v418_v45, %v418_v45 }
  0x29   : > { %v953_v54 = vunpack.c.l.b16 %v440_v49  ;;  %v954_v55 = vunpack.c.l.b16 %v441_v50  ;;  %v3905_v60 = vpack.c.b16 %v970_v48, %v969_v47  ;;  %v3694_v62 = vunpack.c.h.bf16 %v3727_v46  ;;  %v3732_v46 = vld [vmem:[%s3831_s12 + $0x70] sm:$0xff]  }
  0x2a   : > { %5136 = vst [vmem:[#allocation5_spill] sm:$0xff] %v3903_v59  ;;  %v358_v0 = vmul.f32 %v3836_v9, %v3693_v57  ;;  %v3709_v1 = vunpack.c.l.bf16 %v3731_v53  ;;  %v3710_v4 = vunpack.c.h.bf16 %v3731_v53  ;;  %v3911_v6 = vpack.c.b16 %v978_v52, %v977_v51  ;;  %v3720_v51 = vld [vmem:[%s3831_s12 + $0x10] sm:$0xff]  }
  0x2b   : > { %5137 = vst [vmem:[#allocation6_spill] sm:$0xff] %v3905_v60  ;;  %v3907_v63 = vpack.c.b16 %v954_v55, %v953_v54  ;;  %v359_v10 = vmul.f32 %v3836_v9, %v3694_v62  ;;  %v3661_v11 = vunpack.c.l.bf16 %v3719_v58  ;;  %v3662_v12 = vunpack.c.h.bf16 %v3719_v58 }
  0x2c   : > { %v451_v8 = vpack.c.bf16 %v419_v56, %v419_v56  ;;  %v394_v13 = vadd.f32 %v3846_v17, %v358_v0  ;;  %v366_v15 = vmul.f32 %v3836_v9, %v3709_v1  ;;  %v367_v16 = vmul.f32 %v3836_v9, %v3710_v4 }
  0x2d   : > { %3506 = vmatmul.msk.bf16.gmra.mxu0 %vm1858_vm1, %v3907_v63  ;;  %v395_v18 = vadd.f32 %v3846_v17, %v359_v10  ;;  %v342_v19 = vmul.f32 %v3836_v9, %v3661_v11  ;;  %v343_v20 = vmul.f32 %v3836_v9, %v3662_v12  ;;  %v3681_v21 = vunpack.c.l.bf16 %v3724_v5 }
  0x2e   : > { %v426_v22 = vmax.f32 %v394_v13, 0.0  ;;  %v402_v23 = vadd.f32 %v3846_v17, %v366_v15  ;;  %v403_v24 = vadd.f32 %v3846_v17, %v367_v16  ;;  %v3682_v25 = vunpack.c.h.bf16 %v3724_v5 }
  0x2f   : > { %3510 = vmatmul.msk.bf16.gmra.mxu1 %vm1858_vm1, %v3903_v59  ;;  %v427_v26 = vmax.f32 %v395_v18, 0.0  ;;  %v378_v27 = vadd.f32 %v3846_v17, %v342_v19  ;;  %v379_v28 = vadd.f32 %v3846_v17, %v343_v20  ;;  %v963_v29 = vunpack.c.l.b16 %v450_v61 }
  0x30   : > { %3514 = vmatmul.msk.bf16.gmra.mxu2 %vm1858_vm1, %v3905_v60  ;;  %v964_v30 = vunpack.c.l.b16 %v451_v8  ;;  %v434_v31 = vmax.f32 %v402_v23, 0.0  ;;  %v435_v32 = vmax.f32 %v403_v24, 0.0  ;;  %v458_v33 = vpack.c.bf16 %v426_v22, %v426_v22 }
  0x31   : > { %3518 = vmatmul.msk.bf16.gmra.mxu3 %vm1858_vm1, %v3911_v6  ;;  %v459_v34 = vpack.c.bf16 %v427_v26, %v427_v26  ;;  %v410_v35 = vmax.f32 %v378_v27, 0.0  ;;  %v411_v36 = vmax.f32 %v379_v28, 0.0  ;;  %v352_v38 = vmul.f32 %v3836_v9, %v3681_v21 }
  0x32   : > { %v353_v39 = vmul.f32 %v3836_v9, %v3682_v25  ;;  %v466_v40 = vpack.c.bf16 %v434_v31, %v434_v31  ;;  %v467_v41 = vpack.c.bf16 %v435_v32, %v435_v32  ;;  %v3935_v44 = vpack.c.b16 %v964_v30, %v963_v29 }
  0x33   : > { %v442_v42 = vpack.c.bf16 %v410_v35, %v410_v35  ;;  %v443_v43 = vpack.c.bf16 %v411_v36, %v411_v36  ;;  %v3697_v45 = vunpack.c.l.bf16 %v3728_v37  ;;  %v971_v47 = vunpack.c.l.b16 %v458_v33 }
  0x34   : > { %5138 = vst [vmem:[#allocation7_spill] sm:$0xff] %v3935_v44  ;;  %v972_v48 = vunpack.c.l.b16 %v459_v34  ;;  %v388_v52 = vadd.f32 %v3846_v17, %v352_v38  ;;  %v389_v53 = vadd.f32 %v3846_v17, %v353_v39  ;;  %v3698_v54 = vunpack.c.h.bf16 %v3728_v37  ;;  %v3603_v37 = vld [vmem:[%s5097_s3 + $0xc] sm:$0x3]  ;;  %v3619_v38 = vld [vmem:[%s5097_s3 + $0xe] sm:$0x3] }
  0x35   : > { %v955_v49 = vunpack.c.l.b16 %v442_v42  ;;  %v956_v50 = vunpack.c.l.b16 %v443_v43  ;;  %v360_v55 = vmul.f32 %v3836_v9, %v3697_v45  ;;  %v979_v56 = vunpack.c.l.b16 %v466_v40  ;;  %v3586_v39 = vld [vmem:[%s5097_s3 + $0xa] sm:$0x3]  ;;  %v3635_v42 = vld [vmem:[%s5097_s3 + $0x10] sm:$0x3] }
  0x36   : > { %v980_v57 = vunpack.c.l.b16 %v467_v41  ;;  %v3713_v58 = vunpack.c.l.bf16 %v3732_v46  ;;  %v3714_v61 = vunpack.c.h.bf16 %v3732_v46  ;;  %v361_v0 = vmul.f32 %v3836_v9, %v3698_v54 }
  0x37   : > { %v3942_v62 = vpack.c.b16 %v956_v50, %v955_v49  ;;  %v3665_v1 = vunpack.c.l.bf16 %v3720_v51  ;;  %v3666_v4 = vunpack.c.h.bf16 %v3720_v51  ;;  %v3945_v5 = vpack.c.b16 %v972_v48, %v971_v47 }
  0x38   : > { %v368_v10 = vmul.f32 %v3836_v9, %v3713_v58  ;;  %v369_v11 = vmul.f32 %v3836_v9, %v3714_v61  ;;  %v472_v12 = vlaneseq  ;;  %v396_v8 = vadd.f32 %v3846_v17, %v360_v55 }
  0x39   : > { %v397_v13 = vadd.f32 %v3846_v17, %v361_v0  ;;  %v344_v15 = vmul.f32 %v3836_v9, %v3665_v1  ;;  %v345_v16 = vmul.f32 %v3836_v9, %v3666_v4  ;;  %v3953_v18 = vpack.c.b16 %v980_v57, %v979_v56 }
  0x3a   : > { %v404_v19 = vadd.f32 %v3846_v17, %v368_v10  ;;  %v405_v20 = vadd.f32 %v3846_v17, %v369_v11  ;;  %v420_v21 = vmax.f32 %v388_v52, 0.0  ;;  %v3961_v24 = vshrl.u32 %v472_v12, 7 }
  0x3b   : > { %v380_v22 = vadd.f32 %v3846_v17, %v344_v15  ;;  %v381_v23 = vadd.f32 %v3846_v17, %v345_v16  ;;  %v421_v25 = vmax.f32 %v389_v53, 0.0  ;;  %v428_v9 = vmax.f32 %v396_v8, 0.0 }
  0x3c   : > { %5139 = vst [vmem:[#allocation8_spill] sm:$0xff] %v3961_v24  ;;  %v429_v26 = vmax.f32 %v397_v13, 0.0  ;;  %v436_v29 = vmax.f32 %v404_v19, 0.0  ;;  %v437_v30 = vmax.f32 %v405_v20, 0.0  ;;  %v452_v31 = vpack.c.bf16 %v420_v21, %v420_v21 }
  0x3d   : > { %3507 = vmatmul.msk.bf16.gmra.mxu0 %vm1858_vm1, %v3942_v62  ;;  %v412_v27 = vmax.f32 %v380_v22, 0.0  ;;  %v413_v28 = vmax.f32 %v381_v23, 0.0  ;;  %v509_v33 = vand.u32 15, %v3961_v24  ;;  %v453_v34 = vpack.c.bf16 %v421_v25, %v421_v25 }
  0x3e   : > { %v460_v35 = vpack.c.bf16 %v428_v9, %v428_v9  ;;  %v461_v36 = vpack.c.bf16 %v429_v26, %v429_v26  ;;  %v468_v40 = vpack.c.bf16 %v436_v29, %v436_v29  ;;  %v469_v41 = vpack.c.bf16 %v437_v30, %v437_v30 }
  0x3f   : > { %3511 = vmatmul.msk.bf16.gmra.mxu1 %vm1858_vm1, %v3935_v44  ;;  %v444_v17 = vpack.c.bf16 %v412_v27, %v412_v27  ;;  %v445_v32 = vpack.c.bf16 %v413_v28, %v413_v28  ;;  %v965_v43 = vunpack.c.l.b16 %v452_v31  ;;  %vm3982_vm2 = vcmp.eq.s32.totalorder %v509_v33, 0 }
  0x40   : > { %3515 = vmatmul.msk.bf16.gmra.mxu2 %vm1858_vm1, %v3945_v5  ;;  %v2682_v48 = vsel %vm1892_vm0, %v3603_v37, 0  ;;  %v2808_v49 = vsel %vm1892_vm0, %v3619_v38, 0  ;;  %v2556_v50 = vsel %vm1892_vm0, %v3586_v39, 0  ;;  %v966_v51 = vunpack.c.l.b16 %v453_v34  ;;  %vm1212_vm3 = vmpackc.low %vm3982_vm2, %vm3982_vm2 }
  0x41   : > { %3519 = vmatmul.msk.bf16.gmra.mxu3 %vm1858_vm1, %v3953_v18  ;;  %v957_v45 = vunpack.c.l.b16 %v444_v17  ;;  %v958_v46 = vunpack.c.l.b16 %v445_v32  ;;  %v973_v52 = vunpack.c.l.b16 %v460_v35  ;;  %v974_v53 = vunpack.c.l.b16 %v461_v36  ;;  %2691 = vmatpush.bf16.msra.mxu2 %v2682_v48 }
  0x42   : > { %2817 = vmatpush.bf16.msra.mxu3 %v2808_v49  ;;  %v2934_v54 = vsel %vm1892_vm0, %v3635_v42, 0  ;;  %v981_v55 = vunpack.c.l.b16 %v468_v40  ;;  %v982_v56 = vunpack.c.l.b16 %v469_v41  ;;  %2565 = vmatpush.bf16.msra.mxu1 %v2556_v50  ;;  %v3995_v58 = vpack.c.b16 %v966_v51, %v965_v43 }
  0x43   : > { %2943 = vmatpush.bf16.msra.mxu0 %v2934_v54  ;;  %v3993_v57 = vpack.c.b16 %v958_v46, %v957_v45  ;;  %v3997_v61 = vpack.c.b16 %v974_v53, %v973_v52  ;;  %v1244_v1 = vsel %vm1212_vm3, 65537, %v5101_v14  ;;  %v1245_v4 = vsel %vm1213_vm5, 65537, %v5101_v14 }
  0x44   : > { %5142 = vst [vmem:[#allocation9_spill] sm:$0xff] %v3995_v58  ;;  %v3999_v0 = vpack.c.b16 %v982_v56, %v981_v55  ;;  %v474_v10 = vadd.s32 8, %v3961_v24  ;;  %v1003_v11 = vshrl.u32 %v3907_v63, 16  ;;  %v475_v12 = vadd.s32 16, %v3961_v24 }
  0x45   : > { %v1276_v8 = vunpack.c.l.b16 %v1244_v1  ;;  %v1277_v13 = vunpack.c.l.b16 %v1245_v4  ;;  %v1006_v19 = vshll.u32 %v3907_v63, 16  ;;  %v4016_v23 = vunpack.c.l.b16 %v5101_v14 }
  0x46   : > { %v516_v15 = vand.u32 15, %v474_v10  ;;  %v1005_v16 = vrot.slane %v1003_v11, 7  ;;  %v523_v20 = vand.u32 15, %v475_v12  ;;  %v4019_v25 = vunpack.c.h.b16 %v5101_v14 }
  0x47   : > { %v3441_v21 = vunpack.i.l.s16 %v1276_v8  ;;  %v3442_v22 = vunpack.i.l.s16 %v1277_v13  ;;  %v476_v30 = vadd.s32 24, %v3961_v24  ;;  %v1010_v32 = vshrl.u32 %v3942_v62, 16 }
  0x48   : > { %vm1453_vm8 = vcmp.eq.s32.totalorder %v516_v15, 15  ;;  %v1008_v9 = vor.u32 %v1006_v19, %v1005_v16  ;;  %vm891_vm10 = vcmp.eq.s32.totalorder %v523_v20, 0  ;;  %v477_v33 = vadd.s32 32, %v3961_v24 }
  0x49   : > { %vm1328_vm11 = vcmp.ne.s32.totalorder %v3441_v21, %v4016_v23  ;;  %vm4024_vm12 = vcmp.ne.s32.totalorder %v3442_v22, %v4019_v25  ;;  %vm1616_vm13 = vmpackc.low %vm1453_vm8, %vm1453_vm8  ;;  %v530_v35 = vand.u32 15, %v476_v30  ;;  %v1013_v36 = vshll.u32 %v3942_v62, 16 }
  0x4a   : > { %vm1214_vm14 = vmpackc.low %vm891_vm10, %vm891_vm10  ;;  %v1147_v27 = vsel %vm1146_vm9, 0, %v1008_v9  ;;  %v1648_v28 = vsel %vm1616_vm13, 65537, %v5101_v14  ;;  %v1485_v37 = vrot.slane %v1006_v19, 1  ;;  %v1012_v39 = vrot.slane %v1010_v32, 7 }
  0x4b   : > { %vm1330_vm15 = vmpackc.low %vm4024_vm12, %vm1328_vm11  ;;  %v1246_v29 = vsel %vm1214_vm14, 65537, %v5101_v14  ;;  %v1680_v17 = vunpack.c.l.b16 %v1648_v28  ;;  %v537_v40 = vand.u32 15, %v477_v33  ;;  %vm4041_vm0 = vcmp.eq.s32.totalorder %v530_v35, 15 }
  0x4c   : > { %v1436_v31 = vsel %vm1330_vm15, 0, %v1147_v27  ;;  %v1278_v34 = vunpack.c.l.b16 %v1246_v29  ;;  %v1486_v42 = vor.u32 %v1485_v37, %v1003_v11  ;;  %v1487_v43 = vrot.slane %v1013_v36, 1  ;;  %vm1618_vm8 = vmpackc.low %vm4041_vm0, %vm4041_vm0 }
  0x4d   : > { %3508 = vmatmul.msk.bf16.gmra.mxu0 %vm1858_vm1, %v3993_v57  ;;  %v3474_v38 = vunpack.i.l.s16 %v1680_v17  ;;  %vm4046_vm2 = vcmp.ne.s32.totalorder %v3442_v22, %v4016_v23  ;;  %v1015_v46 = vor.u32 %v1013_v36, %v1012_v39  ;;  %vm893_vm5 = vcmp.eq.s32.totalorder %v537_v40, 0 }
  0x4e   : > { %v1488_v47 = vsel %vm1484_vm4, %v1486_v42, %v1487_v43  ;;  %vm1216_vm10 = vmpackc.low %vm893_vm5, %vm893_vm5  ;;  %v1650_v49 = vsel %vm1618_vm8, 65537, %v5101_v14  ;;  %v478_v52 = vadd.s32 40, %v3961_v24  ;;  %v1018_v55 = vshrl.u32 %v3993_v57, 16 }
  0x4f   : > { %3512 = vmatmul.msk.bf16.gmra.mxu1 %vm1858_vm1, %v3995_v58  ;;  %vm1732_vm3 = vcmp.ne.s32.totalorder %v3474_v38, %v4019_v25  ;;  %v1016_v48 = vsel %vm1001_vm6, %v1005_v16, %v1015_v46  ;;  %v1248_v51 = vsel %vm1216_vm10, 65537, %v5101_v14  ;;  %v1682_v54 = vunpack.c.l.b16 %v1650_v49 }
  0x50   : > { %3516 = vmatmul.msk.bf16.gmra.mxu2 %vm1858_vm1, %v3997_v61  ;;  %vm1733_vm9 = vmpackc.low %vm1732_vm3, %vm4046_vm2  ;;  %v479_v56 = vadd.s32 48, %v3961_v24  ;;  %v1280_v1 = vunpack.c.l.b16 %v1248_v51  ;;  %v544_v4 = vand.u32 15, %v478_v52  ;;  %v1021_v10 = vshll.u32 %v3993_v57, 16 }
  0x51   : > { %3520 = vmatmul.msk.bf16.gmra.mxu3 %vm1858_vm1, %v3999_v0  ;;  %v4062_v50 = vsel %vm1733_vm9, 0, %v1488_v47  ;;  %v3476_v11 = vunpack.i.l.s16 %v1682_v54  ;;  %v1020_v12 = vrot.slane %v1018_v55, 7  ;;  %v1489_v15 = vor.u32 %v1487_v43, %v1010_v32 }
  0x52   : > { %v551_v8 = vand.u32 15, %v479_v56  ;;  %v3445_v13 = vunpack.i.l.s16 %v1280_v1  ;;  %vm1457_vm13 = vcmp.eq.s32.totalorder %v544_v4, 15  ;;  %v1490_v16 = vrot.slane %v1021_v10, 1 }
  0x53   : > { %vm1739_vm14 = vcmp.ne.s32.totalorder %v3476_v11, %v4019_v25  ;;  %v1023_v19 = vor.u32 %v1021_v10, %v1020_v12  ;;  %vm1620_vm3 = vmpackc.low %vm1457_vm13, %vm1457_vm13  ;;  %v480_v28 = vadd.s32 56, %v3961_v24  ;;  %v481_v17 = vadd.s32 64, %v3961_v24 }
  0x54   : > { %vm895_vm15 = vcmp.eq.s32.totalorder %v551_v8, 0  ;;  %vm1342_vm0 = vcmp.ne.s32.totalorder %v3445_v13, %v4016_v23  ;;  %vm1740_vm5 = vmpackc.low %vm1739_vm14, %vm4046_vm2  ;;  %v1491_v20 = vsel %vm1484_vm4, %v1489_v15, %v1490_v16  ;;  %v1652_v22 = vsel %vm1620_vm3, 65537, %v5101_v14 }
  0x55   : > { %v1024_v21 = vsel %vm1001_vm6, %v1012_v39, %v1023_v19  ;;  %vm1344_vm8 = vmpackc.low %vm4024_vm12, %vm1342_vm0  ;;  %v4087_v9 = vsel %vm1740_vm5, 0, %v1491_v20  ;;  %v1684_v30 = vunpack.c.l.b16 %v1652_v22  ;;  %v558_v33 = vand.u32 15, %v480_v28 }
  0x56   : > { %v4091_v29 = vsel %vm1344_vm8, 0, %v1024_v21  ;;  %v565_v37 = vand.u32 15, %v481_v17  ;;  %v1492_v39 = vor.u32 %v1490_v16, %v1018_v55  ;;  %v1034_v52 = vshrl.u32 %v3903_v59, 16 }
  0x57   : > { %v3478_v35 = vunpack.i.l.s16 %v1684_v30  ;;  %vm1459_vm9 = vcmp.eq.s32.totalorder %v558_v33, 15  ;;  %v483_v54 = vadd.s32 80, %v3961_v24  ;;  %v1037_v1 = vshll.u32 %v3903_v59, 16 }
  0x58   : > { %vm1622_vm14 = vmpackc.low %vm1459_vm9, %vm1459_vm9  ;;  %v1036_v10 = vrot.slane %v1034_v52, 7  ;;  %v484_v30 = vadd.s32 88, %v3961_v24  ;;  %v485_v33 = vadd.s32 96, %v3961_v24 }
  0x59   : > { %vm1746_vm10 = vcmp.ne.s32.totalorder %v3478_v35, %v4019_v25  ;;  %v1654_v43 = vsel %vm1622_vm14, 65537, %v5101_v14  ;;  %v579_v11 = vand.u32 15, %v483_v54  ;;  %v1496_v13 = vrot.slane %v1037_v1, 1 }
  0x5a   : > { %v1686_v51 = vunpack.c.l.b16 %v1654_v43  ;;  %v1039_v16 = vor.u32 %v1037_v1, %v1036_v10 }
  0x5b   : > { %vm899_vm8 = vcmp.eq.s32.totalorder %v579_v11, 0 }
  0x5c   : > { %v3480_v4 = vunpack.i.l.s16 %v1686_v51 }
  0x5d   : > { %3570 = vmatmul.msk.bf16.vlgmr.msrb.gmra.mxu0 %vm1858_vm1, %v3907_v63  ;;  %v3443_v63 = vunpack.i.l.s16 %v1278_v34  ;;  %v1029_v34 = vshll.u32 %v3870_v2, 16 }
  0x5f   : > { %2041 = vmatmul.bf16.vlgmr.msrb.gmra.mxu1 %v5101_v14  ;;  %vm1335_vm7 = vcmp.ne.s32.totalorder %v3443_v63, %v4016_v23  ;;  %v1493_v40 = vrot.slane %v1029_v34, 1 }
  0x60   : > { %2180 = vmatmul.bf16.vlgmr.msrb.gmra.mxu2 %v5101_v14  ;;  %vm1337_vm11 = vmpackc.low %vm4024_vm12, %vm1335_vm7 }
  0x61   : > { %3553 = vmatmul.msk.bf16.vlgmr.msrb.gmra.mxu3 %vm1858_vm1, %v1436_v31  ;;  %v4066_v53 = vsel %vm1337_vm11, 0, %v1016_v48  ;;  %vm1218_vm7 = vmpackc.low %vm895_vm15, %vm895_vm15  ;;  %vm897_vm11 = vcmp.eq.s32.totalorder %v565_v37, 0  ;;  %v1494_v41 = vsel %vm1484_vm4, %v1492_v39, %v1493_v40  ;;  %v482_v48 = vadd.s32 72, %v3961_v24 }
  0x62   : > { %v1250_v27 = vsel %vm1218_vm7, 65537, %v5101_v14  ;;  %vm1747_vm15 = vmpackc.low %vm1746_vm10, %vm4046_vm2  ;;  %vm1753_vm7 = vcmp.ne.s32.totalorder %v3480_v4, %v4019_v25  ;;  %v1045_v37 = vshll.u32 %v3935_v44, 16 }
  0x63   : > { %v1282_v32 = vunpack.c.l.b16 %v1250_v27  ;;  %vm1220_vm0 = vmpackc.low %vm897_vm11, %vm897_vm11  ;;  %v4113_v46 = vsel %vm1747_vm15, 0, %v1494_v41  ;;  %v572_v56 = vand.u32 15, %v482_v48  ;;  %v1498_v48 = vor.u32 %v1496_v13, %v1034_v52 }
  0x64   : > { %v1252_v47 = vsel %vm1220_vm0, 65537, %v5101_v14  ;;  %vm1754_vm11 = vmpackc.low %vm1753_vm7, %vm4046_vm2  ;;  %v1499_v51 = vrot.slane %v1045_v37, 1 }
  0x65   : > { %v3447_v38 = vunpack.i.l.s16 %v1282_v32  ;;  %v1284_v55 = vunpack.c.l.b16 %v1252_v47  ;;  %vm1461_vm5 = vcmp.eq.s32.totalorder %v572_v56, 15  ;;  %v1042_v32 = vshrl.u32 %v3935_v44, 16 }
  0x66   : > { %vm1624_vm10 = vmpackc.low %vm1461_vm5, %vm1461_vm5 }
  0x67   : > { %vm1349_vm13 = vcmp.ne.s32.totalorder %v3447_v38, %v4016_v23  ;;  %v1656_v21 = vsel %vm1624_vm10, 65537, %v5101_v14 }
  0x68   : > { %vm1351_vm3 = vmpackc.low %vm4024_vm12, %vm1349_vm13  ;;  %v1688_v17 = vunpack.c.l.b16 %v1656_v21  ;;  %v487_v21 = vadd.s32 112, %v3961_v24 }
  0x69   : > { %vm1222_vm13 = vmpackc.low %vm899_vm8, %vm899_vm8 }
  0x6a   : > { %v1254_v28 = vsel %vm1222_vm13, 65537, %v5101_v14  ;;  %v3482_v38 = vunpack.i.l.s16 %v1688_v17  ;;  %v1053_v17 = vshll.u32 %v3995_v58, 16 }
  0x6c   : > { %vm1760_vm0 = vcmp.ne.s32.totalorder %v3482_v38, %v4019_v25  ;;  %v607_v38 = vand.u32 15, %v487_v21 }
  0x6d   : > { %3571 = vmatmul.msk.bf16.gmra.mxu0 %vm1858_vm1, %v3942_v62  ;;  %vm1761_vm8 = vmpackc.low %vm1760_vm0, %vm4046_vm2 }
  0x6f   : > { %3521 = vmatmul.msk.bf16.gmra.mxu1 %vm1858_vm1, %v1436_v31  ;;  %v1026_v31 = vshrl.u32 %v3870_v2, 16 }
  0x70   : > { %3537 = vmatmul.msk.bf16.gmra.mxu2 %vm1858_vm1, %v4062_v50 }
  0x71   : > { %3554 = vmatmul.msk.bf16.gmra.mxu3 %vm1858_vm1, %v4066_v53  ;;  %v1028_v36 = vrot.slane %v1026_v31, 7  ;;  %v1495_v8 = vor.u32 %v1493_v40, %v1026_v31  ;;  %v1044_v40 = vrot.slane %v1042_v32, 7 }
  0x73   : > { %v1031_v63 = vor.u32 %v1029_v34, %v1028_v36  ;;  %v1497_v19 = vsel %vm1484_vm4, %v1495_v8, %v1496_v13  ;;  %v1040_v20 = vsel %vm1001_vm6, %v1028_v36, %v1039_v16  ;;  %v1286_v34 = vunpack.c.l.b16 %v1254_v28 }
  0x74   : > { %v4143_v27 = vsel %vm1754_vm11, 0, %v1497_v19  ;;  %v586_v36 = vand.u32 15, %v484_v30  ;;  %v1047_v54 = vor.u32 %v1045_v37, %v1044_v40  ;;  %v486_v16 = vadd.s32 104, %v3961_v24 }
  0x75   : > { %v1032_v42 = vsel %vm1001_vm6, %v1020_v12, %v1031_v63  ;;  %v3449_v12 = vunpack.i.l.s16 %v1284_v55  ;;  %5150 = vst [vmem:[#allocation11_spill] sm:$0xff] %v4143_v27  ;;  %v593_v63 = vand.u32 15, %v485_v33  ;;  %v1500_v55 = vsel %vm1484_vm4, %v1498_v48, %v1499_v51 }
  0x76   : > { %v4117_v49 = vsel %vm1351_vm3, 0, %v1032_v42  ;;  %v3451_v42 = vunpack.i.l.s16 %v1286_v34  ;;  %vm4168_vm15 = vcmp.eq.s32.totalorder %v586_v36, 15  ;;  %v1048_v1 = vsel %vm1001_vm6, %v1036_v10, %v1047_v54 }
  0x77   : > { %5149 = vst [vmem:[#allocation10_spill] sm:$0xff] %v4117_v49  ;;  %vm1356_vm9 = vcmp.ne.s32.totalorder %v3449_v12, %v4016_v23  ;;  %vm901_vm3 = vcmp.eq.s32.totalorder %v593_v63, 0  ;;  %vm1626_vm7 = vmpackc.low %vm4168_vm15, %vm4168_vm15  ;;  %v4192_v8 = vsel %vm1761_vm8, 0, %v1500_v55  ;;  %v600_v30 = vand.u32 15, %v486_v16 }
  0x78   : > { %vm1358_vm14 = vmpackc.low %vm4024_vm12, %vm1356_vm9  ;;  %vm1363_vm5 = vcmp.ne.s32.totalorder %v3451_v42, %v4016_v23  ;;  %v1658_v4 = vsel %vm1626_vm7, 65537, %v5101_v14  ;;  %5156 = vst [vmem:[#allocation15_spill] sm:$0xff] %v4192_v8  ;;  %v1501_v54 = vor.u32 %v1499_v51, %v1042_v32  ;;  %v1502_v55 = vrot.slane %v1053_v17, 1 }
  0x79   : > { %v4147_v31 = vsel %vm1358_vm14, 0, %v1040_v20  ;;  %vm1224_vm9 = vmpackc.low %vm901_vm3, %vm901_vm3  ;;  %v1690_v10 = vunpack.c.l.b16 %v1658_v4  ;;  %v1050_v20 = vshrl.u32 %v3995_v58, 16  ;;  %vm4217_vm11 = vcmp.eq.s32.totalorder %v600_v30, 15 }
  0x7a   : > { %5151 = vst [vmem:[#allocation12_spill] sm:$0xff] %v4147_v31  ;;  %vm1365_vm10 = vmpackc.low %vm4024_vm12, %vm1363_vm5  ;;  %v1256_v13 = vsel %vm1224_vm9, 65537, %v5101_v14  ;;  %vm903_vm14 = vcmp.eq.s32.totalorder %v607_v38, 0  ;;  %v1503_v4 = vsel %vm1484_vm4, %v1501_v54, %v1502_v55  ;;  %v1058_v38 = vshrl.u32 %v3872_v3, 16 }
  0x7b   : > { %v4196_v19 = vsel %vm1365_vm10, 0, %v1048_v1  ;;  %v1288_v28 = vunpack.c.l.b16 %v1256_v13  ;;  %v3484_v33 = vunpack.i.l.s16 %v1690_v10  ;;  %v1052_v37 = vrot.slane %v1050_v20, 7  ;;  %vm1628_vm0 = vmpackc.low %vm4217_vm11, %vm4217_vm11 }
  0x7c   : > { %5157 = vst [vmem:[#allocation16_spill] sm:$0xff] %v4196_v19  ;;  %vm1226_vm5 = vmpackc.low %vm903_vm14, %vm903_vm14  ;;  %v1660_v16 = vsel %vm1628_vm0, 65537, %v5101_v14 }
  0x7d   : > { %3572 = vmatmul.msk.bf16.gmra.mxu0 %vm1858_vm1, %v3993_v57  ;;  %v3453_v42 = vunpack.i.l.s16 %v1288_v28  ;;  %vm1767_vm13 = vcmp.ne.s32.totalorder %v3484_v33, %v4019_v25  ;;  %v1055_v1 = vor.u32 %v1053_v17, %v1052_v37  ;;  %v1258_v30 = vsel %vm1226_vm5, 65537, %v5101_v14 }
  0x7e   : > { %vm1768_vm3 = vmpackc.low %vm1767_vm13, %vm4046_vm2  ;;  %v488_v17 = vadd.s32 120, %v3961_v24  ;;  %v1290_v48 = vunpack.c.l.b16 %v1258_v30  ;;  %v1060_v14 = vrot.slane %v1058_v38, 7  ;;  %v490_v30 = vadd.s32 136, %v3961_v24 }
  0x7f   : > { %3522 = vmatmul.msk.bf16.gmra.mxu1 %vm1858_vm1, %v4066_v53  ;;  %vm1370_vm15 = vcmp.ne.s32.totalorder %v3453_v42, %v4016_v23  ;;  %v1056_v51 = vsel %vm1001_vm6, %v1044_v40, %v1055_v1  ;;  %v4241_v28 = vsel %vm1768_vm3, 0, %v1503_v4  ;;  %v1692_v40 = vunpack.c.l.b16 %v1660_v16 }
  0x80   : > { %3538 = vmatmul.msk.bf16.gmra.mxu2 %vm1858_vm1, %v4087_v9  ;;  %vm1372_vm7 = vmpackc.low %vm4024_vm12, %vm1370_vm15  ;;  %5162 = vst [vmem:[#allocation19_spill] sm:$0xff] %v4241_v28  ;;  %v489_v42 = vadd.s32 128, %v3961_v24  ;;  %v614_v54 = vand.u32 15, %v488_v17  ;;  %v1061_v1 = vshll.u32 %v3872_v3, 16 }
  0x81   : > { %3555 = vmatmul.msk.bf16.gmra.mxu3 %vm1858_vm1, %v4091_v29  ;;  %v4245_v33 = vsel %vm1372_vm7, 0, %v1056_v51  ;;  %v3486_v4 = vunpack.i.l.s16 %v1692_v40 }
  0x82   : > { %5163 = vst [vmem:[#allocation20_spill] sm:$0xff] %v4245_v33  ;;  %vm4266_vm8 = vcmp.eq.s32.totalorder %v614_v54, 15  ;;  %v1505_v17 = vrot.slane %v1061_v1, 1  ;;  %v1063_v40 = vor.u32 %v1061_v1, %v1060_v14 }
  0x83   : > { %vm1774_vm9 = vcmp.ne.s32.totalorder %v3486_v4, %v4019_v25  ;;  %vm1630_vm13 = vmpackc.low %vm4266_vm8, %vm4266_vm8 }
  0x84   : > { %vm1775_vm14 = vmpackc.low %vm1774_vm9, %vm4046_vm2 }
  0x8d   : > { %3573 = vmatmul.msk.bf16.gmra.mxu0 %vm1858_vm1, %v3870_v2 }
  0x8f   : > { %3523 = vmatmul.msk.bf16.gmra.mxu1 %vm1858_vm1, %v4091_v29  ;;  %v4131_v15 = vpop.f32.mrf.mxu0 }
  0x90   : > { %3539 = vmatmul.msk.bf16.gmra.mxu2 %vm1858_vm1, %v4113_v46 }
  0x91   : > { %3556 = vmatmul.msk.bf16.gmra.mxu3 %vm1858_vm1, %v4117_v49 }
  0x97   : > { %v4159_v35 = vpop.f32.mrf.mxu0 }
  0x9c   : > { %v4141_v22 = vpop.f32.mrf.mxu1 }
  0x9d   : > { %3574 = vmatmul.msk.bf16.gmra.mxu0 %vm1858_vm1, %v3903_v59 }
  0x9f   : > { %3524 = vmatmul.msk.bf16.gmra.mxu1 %vm1858_vm1, %v4117_v49 }
  0xa0   : > { %3540 = vmatmul.msk.bf16.gmra.mxu2 %vm1858_vm1, %v4143_v27 }
  0xa1   : > { %3557 = vmatmul.msk.bf16.gmra.mxu3 %vm1858_vm1, %v4147_v31 }
  0xa3   : > { %v4162_v39 = vpop.f32.mrf.mxu2 }
  0xa4   : > { %v4164_v41 = vpop.f32.mrf.mxu3  ;;  %v4166_v43 = vpop.f32.mrf.mxu1 }
  0xa5   : > { %5152 = vst [vmem:[#allocation13_spill] sm:$0xff] %v4164_v41  ;;  %v1504_v41 = vor.u32 %v1502_v55, %v1050_v20  ;;  %v1064_v55 = vsel %vm1001_vm6, %v1052_v37, %v1063_v40  ;;  %v1066_v40 = vshrl.u32 %v3905_v60, 16 }
  0xaa   : > { %v4182_v52 = vpop.f32.mrf.mxu0 }
  0xab   : > { %v4180_v56 = vpop.f32.mrf.mxu2 }
  0xac   : > { %v4188_v11 = vpop.f32.mrf.mxu3  ;;  %v4190_v12 = vpop.f32.mrf.mxu1 }
  0xad   : > { %5155 = vst [vmem:[#allocation14_spill] sm:$0xff] %v4188_v11  ;;  %3575 = vmatmul.msk.bf16.gmra.mxu0 %vm1858_vm1, %v3935_v44  ;;  %v491_v44 = vadd.s32 144, %v3961_v24 }
  0xaf   : > { %3525 = vmatmul.msk.bf16.gmra.mxu1 %vm1858_vm1, %v4147_v31  ;;  %v635_v59 = vand.u32 15, %v491_v44 }
  0xb0   : > { %3541 = vmatmul.msk.bf16.gmra.mxu2 %vm1858_vm1, %v4192_v8 }
  0xb1   : > { %3558 = vmatmul.msk.bf16.gmra.mxu3 %vm1858_vm1, %v4196_v19  ;;  %vm907_vm7 = vcmp.eq.s32.totalorder %v635_v59, 0 }
  0xb2   : > { %v4211_v36 = vpop.f32.mrf.mxu0 }
  0xb3   : > { %v4209_v34 = vpop.f32.mrf.mxu2 }
  0xb4   : > { %v4213_v63 = vpop.f32.mrf.mxu3  ;;  %v4215_v47 = vpop.f32.mrf.mxu1 }
  0xb5   : > { %5158 = vst [vmem:[#allocation17_spill] sm:$0xff] %v4213_v63 }
  0xba   : > { %v4231_v32 = vpop.f32.mrf.mxu0 }
  0xbb   : > { %v4229_v13 = vpop.f32.mrf.mxu2 }
  0xbc   : > { %v4237_v10 = vpop.f32.mrf.mxu3  ;;  %v4239_v21 = vpop.f32.mrf.mxu1 }
  0xbd   : > { %5161 = vst [vmem:[#allocation18_spill] sm:$0xff] %v4237_v10  ;;  %3576 = vmatmul.msk.bf16.gmra.mxu0 %vm1858_vm1, %v3995_v58  ;;  %v621_v10 = vand.u32 15, %v489_v42  ;;  %v3455_v58 = vunpack.i.l.s16 %v1290_v48  ;;  %v1506_v42 = vsel %vm1484_vm4, %v1504_v41, %v1505_v17 }
  0xbe   : > { %v4290_v4 = vsel %vm1775_vm14, 0, %v1506_v42 }
  0xbf   : > { %3526 = vmatmul.msk.bf16.gmra.mxu1 %vm1858_vm1, %v4196_v19  ;;  %vm905_vm10 = vcmp.eq.s32.totalorder %v621_v10, 0  ;;  %vm1377_vm11 = vcmp.ne.s32.totalorder %v3455_v58, %v4016_v23  ;;  %v5169_v58 = vmov 0   ;;  %5171 = vst [vmem:[#allocation25_spill] sm:$0xff] %v4290_v4 }
  0xc0   : > { %3542 = vmatmul.msk.bf16.gmra.mxu2 %vm1858_vm1, %v4241_v28  ;;  %vm1228_vm15 = vmpackc.low %vm905_vm10, %vm905_vm10  ;;  %v1662_v10 = vsel %vm1630_vm13, 65537, %v5169_v58  ;;  %v4311_v28 = vrot.slane %v1066_v40, 7 }
  0xc1   : > { %3559 = vmatmul.msk.bf16.gmra.mxu3 %vm1858_vm1, %v4245_v33  ;;  %vm1379_vm0 = vmpackc.low %vm4024_vm12, %vm1377_vm11  ;;  %v1260_v41 = vsel %vm1228_vm15, 65537, %v5169_v58  ;;  %v1694_v37 = vunpack.c.l.b16 %v1662_v10 }
  0xc2   : > { %v4260_v16 = vpop.f32.mrf.mxu0  ;;  %v1292_v42 = vunpack.c.l.b16 %v1260_v41  ;;  %vm1230_vm11 = vmpackc.low %vm907_vm7, %vm907_vm7  ;;  %v492_v41 = vadd.s32 152, %v3961_v24 }
  0xc3   : > { %v4258_v51 = vpop.f32.mrf.mxu2  ;;  %v3488_v19 = vunpack.i.l.s16 %v1694_v37 }
  0xc4   : > { %5164 = vst [vmem:[#allocation21_spill] sm:$0xff] %v4258_v51  ;;  %v4262_v63 = vpop.f32.mrf.mxu3  ;;  %v4264_v11 = vpop.f32.mrf.mxu1 }
  0xc5   : > { %5165 = vst [vmem:[#allocation22_spill] sm:$0xff] %v4262_v63  ;;  %v4294_v63 = vsel %vm1379_vm0, 0, %v1064_v55  ;;  %v628_v55 = vand.u32 15, %v490_v30  ;;  %v1507_v30 = vor.u32 %v1505_v17, %v1058_v38  ;;  %vm1781_vm5 = vcmp.ne.s32.totalorder %v3488_v19, %v4019_v25 }
  0xc6   : > { %5172 = vst [vmem:[#allocation26_spill] sm:$0xff] %v4294_v63  ;;  %vm1782_vm10 = vmpackc.low %vm1781_vm5, %vm4046_vm2 }
  0xc7   : > { %vm4317_vm3 = vcmp.eq.s32.totalorder %v628_v55, 15  ;;  %v1262_v55 = vsel %vm1230_vm11, 65537, %v5169_v58 }
  0xc8   : > { %vm1632_vm9 = vmpackc.low %vm4317_vm3, %vm4317_vm3 }
  0xc9   : > { %v1664_v59 = vsel %vm1632_vm9, 65537, %v5169_v58 }
  0xca   : > { %v4280_v20 = vpop.f32.mrf.mxu0 }
  0xcb   : > { %v4278_v48 = vpop.f32.mrf.mxu2 }
  0xcc   : > { %5168 = vst [vmem:[#allocation23_spill] sm:$0xff] %v4278_v48  ;;  %v4286_v54 = vpop.f32.mrf.mxu3  ;;  %v4288_v1 = vpop.f32.mrf.mxu1 }
  0xcd   : > { %5170 = vst [vmem:[#allocation24_spill] sm:$0xff] %v4286_v54  ;;  %3577 = vmatmul.msk.bf16.gmra.mxu0 %vm1858_vm1, %v3872_v3  ;;  %v1069_v54 = vshll.u32 %v3905_v60, 16 }
  0xcf   : > { %3527 = vmatmul.msk.bf16.gmra.mxu1 %vm1858_vm1, %v4245_v33  ;;  %v3457_v33 = vunpack.i.l.s16 %v1292_v42  ;;  %v1071_v37 = vor.u32 %v1069_v54, %v4311_v28 }
  0xd0   : > { %3543 = vmatmul.msk.bf16.gmra.mxu2 %vm1858_vm1, %v4290_v4  ;;  %v1508_v4 = vrot.slane %v1069_v54, 1 }
  0xd1   : > { %3560 = vmatmul.msk.bf16.gmra.mxu3 %vm1858_vm1, %v4294_v63  ;;  %vm1384_vm8 = vcmp.ne.s32.totalorder %v3457_v33, %v4016_v23  ;;  %v1072_v19 = vsel %vm1001_vm6, %v1060_v14, %v1071_v37  ;;  %v1696_v14 = vunpack.c.l.b16 %v1664_v59 }
  0xd2   : > { %v4309_v10 = vpop.f32.mrf.mxu0  ;;  %v1509_v44 = vsel %vm1484_vm4, %v1507_v30, %v1508_v4  ;;  %vm1386_vm13 = vmpackc.low %vm4024_vm12, %vm1384_vm8  ;;  %v1510_v49 = vor.u32 %v1508_v4, %v1066_v40 }
  0xd3   : > { %v4307_v3 = vpop.f32.mrf.mxu2  ;;  %v4338_v54 = vsel %vm1782_vm10, 0, %v1509_v44  ;;  %v4342_v30 = vsel %vm1386_vm13, 0, %v1072_v19  ;;  %v1294_v44 = vunpack.c.l.b16 %v1262_v55  ;;  %v642_v19 = vand.u32 15, %v492_v41 }
  0xd4   : > { %5173 = vst [vmem:[#allocation27_spill] sm:$0xff] %v4307_v3  ;;  %v4313_v31 = vpop.f32.mrf.mxu3  ;;  %v4315_v8 = vpop.f32.mrf.mxu1  ;;  %v3490_v59 = vunpack.i.l.s16 %v1696_v14  ;;  %v5180_v3 = vshrl.u32 %v3945_v5, 16 }
  0xd5   : > { %5174 = vst [vmem:[#allocation28_spill] sm:$0xff] %v4313_v31  ;;  %v493_v31 = vadd.s32 160, %v3961_v24  ;;  %vm4360_vm14 = vcmp.eq.s32.totalorder %v642_v19, 15  ;;  %v5124_v19 = vshrl.u32 %v3997_v61, 16 }
  0xd6   : > { %5179 = vst [vmem:[#allocation31_spill] sm:$0xff] %v4338_v54  ;;  %v4358_v48 = vrot.slane %v5180_v3, 7  ;;  %vm1788_vm15 = vcmp.ne.s32.totalorder %v3490_v59, %v4019_v25  ;;  %vm1634_vm5 = vmpackc.low %vm4360_vm14, %vm4360_vm14  ;;  %v495_v59 = vadd.s32 176, %v3961_v24 }
  0xd7   : > { %vm1789_vm7 = vmpackc.low %vm1788_vm15, %vm4046_vm2  ;;  %v1666_v27 = vsel %vm1634_vm5, 65537, %v5169_v58 }
  0xda   : > { %v2438_v38 = vpop.f32.mrf.mxu0 }
  0xdb   : > { %v4330_v42 = vpop.f32.mrf.mxu2 }
  0xdc   : > { %5177 = vst [vmem:[#allocation29_spill] sm:$0xff] %v4330_v42  ;;  %v4336_v33 = vpop.f32.mrf.mxu3  ;;  %v2042_v17 = vpop.f32.mrf.mxu1 }
  0xdd   : > { %5178 = vst [vmem:[#allocation30_spill] sm:$0xff] %v4336_v33  ;;  %3578 = vmatmul.msk.bf16.gmra.mxu0 %vm1858_vm1, %v3905_v60  ;;  %v2043_v33 = vadd.f32 %v2042_v17, %v4131_v15  ;;  %v1077_v60 = vshll.u32 %v3945_v5, 16 }
  0xdf   : > { %3528 = vmatmul.msk.bf16.gmra.mxu1 %vm1858_vm1, %v4294_v63  ;;  %v649_v63 = vand.u32 15, %v493_v31  ;;  %v1511_v41 = vrot.slane %v1077_v60, 1  ;;  %v1079_v14 = vor.u32 %v1077_v60, %v4358_v48 }
  0xe0   : > { %3544 = vmatmul.msk.bf16.gmra.mxu2 %vm1858_vm1, %v4338_v54  ;;  %v3459_v54 = vunpack.i.l.s16 %v1294_v44 }
  0xe1   : > { %3561 = vmatmul.msk.bf16.gmra.mxu3 %vm1858_vm1, %v4342_v30  ;;  %vm4367_vm0 = vcmp.eq.s32.totalorder %v649_v63, 0  ;;  %v1080_v63 = vsel %vm1001_vm6, %v4311_v28, %v1079_v14  ;;  %v1698_v28 = vunpack.c.l.b16 %v1666_v27 }
  0xe2   : > { %v2440_v37 = vpop.f32.mrf.mxu0  ;;  %vm1391_vm3 = vcmp.ne.s32.totalorder %v3459_v54, %v4016_v23  ;;  %vm1232_vm8 = vmpackc.low %vm4367_vm0, %vm4367_vm0 }
  0xe3   : > { %v2181_v42 = vpop.f32.mrf.mxu2  ;;  %vm1393_vm9 = vmpackc.low %vm4024_vm12, %vm1391_vm3  ;;  %v3492_v14 = vunpack.i.l.s16 %v1698_v28 }
  0xe4   : > { %v2261_v51 = vadd.f32 %v2181_v42, %v2043_v33  ;;  %v2310_v2 = vpop.f32.mrf.mxu3  ;;  %v2044_v55 = vpop.f32.mrf.mxu1  ;;  %v4393_v44 = vsel %vm1393_vm9, 0, %v1080_v63  ;;  %v663_v63 = vand.u32 15, %v495_v59 }
  0xe5   : > { %v2045_v17 = vadd.f32 %v2044_v55, %v4159_v35  ;;  %vm1795_vm11 = vcmp.ne.s32.totalorder %v3492_v14, %v4019_v25 }
  0xe6   : > { %v2390_v15 = vadd.f32 %v2310_v2, %v2261_v51  ;;  %v1512_v2 = vsel %vm1484_vm4, %v1510_v49, %v1511_v41  ;;  %v1264_v49 = vsel %vm1232_vm8, 65537, %v5169_v58  ;;  %vm4421_vm13 = vcmp.eq.s32.totalorder %v663_v63, 0  ;;  %vm1796_vm0 = vmpackc.low %vm1795_vm11, %vm4046_vm2 }
  0xe7   : > { %v4388_v42 = vsel %vm1789_vm7, 0, %v1512_v2  ;;  %v1296_v55 = vunpack.c.l.b16 %v1264_v49  ;;  %vm1234_vm3 = vmpackc.low %vm4421_vm13, %vm4421_vm13 }
  0xe8   : > { %v4375_v31 = vadd.f32 %v2438_v38, %v2390_v15  ;;  %v494_v38 = vadd.s32 168, %v3961_v24 }
  0xea   : > { %v2443_v35 = vpop.f32.mrf.mxu0 }
  0xeb   : > { %v2183_v60 = vpop.f32.mrf.mxu2 }
  0xec   : > { %v2262_v51 = vadd.f32 %v2183_v60, %v2045_v17  ;;  %v2312_v4 = vpop.f32.mrf.mxu3  ;;  %v2047_v40 = vpop.f32.mrf.mxu1  ;;  %v1085_v17 = vshll.u32 %v3997_v61, 16  ;;  %v4410_v60 = vrot.slane %v5124_v19, 7 }
  0xed   : > { %v2048_v54 = vadd.f32 %v2047_v40, %v4182_v52  ;;  %3579 = vmatmul.msk.bf16.gmra.mxu0 %vm1858_vm1, %v3945_v5  ;;  %v656_v52 = vand.u32 15, %v494_v38 }
  0xee   : > { %v2391_v33 = vadd.f32 %v2312_v4, %v2262_v51  ;;  %v3461_v4 = vunpack.i.l.s16 %v1296_v55  ;;  %v1087_v19 = vor.u32 %v1085_v17, %v4410_v60 }
  0xef   : > { %3529 = vmatmul.msk.bf16.gmra.mxu1 %vm1858_vm1, %v4342_v30  ;;  %vm4414_vm10 = vcmp.eq.s32.totalorder %v656_v52, 15 }
  0xf0   : > { %3545 = vmatmul.msk.bf16.gmra.mxu2 %vm1858_vm1, %v4388_v42  ;;  %v4403_v15 = vadd.f32 %v2440_v37, %v2391_v33  ;;  %v5186_v37 = vshrl.u32 %v3945_v5, 16  ;;  %vm1398_vm14 = vcmp.ne.s32.totalorder %v3461_v4, %v4016_v23  ;;  %vm1636_vm15 = vmpackc.low %vm4414_vm10, %vm4414_vm10  ;;  %v1088_v52 = vsel %vm1001_vm6, %v4358_v48, %v1087_v19 }
  0xf1   : > { %3562 = vmatmul.msk.bf16.gmra.mxu3 %vm1858_vm1, %v4393_v44  ;;  %vm1400_vm5 = vmpackc.low %vm4024_vm12, %vm1398_vm14  ;;  %v5125_v19 = vshrl.u32 %v3875_v7, 16 }
  0xf2   : > { %5185 = vst [vmem:[#allocation32_spill] sm:$0xff] %v4403_v15  ;;  %v2445_v2 = vpop.f32.mrf.mxu0  ;;  %v1513_v49 = vor.u32 %v1511_v41, %v5186_v37  ;;  %v1514_v15 = vrot.slane %v1085_v17, 1  ;;  %v4447_v37 = vsel %vm1400_vm5, 0, %v1088_v52 }
  0xf3   : > { %v2186_v3 = vpop.f32.mrf.mxu2  ;;  %v4464_v52 = vrot.slane %v5125_v19, 7 }
  0xf4   : > { %v2263_v27 = vadd.f32 %v2186_v3, %v2048_v54  ;;  %v2315_v51 = vpop.f32.mrf.mxu3  ;;  %v2049_v40 = vpop.f32.mrf.mxu1 }
  0xf5   : > { %v2050_v28 = vadd.f32 %v2049_v40, %v4211_v36  ;;  %v1515_v36 = vsel %vm1484_vm4, %v1513_v49, %v1514_v15  ;;  %v497_v49 = vadd.s32 192, %v3961_v24 }
  0xf6   : > { %v2392_v38 = vadd.f32 %v2315_v51, %v2263_v27  ;;  %v4442_v63 = vsel %vm1796_vm0, 0, %v1515_v36  ;;  %v1266_v27 = vsel %vm1234_vm3, 65537, %v5169_v58  ;;  %v496_v51 = vadd.s32 184, %v3961_v24 }
  0xf7   : > { %v1298_v33 = vunpack.c.l.b16 %v1266_v27 }
  0xf8   : > { %v4429_v41 = vadd.f32 %v2443_v35, %v2392_v38  ;;  %v1668_v35 = vsel %vm1636_vm15, 65537, %v5169_v58 }
  0xf9   : > { %v1700_v48 = vunpack.c.l.b16 %v1668_v35  ;;  %v677_v35 = vand.u32 15, %v497_v49 }
  0xfa   : > { %5191 = vst [vmem:[#allocation33_spill] sm:$0xff] %v4429_v41  ;;  %v2448_v55 = vpop.f32.mrf.mxu0 }
  0xfb   : > { %v2188_v59 = vpop.f32.mrf.mxu2  ;;  %v3494_v54 = vunpack.i.l.s16 %v1700_v48  ;;  %vm4475_vm9 = vcmp.eq.s32.totalorder %v677_v35, 0 }
  0xfc   : > { %v2264_v17 = vadd.f32 %v2188_v59, %v2050_v28  ;;  %v2317_v14 = vpop.f32.mrf.mxu3  ;;  %v2052_v3 = vpop.f32.mrf.mxu1  ;;  %v1093_v28 = vshll.u32 %v3875_v7, 16  ;;  %vm1236_vm14 = vmpackc.low %vm4475_vm9, %vm4475_vm9 }
  0xfd   : > { %v2053_v40 = vadd.f32 %v2052_v3, %v4231_v32  ;;  %3580 = vmatmul.msk.bf16.gmra.mxu0 %vm1858_vm1, %v3997_v61  ;;  %v670_v32 = vand.u32 15, %v496_v51  ;;  %v3463_v3 = vunpack.i.l.s16 %v1298_v33  ;;  %vm1802_vm8 = vcmp.ne.s32.totalorder %v3494_v54, %v4019_v25 }
  0xfe   : > { %v2393_v4 = vadd.f32 %v2317_v14, %v2264_v17  ;;  %v1517_v41 = vrot.slane %v1093_v28, 1  ;;  %v1095_v19 = vor.u32 %v1093_v28, %v4464_v52  ;;  %vm1803_vm13 = vmpackc.low %vm1802_vm8, %vm4046_vm2  ;;  %v1268_v35 = vsel %vm1236_vm14, 65537, %v5169_v58 }
  0xff   : > { %3530 = vmatmul.msk.bf16.gmra.mxu1 %vm1858_vm1, %v4393_v44  ;;  %vm4468_vm7 = vcmp.eq.s32.totalorder %v670_v32, 15  ;;  %vm1405_vm10 = vcmp.ne.s32.totalorder %v3463_v3, %v4016_v23 }
 0x100   : > { %3546 = vmatmul.msk.bf16.gmra.mxu2 %vm1858_vm1, %v4442_v63  ;;  %v4457_v38 = vadd.f32 %v2445_v2, %v2393_v4  ;;  %v5193_v2 = vshrl.u32 %v3997_v61, 16  ;;  %vm1638_vm11 = vmpackc.low %vm4468_vm7, %vm4468_vm7  ;;  %v1096_v32 = vsel %vm1001_vm6, %v4410_v60, %v1095_v19  ;;  %v5126_v19 = vshrl.u32 %v3911_v6, 16 }
 0x101   : > { %3563 = vmatmul.msk.bf16.gmra.mxu3 %vm1858_vm1, %v4447_v37  ;;  %vm1407_vm15 = vmpackc.low %vm4024_vm12, %vm1405_vm10 }
 0x102   : > { %5192 = vst [vmem:[#allocation34_spill] sm:$0xff] %v4457_v38  ;;  %v2450_v59 = vpop.f32.mrf.mxu0  ;;  %v1516_v4 = vor.u32 %v1514_v15, %v5193_v2  ;;  %v499_v2 = vadd.s32 208, %v3961_v24 }
 0x103   : > { %v2191_v36 = vpop.f32.mrf.mxu2 }
 0x104   : > { %v2265_v17 = vadd.f32 %v2191_v36, %v2053_v40  ;;  %v2320_v14 = vpop.f32.mrf.mxu3  ;;  %v2054_v27 = vpop.f32.mrf.mxu1 }
 0x105   : > { %v2055_v48 = vadd.f32 %v2054_v27, %v4260_v16  ;;  %v1518_v16 = vsel %vm1484_vm4, %v1516_v4, %v1517_v41  ;;  %v4501_v27 = vsel %vm1407_vm15, 0, %v1096_v32  ;;  %v1300_v4 = vunpack.c.l.b16 %v1268_v35 }
 0x106   : > { %v2394_v51 = vadd.f32 %v2320_v14, %v2265_v17  ;;  %v4496_v36 = vsel %vm1803_vm13, 0, %v1518_v16  ;;  %v498_v17 = vadd.s32 200, %v3961_v24  ;;  %5199 = vst [vmem:[#allocation36_spill] sm:$0xff] %v4501_v27  ;;  %v4518_v32 = vrot.slane %v5126_v19, 7 }
 0x108   : > { %v4483_v15 = vadd.f32 %v2448_v55, %v2394_v51  ;;  %v1670_v55 = vsel %vm1638_vm11, 65537, %v5169_v58 }
 0x109   : > { %v1702_v60 = vunpack.c.l.b16 %v1670_v55  ;;  %v691_v55 = vand.u32 15, %v499_v2 }
 0x10a   : > { %5198 = vst [vmem:[#allocation35_spill] sm:$0xff] %v4483_v15  ;;  %v2453_v33 = vpop.f32.mrf.mxu0 }
 0x10b   : > { %v2193_v49 = vpop.f32.mrf.mxu2  ;;  %v3496_v40 = vunpack.i.l.s16 %v1702_v60  ;;  %vm4529_vm5 = vcmp.eq.s32.totalorder %v691_v55, 0 }
 0x10c   : > { %v2266_v38 = vadd.f32 %v2193_v49, %v2055_v48  ;;  %v2322_v28 = vpop.f32.mrf.mxu3  ;;  %v2057_v54 = vpop.f32.mrf.mxu1  ;;  %v1101_v48 = vshll.u32 %v3911_v6, 16  ;;  %vm1238_vm10 = vmpackc.low %vm4529_vm5, %vm4529_vm5 }
 0x10d   : > { %v2058_v3 = vadd.f32 %v2057_v54, %v4280_v20  ;;  %3581 = vmatmul.msk.bf16.gmra.mxu0 %vm1858_vm1, %v3875_v7  ;;  %v684_v20 = vand.u32 15, %v498_v17  ;;  %v3465_v54 = vunpack.i.l.s16 %v1300_v4  ;;  %vm1809_vm3 = vcmp.ne.s32.totalorder %v3496_v40, %v4019_v25 }
 0x10e   : > { %v2395_v14 = vadd.f32 %v2322_v28, %v2266_v38  ;;  %v1520_v15 = vrot.slane %v1101_v48, 1  ;;  %v1103_v19 = vor.u32 %v1101_v48, %v4518_v32  ;;  %vm1810_vm9 = vmpackc.low %vm1809_vm3, %vm4046_vm2  ;;  %v500_v40 = vadd.s32 216, %v3961_v24 }
 0x10f   : > { %3531 = vmatmul.msk.bf16.gmra.mxu1 %vm1858_vm1, %v4447_v37  ;;  %vm4522_vm0 = vcmp.eq.s32.totalorder %v684_v20, 15  ;;  %vm1412_vm7 = vcmp.ne.s32.totalorder %v3465_v54, %v4016_v23 }
 0x110   : > { %3547 = vmatmul.msk.bf16.gmra.mxu2 %vm1858_vm1, %v4496_v36  ;;  %v4511_v51 = vadd.f32 %v2450_v59, %v2395_v14  ;;  %v5201_v59 = vshrl.u32 %v3875_v7, 16  ;;  %vm1640_vm8 = vmpackc.low %vm4522_vm0, %vm4522_vm0  ;;  %v1104_v20 = vsel %vm1001_vm6, %v4464_v52, %v1103_v19  ;;  %v5129_v19 = vshrl.u32 %v3953_v18, 16 }
 0x111   : > { %3564 = vmatmul.msk.bf16.gmra.mxu3 %vm1858_vm1, %v4501_v27  ;;  %vm1414_vm11 = vmpackc.low %vm4024_vm12, %vm1412_vm7 }
 0x112   : > { %5200 = vst [vmem:[#allocation37_spill] sm:$0xff] %v4511_v51  ;;  %v2455_v49 = vpop.f32.mrf.mxu0  ;;  %v1519_v14 = vor.u32 %v1517_v41, %v5201_v59  ;;  %v4554_v54 = vsel %vm1414_vm11, 0, %v1104_v20 }
 0x113   : > { %v2196_v16 = vpop.f32.mrf.mxu2 }
 0x114   : > { %v2267_v38 = vadd.f32 %v2196_v16, %v2058_v3  ;;  %v2325_v28 = vpop.f32.mrf.mxu3  ;;  %v2059_v35 = vpop.f32.mrf.mxu1 }
 0x115   : > { %v2060_v60 = vadd.f32 %v2059_v35, %v4309_v10  ;;  %v1521_v10 = vsel %vm1484_vm4, %v1519_v14, %v1520_v15  ;;  %v501_v35 = vadd.s32 224, %v3961_v24  ;;  %v698_v14 = vand.u32 15, %v500_v40 }
 0x116   : > { %v2396_v17 = vadd.f32 %v2325_v28, %v2267_v38  ;;  %v4551_v55 = vsel %vm1810_vm9, 0, %v1521_v10  ;;  %v1270_v38 = vsel %vm1238_vm10, 65537, %v5169_v58  ;;  %v1109_v10 = vshll.u32 %v3953_v18, 16 }
 0x117   : > { %v1302_v59 = vunpack.c.l.b16 %v1270_v38  ;;  %vm4575_vm13 = vcmp.eq.s32.totalorder %v698_v14, 15 }
 0x118   : > { %v4537_v41 = vadd.f32 %v2453_v33, %v2396_v17  ;;  %v1672_v33 = vsel %vm1640_vm8, 65537, %v5169_v58  ;;  %v3733_v17 = vld [vmem:[%s3831_s12 + $0x78] sm:$0xff]   ;;  %vm1642_vm15 = vmpackc.low %vm4575_vm13, %vm4575_vm13  ;;  %s265_s12 = scalar_lea.vmem %s5099_s5, %s5267_s22 }
 0x119   : > { %v1704_v52 = vunpack.c.l.b16 %v1672_v33  ;;  %v3717_v38 = vunpack.c.l.bf16 %v3733_v17  ;;  %v3718_v40 = vunpack.c.h.bf16 %v3733_v17 }
 0x11a   : > { %5206 = vst [vmem:[#allocation38_spill] sm:$0xff] %v4537_v41  ;;  %v2458_v4 = vpop.f32.mrf.mxu0 }
 0x11b   : > { %v2198_v2 = vpop.f32.mrf.mxu2 }
 0x11c   : > { %v2268_v51 = vadd.f32 %v2198_v2, %v2060_v60  ;;  %v2327_v48 = vpop.f32.mrf.mxu3  ;;  %v2062_v16 = vpop.f32.mrf.mxu1  ;;  %v3498_v2 = vunpack.i.l.s16 %v1704_v52  ;;  %v5210_v52 = vshrl.u32 %v3911_v6, 16 }
 0x11d   : > { %3582 = vmatmul.msk.bf16.gmra.mxu0 %vm1858_vm1, %v3911_v6  ;;  %v2063_v3 = vadd.f32 %v2062_v16, %v4141_v22 }
 0x11e   : > { %v2397_v28 = vadd.f32 %v2327_v48, %v2268_v51  ;;  %v4573_v51 = vrot.slane %v5129_v19, 7  ;;  %v705_v48 = vand.u32 15, %v501_v35  ;;  %v1522_v7 = vor.u32 %v1520_v15, %v5210_v52 }
 0x11f   : > { %3532 = vmatmul.msk.bf16.gmra.mxu1 %vm1858_vm1, %v4501_v27  ;;  %v1523_v27 = vrot.slane %v1109_v10, 1  ;;  %vm1816_vm14 = vcmp.ne.s32.totalorder %v3498_v2, %v4019_v25 }
 0x120   : > { %3548 = vmatmul.msk.bf16.gmra.mxu2 %vm1858_vm1, %v4551_v55  ;;  %v4565_v60 = vadd.f32 %v2455_v49, %v2397_v28  ;;  %v3467_v28 = vunpack.i.l.s16 %v1302_v59  ;;  %v1111_v19 = vor.u32 %v1109_v10, %v4573_v51  ;;  %vm4586_vm0 = vcmp.eq.s32.totalorder %v705_v48, 0  ;;  %vm1817_vm5 = vmpackc.low %vm1816_vm14, %vm4046_vm2 }
 0x121   : > { %3565 = vmatmul.msk.bf16.gmra.mxu3 %vm1858_vm1, %v4554_v54  ;;  %vm1240_vm7 = vmpackc.low %vm4586_vm0, %vm4586_vm0 }
 0x122   : > { %5207 = vst [vmem:[#allocation39_spill] sm:$0xff] %v4565_v60  ;;  %v2460_v33 = vpop.f32.mrf.mxu0  ;;  %vm1419_vm3 = vcmp.ne.s32.totalorder %v3467_v28, %v4016_v23  ;;  %v1524_v60 = vsel %vm1484_vm4, %v1522_v7, %v1523_v27 }
 0x123   : > { %v2201_v20 = vpop.f32.mrf.mxu2  ;;  %vm1421_vm8 = vmpackc.low %vm4024_vm12, %vm1419_vm3 }
 0x124   : > { %v2269_v41 = vadd.f32 %v2201_v20, %v2063_v3  ;;  %v2330_v49 = vpop.f32.mrf.mxu3  ;;  %v2064_v22 = vpop.f32.mrf.mxu1  ;;  %v1674_v3 = vsel %vm1642_vm15, 65537, %v5169_v58  ;;  %v1112_v20 = vsel %vm1001_vm6, %v4518_v32, %v1111_v19  ;;  %v502_v32 = vadd.s32 232, %v3961_v24 }
 0x125   : > { %v2065_v17 = vadd.f32 %v2064_v22, %v4166_v43  ;;  %v3750_v43 = vld [vmem:[%s5096_s2] ss:$0 sm:$0xff]  ;;  %v1706_v28 = vunpack.c.l.b16 %v1674_v3  ;;  %v1272_v22 = vsel %vm1240_vm7, 65537, %v5169_v58  ;;  %v4614_v52 = vsel %vm1421_vm8, 0, %v1112_v20 }
 0x126   : > { %v2398_v16 = vadd.f32 %v2330_v49, %v2269_v41  ;;  %v3749_v41 = vld [vmem:[%s5095_s1] ss:$0 sm:$0xff]  ;;  %v4611_v49 = vsel %vm1817_vm5, 0, %v1524_v60  ;;  %v5131_v19 = vshrl.u32 %v3999_v0, 16  ;;  %v712_v20 = vand.u32 15, %v502_v32 }
 0x127   : > { %v370_v59 = vmul.f32 %v3749_v41, %v3717_v38  ;;  %v371_v14 = vmul.f32 %v3749_v41, %v3718_v40  ;;  %v3500_v60 = vunpack.i.l.s16 %v1706_v28 }
 0x128   : > { %v4594_v15 = vadd.f32 %v2458_v4, %v2398_v16  ;;  %vm4638_vm10 = vcmp.eq.s32.totalorder %v712_v20, 15 }
 0x129   : > { %v406_v4 = vadd.f32 %v3750_v43, %v370_v59  ;;  %v407_v7 = vadd.f32 %v3750_v43, %v371_v14  ;;  %v503_v59 = vadd.s32 240, %v3961_v24  ;;  %v1304_v14 = vunpack.c.l.b16 %v1272_v22  ;;  %vm1644_vm15 = vmpackc.low %vm4638_vm10, %vm4638_vm10 }
 0x12a   : > { %5213 = vst [vmem:[#allocation40_spill] sm:$0xff] %v4594_v15  ;;  %v2463_v2 = vpop.f32.mrf.mxu0  ;;  %vm1823_vm9 = vcmp.ne.s32.totalorder %v3500_v60, %v4019_v25 }
 0x12b   : > { %v2203_v10 = vpop.f32.mrf.mxu2  ;;  %v438_v35 = vmax.f32 %v406_v4, 0.0  ;;  %v439_v41 = vmax.f32 %v407_v7, 0.0  ;;  %v4633_v7 = vrot.slane %v5131_v19, 7  ;;  %v719_v22 = vand.u32 15, %v503_v59  ;;  %vm4649_vm13 = vmpackc.low %vm1823_vm9, %vm4046_vm2 }
 0x12c   : > { %v2270_v48 = vadd.f32 %v2203_v10, %v2065_v17  ;;  %v2332_v38 = vpop.f32.mrf.mxu3  ;;  %v2067_v40 = vpop.f32.mrf.mxu1  ;;  %v1117_v10 = vshll.u32 %v3999_v0, 16 }
 0x12d   : > { %3583 = vmatmul.msk.bf16.gmra.mxu0 %vm1858_vm1, %v3953_v18  ;;  %v2068_v3 = vadd.f32 %v2067_v40, %v4190_v12  ;;  %v5215_v12 = vshrl.u32 %v3953_v18, 16  ;;  %vm4643_vm11 = vcmp.eq.s32.totalorder %v719_v22, 0 }
 0x12e   : > { %v2399_v16 = vadd.f32 %v2332_v38, %v2270_v48  ;;  %v470_v48 = vpack.c.bf16 %v438_v35, %v438_v35  ;;  %v471_v38 = vpack.c.bf16 %v439_v41, %v439_v41  ;;  %v1526_v32 = vrot.slane %v1117_v10, 1  ;;  %vm1242_vm0 = vmpackc.low %vm4643_vm11, %vm4643_vm11 }
 0x12f   : > { %3533 = vmatmul.msk.bf16.gmra.mxu1 %vm1858_vm1, %v4554_v54  ;;  %v1525_v40 = vor.u32 %v1523_v27, %v5215_v12  ;;  %v1119_v19 = vor.u32 %v1117_v10, %v4633_v7  ;;  %vm1548_vm11 = vcmask 1047552  }
 0x130   : > { %3549 = vmatmul.msk.bf16.gmra.mxu2 %vm1858_vm1, %v4611_v49  ;;  %v4625_v17 = vadd.f32 %v2460_v33, %v2399_v16  ;;  %v983_v35 = vunpack.c.l.b16 %v470_v48  ;;  %v984_v41 = vunpack.c.l.b16 %v471_v38  ;;  %v1274_v38 = vsel %vm1242_vm0, 65537, %v5169_v58 }
 0x131   : > { %3566 = vmatmul.msk.bf16.gmra.mxu3 %vm1858_vm1, %v4614_v52 }
 0x132   : > { %5214 = vst [vmem:[#allocation41_spill] sm:$0xff] %v4625_v17  ;;  %v2465_v4 = vpop.f32.mrf.mxu0  ;;  %v3469_v17 = vunpack.i.l.s16 %v1304_v14 }
 0x133   : > { %v2206_v43 = vpop.f32.mrf.mxu2 }
 0x134   : > { %v2271_v33 = vadd.f32 %v2206_v43, %v2068_v3  ;;  %v2335_v16 = vpop.f32.mrf.mxu3  ;;  %v2069_v15 = vpop.f32.mrf.mxu1  ;;  %vm1426_vm14 = vcmp.ne.s32.totalorder %v3469_v17, %v4016_v23  ;;  %v1527_v3 = vsel %vm1484_vm4, %v1525_v40, %v1526_v32  ;;  %v1120_v43 = vsel %vm1001_vm6, %v4573_v51, %v1119_v19 }
 0x135   : > { %v2070_v60 = vadd.f32 %v2069_v15, %v4215_v47  ;;  %vm1428_vm3 = vmpackc.low %vm4024_vm12, %vm1426_vm14  ;;  %v1676_v47 = vsel %vm1644_vm15, 65537, %v5169_v58  ;;  %v4673_v48 = vsel %vm4649_vm13, 0, %v1527_v3 }
 0x136   : > { %v2400_v28 = vadd.f32 %v2335_v16, %v2271_v33  ;;  %v4676_v33 = vsel %vm1428_vm3, 0, %v1120_v43  ;;  %v1708_v51 = vunpack.c.l.b16 %v1676_v47  ;;  %v1306_v16 = vunpack.c.l.b16 %v1274_v38  ;;  %vm4952_vm13 = vmand %vm1548_vm11, %vm1484_vm4 }
 0x138   : > { %v4654_v27 = vadd.f32 %v2463_v2, %v2400_v28  ;;  %v4668_v2 = vpack.c.b16 %v984_v41, %v983_v35  ;;  %v3502_v59 = vunpack.i.l.s16 %v1708_v51 }
 0x13a   : > { %v2468_v20 = vpop.f32.mrf.mxu0  ;;  %v5132_v19 = vshrl.u32 %v4668_v2, 16  ;;  %v1125_v40 = vshll.u32 %v4668_v2, 16  ;;  %vm1830_vm5 = vcmp.ne.s32.totalorder %v3502_v59, %v4019_v25 }
 0x13b   : > { %v2208_v10 = vpop.f32.mrf.mxu2  ;;  %vm1831_vm8 = vmpackc.low %vm1830_vm5, %vm4046_vm2 }
 0x13c   : > { %v2272_v24 = vadd.f32 %v2208_v10, %v2070_v60  ;;  %v2337_v17 = vpop.f32.mrf.mxu3  ;;  %v2072_v15 = vpop.f32.mrf.mxu1  ;;  %v1124_v14 = vrot.slane %v5132_v19, 7  ;;  %v3471_v10 = vunpack.i.l.s16 %v1306_v16  ;;  %v4695_v47 = vrot.slane %v1125_v40, 1 }
 0x13d   : > { %3584 = vmatmul.msk.bf16.gmra.mxu0 %vm1858_vm1, %v3999_v0  ;;  %v2073_v12 = vadd.f32 %v2072_v15, %v4239_v21 }
 0x13e   : > { %v2401_v22 = vadd.f32 %v2337_v17, %v2272_v24  ;;  %v1127_v21 = vor.u32 %v1125_v40, %v1124_v14  ;;  %vm1433_vm7 = vcmp.ne.s32.totalorder %v3471_v10, %v4016_v23 }
 0x13f   : > { %3534 = vmatmul.msk.bf16.gmra.mxu1 %vm1858_vm1, %v4614_v52  ;;  %vm1435_vm9 = vmpackc.low %vm4024_vm12, %vm1433_vm7 }
 0x140   : > { %3550 = vmatmul.msk.bf16.gmra.mxu2 %vm1858_vm1, %v4673_v48  ;;  %v4685_v28 = vadd.f32 %v2465_v4, %v2401_v22  ;;  %v5222_v4 = vshrl.u32 %v3999_v0, 16 }
 0x141   : > { %3567 = vmatmul.msk.bf16.gmra.mxu3 %vm1858_vm1, %v4676_v33 }
 0x142   : > { %v2470_v41 = vpop.f32.mrf.mxu0  ;;  %v1528_v17 = vor.u32 %v1526_v32, %v5222_v4  ;;  %v1128_v32 = vsel %vm1001_vm6, %v4633_v7, %v1127_v21  ;;  %vm3089_vm6 = vcmask 27648  }
 0x143   : > { %v2211_v35 = vpop.f32.mrf.mxu2 }
 0x144   : > { %v2273_v60 = vadd.f32 %v2211_v35, %v2073_v12  ;;  %v2340_v3 = vpop.f32.mrf.mxu3  ;;  %v2074_v43 = vpop.f32.mrf.mxu1  ;;  %v1530_v22 = vsel %vm1484_vm4, %v1528_v17, %v4695_v47  ;;  %v4712_v35 = vsel %vm1435_vm9, 0, %v1128_v32 }
 0x145   : > { %v2075_v38 = vadd.f32 %v2074_v43, %v4264_v11  ;;  %v4710_v40 = vsel %vm1831_vm8, 0, %v1530_v22 }
 0x146   : > { %v2402_v24 = vadd.f32 %v2340_v3, %v2273_v60 }
 0x148   : > { %v4699_v15 = vadd.f32 %v2468_v20, %v2402_v24 }
 0x14a   : > { %v2473_v16 = vpop.f32.mrf.mxu0 }
 0x14b   : > { %v2213_v51 = vpop.f32.mrf.mxu2 }
 0x14c   : > { %v2274_v12 = vadd.f32 %v2213_v51, %v2075_v38  ;;  %v2342_v23 = vpop.f32.mrf.mxu3  ;;  %v2077_v20 = vpop.f32.mrf.mxu1 }
 0x14d   : > { %3585 = vmatmul.msk.bf16.gmra.mxu0 %vm1858_vm1, %v4668_v2  ;;  %v2078_v26 = vadd.f32 %v2077_v20, %v4288_v1 }
 0x14e   : > { %v2403_v11 = vadd.f32 %v2342_v23, %v2274_v12 }
 0x14f   : > { %3535 = vmatmul.msk.bf16.gmra.mxu1 %vm1858_vm1, %v4676_v33 }
 0x150   : > { %3551 = vmatmul.msk.bf16.gmra.mxu2 %vm1858_vm1, %v4710_v40  ;;  %v4720_v7 = vadd.f32 %v2470_v41, %v2403_v11 }
 0x151   : > { %3568 = vmatmul.msk.bf16.gmra.mxu3 %vm1858_vm1, %v4712_v35 }
 0x152   : > { %v2475_v14 = vpop.f32.mrf.mxu0 }
 0x153   : > { %v2216_v59 = vpop.f32.mrf.mxu2 }
 0x154   : > { %v2275_v60 = vadd.f32 %v2216_v59, %v2078_v26  ;;  %v2345_v3 = vpop.f32.mrf.mxu3  ;;  %v2079_v10 = vpop.f32.mrf.mxu1 }
 0x155   : > { %v2080_v4 = vadd.f32 %v2079_v10, %v4315_v8 }
 0x156   : > { %v2404_v43 = vadd.f32 %v2345_v3, %v2275_v60 }
 0x158   : > { %v4725_v24 = vadd.f32 %v2473_v16, %v2404_v43 }
 0x15a   : > { %v2478_v21 = vpop.f32.mrf.mxu0 }
 0x15b   : > { %v2218_v17 = vpop.f32.mrf.mxu2 }
 0x15c   : > { %v2276_v38 = vadd.f32 %v2218_v17, %v2080_v4  ;;  %v2347_v41 = vpop.f32.mrf.mxu3  ;;  %v2082_v22 = vpop.f32.mrf.mxu1 }
 0x15d   : > { %3636 = vmatmul.msk.bf16.vlgmr.msra.gmra.mxu0 %vm1858_vm1, %v4087_v9  ;;  %v2083_v8 = vadd.f32 %v2082_v22, %v4162_v39 }
 0x15e   : > { %v2405_v51 = vadd.f32 %v2347_v41, %v2276_v38 }
 0x15f   : > { %3587 = vmatmul.msk.bf16.vlgmr.msra.gmra.mxu1 %vm1858_vm1, %v4062_v50 }
 0x160   : > { %3604 = vmatmul.msk.bf16.vlgmr.msra.gmra.mxu2 %vm1858_vm1, %v4066_v53  ;;  %v4734_v1 = vadd.f32 %v2475_v14, %v2405_v51 }
 0x161   : > { %3620 = vmatmul.msk.bf16.vlgmr.msra.gmra.mxu3 %vm1858_vm1, %v3942_v62 }
 0x162   : > { %v2480_v32 = vpop.f32.mrf.mxu0 }
 0x163   : > { %v2221_v16 = vpop.f32.mrf.mxu2 }
 0x164   : > { %v2277_v12 = vadd.f32 %v2221_v16, %v2083_v8  ;;  %v2350_v23 = vpop.f32.mrf.mxu3  ;;  %v2084_v20 = vpop.f32.mrf.mxu1 }
 0x165   : > { %v2085_v50 = vadd.f32 %v2084_v20, %v4180_v56 }
 0x166   : > { %v2406_v11 = vadd.f32 %v2350_v23, %v2277_v12  ;;  %v5223_v12 = vld [vmem:[#allocation11_spill] sm:$0xff]  ;;  %v5225_v23 = vld [vmem:[#allocation2_spill] sm:$0xff] }
 0x168   : > { %v4739_v26 = vadd.f32 %v2478_v21, %v2406_v11 }
 0x16a   : > { %v2483_v60 = vpop.f32.mrf.mxu0 }
 0x16b   : > { %v2223_v59 = vpop.f32.mrf.mxu2 }
 0x16c   : > { %v2278_v53 = vadd.f32 %v2223_v59, %v2085_v50  ;;  %v2352_v14 = vpop.f32.mrf.mxu3  ;;  %v2087_v3 = vpop.f32.mrf.mxu1 }
 0x16d   : > { %3637 = vmatmul.msk.bf16.gmra.mxu0 %vm1858_vm1, %v4113_v46  ;;  %v2088_v39 = vadd.f32 %v2087_v3, %v4209_v34 }
 0x16e   : > { %v2407_v10 = vadd.f32 %v2352_v14, %v2278_v53 }
 0x16f   : > { %3588 = vmatmul.msk.bf16.gmra.mxu1 %vm1858_vm1, %v4087_v9 }
 0x170   : > { %3605 = vmatmul.msk.bf16.gmra.mxu2 %vm1858_vm1, %v4091_v29  ;;  %v4748_v62 = vadd.f32 %v2480_v32, %v2407_v10  ;;  %v5227_v10 = vld [vmem:[#allocation23_spill] sm:$0xff] }
 0x171   : > { %3621 = vmatmul.msk.bf16.gmra.mxu3 %vm1858_vm1, %v3993_v57  ;;  %v5224_v57 = vld [vmem:[#allocation10_spill] sm:$0xff] }
 0x172   : > { %v2485_v43 = vpop.f32.mrf.mxu0 }
 0x173   : > { %v2226_v56 = vpop.f32.mrf.mxu2 }
 0x174   : > { %v2279_v4 = vadd.f32 %v2226_v56, %v2088_v39  ;;  %v2355_v17 = vpop.f32.mrf.mxu3  ;;  %v2089_v21 = vpop.f32.mrf.mxu1 }
 0x175   : > { %v2090_v9 = vadd.f32 %v2089_v21, %v4229_v13  ;;  %v5226_v13 = vld [vmem:[#allocation21_spill] sm:$0xff] }
 0x176   : > { %v2408_v38 = vadd.f32 %v2355_v17, %v2279_v4 }
 0x178   : > { %v4753_v41 = vadd.f32 %v2483_v60, %v2408_v38  ;;  %v5228_v38 = vld [vmem:[#allocation15_spill] sm:$0xff] }
 0x17a   : > { %v2488_v51 = vpop.f32.mrf.mxu0 }
 0x17b   : > { %v2228_v22 = vpop.f32.mrf.mxu2 }
 0x17c   : > { %v2280_v29 = vadd.f32 %v2228_v22, %v2090_v9  ;;  %v2357_v8 = vpop.f32.mrf.mxu3  ;;  %v2092_v16 = vpop.f32.mrf.mxu1  ;;  %v5229_v9 = vld [vmem:[#allocation12_spill] sm:$0xff] }
 0x17d   : > { %3638 = vmatmul.msk.bf16.gmra.mxu0 %vm1858_vm1, %v5223_v12  ;;  %v2093_v20 = vadd.f32 %v2092_v16, %v5226_v13 }
 0x17e   : > { %v2409_v32 = vadd.f32 %v2357_v8, %v2280_v29  ;;  %v5231_v29 = vld [vmem:[#allocation27_spill] sm:$0xff] }
 0x17f   : > { %3589 = vmatmul.msk.bf16.gmra.mxu1 %vm1858_vm1, %v4113_v46 }
 0x180   : > { %3606 = vmatmul.msk.bf16.gmra.mxu2 %vm1858_vm1, %v5224_v57  ;;  %v4762_v34 = vadd.f32 %v2485_v43, %v2409_v32 }
 0x181   : > { %3622 = vmatmul.msk.bf16.gmra.mxu3 %vm1858_vm1, %v5225_v23 }
 0x182   : > { %v2490_v50 = vpop.f32.mrf.mxu0 }
 0x183   : > { %v2231_v11 = vpop.f32.mrf.mxu2 }
 0x184   : > { %v2281_v59 = vadd.f32 %v2231_v11, %v2093_v20  ;;  %v2360_v60 = vpop.f32.mrf.mxu3  ;;  %v2094_v53 = vpop.f32.mrf.mxu1 }
 0x185   : > { %v2095_v46 = vadd.f32 %v2094_v53, %v5227_v10 }
 0x186   : > { %v2410_v14 = vadd.f32 %v2360_v60, %v2281_v59  ;;  %v5232_v59 = vld [vmem:[#allocation29_spill] sm:$0xff] }
 0x188   : > { %v4767_v3 = vadd.f32 %v2488_v51, %v2410_v14  ;;  %v5230_v51 = vld [vmem:[#allocation5_spill] sm:$0xff] }
 0x18a   : > { %v2493_v56 = vpop.f32.mrf.mxu0 }
 0x18b   : > { %v2233_v39 = vpop.f32.mrf.mxu2 }
 0x18c   : > { %v2282_v4 = vadd.f32 %v2233_v39, %v2095_v46  ;;  %v2362_v43 = vpop.f32.mrf.mxu3  ;;  %v2097_v17 = vpop.f32.mrf.mxu1  ;;  %v5233_v39 = vld [vmem:[#allocation19_spill] sm:$0xff] }
 0x18d   : > { %3639 = vmatmul.msk.bf16.gmra.mxu0 %vm1858_vm1, %v5228_v38  ;;  %v2098_v8 = vadd.f32 %v2097_v17, %v5231_v29  ;;  %v5236_v17 = vld [vmem:[#allocation13_spill] sm:$0xff] }
 0x18e   : > { %v2411_v21 = vadd.f32 %v2362_v43, %v2282_v4  ;;  %v5234_v4 = vld [vmem:[#allocation16_spill] sm:$0xff] }
 0x18f   : > { %3590 = vmatmul.msk.bf16.gmra.mxu1 %vm1858_vm1, %v5223_v12 }
 0x190   : > { %3607 = vmatmul.msk.bf16.gmra.mxu2 %vm1858_vm1, %v5229_v9  ;;  %v4776_v22 = vadd.f32 %v2490_v50, %v2411_v21 }
 0x191   : > { %3623 = vmatmul.msk.bf16.gmra.mxu3 %vm1858_vm1, %v5230_v51 }
 0x192   : > { %v2495_v32 = vpop.f32.mrf.mxu0 }
 0x193   : > { %v2236_v16 = vpop.f32.mrf.mxu2 }
 0x194   : > { %v2283_v57 = vadd.f32 %v2236_v16, %v2098_v8  ;;  %v2365_v23 = vpop.f32.mrf.mxu3  ;;  %v2099_v13 = vpop.f32.mrf.mxu1 }
 0x195   : > { %v2100_v12 = vadd.f32 %v2099_v13, %v5232_v59  ;;  %v5237_v13 = vld [vmem:[#allocation14_spill] sm:$0xff] }
 0x196   : > { %v2412_v20 = vadd.f32 %v2365_v23, %v2283_v57 }
 0x198   : > { %v4781_v11 = vadd.f32 %v2493_v56, %v2412_v20  ;;  %v5235_v56 = vld [vmem:[#allocation7_spill] sm:$0xff] }
 0x19a   : > { %v2498_v53 = vpop.f32.mrf.mxu0 }
 0x19b   : > { %v2238_v60 = vpop.f32.mrf.mxu2 }
 0x19c   : > { %v2284_v14 = vadd.f32 %v2238_v60, %v2100_v12  ;;  %v2367_v50 = vpop.f32.mrf.mxu3  ;;  %v2102_v10 = vpop.f32.mrf.mxu1 }
 0x19d   : > { %3640 = vmatmul.msk.bf16.gmra.mxu0 %vm1858_vm1, %v5233_v39  ;;  %v2103_v21 = vadd.f32 %v2102_v10, %v5236_v17  ;;  %v5239_v10 = vld [vmem:[#allocation20_spill] sm:$0xff] }
 0x19e   : > { %v2413_v46 = vadd.f32 %v2367_v50, %v2284_v14  ;;  %v5238_v50 = vld [vmem:[#allocation25_spill] sm:$0xff] }
 0x19f   : > { %3591 = vmatmul.msk.bf16.gmra.mxu1 %vm1858_vm1, %v5228_v38 }
 0x1a0   : > { %3608 = vmatmul.msk.bf16.gmra.mxu2 %vm1858_vm1, %v5234_v4  ;;  %v4790_v43 = vadd.f32 %v2495_v32, %v2413_v46  ;;  %v5241_v4 = vld [vmem:[#allocation17_spill] sm:$0xff] }
 0x1a1   : > { %3624 = vmatmul.msk.bf16.gmra.mxu3 %vm1858_vm1, %v5235_v56 }
 0x1a2   : > { %v2500_v51 = vpop.f32.mrf.mxu0 }
 0x1a3   : > { %v2241_v9 = vpop.f32.mrf.mxu2 }
 0x1a4   : > { %v2285_v29 = vadd.f32 %v2241_v9, %v2103_v21  ;;  %v2370_v8 = vpop.f32.mrf.mxu3  ;;  %v2104_v16 = vpop.f32.mrf.mxu1 }
 0x1a5   : > { %v2105_v38 = vadd.f32 %v2104_v16, %v5237_v13  ;;  %v5242_v13 = vld [vmem:[#allocation18_spill] sm:$0xff] }
 0x1a6   : > { %v2414_v57 = vadd.f32 %v2370_v8, %v2285_v29 }
 0x1a8   : > { %v4795_v23 = vadd.f32 %v2498_v53, %v2414_v57  ;;  %v5240_v53 = vld [vmem:[#allocation9_spill] sm:$0xff] }
 0x1aa   : > { %v2503_v59 = vpop.f32.mrf.mxu0 }
 0x1ab   : > { %v2243_v20 = vpop.f32.mrf.mxu2 }
 0x1ac   : > { %v2286_v12 = vadd.f32 %v2243_v20, %v2105_v38  ;;  %v2372_v32 = vpop.f32.mrf.mxu3  ;;  %v2107_v60 = vpop.f32.mrf.mxu1 }
 0x1ad   : > { %3641 = vmatmul.msk.bf16.gmra.mxu0 %vm1858_vm1, %v5238_v50  ;;  %v2108_v56 = vadd.f32 %v2107_v60, %v5241_v4  ;;  %v5244_v60 = vld [vmem:[#allocation26_spill] sm:$0xff] }
 0x1ae   : > { %v2415_v14 = vadd.f32 %v2372_v32, %v2286_v12  ;;  %v5246_v4 = vld [vmem:[#allocation22_spill] sm:$0xff] }
 0x1af   : > { %3592 = vmatmul.msk.bf16.gmra.mxu1 %vm1858_vm1, %v5233_v39 }
 0x1b0   : > { %3609 = vmatmul.msk.bf16.gmra.mxu2 %vm1858_vm1, %v5239_v10  ;;  %v4804_v46 = vadd.f32 %v2500_v51, %v2415_v14  ;;  %v5243_v10 = vld [vmem:[#allocation31_spill] sm:$0xff] }
 0x1b1   : > { %3625 = vmatmul.msk.bf16.gmra.mxu3 %vm1858_vm1, %v5240_v53 }
 0x1b2   : > { %v2505_v21 = vpop.f32.mrf.mxu0 }
 0x1b3   : > { %v2246_v17 = vpop.f32.mrf.mxu2 }
 0x1b4   : > { %v2287_v9 = vadd.f32 %v2246_v17, %v2108_v56  ;;  %v2375_v29 = vpop.f32.mrf.mxu3  ;;  %v2109_v8 = vpop.f32.mrf.mxu1 }
 0x1b5   : > { %v2110_v39 = vadd.f32 %v2109_v8, %v5242_v13 }
 0x1b6   : > { %v2416_v16 = vadd.f32 %v2375_v29, %v2287_v9 }
 0x1b8   : > { %v4809_v57 = vadd.f32 %v2503_v59, %v2416_v16  ;;  %v5245_v59 = vld [vmem:[#allocation3_spill] sm:$0xff] }
 0x1ba   : > { %v2508_v20 = vpop.f32.mrf.mxu0 }
 0x1bb   : > { %v2248_v38 = vpop.f32.mrf.mxu2 }
 0x1bc   : > { %v2288_v12 = vadd.f32 %v2248_v38, %v2110_v39  ;;  %v2377_v51 = vpop.f32.mrf.mxu3  ;;  %v2112_v32 = vpop.f32.mrf.mxu1  ;;  %v5247_v38 = vld [vmem:[#allocation24_spill] sm:$0xff] }
 0x1bd   : > { %3642 = vmatmul.msk.bf16.gmra.mxu0 %vm1858_vm1, %v5243_v10  ;;  %v2113_v56 = vadd.f32 %v2112_v32, %v5246_v4 }
 0x1be   : > { %v2417_v14 = vadd.f32 %v2377_v51, %v2288_v12 }
 0x1bf   : > { %3593 = vmatmul.msk.bf16.gmra.mxu1 %vm1858_vm1, %v5238_v50 }
 0x1c0   : > { %3610 = vmatmul.msk.bf16.gmra.mxu2 %vm1858_vm1, %v5244_v60  ;;  %v4818_v53 = vadd.f32 %v2505_v21, %v2417_v14 }
 0x1c1   : > { %3626 = vmatmul.msk.bf16.gmra.mxu3 %vm1858_vm1, %v5245_v59  ;;  %v5249_v59 = vld [vmem:[#allocation28_spill] sm:$0xff] }
 0x1c2   : > { %v2510_v9 = vpop.f32.mrf.mxu0 }
 0x1c3   : > { %v2251_v17 = vpop.f32.mrf.mxu2 }
 0x1c4   : > { %v2289_v29 = vadd.f32 %v2251_v17, %v2113_v56  ;;  %v2380_v8 = vpop.f32.mrf.mxu3  ;;  %v2114_v16 = vpop.f32.mrf.mxu1 }
 0x1c5   : > { %v2115_v50 = vadd.f32 %v2114_v16, %v5247_v38 }
 0x1c6   : > { %v2418_v13 = vadd.f32 %v2380_v8, %v2289_v29 }
 0x1c8   : > { %v4823_v39 = vadd.f32 %v2508_v20, %v2418_v13  ;;  %v5248_v20 = vld [vmem:[#allocation6_spill] sm:$0xff] }
 0x1ca   : > { %v2513_v51 = vpop.f32.mrf.mxu0 }
 0x1cb   : > { %v2253_v12 = vpop.f32.mrf.mxu2 }
 0x1cc   : > { %v2290_v60 = vadd.f32 %v2253_v12, %v2115_v50  ;;  %v2382_v21 = vpop.f32.mrf.mxu3  ;;  %v2117_v14 = vpop.f32.mrf.mxu1  ;;  %v5250_v50 = vld [vmem:[#allocation30_spill] sm:$0xff] }
 0x1cd   : > { %3643 = vmatmul.msk.bf16.gmra.mxu0 %vm1858_vm1, %v4388_v42  ;;  %v2118_v4 = vadd.f32 %v2117_v14, %v5249_v59 }
 0x1ce   : > { %v2419_v19 = vadd.f32 %v2382_v21, %v2290_v60 }
 0x1cf   : > { %3594 = vmatmul.msk.bf16.gmra.mxu1 %vm1858_vm1, %v5243_v10 }
 0x1d0   : > { %3611 = vmatmul.msk.bf16.gmra.mxu2 %vm1858_vm1, %v4342_v30  ;;  %v4832_v32 = vadd.f32 %v2510_v9, %v2419_v19 }
 0x1d1   : > { %3627 = vmatmul.msk.bf16.gmra.mxu3 %vm1858_vm1, %v5248_v20 }
 0x1d2   : > { %v2515_v17 = vpop.f32.mrf.mxu0 }
 0x1d3   : > { %v2256_v56 = vpop.f32.mrf.mxu2 }
 0x1d4   : > { %v2291_v29 = vadd.f32 %v2256_v56, %v2118_v4  ;;  %v2385_v8 = vpop.f32.mrf.mxu3  ;;  %v2119_v16 = vpop.f32.mrf.mxu1 }
 0x1d5   : > { %v2120_v10 = vadd.f32 %v2119_v16, %v5250_v50 }
 0x1d6   : > { %v2420_v13 = vadd.f32 %v2385_v8, %v2291_v29 }
 0x1d8   : > { %v4837_v38 = vadd.f32 %v2513_v51, %v2420_v13 }
 0x1da   : > { %v2945_v60 = vpop.f32.mrf.mxu0 }
 0x1db   : > { %v2258_v12 = vpop.f32.mrf.mxu2 }
 0x1dc   : > { %v2292_v30 = vadd.f32 %v2258_v12, %v2120_v10  ;;  %v2387_v19 = vpop.f32.mrf.mxu3  ;;  %v2567_v9 = vpop.f32.mrf.mxu1 }
 0x1dd   : > { %3644 = vmatmul.msk.bf16.gmra.mxu0 %vm1858_vm1, %v4442_v63  ;;  %v2647_v14 = vadd.f32 %v2567_v9, %v4375_v31  ;;  %v5252_v9 = vld [vmem:[#allocation33_spill] sm:$0xff] }
 0x1de   : > { %v2421_v21 = vadd.f32 %v2387_v19, %v2292_v30 }
 0x1df   : > { %3595 = vmatmul.msk.bf16.gmra.mxu1 %vm1858_vm1, %v4388_v42 }
 0x1e0   : > { %3612 = vmatmul.msk.bf16.gmra.mxu2 %vm1858_vm1, %v4393_v44  ;;  %v4846_v51 = vadd.f32 %v2515_v17, %v2421_v21  ;;  %v5251_v44 = vld [vmem:[#allocation32_spill] sm:$0xff] }
 0x1e1   : > { %3628 = vmatmul.msk.bf16.gmra.mxu3 %vm1858_vm1, %v3945_v5 }
 0x1e2   : > { %v2947_v59 = vpop.f32.mrf.mxu0 }
 0x1e3   : > { %v2693_v20 = vpop.f32.mrf.mxu2 }
 0x1e4   : > { %v2773_v4 = vadd.f32 %v2693_v20, %v2647_v14  ;;  %v2819_v56 = vpop.f32.mrf.mxu3  ;;  %v2569_v29 = vpop.f32.mrf.mxu1 }
 0x1e5   : > { %v2648_v5 = vadd.f32 %v2569_v29, %v5251_v44 }
 0x1e6   : > { %v2899_v8 = vadd.f32 %v2819_v56, %v2773_v4 }
 0x1e8   : > { %v3025_v16 = vadd.f32 %v2945_v60, %v2899_v8 }
 0x1ea   : > { %v3057_v42 = vpack.c.bf16 %v3025_v16, %v3025_v16  ;;  %v2950_v31 = vpop.f32.mrf.mxu0 }
 0x1eb   : > { %v2695_v17 = vpop.f32.mrf.mxu2 }
 0x1ec   : > { %3090 = vst.msk [vmem:[%s4856_s10] sm:$0xf] %vm3089_vm6, %v3057_v42  ;;  %v2774_v13 = vadd.f32 %v2695_v17, %v2648_v5  ;;  %v2821_v50 = vpop.f32.mrf.mxu3  ;;  %v2572_v10 = vpop.f32.mrf.mxu1  ;;  %v3122_v60 = vunpack.c.l.bf16 %v3057_v42 }
 0x1ed   : > { %3645 = vmatmul.msk.bf16.gmra.mxu0 %vm1858_vm1, %v4496_v36  ;;  %v2649_v21 = vadd.f32 %v2572_v10, %v5252_v9  ;;  %v5253_v10 = vld [vmem:[#allocation34_spill] sm:$0xff] }
 0x1ee   : > { %v2900_v12 = vadd.f32 %v2821_v50, %v2774_v13  ;;  %v3225_v4 = vmul.f32 %v3122_v60, %v3122_v60 }
 0x1ef   : > { %3596 = vmatmul.msk.bf16.gmra.mxu1 %vm1858_vm1, %v4442_v63  ;;  %v3154_v63 = vsel %vm1858_vm1, %v3122_v60, 0.0 }
 0x1f0   : > { %v3026_v30 = vadd.f32 %v2947_v59, %v2900_v12  ;;  %3613 = vmatmul.msk.bf16.gmra.mxu2 %vm1858_vm1, %v4447_v37  ;;  %v3257_v44 = vsel %vm1858_vm1, %v3225_v4, 0.0 }
 0x1f1   : > { %3629 = vmatmul.msk.bf16.gmra.mxu3 %vm1858_vm1, %v3997_v61 }
 0x1f2   : > { %v3058_v19 = vpack.c.bf16 %v3026_v30, %v3026_v30  ;;  %v2952_v20 = vpop.f32.mrf.mxu0 }
 0x1f3   : > { %v2698_v14 = vpop.f32.mrf.mxu2 }
 0x1f4   : > { %3091 = vst.msk [vmem:[%s4856_s10 + $0x4] sm:$0xf] %vm3089_vm6, %v3058_v19  ;;  %v3123_v56 = vunpack.c.l.bf16 %v3058_v19  ;;  %v2775_v29 = vadd.f32 %v2698_v14, %v2649_v21  ;;  %v2824_v59 = vpop.f32.mrf.mxu3  ;;  %v2574_v8 = vpop.f32.mrf.mxu1 }
 0x1f5   : > { %v2650_v12 = vadd.f32 %v2574_v8, %v5253_v10 }
 0x1f6   : > { %v3155_v37 = vsel %vm1858_vm1, %v3123_v56, 0.0  ;;  %v3226_v16 = vmul.f32 %v3123_v56, %v3123_v56  ;;  %v2901_v42 = vadd.f32 %v2824_v59, %v2775_v29 }
 0x1f7   : > { %v3156_v61 = vadd.f32 %v3155_v37, %v3154_v63  ;;  %v5254_v63 = vld [vmem:[#allocation36_spill] sm:$0xff] }
 0x1f8   : > { %v3258_v5 = vsel %vm1858_vm1, %v3226_v16, 0.0  ;;  %v3027_v17 = vadd.f32 %v2950_v31, %v2901_v42  ;;  %v5255_v16 = vld [vmem:[#allocation4_spill] sm:$0xff] }
 0x1f9   : > { %v3259_v13 = vadd.f32 %v3258_v5, %v3257_v44  ;;  %v5256_v44 = vld [vmem:[#allocation35_spill] sm:$0xff] }
 0x1fa   : > { %v3059_v50 = vpack.c.bf16 %v3027_v17, %v3027_v17  ;;  %v2955_v19 = vpop.f32.mrf.mxu0 }
 0x1fb   : > { %v2700_v30 = vpop.f32.mrf.mxu2 }
 0x1fc   : > { %3092 = vst.msk [vmem:[%s4856_s10 + $0x8] sm:$0xf] %vm3089_vm6, %v3059_v50  ;;  %v3124_v9 = vunpack.c.l.bf16 %v3059_v50  ;;  %v2776_v60 = vadd.f32 %v2700_v30, %v2650_v12  ;;  %v2826_v21 = vpop.f32.mrf.mxu3  ;;  %v2577_v14 = vpop.f32.mrf.mxu1 }
 0x1fd   : > { %3646 = vmatmul.msk.bf16.gmra.mxu0 %vm1858_vm1, %v4551_v55  ;;  %v2651_v5 = vadd.f32 %v2577_v14, %v5256_v44  ;;  %v5257_v14 = vld [vmem:[#allocation37_spill] sm:$0xff] }
 0x1fe   : > { %v3157_v56 = vsel %vm1858_vm1, %v3124_v9, 0.0  ;;  %v3227_v29 = vmul.f32 %v3124_v9, %v3124_v9  ;;  %v2902_v4 = vadd.f32 %v2826_v21, %v2776_v60 }
 0x1ff   : > { %v3158_v31 = vadd.f32 %v3157_v56, %v3156_v61  ;;  %3597 = vmatmul.msk.bf16.gmra.mxu1 %vm1858_vm1, %v4496_v36 }
 0x200   : > { %v3260_v59 = vsel %vm1858_vm1, %v3227_v29, 0.0  ;;  %v3028_v8 = vadd.f32 %v2952_v20, %v2902_v4  ;;  %3614 = vmatmul.msk.bf16.gmra.mxu2 %vm1858_vm1, %v5254_v63 }
 0x201   : > { %v3261_v37 = vadd.f32 %v3260_v59, %v3259_v13  ;;  %3630 = vmatmul.msk.bf16.gmra.mxu3 %vm1858_vm1, %v5255_v16 }
 0x202   : > { %v3060_v42 = vpack.c.bf16 %v3028_v8, %v3028_v8  ;;  %v2957_v50 = vpop.f32.mrf.mxu0 }
 0x203   : > { %v2703_v17 = vpop.f32.mrf.mxu2 }
 0x204   : > { %3093 = vst.msk [vmem:[%s4856_s10 + $0xc] sm:$0xf] %vm3089_vm6, %v3060_v42  ;;  %v3125_v61 = vunpack.c.l.bf16 %v3060_v42  ;;  %v2777_v20 = vadd.f32 %v2703_v17, %v2651_v5  ;;  %v2829_v10 = vpop.f32.mrf.mxu3  ;;  %v2579_v12 = vpop.f32.mrf.mxu1 }
 0x205   : > { %v2652_v4 = vadd.f32 %v2579_v12, %v5257_v14  ;;  %v5258_v12 = vld [vmem:[#allocation38_spill] sm:$0xff] }
 0x206   : > { %v3159_v36 = vsel %vm1858_vm1, %v3125_v61, 0.0  ;;  %v3228_v30 = vmul.f32 %v3125_v61, %v3125_v61  ;;  %v2903_v9 = vadd.f32 %v2829_v10, %v2777_v20 }
 0x207   : > { %v3160_v13 = vadd.f32 %v3159_v36, %v3158_v31 }
 0x208   : > { %v3262_v60 = vsel %vm1858_vm1, %v3228_v30, 0.0  ;;  %v3029_v21 = vadd.f32 %v2955_v19, %v2903_v9 }
 0x209   : > { %v3263_v56 = vadd.f32 %v3262_v60, %v3261_v37 }
 0x20a   : > { %v3061_v29 = vpack.c.bf16 %v3029_v21, %v3029_v21  ;;  %v2960_v8 = vpop.f32.mrf.mxu0 }
 0x20b   : > { %v2705_v59 = vpop.f32.mrf.mxu2 }
 0x20c   : > { %3094 = vst.msk [vmem:[%s4856_s10 + $0x10] sm:$0xf] %vm3089_vm6, %v3061_v29  ;;  %v3126_v63 = vunpack.c.l.bf16 %v3061_v29  ;;  %v2778_v16 = vadd.f32 %v2705_v59, %v2652_v4  ;;  %v2831_v42 = vpop.f32.mrf.mxu3  ;;  %v2582_v44 = vpop.f32.mrf.mxu1 }
 0x20d   : > { %3647 = vmatmul.msk.bf16.gmra.mxu0 %vm1858_vm1, %v4611_v49  ;;  %v2653_v36 = vadd.f32 %v2582_v44, %v5258_v12 }
 0x20e   : > { %v3161_v5 = vsel %vm1858_vm1, %v3126_v63, 0.0  ;;  %v3229_v17 = vmul.f32 %v3126_v63, %v3126_v63  ;;  %v2904_v31 = vadd.f32 %v2831_v42, %v2778_v16  ;;  %v5259_v63 = vld [vmem:[#allocation39_spill] sm:$0xff] }
 0x20f   : > { %v3162_v19 = vadd.f32 %v3161_v5, %v3160_v13  ;;  %3598 = vmatmul.msk.bf16.gmra.mxu1 %vm1858_vm1, %v4551_v55 }
 0x210   : > { %v3264_v37 = vsel %vm1858_vm1, %v3229_v17, 0.0  ;;  %v3030_v61 = vadd.f32 %v2957_v50, %v2904_v31  ;;  %3615 = vmatmul.msk.bf16.gmra.mxu2 %vm1858_vm1, %v4554_v54 }
 0x211   : > { %v3265_v20 = vadd.f32 %v3264_v37, %v3263_v56  ;;  %3631 = vmatmul.msk.bf16.gmra.mxu3 %vm1858_vm1, %v3911_v6  ;;  %v5260_v37 = vld [vmem:[#allocation8_spill] sm:$0xff] }
 0x212   : > { %v3062_v10 = vpack.c.bf16 %v3030_v61, %v3030_v61  ;;  %v2962_v9 = vpop.f32.mrf.mxu0  ;;  %v504_v61 = vadd.s32 248, %v5260_v37 }
 0x213   : > { %v2708_v30 = vpop.f32.mrf.mxu2 }
 0x214   : > { %3095 = vst.msk [vmem:[%s4856_s10 + $0x14] sm:$0xf] %vm3089_vm6, %v3062_v10  ;;  %v3127_v13 = vunpack.c.l.bf16 %v3062_v10  ;;  %v2779_v50 = vadd.f32 %v2708_v30, %v2653_v36  ;;  %v2834_v60 = vpop.f32.mrf.mxu3  ;;  %v2584_v21 = vpop.f32.mrf.mxu1 }
 0x215   : > { %v2654_v16 = vadd.f32 %v2584_v21, %v5259_v63  ;;  %v5261_v21 = vld [vmem:[#allocation40_spill] sm:$0xff] }
 0x216   : > { %v3163_v55 = vsel %vm1858_vm1, %v3127_v13, 0.0  ;;  %v3230_v29 = vmul.f32 %v3127_v13, %v3127_v13  ;;  %v2905_v54 = vadd.f32 %v2834_v60, %v2779_v50  ;;  %v726_v13 = vand.u32 15, %v504_v61 }
 0x217   : > { %v3164_v56 = vadd.f32 %v3163_v55, %v3162_v19 }
 0x218   : > { %v3266_v14 = vsel %vm1858_vm1, %v3230_v29, 0.0  ;;  %v3031_v6 = vadd.f32 %v2960_v8, %v2905_v54  ;;  %vm1483_vm12 = vcmp.eq.s32.totalorder %v726_v13, 15 }
 0x219   : > { %v3267_v4 = vadd.f32 %v3266_v14, %v3265_v20  ;;  %vm1646_vm10 = vmpackc.low %vm1483_vm12, %vm1483_vm12 }
 0x21a   : > { %v3063_v59 = vpack.c.bf16 %v3031_v6, %v3031_v6  ;;  %v2965_v44 = vpop.f32.mrf.mxu0 }
 0x21b   : > { %v2710_v42 = vpop.f32.mrf.mxu2 }
 0x21c   : > { %3096 = vst.msk [vmem:[%s4856_s10 + $0x18] sm:$0xf] %vm3089_vm6, %v3063_v59  ;;  %v3128_v5 = vunpack.c.l.bf16 %v3063_v59  ;;  %v2780_v17 = vadd.f32 %v2710_v42, %v2654_v16  ;;  %v2836_v31 = vpop.f32.mrf.mxu3  ;;  %v2587_v10 = vpop.f32.mrf.mxu1 }
 0x21d   : > { %3648 = vmatmul.msk.bf16.gmra.mxu0 %vm1858_vm1, %v4673_v48  ;;  %v2655_v55 = vadd.f32 %v2587_v10, %v5261_v21 }
 0x21e   : > { %v3165_v12 = vsel %vm1858_vm1, %v3128_v5, 0.0  ;;  %v3231_v19 = vmul.f32 %v3128_v5, %v3128_v5  ;;  %v2906_v36 = vadd.f32 %v2836_v31, %v2780_v17  ;;  %v5262_v5 = vld [vmem:[#allocation41_spill] sm:$0xff]  ;;  %v1678_v31 = vsel %vm1646_vm10, 65537, %v5169_v58 }
 0x21f   : > { %v3166_v8 = vadd.f32 %v3165_v12, %v3164_v56  ;;  %3599 = vmatmul.msk.bf16.gmra.mxu1 %vm1858_vm1, %v4611_v49 }
 0x220   : > { %v3268_v20 = vsel %vm1858_vm1, %v3231_v19, 0.0  ;;  %v3032_v30 = vadd.f32 %v2962_v9, %v2906_v36  ;;  %3616 = vmatmul.msk.bf16.gmra.mxu2 %vm1858_vm1, %v4614_v52 }
 0x221   : > { %v3269_v50 = vadd.f32 %v3268_v20, %v3267_v4  ;;  %3632 = vmatmul.msk.bf16.gmra.mxu3 %vm1858_vm1, %v3953_v18  ;;  %v1710_v20 = vunpack.c.l.b16 %v1678_v31 }
 0x222   : > { %v3064_v60 = vpack.c.bf16 %v3032_v30, %v3032_v30  ;;  %v2967_v54 = vpop.f32.mrf.mxu0 }
 0x223   : > { %v2713_v29 = vpop.f32.mrf.mxu2 }
 0x224   : > { %3097 = vst.msk [vmem:[%s4856_s10 + $0x1c] sm:$0xf] %vm3089_vm6, %v3064_v60  ;;  %v3129_v56 = vunpack.c.l.bf16 %v3064_v60  ;;  %v2781_v9 = vadd.f32 %v2713_v29, %v2655_v55  ;;  %v2839_v14 = vpop.f32.mrf.mxu3  ;;  %v2589_v49 = vpop.f32.mrf.mxu1  ;;  %v3504_v55 = vunpack.i.l.s16 %v1710_v20 }
 0x225   : > { %v2656_v17 = vadd.f32 %v2589_v49, %v5262_v5 }
 0x226   : > { %v3167_v52 = vsel %vm1858_vm1, %v3129_v56, 0.0  ;;  %v3232_v6 = vmul.f32 %v3129_v56, %v3129_v56  ;;  %v2907_v4 = vadd.f32 %v2839_v14, %v2781_v9  ;;  %vm1837_vm14 = vcmp.ne.s32.totalorder %v3504_v55, %v4019_v25 }
 0x227   : > { %v3168_v59 = vadd.f32 %v3167_v52, %v3166_v8  ;;  %vm1838_vm4 = vmpackc.low %vm1837_vm14, %vm4046_vm2  ;;  %vm3223_vm2 = vcmask 24576  }
 0x228   : > { %v3270_v18 = vsel %vm1858_vm1, %v3232_v6, 0.0  ;;  %v3033_v63 = vadd.f32 %v2965_v44, %v2907_v4 }
 0x229   : > { %v3271_v16 = vadd.f32 %v3270_v18, %v3269_v50 }
 0x22a   : > { %v3065_v42 = vpack.c.bf16 %v3033_v63, %v3033_v63  ;;  %v2970_v61 = vpop.f32.mrf.mxu0 }
 0x22b   : > { %v2715_v37 = vpop.f32.mrf.mxu2 }
 0x22c   : > { %3098 = vst.msk [vmem:[%s4856_s10 + $0x20] sm:$0xf] %vm3089_vm6, %v3065_v42  ;;  %v3130_v10 = vunpack.c.l.bf16 %v3065_v42  ;;  %v2782_v12 = vadd.f32 %v2715_v37, %v2656_v17  ;;  %v2841_v19 = vpop.f32.mrf.mxu3  ;;  %v2592_v36 = vpop.f32.mrf.mxu1 }
 0x22d   : > { %3649 = vmatmul.msk.bf16.gmra.mxu0 %vm1858_vm1, %v4710_v40  ;;  %v2657_v56 = vadd.f32 %v2592_v36, %v4654_v27 }
 0x22e   : > { %v3169_v8 = vsel %vm1858_vm1, %v3130_v10, 0.0  ;;  %v3233_v30 = vmul.f32 %v3130_v10, %v3130_v10  ;;  %v2908_v44 = vadd.f32 %v2841_v19, %v2782_v12 }
 0x22f   : > { %v3170_v13 = vadd.f32 %v3169_v8, %v3168_v59  ;;  %3600 = vmatmul.msk.bf16.gmra.mxu1 %vm1858_vm1, %v4673_v48  ;;  %v5263_v48 = vshrl.u32 %v4668_v2, 16 }
 0x230   : > { %v3272_v50 = vsel %vm1858_vm1, %v3233_v30, 0.0  ;;  %v3034_v60 = vadd.f32 %v2967_v54, %v2908_v44  ;;  %3617 = vmatmul.msk.bf16.gmra.mxu2 %vm1858_vm1, %v4676_v33 }
 0x231   : > { %v3273_v21 = vadd.f32 %v3272_v50, %v3271_v16  ;;  %3633 = vmatmul.msk.bf16.gmra.mxu3 %vm1858_vm1, %v3999_v0  ;;  %v1531_v33 = vor.u32 %v4695_v47, %v5263_v48 }
 0x232   : > { %v3066_v29 = vpack.c.bf16 %v3034_v60, %v3034_v60  ;;  %v2972_v14 = vpop.f32.mrf.mxu0 }
 0x233   : > { %v2718_v9 = vpop.f32.mrf.mxu2  ;;  %v1550_v47 = vsel %vm4952_vm13, %v1531_v33, 0 }
 0x234   : > { %3099 = vst.msk [vmem:[%s4856_s10 + $0x24] sm:$0xf] %vm3089_vm6, %v3066_v29  ;;  %v3131_v54 = vunpack.c.l.bf16 %v3066_v29  ;;  %v2783_v49 = vadd.f32 %v2718_v9, %v2657_v56  ;;  %v2844_v52 = vpop.f32.mrf.mxu3  ;;  %v2594_v6 = vpop.f32.mrf.mxu1  ;;  %v1854_v37 = vsel %vm1838_vm4, 0, %v1550_v47 }
 0x235   : > { %v2658_v17 = vadd.f32 %v2594_v6, %v4685_v28 }
 0x236   : > { %v3171_v27 = vsel %vm1858_vm1, %v3131_v54, 0.0  ;;  %v3234_v4 = vmul.f32 %v3131_v54, %v3131_v54  ;;  %v2909_v59 = vadd.f32 %v2844_v52, %v2783_v49 }
 0x237   : > { %v3172_v18 = vadd.f32 %v3171_v27, %v3170_v13 }
 0x238   : > { %v3274_v63 = vsel %vm1858_vm1, %v3234_v4, 0.0  ;;  %v3035_v16 = vadd.f32 %v2970_v61, %v2909_v59 }
 0x239   : > { %v3275_v42 = vadd.f32 %v3274_v63, %v3273_v21 }
 0x23a   : > { %v3067_v5 = vpack.c.bf16 %v3035_v16, %v3035_v16  ;;  %v2975_v25 = vpop.f32.mrf.mxu0 }
 0x23b   : > { %v2720_v31 = vpop.f32.mrf.mxu2 }
 0x23c   : > { %3100 = vst.msk [vmem:[%s4856_s10 + $0x28] sm:$0xf] %vm3089_vm6, %v3067_v5  ;;  %v3132_v10 = vunpack.c.l.bf16 %v3067_v5  ;;  %v2784_v12 = vadd.f32 %v2720_v31, %v2658_v17  ;;  %v2846_v19 = vpop.f32.mrf.mxu3  ;;  %v2597_v36 = vpop.f32.mrf.mxu1 }
 0x23d   : > { %3650 = vmatmul.msk.bf16.gmra.mxu0 %vm1858_vm1, %v1854_v37  ;;  %v2659_v50 = vadd.f32 %v2597_v36, %v4699_v15 }
 0x23e   : > { %v3173_v61 = vsel %vm1858_vm1, %v3132_v10, 0.0  ;;  %v3235_v20 = vmul.f32 %v3132_v10, %v3132_v10  ;;  %v2910_v8 = vadd.f32 %v2846_v19, %v2784_v12 }
 0x23f   : > { %v3174_v45 = vadd.f32 %v3173_v61, %v3172_v18  ;;  %3601 = vmatmul.msk.bf16.gmra.mxu1 %vm1858_vm1, %v4710_v40 }
 0x240   : > { %v3276_v30 = vsel %vm1858_vm1, %v3235_v20, 0.0  ;;  %v3036_v28 = vadd.f32 %v2972_v14, %v2910_v8  ;;  %3618 = vmatmul.msk.bf16.gmra.mxu2 %vm1858_vm1, %v4712_v35 }
 0x241   : > { %v3277_v44 = vadd.f32 %v3276_v30, %v3275_v42  ;;  %3634 = vmatmul.msk.bf16.gmra.mxu3 %vm1858_vm1, %v4668_v2 }
 0x242   : > { %v3068_v13 = vpack.c.bf16 %v3036_v28, %v3036_v28  ;;  %v2977_v21 = vpop.f32.mrf.mxu0 }
 0x243   : > { %v2723_v60 = vpop.f32.mrf.mxu2 }
 0x244   : > { %3101 = vst.msk [vmem:[%s4856_s10 + $0x2c] sm:$0xf] %vm3089_vm6, %v3068_v13  ;;  %v3133_v55 = vunpack.c.l.bf16 %v3068_v13  ;;  %v2785_v29 = vadd.f32 %v2723_v60, %v2659_v50  ;;  %v2849_v56 = vpop.f32.mrf.mxu3  ;;  %v2599_v9 = vpop.f32.mrf.mxu1 }
 0x245   : > { %v2660_v15 = vadd.f32 %v2599_v9, %v4720_v7 }
 0x246   : > { %v3175_v40 = vsel %vm1858_vm1, %v3133_v55, 0.0  ;;  %v3236_v14 = vmul.f32 %v3133_v55, %v3133_v55  ;;  %v2911_v35 = vadd.f32 %v2849_v56, %v2785_v29 }
 0x247   : > { %v3176_v54 = vadd.f32 %v3175_v40, %v3174_v45 }
 0x248   : > { %v3278_v49 = vsel %vm1858_vm1, %v3236_v14, 0.0  ;;  %v3037_v2 = vadd.f32 %v2975_v25, %v2911_v35 }
 0x249   : > { %v3279_v52 = vadd.f32 %v3278_v49, %v3277_v44 }
 0x24a   : > { %v3069_v48 = vpack.c.bf16 %v3037_v2, %v3037_v2  ;;  %v2980_v6 = vpop.f32.mrf.mxu0 }
 0x24b   : > { %v2725_v33 = vpop.f32.mrf.mxu2 }
 0x24c   : > { %3102 = vst.msk [vmem:[%s4856_s10 + $0x30] sm:$0xf] %vm3089_vm6, %v3069_v48  ;;  %v3134_v0 = vunpack.c.l.bf16 %v3069_v48  ;;  %v2786_v27 = vadd.f32 %v2725_v33, %v2660_v15  ;;  %v2851_v4 = vpop.f32.mrf.mxu3  ;;  %v2602_v59 = vpop.f32.mrf.mxu1 }
 0x24d   : > { %3019 = vmatmul.bf16.gmra.mxu0 %v5169_v58  ;;  %v2661_v31 = vadd.f32 %v2602_v59, %v4725_v24 }
 0x24e   : > { %v3177_v18 = vsel %vm1858_vm1, %v3134_v0, 0.0  ;;  %v3237_v63 = vmul.f32 %v3134_v0, %v3134_v0  ;;  %v2912_v16 = vadd.f32 %v2851_v4, %v2786_v27 }
 0x24f   : > { %v3178_v47 = vadd.f32 %v3177_v18, %v3176_v54  ;;  %3602 = vmatmul.msk.bf16.gmra.mxu1 %vm1858_vm1, %v1854_v37 }
 0x250   : > { %v3280_v42 = vsel %vm1858_vm1, %v3237_v63, 0.0  ;;  %v3038_v5 = vadd.f32 %v2977_v21, %v2912_v16  ;;  %2767 = vmatmul.bf16.gmra.mxu2 %v5169_v58 }
 0x251   : > { %v3281_v7 = vadd.f32 %v3280_v42, %v3279_v52  ;;  %2893 = vmatmul.bf16.gmra.mxu3 %v5169_v58 }
 0x252   : > { %v3070_v17 = vpack.c.bf16 %v3038_v5, %v3038_v5  ;;  %v2982_v10 = vpop.f32.mrf.mxu0 }
 0x253   : > { %v2728_v25 = vpop.f32.mrf.mxu2 }
 0x254   : > { %3103 = vst.msk [vmem:[%s4856_s10 + $0x34] sm:$0xf] %vm3089_vm6, %v3070_v17  ;;  %v3135_v12 = vunpack.c.l.bf16 %v3070_v17  ;;  %v2787_v19 = vadd.f32 %v2728_v25, %v2661_v31  ;;  %v2854_v36 = vpop.f32.mrf.mxu3  ;;  %v2604_v61 = vpop.f32.mrf.mxu1 }
 0x255   : > { %v2662_v24 = vadd.f32 %v2604_v61, %v4734_v1 }
 0x256   : > { %v3179_v20 = vsel %vm1858_vm1, %v3135_v12, 0.0  ;;  %v3238_v37 = vmul.f32 %v3135_v12, %v3135_v12  ;;  %v2913_v8 = vadd.f32 %v2854_v36, %v2787_v19 }
 0x257   : > { %v3180_v45 = vadd.f32 %v3179_v20, %v3178_v47 }
 0x258   : > { %v3282_v30 = vsel %vm1858_vm1, %v3238_v37, 0.0  ;;  %v3039_v58 = vadd.f32 %v2980_v6, %v2913_v8 }
 0x259   : > { %v3283_v28 = vadd.f32 %v3282_v30, %v3281_v7 }
 0x25a   : > { %v3071_v44 = vpack.c.bf16 %v3039_v58, %v3039_v58  ;;  %v2985_v50 = vpop.f32.mrf.mxu0 }
 0x25b   : > { %v2730_v13 = vpop.f32.mrf.mxu2 }
 0x25c   : > { %3104 = vst.msk [vmem:[%s4856_s10 + $0x38] sm:$0xf] %vm3089_vm6, %v3071_v44  ;;  %v3136_v60 = vunpack.c.l.bf16 %v3071_v44  ;;  %v2788_v21 = vadd.f32 %v2730_v13, %v2662_v24  ;;  %v2856_v55 = vpop.f32.mrf.mxu3  ;;  %v2607_v29 = vpop.f32.mrf.mxu1 }
 0x25d   : > { %v2663_v1 = vadd.f32 %v2607_v29, %v4739_v26 }
 0x25e   : > { %v3181_v56 = vsel %vm1858_vm1, %v3136_v60, 0.0  ;;  %v3239_v9 = vmul.f32 %v3136_v60, %v3136_v60  ;;  %v2914_v40 = vadd.f32 %v2856_v55, %v2788_v21 }
 0x25f   : > { %v3182_v14 = vadd.f32 %v3181_v56, %v3180_v45 }
 0x260   : > { %v3284_v35 = vsel %vm1858_vm1, %v3239_v9, 0.0  ;;  %v3040_v54 = vadd.f32 %v2982_v10, %v2914_v40 }
 0x261   : > { %v3285_v49 = vadd.f32 %v3284_v35, %v3283_v28 }
 0x262   : > { %v3072_v2 = vpack.c.bf16 %v3040_v54, %v3040_v54  ;;  %v2987_v48 = vpop.f32.mrf.mxu0 }
 0x263   : > { %v2733_v52 = vpop.f32.mrf.mxu2 }
 0x264   : > { %3105 = vst.msk [vmem:[%s4856_s10 + $0x3c] sm:$0xf] %vm3089_vm6, %v3072_v2  ;;  %v3137_v15 = vunpack.c.l.bf16 %v3072_v2  ;;  %v2789_v33 = vadd.f32 %v2733_v52, %v2663_v1  ;;  %v2859_v6 = vpop.f32.mrf.mxu3  ;;  %v2609_v0 = vpop.f32.mrf.mxu1 }
 0x265   : > { %v2664_v26 = vadd.f32 %v2609_v0, %v4748_v62 }
 0x266   : > { %v3183_v27 = vsel %vm1858_vm1, %v3137_v15, 0.0  ;;  %v3240_v4 = vmul.f32 %v3137_v15, %v3137_v15  ;;  %v2915_v59 = vadd.f32 %v2859_v6, %v2789_v33 }
 0x267   : > { %v3184_v18 = vadd.f32 %v3183_v27, %v3182_v14 }
 0x268   : > { %v3286_v63 = vsel %vm1858_vm1, %v3240_v4, 0.0  ;;  %v3041_v16 = vadd.f32 %v2985_v50, %v2915_v59 }
 0x269   : > { %v3287_v47 = vadd.f32 %v3286_v63, %v3285_v49 }
 0x26a   : > { %v3073_v42 = vpack.c.bf16 %v3041_v16, %v3041_v16  ;;  %v2990_v7 = vpop.f32.mrf.mxu0 }
 0x26b   : > { %v2735_v5 = vpop.f32.mrf.mxu2 }
 0x26c   : > { %3106 = vst.msk [vmem:[%s4856_s10 + $0x40] sm:$0xf] %vm3089_vm6, %v3073_v42  ;;  %v3138_v17 = vunpack.c.l.bf16 %v3073_v42  ;;  %v2790_v31 = vadd.f32 %v2735_v5, %v2664_v26  ;;  %v2861_v25 = vpop.f32.mrf.mxu3  ;;  %v2612_v10 = vpop.f32.mrf.mxu1 }
 0x26d   : > { %v2665_v62 = vadd.f32 %v2612_v10, %v4753_v41 }
 0x26e   : > { %v3185_v12 = vsel %vm1858_vm1, %v3138_v17, 0.0  ;;  %v3241_v19 = vmul.f32 %v3138_v17, %v3138_v17  ;;  %v2916_v36 = vadd.f32 %v2861_v25, %v2790_v31 }
 0x26f   : > { %v3186_v61 = vadd.f32 %v3185_v12, %v3184_v18 }
 0x270   : > { %v3288_v20 = vsel %vm1858_vm1, %v3241_v19, 0.0  ;;  %v3042_v37 = vadd.f32 %v2987_v48, %v2916_v36 }
 0x271   : > { %v3289_v8 = vadd.f32 %v3288_v20, %v3287_v47 }
 0x272   : > { %v3074_v45 = vpack.c.bf16 %v3042_v37, %v3042_v37  ;;  %v2992_v58 = vpop.f32.mrf.mxu0 }
 0x273   : > { %v2738_v30 = vpop.f32.mrf.mxu2 }
 0x274   : > { %3107 = vst.msk [vmem:[%s4856_s10 + $0x44] sm:$0xf] %vm3089_vm6, %v3074_v45  ;;  %v3139_v28 = vunpack.c.l.bf16 %v3074_v45  ;;  %v2791_v44 = vadd.f32 %v2738_v30, %v2665_v62  ;;  %v2864_v24 = vpop.f32.mrf.mxu3  ;;  %v2614_v13 = vpop.f32.mrf.mxu1 }
 0x275   : > { %v2666_v41 = vadd.f32 %v2614_v13, %v4762_v34 }
 0x276   : > { %v3187_v50 = vsel %vm1858_vm1, %v3139_v28, 0.0  ;;  %v3242_v60 = vmul.f32 %v3139_v28, %v3139_v28  ;;  %v2917_v21 = vadd.f32 %v2864_v24, %v2791_v44 }
 0x277   : > { %v3188_v55 = vadd.f32 %v3187_v50, %v3186_v61 }
 0x278   : > { %v3290_v29 = vsel %vm1858_vm1, %v3242_v60, 0.0  ;;  %v3043_v56 = vadd.f32 %v2990_v7, %v2917_v21 }
 0x279   : > { %v3291_v9 = vadd.f32 %v3290_v29, %v3289_v8 }
 0x27a   : > { %v3075_v40 = vpack.c.bf16 %v3043_v56, %v3043_v56  ;;  %v2995_v35 = vpop.f32.mrf.mxu0 }
 0x27b   : > { %v2740_v14 = vpop.f32.mrf.mxu2 }
 0x27c   : > { %3108 = vst.msk [vmem:[%s4856_s10 + $0x48] sm:$0xf] %vm3089_vm6, %v3075_v40  ;;  %v3140_v54 = vunpack.c.l.bf16 %v3075_v40  ;;  %v2792_v49 = vadd.f32 %v2740_v14, %v2666_v41  ;;  %v2866_v2 = vpop.f32.mrf.mxu3  ;;  %v2617_v1 = vpop.f32.mrf.mxu1 }
 0x27d   : > { %v2667_v34 = vadd.f32 %v2617_v1, %v4767_v3 }
 0x27e   : > { %v3189_v52 = vsel %vm1858_vm1, %v3140_v54, 0.0  ;;  %v3243_v48 = vmul.f32 %v3140_v54, %v3140_v54  ;;  %v2918_v15 = vadd.f32 %v2866_v2, %v2792_v49 }
 0x27f   : > { %v3190_v33 = vadd.f32 %v3189_v52, %v3188_v55 }
 0x280   : > { %v3292_v6 = vsel %vm1858_vm1, %v3243_v48, 0.0  ;;  %v3044_v0 = vadd.f32 %v2992_v58, %v2918_v15 }
 0x281   : > { %v3293_v27 = vadd.f32 %v3292_v6, %v3291_v9 }
 0x282   : > { %v3076_v4 = vpack.c.bf16 %v3044_v0, %v3044_v0  ;;  %v2997_v18 = vpop.f32.mrf.mxu0 }
 0x283   : > { %v2743_v59 = vpop.f32.mrf.mxu2 }
 0x284   : > { %3109 = vst.msk [vmem:[%s4856_s10 + $0x4c] sm:$0xf] %vm3089_vm6, %v3076_v4  ;;  %v3141_v63 = vunpack.c.l.bf16 %v3076_v4  ;;  %v2793_v16 = vadd.f32 %v2743_v59, %v2667_v34  ;;  %v2869_v47 = vpop.f32.mrf.mxu3  ;;  %v2619_v42 = vpop.f32.mrf.mxu1 }
 0x285   : > { %v2668_v3 = vadd.f32 %v2619_v42, %v4776_v22 }
 0x286   : > { %v3191_v26 = vsel %vm1858_vm1, %v3141_v63, 0.0  ;;  %v3244_v5 = vmul.f32 %v3141_v63, %v3141_v63  ;;  %v2919_v7 = vadd.f32 %v2869_v47, %v2793_v16 }
 0x287   : > { %v3192_v17 = vadd.f32 %v3191_v26, %v3190_v33 }
 0x288   : > { %v3294_v31 = vsel %vm1858_vm1, %v3244_v5, 0.0  ;;  %v3045_v25 = vadd.f32 %v2995_v35, %v2919_v7 }
 0x289   : > { %v3295_v10 = vadd.f32 %v3294_v31, %v3293_v27 }
 0x28a   : > { %v3077_v12 = vpack.c.bf16 %v3045_v25, %v3045_v25  ;;  %v3000_v36 = vpop.f32.mrf.mxu0 }
 0x28b   : > { %v2745_v19 = vpop.f32.mrf.mxu2 }
 0x28c   : > { %3110 = vst.msk [vmem:[%s4856_s10 + $0x50] sm:$0xf] %vm3089_vm6, %v3077_v12  ;;  %v3142_v61 = vunpack.c.l.bf16 %v3077_v12  ;;  %v2794_v20 = vadd.f32 %v2745_v19, %v2668_v3  ;;  %v2871_v37 = vpop.f32.mrf.mxu3  ;;  %v2622_v8 = vpop.f32.mrf.mxu1 }
 0x28d   : > { %v2669_v22 = vadd.f32 %v2622_v8, %v4781_v11 }
 0x28e   : > { %v3193_v45 = vsel %vm1858_vm1, %v3142_v61, 0.0  ;;  %v3245_v62 = vmul.f32 %v3142_v61, %v3142_v61  ;;  %v2920_v30 = vadd.f32 %v2871_v37, %v2794_v20 }
 0x28f   : > { %v3194_v58 = vadd.f32 %v3193_v45, %v3192_v17 }
 0x290   : > { %v3296_v28 = vsel %vm1858_vm1, %v3245_v62, 0.0  ;;  %v3046_v44 = vadd.f32 %v2997_v18, %v2920_v30 }
 0x291   : > { %v3297_v24 = vadd.f32 %v3296_v28, %v3295_v10 }
 0x292   : > { %v3078_v13 = vpack.c.bf16 %v3046_v44, %v3046_v44  ;;  %v3002_v60 = vpop.f32.mrf.mxu0 }
 0x293   : > { %v2748_v50 = vpop.f32.mrf.mxu2 }
 0x294   : > { %3111 = vst.msk [vmem:[%s4856_s10 + $0x54] sm:$0xf] %vm3089_vm6, %v3078_v13  ;;  %v3143_v21 = vunpack.c.l.bf16 %v3078_v13  ;;  %v2795_v55 = vadd.f32 %v2748_v50, %v2669_v22  ;;  %v2874_v29 = vpop.f32.mrf.mxu3  ;;  %v2624_v56 = vpop.f32.mrf.mxu1 }
 0x295   : > { %v2670_v11 = vadd.f32 %v2624_v56, %v4790_v43 }
 0x296   : > { %v3195_v9 = vsel %vm1858_vm1, %v3143_v21, 0.0  ;;  %v3246_v40 = vmul.f32 %v3143_v21, %v3143_v21  ;;  %v2921_v41 = vadd.f32 %v2874_v29, %v2795_v55 }
 0x297   : > { %v3196_v14 = vadd.f32 %v3195_v9, %v3194_v58 }
 0x298   : > { %v3298_v35 = vsel %vm1858_vm1, %v3246_v40, 0.0  ;;  %v3047_v54 = vadd.f32 %v3000_v36, %v2921_v41 }
 0x299   : > { %v3299_v49 = vadd.f32 %v3298_v35, %v3297_v24 }
 0x29a   : > { %v3079_v2 = vpack.c.bf16 %v3047_v54, %v3047_v54  ;;  %v3005_v52 = vpop.f32.mrf.mxu0 }
 0x29b   : > { %v2750_v1 = vpop.f32.mrf.mxu2 }
 0x29c   : > { %3112 = vst.msk [vmem:[%s4856_s10 + $0x58] sm:$0xf] %vm3089_vm6, %v3079_v2  ;;  %v3144_v48 = vunpack.c.l.bf16 %v3079_v2  ;;  %v2796_v15 = vadd.f32 %v2750_v1, %v2670_v11  ;;  %v2876_v33 = vpop.f32.mrf.mxu3  ;;  %v2627_v6 = vpop.f32.mrf.mxu1 }
 0x29d   : > { %v2671_v43 = vadd.f32 %v2627_v6, %v4795_v23 }
 0x29e   : > { %v3197_v0 = vsel %vm1858_vm1, %v3144_v48, 0.0  ;;  %v3247_v27 = vmul.f32 %v3144_v48, %v3144_v48  ;;  %v2922_v4 = vadd.f32 %v2876_v33, %v2796_v15 }
 0x29f   : > { %v3198_v34 = vadd.f32 %v3197_v0, %v3196_v14 }
 0x2a0   : > { %v3300_v59 = vsel %vm1858_vm1, %v3247_v27, 0.0  ;;  %v3048_v18 = vadd.f32 %v3002_v60, %v2922_v4 }
 0x2a1   : > { %v3301_v63 = vadd.f32 %v3300_v59, %v3299_v49 }
 0x2a2   : > { %v3080_v16 = vpack.c.bf16 %v3048_v18, %v3048_v18  ;;  %v3007_v42 = vpop.f32.mrf.mxu0 }
 0x2a3   : > { %v2753_v47 = vpop.f32.mrf.mxu2 }
 0x2a4   : > { %3113 = vst.msk [vmem:[%s4856_s10 + $0x5c] sm:$0xf] %vm3089_vm6, %v3080_v16  ;;  %v3145_v26 = vunpack.c.l.bf16 %v3080_v16  ;;  %v2797_v5 = vadd.f32 %v2753_v47, %v2671_v43  ;;  %v2879_v7 = vpop.f32.mrf.mxu3  ;;  %v2629_v17 = vpop.f32.mrf.mxu1 }
 0x2a5   : > { %v2672_v23 = vadd.f32 %v2629_v17, %v4804_v46 }
 0x2a6   : > { %v3199_v31 = vsel %vm1858_vm1, %v3145_v26, 0.0  ;;  %v3248_v25 = vmul.f32 %v3145_v26, %v3145_v26  ;;  %v2923_v10 = vadd.f32 %v2879_v7, %v2797_v5 }
 0x2a7   : > { %v3200_v12 = vadd.f32 %v3199_v31, %v3198_v34 }
 0x2a8   : > { %v3302_v3 = vsel %vm1858_vm1, %v3248_v25, 0.0  ;;  %v3049_v19 = vadd.f32 %v3005_v52, %v2923_v10 }
 0x2a9   : > { %v3303_v36 = vadd.f32 %v3302_v3, %v3301_v63 }
 0x2aa   : > { %v3081_v61 = vpack.c.bf16 %v3049_v19, %v3049_v19  ;;  %v3010_v30 = vpop.f32.mrf.mxu0 }
 0x2ab   : > { %v2755_v20 = vpop.f32.mrf.mxu2 }
 0x2ac   : > { %3114 = vst.msk [vmem:[%s4856_s10 + $0x60] sm:$0xf] %vm3089_vm6, %v3081_v61  ;;  %v3146_v37 = vunpack.c.l.bf16 %v3081_v61  ;;  %v2798_v8 = vadd.f32 %v2755_v20, %v2672_v23  ;;  %v2881_v45 = vpop.f32.mrf.mxu3  ;;  %v2632_v62 = vpop.f32.mrf.mxu1 }
 0x2ad   : > { %v2673_v46 = vadd.f32 %v2632_v62, %v4809_v57 }
 0x2ae   : > { %v3201_v58 = vsel %vm1858_vm1, %v3146_v37, 0.0  ;;  %v3249_v28 = vmul.f32 %v3146_v37, %v3146_v37  ;;  %v2924_v44 = vadd.f32 %v2881_v45, %v2798_v8 }
 0x2af   : > { %v3202_v24 = vadd.f32 %v3201_v58, %v3200_v12 }
 0x2b0   : > { %v3304_v13 = vsel %vm1858_vm1, %v3249_v28, 0.0  ;;  %v3050_v22 = vadd.f32 %v3007_v42, %v2924_v44 }
 0x2b1   : > { %v3305_v50 = vadd.f32 %v3304_v13, %v3303_v36 }
 0x2b2   : > { %v3082_v60 = vpack.c.bf16 %v3050_v22, %v3050_v22  ;;  %v3012_v54 = vpop.f32.mrf.mxu0 }
 0x2b3   : > { %v2758_v21 = vpop.f32.mrf.mxu2 }
 0x2b4   : > { %3115 = vst.msk [vmem:[%s4856_s10 + $0x64] sm:$0xf] %vm3089_vm6, %v3082_v60  ;;  %v3147_v55 = vunpack.c.l.bf16 %v3082_v60  ;;  %v2799_v29 = vadd.f32 %v2758_v21, %v2673_v46  ;;  %v2884_v56 = vpop.f32.mrf.mxu3  ;;  %v2634_v9 = vpop.f32.mrf.mxu1 }
 0x2b5   : > { %v2674_v57 = vadd.f32 %v2634_v9, %v4818_v53 }
 0x2b6   : > { %v3203_v40 = vsel %vm1858_vm1, %v3147_v55, 0.0  ;;  %v3250_v41 = vmul.f32 %v3147_v55, %v3147_v55  ;;  %v2925_v14 = vadd.f32 %v2884_v56, %v2799_v29 }
 0x2b7   : > { %v3204_v35 = vadd.f32 %v3203_v40, %v3202_v24 }
 0x2b8   : > { %v3306_v49 = vsel %vm1858_vm1, %v3250_v41, 0.0  ;;  %v3051_v2 = vadd.f32 %v3010_v30, %v2925_v14 }
 0x2b9   : > { %v3307_v11 = vadd.f32 %v3306_v49, %v3305_v50 }
 0x2ba   : > { %v3083_v1 = vpack.c.bf16 %v3051_v2, %v3051_v2  ;;  %v3015_v16 = vpop.f32.mrf.mxu0 }
 0x2bb   : > { %v2760_v52 = vpop.f32.mrf.mxu2 }
 0x2bc   : > { %3116 = vst.msk [vmem:[%s4856_s10 + $0x68] sm:$0xf] %vm3089_vm6, %v3083_v1  ;;  %v3148_v48 = vunpack.c.l.bf16 %v3083_v1  ;;  %v2800_v15 = vadd.f32 %v2760_v52, %v2674_v57  ;;  %v2886_v33 = vpop.f32.mrf.mxu3  ;;  %v2637_v6 = vpop.f32.mrf.mxu1 }
 0x2bd   : > { %v2675_v53 = vadd.f32 %v2637_v6, %v4823_v39 }
 0x2be   : > { %v3205_v0 = vsel %vm1858_vm1, %v3148_v48, 0.0  ;;  %v3251_v27 = vmul.f32 %v3148_v48, %v3148_v48  ;;  %v2926_v4 = vadd.f32 %v2886_v33, %v2800_v15 }
 0x2bf   : > { %v3206_v34 = vadd.f32 %v3205_v0, %v3204_v35 }
 0x2c0   : > { %v3308_v59 = vsel %vm1858_vm1, %v3251_v27, 0.0  ;;  %v3052_v18 = vadd.f32 %v3012_v54, %v2926_v4 }
 0x2c1   : > { %v3309_v63 = vadd.f32 %v3308_v59, %v3307_v11 }
 0x2c2   : > { %v3084_v43 = vpack.c.bf16 %v3052_v18, %v3052_v18  ;;  %v3017_v61 = vpop.f32.mrf.mxu0 }
 0x2c3   : > { %v2763_v47 = vpop.f32.mrf.mxu2 }
 0x2c4   : > { %3117 = vst.msk [vmem:[%s4856_s10 + $0x6c] sm:$0xf] %vm3089_vm6, %v3084_v43  ;;  %v3149_v42 = vunpack.c.l.bf16 %v3084_v43  ;;  %v2801_v26 = vadd.f32 %v2763_v47, %v2675_v53  ;;  %v2889_v5 = vpop.f32.mrf.mxu3  ;;  %v2639_v7 = vpop.f32.mrf.mxu1 }
 0x2c5   : > { %v2676_v39 = vadd.f32 %v2639_v7, %v4832_v32 }
 0x2c6   : > { %v3207_v17 = vsel %vm1858_vm1, %v3149_v42, 0.0  ;;  %v3252_v31 = vmul.f32 %v3149_v42, %v3149_v42  ;;  %v2927_v25 = vadd.f32 %v2889_v5, %v2801_v26 }
 0x2c7   : > { %v3208_v10 = vadd.f32 %v3207_v17, %v3206_v34 }
 0x2c8   : > { %v3310_v12 = vsel %vm1858_vm1, %v3252_v31, 0.0  ;;  %v3053_v3 = vadd.f32 %v3015_v16, %v2927_v25 }
 0x2c9   : > { %v3311_v19 = vadd.f32 %v3310_v12, %v3309_v63 }
 0x2ca   : > { %v3085_v36 = vpack.c.bf16 %v3053_v3, %v3053_v3  ;;  %v3020_v55 = vpop.f32.mrf.mxu0 }
 0x2cb   : > { %v2765_v23 = vpop.f32.mrf.mxu2 }
 0x2cc   : > { %3118 = vst.msk [vmem:[%s4856_s10 + $0x70] sm:$0xf] %vm3089_vm6, %v3085_v36  ;;  %v3150_v20 = vunpack.c.l.bf16 %v3085_v36  ;;  %v2802_v37 = vadd.f32 %v2765_v23, %v2676_v39  ;;  %v2891_v8 = vpop.f32.mrf.mxu3  ;;  %v2642_v45 = vpop.f32.mrf.mxu1 }
 0x2cd   : > { %v2677_v32 = vadd.f32 %v2642_v45, %v4837_v38 }
 0x2ce   : > { %v3209_v62 = vsel %vm1858_vm1, %v3150_v20, 0.0  ;;  %v3253_v30 = vmul.f32 %v3150_v20, %v3150_v20  ;;  %v2928_v58 = vadd.f32 %v2891_v8, %v2802_v37 }
 0x2cf   : > { %v3210_v28 = vadd.f32 %v3209_v62, %v3208_v10 }
 0x2d0   : > { %v3312_v44 = vsel %vm1858_vm1, %v3253_v30, 0.0  ;;  %v3054_v24 = vadd.f32 %v3017_v61, %v2928_v58 }
 0x2d1   : > { %v3313_v13 = vadd.f32 %v3312_v44, %v3311_v19 }
 0x2d2   : > { %v3086_v22 = vpack.c.bf16 %v3054_v24, %v3054_v24  ;;  %v3022_v6 = vpop.f32.mrf.mxu0 }
 0x2d3   : > { %v2768_v50 = vpop.f32.mrf.mxu2 }
 0x2d4   : > { %3119 = vst.msk [vmem:[%s4856_s10 + $0x74] sm:$0xf] %vm3089_vm6, %v3086_v22  ;;  %v3151_v60 = vunpack.c.l.bf16 %v3086_v22  ;;  %v2803_v46 = vadd.f32 %v2768_v50, %v2677_v32  ;;  %v2894_v21 = vpop.f32.mrf.mxu3  ;;  %v2644_v41 = vpop.f32.mrf.mxu1 }
 0x2d5   : > { %v2678_v38 = vadd.f32 %v2644_v41, %v4846_v51 }
 0x2d6   : > { %v3211_v29 = vsel %vm1858_vm1, %v3151_v60, 0.0  ;;  %v3254_v56 = vmul.f32 %v3151_v60, %v3151_v60  ;;  %v2929_v9 = vadd.f32 %v2894_v21, %v2803_v46 }
 0x2d7   : > { %v3212_v40 = vadd.f32 %v3211_v29, %v3210_v28 }
 0x2d8   : > { %v3314_v14 = vsel %vm1858_vm1, %v3254_v56, 0.0  ;;  %v3055_v35 = vadd.f32 %v3020_v55, %v2929_v9 }
 0x2d9   : > { %v3315_v54 = vadd.f32 %v3314_v14, %v3313_v13 }
 0x2da   : > { %v3087_v49 = vpack.c.bf16 %v3055_v35, %v3055_v35 }
 0x2db   : > { %v2770_v2 = vpop.f32.mrf.mxu2 }
 0x2dc   : > { %3120 = vst.msk [vmem:[%s4856_s10 + $0x78] sm:$0xf] %vm3089_vm6, %v3087_v49  ;;  %v3152_v11 = vunpack.c.l.bf16 %v3087_v49  ;;  %v2804_v1 = vadd.f32 %v2770_v2, %v2678_v38  ;;  %v2896_v57 = vpop.f32.mrf.mxu3 }
 0x2de   : > { %v3213_v52 = vsel %vm1858_vm1, %v3152_v11, 0.0  ;;  %v3255_v48 = vmul.f32 %v3152_v11, %v3152_v11  ;;  %v2930_v15 = vadd.f32 %v2896_v57, %v2804_v1 }
 0x2df   : > { %v3214_v33 = vadd.f32 %v3213_v52, %v3212_v40 }
 0x2e0   : > { %v3316_v0 = vsel %vm1858_vm1, %v3255_v48, 0.0  ;;  %v3056_v27 = vadd.f32 %v3022_v6, %v2930_v15 }
 0x2e1   : > { %v3317_v4 = vadd.f32 %v3316_v0, %v3315_v54 }
 0x2e2   : > { %v3088_v34 = vpack.c.bf16 %v3056_v27, %v3056_v27 }
 0x2e4   : > { %3121 = vst.msk [vmem:[%s4856_s10 + $0x7c] sm:$0xf] %vm3089_vm6, %v3088_v34  ;;  %v3153_v51 = vunpack.c.l.bf16 %v3088_v34 }
 0x2e6   : > { %v3215_v59 = vsel %vm1858_vm1, %v3153_v51, 0.0  ;;  %v3256_v18 = vmul.f32 %v3153_v51, %v3153_v51 }
 0x2e7   : > { %v3216_v63 = vadd.f32 %v3215_v59, %v3214_v33 }
 0x2e8   : > { %v3318_v16 = vsel %vm1858_vm1, %v3256_v18, 0.0 }
 0x2e9   : > { %v3217_v43 = vrot.slane %v3216_v63, 4  ;;  %v3319_v53 = vadd.f32 %v3318_v16, %v3317_v4 }
 0x2eb   : > { %v3218_v47 = vadd.f32 %v3217_v43, %v3216_v63  ;;  %v3320_v42 = vrot.slane %v3319_v53, 4 }
 0x2ed   : > { %v3219_v26 = vrot.slane %v3218_v47, 2  ;;  %v3321_v5 = vadd.f32 %v3320_v42, %v3319_v53 }
 0x2ef   : > { %v3220_v7 = vadd.f32 %v3219_v26, %v3218_v47  ;;  %v3322_v17 = vrot.slane %v3321_v5, 2 }
 0x2f1   : > { %v3221_v31 = vrot.slane %v3220_v7, 1  ;;  %v3323_v25 = vadd.f32 %v3322_v17, %v3321_v5 }
 0x2f3   : > { %v3222_v10 = vadd.f32 %v3221_v31, %v3220_v7  ;;  %v3324_v12 = vrot.slane %v3323_v25, 1 }
 0x2f5   : > { %3224 = vst.msk [vmem:[%s265_s12] sm:$0x1] %vm3223_vm2, %v3222_v10  ;;  %v3325_v3 = vadd.f32 %v3324_v12, %v3323_v25 }
 0x2f7   : > { %3326 = vst.msk [vmem:[%s268_s15] sm:$0x1] %vm3223_vm2, %v3325_v3 }
 0x2f8 PF: > { %s17_s21 = sadd.s32 1, %s3757_s21  }
 0x2f9   : > { %p14_p4 = scmp.ge.s32.totalorder %s17_s21, 4  }
 0x2fb   :  { %16 = sbr.rel (!%p14_p4) target bundleno = 1 (0x1), region = 98 }

// kernel: _lambda_.11
= control target key start
LH: loop header
LB: loop body
LE: loop exit
PB: predicated region body
PF: predicated region fallthrough
CT: control target
= control target key end

     0   :  { %vm489_vm0 = vcmask 1043456   ;;  %vm392_vm1 = vcmask 64512   ;;  %vm726_vm2 = vcmask 27648   ;;  %vm1484_vm3 = vcmask 31744   ;;  %s3682_s5 = inlined_call_operand.vmem [shape: bf16[8,4], index: 5, kind: input, shape index: {}]   ;;  %s3683_s0 = inlined_call_operand.vmem [shape: bf16[512,8], index: 0, kind: input, shape index: {}]   ;;  %s3684_s1 = inlined_call_operand.vmem [shape: f32[1,8], index: 1, kind: input, shape index: {}]   ;;  %s3685_s2 = inlined_call_operand.vmem [shape: f32[1,8], index: 2, kind: input, shape index: {}]   ;;  %s3686_s3 = inlined_call_operand.vmem [shape: f32[1,8], index: 3, kind: input, shape index: {}]   ;;  %s3687_s4 = inlined_call_operand.vmem [shape: f32[1,8], index: 4, kind: input, shape index: {}]   ;;  %s3688_s6 = inlined_call_operand.vmem [shape: bf16[8,4], index: 6, kind: input, shape index: {}]   ;;  %s3689_s7 = inlined_call_operand.vmem [shape: bf16[512,4], index: 7, kind: output, shape index: {0}]   ;;  %s3690_s8 = inlined_call_operand.vmem [shape: bf16[512,4], index: 8, kind: output, shape index: {1}]   ;;  %s3691_s9 = inlined_call_operand.vmem [shape: f32[1,1,4], index: 9, kind: output, shape index: {2}]   ;;  %s3692_s10 = inlined_call_operand.vmem [shape: f32[1,1,4], index: 10, kind: output, shape index: {3}]  }
   0x1   :  { %v391_v0 = vld [vmem:[%s3682_s5] sm:$0xf]  ;;  %v2152_v9 = vld [vmem:[%s3683_s0 + $0x8] sm:$0xff]   ;;  %v2173_v24 = vld [vmem:[%s3683_s0 + $0x10] sm:$0xff]   ;;  %vm1618_vm4 = vcmask 24576  }
   0x2   :  { %v2128_v1 = vld [vmem:[%s3683_s0] sm:$0xff]   ;;  %v491_v2 = vsel %vm489_vm0, %v391_v0, 0  ;;  %v1904_v14 = vunpack.c.l.bf16 %v2152_v9  ;;  %v1905_v15 = vunpack.c.h.bf16 %v2152_v9  ;;  %v1908_v29 = vunpack.c.l.bf16 %v2173_v24  ;;  %v2042_v41 = vld [vmem:[%s3683_s0 + $0x88] sm:$0xff]   ;;  %v2197_v44 = vld [vmem:[%s3683_s0 + $0x18] sm:$0xff]  }
   0x3   :  { %v1900_v3 = vunpack.c.l.bf16 %v2128_v1  ;;  %v1901_v4 = vunpack.c.h.bf16 %v2128_v1  ;;  %v2136_v5 = vld [vmem:[%s3684_s1] ss:$0 sm:$0xff]  ;;  %500 = vmatpush.bf16.msra.mxu0 %v491_v2  ;;  %2057 = vmatpush.bf16.msra.mxu2 %v491_v2  ;;  %v1909_v31 = vunpack.c.h.bf16 %v2173_v24  ;;  %v1968_v45 = vunpack.c.l.bf16 %v2042_v41 }
   0x4   :  { %v2141_v6 = vld [vmem:[%s3685_s2] ss:$0 sm:$0xff]  ;;  %v165_v17 = vmul.f32 %v2136_v5, %v1904_v14  ;;  %v166_v18 = vmul.f32 %v2136_v5, %v1905_v15  ;;  %v167_v36 = vmul.f32 %v2136_v5, %v1908_v29  ;;  %v1969_v46 = vunpack.c.h.bf16 %v2042_v41 }
   0x5   :  { %v163_v7 = vmul.f32 %v2136_v5, %v1900_v3  ;;  %v164_v8 = vmul.f32 %v2136_v5, %v1901_v4  ;;  %v2041_v21 = vld [vmem:[%s3683_s0 + $0x80] sm:$0xff]   ;;  %v168_v37 = vmul.f32 %v2136_v5, %v1909_v31  ;;  %v197_v47 = vmul.f32 %v2136_v5, %v1968_v45 }
   0x6   :  { %v233_v19 = vadd.f32 %v2141_v6, %v165_v17  ;;  %v234_v20 = vadd.f32 %v2141_v6, %v166_v18  ;;  %v1964_v25 = vunpack.c.l.bf16 %v2041_v21  ;;  %v1965_v26 = vunpack.c.h.bf16 %v2041_v21  ;;  %v2205_v50 = vld [vmem:[%s3686_s3] ss:$0 sm:$0xff] }
   0x7   :  { %v231_v10 = vadd.f32 %v2141_v6, %v163_v7  ;;  %v232_v11 = vadd.f32 %v2141_v6, %v164_v8  ;;  %v235_v39 = vadd.f32 %v2141_v6, %v167_v36  ;;  %v236_v40 = vadd.f32 %v2141_v6, %v168_v37  ;;  %v2215_v57 = vld [vmem:[%s3687_s4] ss:$0 sm:$0xff] }
   0x8   :  { %v297_v22 = vmax.f32 %v233_v19, 0.0  ;;  %v298_v23 = vmax.f32 %v234_v20, 0.0  ;;  %v195_v27 = vmul.f32 %v2136_v5, %v1964_v25  ;;  %v196_v28 = vmul.f32 %v2136_v5, %v1965_v26  ;;  %v1023_v2 = vld [vmem:[%s3688_s6] sm:$0xf]  ;;  %v2043_v20 = vld [vmem:[%s3683_s0 + $0x90] sm:$0xff]  }
   0x9   :  { %v295_v12 = vmax.f32 %v231_v10, 0.0  ;;  %v296_v13 = vmax.f32 %v232_v11, 0.0  ;;  %v299_v42 = vmax.f32 %v235_v39, 0.0  ;;  %v300_v43 = vmax.f32 %v236_v40, 0.0 }
   0xa   :  { %v360_v30 = vpack.c.bf16 %v298_v23, %v297_v22  ;;  %v263_v32 = vadd.f32 %v2141_v6, %v195_v27  ;;  %v264_v33 = vadd.f32 %v2141_v6, %v196_v28  ;;  %v198_v48 = vmul.f32 %v2136_v5, %v1969_v46  ;;  %v2248_v23 = vld [vmem:[%s3683_s0 + $0x20] sm:$0xff]  }
   0xb   :  { %v359_v16 = vpack.c.bf16 %v296_v13, %v295_v12  ;;  %v1912_v49 = vunpack.c.l.bf16 %v2197_v44  ;;  %v361_v51 = vpack.c.bf16 %v300_v43, %v299_v42  ;;  %v1913_v52 = vunpack.c.h.bf16 %v2197_v44 }
   0xc   :  { %v327_v34 = vmax.f32 %v263_v32, 0.0  ;;  %v328_v35 = vmax.f32 %v264_v33, 0.0  ;;  %v265_v53 = vadd.f32 %v2141_v6, %v197_v47  ;;  %v266_v54 = vadd.f32 %v2141_v6, %v198_v48 }
   0xd   :  { %1834 = vmatmul.msk.bf16.vlgmr.msra.gmra.mxu0 %vm392_vm1, %v359_v16  ;;  %v827_v55 = vmul.f32 %v2205_v50, %v1964_v25  ;;  %v828_v56 = vmul.f32 %v2205_v50, %v1965_v26  ;;  %v169_v60 = vmul.f32 %v2136_v5, %v1912_v49  ;;  %v170_v63 = vmul.f32 %v2136_v5, %v1913_v52 }
   0xe   :  { %v375_v38 = vpack.c.bf16 %v328_v35, %v327_v34  ;;  %v329_v58 = vmax.f32 %v265_v53, 0.0  ;;  %v330_v59 = vmax.f32 %v266_v54, 0.0  ;;  %v795_v7 = vmul.f32 %v2205_v50, %v1900_v3 }
   0xf   :  { %v895_v61 = vadd.f32 %v2215_v57, %v827_v55  ;;  %v896_v62 = vadd.f32 %v2215_v57, %v828_v56  ;;  %v796_v8 = vmul.f32 %v2205_v50, %v1901_v4  ;;  %v1121_v10 = vsel %vm489_vm0, %v1023_v2, 0 }
  0x10   :  { %1850 = vmatmul.msk.bf16.vlgmr.msra.gmra.mxu2 %vm392_vm1, %v375_v38  ;;  %v376_v0 = vpack.c.bf16 %v330_v59, %v329_v58  ;;  %2058 = vmatpush.bf16.msra.mxu3 %v1121_v10  ;;  %v863_v13 = vadd.f32 %v2215_v57, %v795_v7  ;;  %v237_v18 = vadd.f32 %v2141_v6, %v169_v60  ;;  %v1972_v25 = vunpack.c.l.bf16 %v2043_v20 }
  0x11   :  { %v959_v11 = vmax.f32 %v895_v61, 0.0  ;;  %v960_v12 = vmax.f32 %v896_v62, 0.0  ;;  %v864_v16 = vadd.f32 %v2215_v57, %v796_v8  ;;  %1130 = vmatpush.bf16.msra.mxu1 %v1121_v10  ;;  %v238_v3 = vadd.f32 %v2141_v6, %v170_v63  ;;  %v2286_v62 = vld [vmem:[%s3683_s0 + $0x28] sm:$0xff]  }
  0x12   :  { %v927_v1 = vmax.f32 %v863_v13, 0.0  ;;  %v301_v21 = vmax.f32 %v237_v18, 0.0  ;;  %v1973_v26 = vunpack.c.h.bf16 %v2043_v20  ;;  %v199_v27 = vmul.f32 %v2136_v5, %v1972_v25 }
  0x13   :  { %v1007_v17 = vpack.c.bf16 %v960_v12, %v959_v11  ;;  %v928_v19 = vmax.f32 %v864_v16, 0.0  ;;  %v302_v22 = vmax.f32 %v238_v3, 0.0  ;;  %v1917_v33 = vunpack.c.h.bf16 %v2248_v23 }
  0x14   :  { %v200_v28 = vmul.f32 %v2136_v5, %v1973_v26  ;;  %v267_v34 = vadd.f32 %v2141_v6, %v199_v27  ;;  %v829_v36 = vmul.f32 %v2205_v50, %v1968_v45  ;;  %v830_v37 = vmul.f32 %v2205_v50, %v1969_v46 }
  0x15   :  { %1882 = vmatmul.msk.bf16.vlgmr.msra.gmra.mxu3 %vm392_vm1, %v1007_v17  ;;  %v991_v4 = vpack.c.bf16 %v928_v19, %v927_v1  ;;  %v362_v32 = vpack.c.bf16 %v302_v22, %v301_v21  ;;  %v172_v43 = vmul.f32 %v2136_v5, %v1917_v33  ;;  %v797_v45 = vmul.f32 %v2205_v50, %v1904_v14  ;;  %v2044_v14 = vld [vmem:[%s3683_s0 + $0x98] sm:$0xff]  }
  0x16   :  { %v268_v35 = vadd.f32 %v2141_v6, %v200_v28  ;;  %v331_v38 = vmax.f32 %v267_v34, 0.0  ;;  %v897_v41 = vadd.f32 %v2215_v57, %v829_v36  ;;  %v898_v42 = vadd.f32 %v2215_v57, %v830_v37 }
  0x17   :  { %1866 = vmatmul.msk.bf16.vlgmr.msra.gmra.mxu1 %vm392_vm1, %v991_v4  ;;  %v798_v46 = vmul.f32 %v2205_v50, %v1905_v15  ;;  %v865_v53 = vadd.f32 %v2215_v57, %v797_v45  ;;  %v240_v58 = vadd.f32 %v2141_v6, %v172_v43  ;;  %v1976_v63 = vunpack.c.l.bf16 %v2044_v14 }
  0x18   :  { %v332_v39 = vmax.f32 %v268_v35, 0.0  ;;  %v961_v48 = vmax.f32 %v897_v41, 0.0  ;;  %v1920_v8 = vunpack.c.l.bf16 %v2286_v62  ;;  %v1921_v11 = vunpack.c.h.bf16 %v2286_v62  ;;  %v2440_v62 = vld [vmem:[%s3683_s0 + $0xb8] sm:$0xff]  }
  0x19   :  { %v866_v54 = vadd.f32 %v2215_v57, %v798_v46  ;;  %v929_v59 = vmax.f32 %v865_v53, 0.0  ;;  %v304_v61 = vmax.f32 %v240_v58, 0.0  ;;  %v201_v2 = vmul.f32 %v2136_v5, %v1976_v63 }
  0x1a   :  { %v377_v47 = vpack.c.bf16 %v332_v39, %v331_v38  ;;  %v831_v16 = vmul.f32 %v2205_v50, %v1972_v25  ;;  %v832_v17 = vmul.f32 %v2205_v50, %v1973_v26  ;;  %v173_v1 = vmul.f32 %v2136_v5, %v1920_v8 }
  0x1b   :  { %v930_v60 = vmax.f32 %v866_v54, 0.0  ;;  %v269_v12 = vadd.f32 %v2141_v6, %v201_v2  ;;  %v174_v20 = vmul.f32 %v2136_v5, %v1921_v11  ;;  %v799_v22 = vmul.f32 %v2205_v50, %v1908_v29  ;;  %v2045_v29 = vld [vmem:[%s3683_s0 + $0xa0] sm:$0xff]  }
  0x1c   :  { %v899_v19 = vadd.f32 %v2215_v57, %v831_v16  ;;  %v900_v4 = vadd.f32 %v2215_v57, %v832_v17  ;;  %v800_v25 = vmul.f32 %v2205_v50, %v1909_v31  ;;  %v241_v35 = vadd.f32 %v2141_v6, %v173_v1 }
  0x1d   :  { %1835 = vmatmul.msk.bf16.gmra.mxu0 %vm392_vm1, %v360_v30  ;;  %v1916_v30 = vunpack.c.l.bf16 %v2248_v23  ;;  %v992_v9 = vpack.c.bf16 %v930_v60, %v929_v59  ;;  %v333_v18 = vmax.f32 %v269_v12, 0.0  ;;  %v867_v28 = vadd.f32 %v2215_v57, %v799_v22  ;;  %v2400_v23 = vld [vmem:[%s3683_s0 + $0x40] sm:$0xff]  }
  0x1e   :  { %v963_v26 = vmax.f32 %v899_v19, 0.0  ;;  %v964_v27 = vmax.f32 %v900_v4, 0.0  ;;  %v242_v36 = vadd.f32 %v2141_v6, %v174_v20  ;;  %v305_v31 = vmax.f32 %v241_v35, 0.0 }
  0x1f   :  { %v171_v40 = vmul.f32 %v2136_v5, %v1916_v30  ;;  %v931_v37 = vmax.f32 %v867_v28, 0.0  ;;  %v1980_v41 = vunpack.c.l.bf16 %v2045_v29  ;;  %v833_v54 = vmul.f32 %v2205_v50, %v1976_v63 }
  0x20   :  { %1851 = vmatmul.msk.bf16.gmra.mxu2 %vm392_vm1, %v376_v0  ;;  %v1977_v0 = vunpack.c.h.bf16 %v2044_v14  ;;  %v1009_v34 = vpack.c.bf16 %v964_v27, %v963_v26  ;;  %v306_v39 = vmax.f32 %v242_v36, 0.0  ;;  %v802_v63 = vmul.f32 %v2205_v50, %v1913_v52  ;;  %v2046_v52 = vld [vmem:[%s3683_s0 + $0xa8] sm:$0xff]  }
  0x21   :  { %v239_v56 = vadd.f32 %v2141_v6, %v171_v40  ;;  %v2324_v40 = vld [vmem:[%s3683_s0 + $0x30] sm:$0xff]   ;;  %v203_v43 = vmul.f32 %v2136_v5, %v1980_v41  ;;  %v901_v60 = vadd.f32 %v2215_v57, %v833_v54  ;;  %v1984_v19 = vunpack.c.l.bf16 %v2046_v52 }
  0x22   :  { %v202_v7 = vmul.f32 %v2136_v5, %v1977_v0  ;;  %v1924_v45 = vunpack.c.l.bf16 %v2324_v40  ;;  %v364_v46 = vpack.c.bf16 %v306_v39, %v305_v31  ;;  %v1985_v4 = vunpack.c.h.bf16 %v2046_v52 }
  0x23   :  { %v303_v15 = vmax.f32 %v239_v56, 0.0 }
  0x24   :  { %v270_v13 = vadd.f32 %v2141_v6, %v202_v7  ;;  %v175_v59 = vmul.f32 %v2136_v5, %v1924_v45  ;;  %v206_v22 = vmul.f32 %v2136_v5, %v1985_v4 }
  0x25   :  { %v363_v10 = vpack.c.bf16 %v304_v61, %v303_v15  ;;  %v801_v61 = vmul.f32 %v2205_v50, %v1912_v49  ;;  %v2359_v49 = vld [vmem:[%s3683_s0 + $0x38] sm:$0xff]  }
  0x26   :  { %v334_v3 = vmax.f32 %v270_v13, 0.0  ;;  %v243_v13 = vadd.f32 %v2141_v6, %v175_v59  ;;  %v1928_v20 = vunpack.c.l.bf16 %v2359_v49  ;;  %v274_v28 = vadd.f32 %v2141_v6, %v206_v22 }
  0x27   :  { %1867 = vmatmul.msk.bf16.gmra.mxu1 %vm392_vm1, %v992_v9  ;;  %v869_v7 = vadd.f32 %v2215_v57, %v801_v61  ;;  %v806_v22 = vmul.f32 %v2205_v50, %v1921_v11 }
  0x28   :  { %v378_v21 = vpack.c.bf16 %v334_v3, %v333_v18  ;;  %v307_v3 = vmax.f32 %v243_v13, 0.0  ;;  %v177_v35 = vmul.f32 %v2136_v5, %v1928_v20 }
  0x29   :  { %v933_v17 = vmax.f32 %v869_v7, 0.0 }
  0x2d   :  { %1836 = vmatmul.msk.bf16.gmra.mxu0 %vm392_vm1, %v361_v51  ;;  %v962_v51 = vmax.f32 %v898_v42, 0.0  ;;  %v1981_v42 = vunpack.c.h.bf16 %v2045_v29 }
  0x2f   :  { %v1008_v55 = vpack.c.bf16 %v962_v51, %v961_v48  ;;  %v1925_v48 = vunpack.c.h.bf16 %v2324_v40  ;;  %v271_v51 = vadd.f32 %v2141_v6, %v203_v43  ;;  %v2485_v40 = vld [vmem:[%s3683_s0 + $0xc0] sm:$0xff]  }
  0x30   :  { %1852 = vmatmul.msk.bf16.gmra.mxu2 %vm392_vm1, %v377_v47  ;;  %v204_v47 = vmul.f32 %v2136_v5, %v1981_v42 }
  0x31   :  { %1883 = vmatmul.msk.bf16.gmra.mxu3 %vm392_vm1, %v1008_v55  ;;  %v834_v55 = vmul.f32 %v2205_v50, %v1977_v0  ;;  %v335_v56 = vmax.f32 %v271_v51, 0.0  ;;  %v176_v14 = vmul.f32 %v2136_v5, %v1925_v48  ;;  %v965_v0 = vmax.f32 %v901_v60, 0.0  ;;  %v2047_v60 = vld [vmem:[%s3683_s0 + $0xb0] sm:$0xff]  }
  0x32   :  { %v272_v53 = vadd.f32 %v2141_v6, %v204_v47  ;;  %v804_v51 = vmul.f32 %v2205_v50, %v1917_v33 }
  0x33   :  { %v902_v9 = vadd.f32 %v2215_v57, %v834_v55  ;;  %v244_v16 = vadd.f32 %v2141_v6, %v176_v14 }
  0x34   :  { %v336_v58 = vmax.f32 %v272_v53, 0.0  ;;  %v872_v54 = vadd.f32 %v2215_v57, %v804_v51 }
  0x35   :  { %v966_v2 = vmax.f32 %v902_v9, 0.0  ;;  %v308_v1 = vmax.f32 %v244_v16, 0.0  ;;  %v1988_v9 = vunpack.c.l.bf16 %v2047_v60 }
  0x36   :  { %v379_v15 = vpack.c.bf16 %v336_v58, %v335_v56  ;;  %v936_v59 = vmax.f32 %v872_v54, 0.0 }
  0x37   :  { %v1010_v12 = vpack.c.bf16 %v966_v2, %v965_v0  ;;  %v365_v26 = vpack.c.bf16 %v308_v1, %v307_v3  ;;  %v207_v14 = vmul.f32 %v2136_v5, %v1988_v9  ;;  %v1933_v0 = vunpack.c.h.bf16 %v2400_v23 }
  0x38   :  { %v839_v51 = vmul.f32 %v2205_v50, %v1988_v9 }
  0x39   :  { %v275_v2 = vadd.f32 %v2141_v6, %v207_v14  ;;  %v180_v52 = vmul.f32 %v2136_v5, %v1933_v0 }
  0x3b   :  { %v339_v13 = vmax.f32 %v275_v2, 0.0 }
  0x3d   :  { %1837 = vmatmul.msk.bf16.gmra.mxu0 %vm392_vm1, %v362_v32  ;;  %v868_v32 = vadd.f32 %v2215_v57, %v800_v25  ;;  %v1929_v25 = vunpack.c.h.bf16 %v2359_v49 }
  0x3f   :  { %v932_v38 = vmax.f32 %v868_v32, 0.0  ;;  %v835_v32 = vmul.f32 %v2205_v50, %v1980_v41 }
  0x40   :  { %1853 = vmatmul.msk.bf16.gmra.mxu2 %vm392_vm1, %v378_v21  ;;  %v205_v21 = vmul.f32 %v2136_v5, %v1984_v19 }
  0x41   :  { %1884 = vmatmul.msk.bf16.gmra.mxu3 %vm392_vm1, %v1009_v34  ;;  %v993_v24 = vpack.c.bf16 %v932_v38, %v931_v37  ;;  %v836_v34 = vmul.f32 %v2205_v50, %v1981_v42  ;;  %v338_v37 = vmax.f32 %v274_v28, 0.0  ;;  %v178_v38 = vmul.f32 %v2136_v5, %v1929_v25 }
  0x42   :  { %v273_v27 = vadd.f32 %v2141_v6, %v205_v21  ;;  %v245_v42 = vadd.f32 %v2141_v6, %v177_v35  ;;  %v805_v21 = vmul.f32 %v2205_v50, %v1920_v8 }
  0x43   :  { %1868 = vmatmul.msk.bf16.gmra.mxu1 %vm392_vm1, %v993_v24  ;;  %v903_v24 = vadd.f32 %v2215_v57, %v835_v32  ;;  %v904_v29 = vadd.f32 %v2215_v57, %v836_v34  ;;  %v246_v43 = vadd.f32 %v2141_v6, %v178_v38  ;;  %v874_v32 = vadd.f32 %v2215_v57, %v806_v22  ;;  %v2435_v34 = vld [vmem:[%s3683_s0 + $0x48] sm:$0xff]  }
  0x44   :  { %v337_v36 = vmax.f32 %v273_v27, 0.0  ;;  %v309_v55 = vmax.f32 %v245_v42, 0.0  ;;  %v248_v27 = vadd.f32 %v2141_v6, %v180_v52  ;;  %v873_v28 = vadd.f32 %v2215_v57, %v805_v21 }
  0x45   :  { %v967_v39 = vmax.f32 %v903_v24, 0.0  ;;  %v968_v41 = vmax.f32 %v904_v29, 0.0  ;;  %v310_v56 = vmax.f32 %v246_v43, 0.0  ;;  %v938_v35 = vmax.f32 %v874_v32, 0.0 }
  0x46   :  { %v380_v31 = vpack.c.bf16 %v338_v37, %v337_v36  ;;  %v937_v8 = vmax.f32 %v873_v28, 0.0  ;;  %v312_v36 = vmax.f32 %v248_v27, 0.0  ;;  %v1992_v37 = vunpack.c.l.bf16 %v2440_v62 }
  0x47   :  { %v1011_v47 = vpack.c.bf16 %v968_v41, %v967_v39  ;;  %v366_v61 = vpack.c.bf16 %v310_v56, %v309_v55  ;;  %v1993_v38 = vunpack.c.h.bf16 %v2440_v62  ;;  %v1936_v29 = vunpack.c.l.bf16 %v2435_v34 }
  0x48   :  { %v996_v24 = vpack.c.bf16 %v938_v35, %v937_v8  ;;  %v1937_v41 = vunpack.c.h.bf16 %v2435_v34  ;;  %v1997_v22 = vunpack.c.h.bf16 %v2485_v40 }
  0x49   :  { %v210_v39 = vmul.f32 %v2136_v5, %v1993_v38  ;;  %v181_v55 = vmul.f32 %v2136_v5, %v1936_v29 }
  0x4d   :  { %1838 = vmatmul.msk.bf16.gmra.mxu0 %vm392_vm1, %v363_v10  ;;  %v870_v10 = vadd.f32 %v2215_v57, %v802_v63  ;;  %v1932_v63 = vunpack.c.l.bf16 %v2400_v23 }
  0x4f   :  { %v934_v18 = vmax.f32 %v870_v10, 0.0  ;;  %v837_v10 = vmul.f32 %v2205_v50, %v1984_v19 }
  0x50   :  { %1854 = vmatmul.msk.bf16.gmra.mxu2 %vm392_vm1, %v379_v15 }
  0x51   :  { %1885 = vmatmul.msk.bf16.gmra.mxu3 %vm392_vm1, %v1010_v12  ;;  %v994_v44 = vpack.c.bf16 %v934_v18, %v933_v17  ;;  %v838_v12 = vmul.f32 %v2205_v50, %v1985_v4  ;;  %v905_v17 = vadd.f32 %v2215_v57, %v837_v10  ;;  %v808_v10 = vmul.f32 %v2205_v50, %v1925_v48 }
  0x53   :  { %1869 = vmatmul.msk.bf16.gmra.mxu1 %vm392_vm1, %v994_v44  ;;  %v906_v18 = vadd.f32 %v2215_v57, %v838_v12  ;;  %v179_v44 = vmul.f32 %v2136_v5, %v1932_v63  ;;  %v969_v1 = vmax.f32 %v905_v17, 0.0  ;;  %v876_v17 = vadd.f32 %v2215_v57, %v808_v10 }
  0x55   :  { %v970_v19 = vmax.f32 %v906_v18, 0.0 }
  0x57   :  { %v1012_v4 = vpack.c.bf16 %v970_v19, %v969_v1  ;;  %v940_v1 = vmax.f32 %v876_v17, 0.0  ;;  %v1996_v19 = vunpack.c.l.bf16 %v2485_v40 }
  0x59   :  { %v211_v35 = vmul.f32 %v2136_v5, %v1996_v19 }
  0x5d   :  { %1839 = vmatmul.msk.bf16.gmra.mxu0 %vm392_vm1, %v364_v46  ;;  %v803_v46 = vmul.f32 %v2205_v50, %v1916_v30  ;;  %v1989_v30 = vunpack.c.h.bf16 %v2047_v60  ;;  %v907_v60 = vadd.f32 %v2215_v57, %v839_v51  ;;  %v841_v51 = vmul.f32 %v2205_v50, %v1992_v37 }
  0x5f   :  { %v871_v53 = vadd.f32 %v2215_v57, %v803_v46  ;;  %v208_v15 = vmul.f32 %v2136_v5, %v1989_v30 }
  0x60   :  { %1855 = vmatmul.msk.bf16.gmra.mxu2 %vm392_vm1, %v380_v31  ;;  %v209_v31 = vmul.f32 %v2136_v5, %v1992_v37 }
  0x61   :  { %1886 = vmatmul.msk.bf16.gmra.mxu3 %vm392_vm1, %v1011_v47  ;;  %v935_v58 = vmax.f32 %v871_v53, 0.0  ;;  %v276_v7 = vadd.f32 %v2141_v6, %v208_v15  ;;  %v278_v47 = vadd.f32 %v2141_v6, %v210_v39  ;;  %v840_v53 = vmul.f32 %v2205_v50, %v1989_v30 }
  0x62   :  { %v277_v43 = vadd.f32 %v2141_v6, %v209_v31  ;;  %v971_v30 = vmax.f32 %v907_v60, 0.0  ;;  %v249_v15 = vadd.f32 %v2141_v6, %v181_v55 }
  0x63   :  { %v995_v33 = vpack.c.bf16 %v936_v59, %v935_v58  ;;  %v340_v16 = vmax.f32 %v276_v7, 0.0  ;;  %v342_v58 = vmax.f32 %v278_v47, 0.0  ;;  %v182_v59 = vmul.f32 %v2136_v5, %v1937_v41 }
  0x64   :  { %v341_v56 = vmax.f32 %v277_v43, 0.0  ;;  %v807_v7 = vmul.f32 %v2205_v50, %v1924_v45  ;;  %v279_v47 = vadd.f32 %v2141_v6, %v211_v35 }
  0x65   :  { %1870 = vmatmul.msk.bf16.gmra.mxu1 %vm392_vm1, %v995_v33  ;;  %v381_v3 = vpack.c.bf16 %v340_v16, %v339_v13  ;;  %v908_v33 = vadd.f32 %v2215_v57, %v840_v53 }
  0x66   :  { %v382_v9 = vpack.c.bf16 %v342_v58, %v341_v56  ;;  %v875_v16 = vadd.f32 %v2215_v57, %v807_v7  ;;  %v343_v55 = vmax.f32 %v279_v47, 0.0  ;;  %v909_v58 = vadd.f32 %v2215_v57, %v841_v51 }
  0x67   :  { %v972_v14 = vmax.f32 %v908_v33, 0.0 }
  0x68   :  { %v973_v33 = vmax.f32 %v909_v58, 0.0 }
  0x69   :  { %v1013_v2 = vpack.c.bf16 %v972_v14, %v971_v30 }
  0x6d   :  { %1840 = vmatmul.msk.bf16.gmra.mxu0 %vm392_vm1, %v365_v26  ;;  %v247_v26 = vadd.f32 %v2141_v6, %v179_v44  ;;  %v313_v44 = vmax.f32 %v249_v15, 0.0 }
  0x6f   :  { %v311_v11 = vmax.f32 %v247_v26, 0.0 }
  0x70   :  { %1856 = vmatmul.msk.bf16.gmra.mxu2 %vm392_vm1, %v381_v3  ;;  %v939_v3 = vmax.f32 %v875_v16, 0.0 }
  0x71   :  { %1887 = vmatmul.msk.bf16.gmra.mxu3 %vm392_vm1, %v1012_v4  ;;  %v367_v42 = vpack.c.bf16 %v312_v36, %v311_v11  ;;  %v2495_v4 = vld [vmem:[%s3683_s0 + $0x50] sm:$0xff]   ;;  %v212_v11 = vmul.f32 %v2136_v5, %v1997_v22 }
  0x72   :  { %v997_v21 = vpack.c.bf16 %v940_v1, %v939_v3  ;;  %v1940_v31 = vunpack.c.l.bf16 %v2495_v4  ;;  %v1941_v39 = vunpack.c.h.bf16 %v2495_v4  ;;  %v2833_v4 = vld [vmem:[%s3683_s0 + $0xe0] sm:$0xff]  }
  0x74   :  { %v183_v37 = vmul.f32 %v2136_v5, %v1940_v31  ;;  %v184_v62 = vmul.f32 %v2136_v5, %v1941_v39 }
  0x75   :  { %1871 = vmatmul.msk.bf16.gmra.mxu1 %vm392_vm1, %v996_v24 }
  0x76   :  { %v251_v10 = vadd.f32 %v2141_v6, %v183_v37  ;;  %v843_v37 = vmul.f32 %v2205_v50, %v1996_v19 }
  0x7d   :  { %1841 = vmatmul.msk.bf16.gmra.mxu0 %vm392_vm1, %v366_v61  ;;  %v250_v61 = vadd.f32 %v2141_v6, %v182_v59 }
  0x7f   :  { %v314_v52 = vmax.f32 %v250_v61, 0.0  ;;  %v809_v61 = vmul.f32 %v2205_v50, %v1928_v20 }
  0x80   :  { %1857 = vmatmul.msk.bf16.gmra.mxu2 %vm392_vm1, %v382_v9 }
  0x81   :  { %1888 = vmatmul.msk.bf16.gmra.mxu3 %vm392_vm1, %v1013_v2  ;;  %v368_v8 = vpack.c.bf16 %v314_v52, %v313_v44  ;;  %v810_v2 = vmul.f32 %v2205_v50, %v1929_v25  ;;  %v877_v44 = vadd.f32 %v2215_v57, %v809_v61  ;;  %v2549_v25 = vld [vmem:[%s3683_s0 + $0xc8] sm:$0xff]  }
  0x83   :  { %v878_v52 = vadd.f32 %v2215_v57, %v810_v2  ;;  %v941_v49 = vmax.f32 %v877_v44, 0.0 }
  0x85   :  { %1872 = vmatmul.msk.bf16.gmra.mxu1 %vm392_vm1, %v997_v21  ;;  %v942_v20 = vmax.f32 %v878_v52, 0.0  ;;  %v2558_v21 = vld [vmem:[%s3683_s0 + $0x58] sm:$0xff]  }
  0x86   :  { %v1945_v47 = vunpack.c.h.bf16 %v2558_v21 }
  0x8a   :  { %v502_v46 = vpop.f32.mrf.mxu0 }
  0x8b   :  { %v662_v54 = vpack.c.bf16 %v502_v46, %v502_v46  ;;  %v280_v46 = vadd.f32 %v2141_v6, %v212_v11  ;;  %v1944_v11 = vunpack.c.l.bf16 %v2558_v21  ;;  %v2925_v21 = vld [vmem:[%s3683_s0 + $0xe8] sm:$0xff]  }
  0x8d   :  { %727 = vst.msk [vmem:[%s3689_s7] sm:$0xf] %vm726_vm2, %v662_v54  ;;  %1842 = vmatmul.msk.bf16.gmra.mxu0 %vm392_vm1, %v367_v42  ;;  %v1420_v12 = vunpack.c.l.bf16 %v662_v54  ;;  %v842_v54 = vmul.f32 %v2205_v50, %v1993_v38  ;;  %v344_v56 = vmax.f32 %v280_v46, 0.0 }
  0x8f   :  { %v1620_v45 = vmul.f32 %v1420_v12, %v1420_v12  ;;  %v1485_v26 = vsel %vm1484_vm3, %v1420_v12, 0.0  ;;  %v910_v38 = vadd.f32 %v2215_v57, %v842_v54  ;;  %v383_v60 = vpack.c.bf16 %v344_v56, %v343_v55 }
  0x90   :  { %v252_v12 = vadd.f32 %v2141_v6, %v184_v62  ;;  %v185_v62 = vmul.f32 %v2136_v5, %v1944_v11 }
  0x91   :  { %v1684_v36 = vsel %vm1484_vm3, %v1620_v45, 0.0  ;;  %v974_v14 = vmax.f32 %v910_v38, 0.0  ;;  %1858 = vmatmul.msk.bf16.gmra.mxu2 %vm392_vm1, %v383_v60  ;;  %v315_v45 = vmax.f32 %v251_v10, 0.0 }
  0x92   :  { %v504_v13 = vpop.f32.mrf.mxu0  ;;  %v253_v2 = vadd.f32 %v2141_v6, %v185_v62 }
  0x93   :  { %v663_v18 = vpack.c.bf16 %v504_v13, %v504_v13  ;;  %v1014_v13 = vpack.c.bf16 %v974_v14, %v973_v33  ;;  %v844_v33 = vmul.f32 %v2205_v50, %v1997_v22 }
  0x95   :  { %728 = vst.msk [vmem:[%s3689_s7 + $0x4] sm:$0xf] %vm726_vm2, %v663_v18  ;;  %v1421_v48 = vunpack.c.l.bf16 %v663_v18  ;;  %v582_v18 = vpop.f32.mrf.mxu2  ;;  %1889 = vmatmul.msk.bf16.gmra.mxu3 %vm392_vm1, %v1014_v13  ;;  %v912_v22 = vadd.f32 %v2215_v57, %v844_v33 }
  0x97   :  { %v1486_v27 = vsel %vm1484_vm3, %v1421_v48, 0.0  ;;  %v1621_v28 = vmul.f32 %v1421_v48, %v1421_v48  ;;  %v316_v48 = vmax.f32 %v252_v12, 0.0  ;;  %v976_v10 = vmax.f32 %v912_v22, 0.0 }
  0x98   :  { %v1487_v32 = vadd.f32 %v1486_v27, %v1485_v26  ;;  %v2000_v26 = vunpack.c.l.bf16 %v2549_v25  ;;  %v998_v27 = vpack.c.bf16 %v942_v20, %v941_v49 }
  0x99   :  { %v1685_v24 = vsel %vm1484_vm3, %v1621_v28, 0.0  ;;  %v2001_v28 = vunpack.c.h.bf16 %v2549_v25 }
  0x9a   :  { %v1686_v42 = vadd.f32 %v1685_v24, %v1684_v36  ;;  %v507_v43 = vpop.f32.mrf.mxu0  ;;  %1873 = vmatmul.msk.bf16.gmra.mxu1 %vm392_vm1, %v998_v27  ;;  %v213_v36 = vmul.f32 %v2136_v5, %v2000_v26  ;;  %v1132_v27 = vpop.f32.mrf.mxu1 }
  0x9b   :  { %v664_v53 = vpack.c.bf16 %v507_v43, %v507_v43  ;;  %v214_v24 = vmul.f32 %v2136_v5, %v2001_v28  ;;  %v369_v43 = vpack.c.bf16 %v316_v48, %v315_v45  ;;  %v317_v45 = vmax.f32 %v253_v2, 0.0  ;;  %v2634_v48 = vld [vmem:[%s3683_s0 + $0x60] sm:$0xff]  }
  0x9c   :  { %v281_v55 = vadd.f32 %v2141_v6, %v213_v36  ;;  %v1949_v62 = vunpack.c.h.bf16 %v2634_v48  ;;  %v845_v2 = vmul.f32 %v2205_v50, %v2000_v26 }
  0x9d   :  { %729 = vst.msk [vmem:[%s3689_s7 + $0x8] sm:$0xf] %vm726_vm2, %v664_v53  ;;  %v1422_v59 = vunpack.c.l.bf16 %v664_v53  ;;  %1843 = vmatmul.msk.bf16.gmra.mxu0 %vm392_vm1, %v368_v8  ;;  %v2573_v53 = vpack.c.bf16 %v582_v18, %v582_v18  ;;  %v584_v54 = vpop.f32.mrf.mxu2  ;;  %v282_v56 = vadd.f32 %v2141_v6, %v214_v24 }
  0x9e   :  { %v345_v38 = vmax.f32 %v281_v55, 0.0 }
  0x9f   :  { %v1488_v9 = vsel %vm1484_vm3, %v1422_v59, 0.0  ;;  %v1622_v30 = vmul.f32 %v1422_v59, %v1422_v59  ;;  %v2577_v59 = vpack.c.bf16 %v584_v54, %v584_v54  ;;  %759 = vst.msk [vmem:[%s3689_s7 + $0x80] sm:$0xf] %vm726_vm2, %v2573_v53  ;;  %v346_v60 = vmax.f32 %v282_v56, 0.0 }
  0xa0   :  { %v1489_v15 = vadd.f32 %v1488_v9, %v1487_v32  ;;  %v186_v9 = vmul.f32 %v2136_v5, %v1945_v47  ;;  %v1948_v54 = vunpack.c.l.bf16 %v2634_v48 }
  0xa1   :  { %v1687_v7 = vsel %vm1484_vm3, %v1622_v30, 0.0  ;;  %v911_v30 = vadd.f32 %v2215_v57, %v843_v37  ;;  %760 = vst.msk [vmem:[%s3689_s7 + $0x84] sm:$0xf] %vm726_vm2, %v2577_v59  ;;  %v384_v40 = vpack.c.bf16 %v346_v60, %v345_v38 }
  0xa2   :  { %v1688_v16 = vadd.f32 %v1687_v7, %v1686_v42  ;;  %v509_v17 = vpop.f32.mrf.mxu0  ;;  %v254_v13 = vadd.f32 %v2141_v6, %v186_v9 }
  0xa3   :  { %v665_v3 = vpack.c.bf16 %v509_v17, %v509_v17  ;;  %1859 = vmatmul.msk.bf16.gmra.mxu2 %vm392_vm1, %v384_v40  ;;  %v975_v7 = vmax.f32 %v911_v30, 0.0  ;;  %v812_v17 = vmul.f32 %v2205_v50, %v1933_v0 }
  0xa4   :  { %v318_v0 = vmax.f32 %v254_v13, 0.0 }
  0xa5   :  { %730 = vst.msk [vmem:[%s3689_s7 + $0xc] sm:$0xf] %vm726_vm2, %v665_v3  ;;  %v1423_v1 = vunpack.c.l.bf16 %v665_v3  ;;  %v587_v52 = vpop.f32.mrf.mxu2  ;;  %v1015_v3 = vpack.c.bf16 %v976_v10, %v975_v7  ;;  %v188_v10 = vmul.f32 %v2136_v5, %v1949_v62 }
  0xa6   :  { %v370_v37 = vpack.c.bf16 %v318_v0, %v317_v45  ;;  %v2649_v33 = vpack.c.bf16 %v587_v52, %v587_v52  ;;  %v813_v45 = vmul.f32 %v2205_v50, %v1936_v29 }
  0xa7   :  { %v1490_v32 = vsel %vm1484_vm3, %v1423_v1, 0.0  ;;  %v1623_v8 = vmul.f32 %v1423_v1, %v1423_v1  ;;  %v880_v1 = vadd.f32 %v2215_v57, %v812_v17  ;;  %1890 = vmatmul.msk.bf16.gmra.mxu3 %vm392_vm1, %v1015_v3  ;;  %v913_v3 = vadd.f32 %v2215_v57, %v845_v2 }
  0xa8   :  { %v1491_v35 = vadd.f32 %v1490_v32, %v1489_v15  ;;  %v1212_v32 = vpop.f32.mrf.mxu3  ;;  %761 = vst.msk [vmem:[%s3689_s7 + $0x88] sm:$0xf] %vm726_vm2, %v2649_v33 }
  0xa9   :  { %v1689_v42 = vsel %vm1484_vm3, %v1623_v8, 0.0  ;;  %v1324_v40 = vpack.c.bf16 %v1212_v32, %v1212_v32  ;;  %v977_v32 = vmax.f32 %v913_v3, 0.0 }
  0xaa   :  { %v1690_v46 = vadd.f32 %v1689_v42, %v1688_v16  ;;  %v512_v51 = vpop.f32.mrf.mxu0  ;;  %v811_v16 = vmul.f32 %v2205_v50, %v1932_v63  ;;  %v2625_v63 = vld [vmem:[%s3683_s0 + $0xd0] sm:$0xff]  }
  0xab   :  { %v666_v58 = vpack.c.bf16 %v512_v51, %v512_v51  ;;  %v2004_v36 = vunpack.c.l.bf16 %v2625_v63  ;;  %v2005_v24 = vunpack.c.h.bf16 %v2625_v63  ;;  %1388 = vst.msk [vmem:[%s3690_s8 + $0x80] sm:$0xf] %vm726_vm2, %v1324_v40 }
  0xac   :  { %v879_v20 = vadd.f32 %v2215_v57, %v811_v16  ;;  %v846_v16 = vmul.f32 %v2205_v50, %v2001_v28 }
  0xad   :  { %731 = vst.msk [vmem:[%s3689_s7 + $0x10] sm:$0xf] %vm726_vm2, %v666_v58  ;;  %v1424_v19 = vunpack.c.l.bf16 %v666_v58  ;;  %1844 = vmatmul.msk.bf16.gmra.mxu0 %vm392_vm1, %v369_v43  ;;  %v215_v55 = vmul.f32 %v2136_v5, %v2004_v36  ;;  %v216_v56 = vmul.f32 %v2136_v5, %v2005_v24  ;;  %v589_v9 = vpop.f32.mrf.mxu2 }
  0xae   :  { %v943_v8 = vmax.f32 %v879_v20, 0.0  ;;  %v256_v20 = vadd.f32 %v2141_v6, %v188_v10 }
  0xaf   :  { %v1492_v14 = vsel %vm1484_vm3, %v1424_v19, 0.0  ;;  %v1624_v15 = vmul.f32 %v1424_v19, %v1424_v19  ;;  %v1292_v19 = vpack.c.bf16 %v1132_v27, %v1132_v27  ;;  %v283_v22 = vadd.f32 %v2141_v6, %v215_v55  ;;  %v2725_v55 = vld [vmem:[%s3683_s0 + $0x68] sm:$0xff]  }
  0xb0   :  { %v1493_v61 = vadd.f32 %v1492_v14, %v1491_v35  ;;  %v944_v35 = vmax.f32 %v880_v1, 0.0  ;;  %v187_v14 = vmul.f32 %v2136_v5, %v1948_v54  ;;  %v1214_v13 = vpop.f32.mrf.mxu3  ;;  %v914_v1 = vadd.f32 %v2215_v57, %v846_v16 }
  0xb1   :  { %v1691_v12 = vsel %vm1484_vm3, %v1624_v15, 0.0  ;;  %v2660_v15 = vpack.c.bf16 %v589_v9, %v589_v9  ;;  %1356 = vst.msk [vmem:[%s3690_s8] sm:$0xf] %vm726_vm2, %v1292_v19  ;;  %v1325_v17 = vpack.c.bf16 %v1214_v13, %v1214_v13 }
  0xb2   :  { %v1692_v18 = vadd.f32 %v1691_v12, %v1690_v46  ;;  %v514_v44 = vpop.f32.mrf.mxu0  ;;  %v999_v46 = vpack.c.bf16 %v944_v35, %v943_v8  ;;  %v1134_v12 = vpop.f32.mrf.mxu1  ;;  %v255_v25 = vadd.f32 %v2141_v6, %v187_v14  ;;  %v814_v8 = vmul.f32 %v2205_v50, %v1937_v41 }
  0xb3   :  { %v667_v49 = vpack.c.bf16 %v514_v44, %v514_v44  ;;  %v1293_v26 = vpack.c.bf16 %v1134_v12, %v1134_v12  ;;  %762 = vst.msk [vmem:[%s3689_s7 + $0x8c] sm:$0xf] %vm726_vm2, %v2660_v15  ;;  %v320_v41 = vmax.f32 %v256_v20, 0.0  ;;  %v1953_v12 = vunpack.c.h.bf16 %v2725_v55 }
  0xb4   :  { %1874 = vmatmul.msk.bf16.gmra.mxu1 %vm392_vm1, %v999_v46  ;;  %1389 = vst.msk [vmem:[%s3690_s8 + $0x84] sm:$0xf] %vm726_vm2, %v1325_v17  ;;  %v319_v46 = vmax.f32 %v255_v25, 0.0  ;;  %v882_v29 = vadd.f32 %v2215_v57, %v814_v8  ;;  %v2751_v25 = vld [vmem:[%s3685_s2] ss:$0 sm:$0xff] }
  0xb5   :  { %732 = vst.msk [vmem:[%s3689_s7 + $0x14] sm:$0xf] %vm726_vm2, %v667_v49  ;;  %v1425_v23 = vunpack.c.l.bf16 %v667_v49 }
  0xb6   :  { %1357 = vst.msk [vmem:[%s3690_s8 + $0x4] sm:$0xf] %vm726_vm2, %v1293_v26  ;;  %v371_v10 = vpack.c.bf16 %v320_v41, %v319_v46 }
  0xb7   :  { %v1494_v42 = vsel %vm1484_vm3, %v1425_v23, 0.0  ;;  %v1625_v43 = vmul.f32 %v1425_v23, %v1425_v23 }
  0xb8   :  { %v1495_v51 = vadd.f32 %v1494_v42, %v1493_v61  ;;  %v284_v61 = vadd.f32 %v2141_v6, %v216_v56  ;;  %v592_v6 = vpop.f32.mrf.mxu2  ;;  %v978_v42 = vmax.f32 %v914_v1, 0.0  ;;  %v847_v1 = vmul.f32 %v2205_v50, %v2004_v36 }
  0xb9   :  { %v1693_v58 = vsel %vm1484_vm3, %v1625_v43, 0.0  ;;  %v881_v43 = vadd.f32 %v2215_v57, %v813_v45  ;;  %v1217_v57 = vpop.f32.mrf.mxu3  ;;  %v2745_v17 = vpack.c.bf16 %v592_v6, %v592_v6  ;;  %v848_v6 = vmul.f32 %v2205_v50, %v2005_v24  ;;  %v2797_v24 = vld [vmem:[%s3687_s4] ss:$0 sm:$0xff] }
  0xba   :  { %v1694_v38 = vadd.f32 %v1693_v58, %v1692_v18  ;;  %v517_v60 = vpop.f32.mrf.mxu0  ;;  %v347_v18 = vmax.f32 %v283_v22, 0.0  ;;  %v348_v28 = vmax.f32 %v284_v61, 0.0  ;;  %v1016_v56 = vpack.c.bf16 %v978_v42, %v977_v32  ;;  %v1137_v58 = vpop.f32.mrf.mxu1  ;;  %v2735_v61 = vld [vmem:[%s3684_s1] ss:$0 sm:$0xff] }
  0xbb   :  { %v668_v30 = vpack.c.bf16 %v517_v60, %v517_v60  ;;  %v1952_v22 = vunpack.c.l.bf16 %v2725_v55  ;;  %763 = vst.msk [vmem:[%s3689_s7 + $0x90] sm:$0xf] %vm726_vm2, %v2745_v17  ;;  %v915_v46 = vadd.f32 %v2797_v24, %v847_v1  ;;  %v916_v41 = vadd.f32 %v2797_v24, %v848_v6 }
  0xbc   :  { %v385_v27 = vpack.c.bf16 %v348_v28, %v347_v18  ;;  %1891 = vmatmul.msk.bf16.gmra.mxu3 %vm392_vm1, %v1016_v56  ;;  %v1294_v18 = vpack.c.bf16 %v1137_v58, %v1137_v58  ;;  %v2810_v56 = vld [vmem:[%s3686_s3] ss:$0 sm:$0xff] }
  0xbd   :  { %733 = vst.msk [vmem:[%s3689_s7 + $0x18] sm:$0xf] %vm726_vm2, %v668_v30  ;;  %v1426_v7 = vunpack.c.l.bf16 %v668_v30  ;;  %1845 = vmatmul.msk.bf16.gmra.mxu0 %vm392_vm1, %v370_v37  ;;  %v945_v37 = vmax.f32 %v881_v43, 0.0  ;;  %v189_v3 = vmul.f32 %v2735_v61, %v1952_v22  ;;  %v815_v58 = vmul.f32 %v2810_v56, %v1940_v31  ;;  %v2826_v31 = vld [vmem:[%s3683_s0 + $0x70] sm:$0xff]  }
  0xbe   :  { %1860 = vmatmul.msk.bf16.gmra.mxu2 %vm392_vm1, %v385_v27  ;;  %1358 = vst.msk [vmem:[%s3690_s8 + $0x8] sm:$0xf] %vm726_vm2, %v1294_v18 }
  0xbf   :  { %v1496_v44 = vsel %vm1484_vm3, %v1426_v7, 0.0  ;;  %v1626_v52 = vmul.f32 %v1426_v7, %v1426_v7  ;;  %v257_v63 = vadd.f32 %v2751_v25, %v189_v3  ;;  %v2013_v3 = vunpack.c.h.bf16 %v2833_v4 }
  0xc0   :  { %v1497_v5 = vadd.f32 %v1496_v44, %v1495_v51  ;;  %v2716_v51 = vld [vmem:[%s3683_s0 + $0xd8] sm:$0xff]   ;;  %v594_v44 = vpop.f32.mrf.mxu2 }
  0xc1   :  { %v1695_v49 = vsel %vm1484_vm3, %v1626_v52, 0.0  ;;  %v2008_v60 = vunpack.c.l.bf16 %v2716_v51  ;;  %v2009_v19 = vunpack.c.h.bf16 %v2716_v51  ;;  %v1219_v27 = vpop.f32.mrf.mxu3 }
  0xc2   :  { %v1696_v23 = vadd.f32 %v1695_v49, %v1694_v38  ;;  %v519_v0 = vpop.f32.mrf.mxu0  ;;  %v946_v38 = vmax.f32 %v882_v29, 0.0  ;;  %v2762_v49 = vpack.c.bf16 %v594_v44, %v594_v44  ;;  %v1327_v32 = vpack.c.bf16 %v1219_v27, %v1219_v27 }
  0xc3   :  { %v669_v35 = vpack.c.bf16 %v519_v0, %v519_v0  ;;  %v217_v2 = vmul.f32 %v2735_v61, %v2008_v60  ;;  %v218_v13 = vmul.f32 %v2735_v61, %v2009_v19  ;;  %v1139_v0 = vpop.f32.mrf.mxu1 }
  0xc4   :  { %v1000_v14 = vpack.c.bf16 %v946_v38, %v945_v37  ;;  %v1295_v36 = vpack.c.bf16 %v1139_v0, %v1139_v0  ;;  %764 = vst.msk [vmem:[%s3689_s7 + $0x94] sm:$0xf] %vm726_vm2, %v2762_v49  ;;  %v1957_v0 = vunpack.c.h.bf16 %v2826_v31 }
  0xc5   :  { %734 = vst.msk [vmem:[%s3689_s7 + $0x1c] sm:$0xf] %vm726_vm2, %v669_v35  ;;  %v1427_v34 = vunpack.c.l.bf16 %v669_v35  ;;  %v285_v28 = vadd.f32 %v2751_v25, %v217_v2  ;;  %v286_v20 = vadd.f32 %v2751_v25, %v218_v13  ;;  %v980_v2 = vmax.f32 %v916_v41, 0.0 }
  0xc6   :  { %1875 = vmatmul.msk.bf16.gmra.mxu1 %vm392_vm1, %v1000_v14  ;;  %1359 = vst.msk [vmem:[%s3690_s8 + $0xc] sm:$0xf] %vm726_vm2, %v1295_v36 }
  0xc7   :  { %v1498_v9 = vsel %vm1484_vm3, %v1427_v34, 0.0  ;;  %v1627_v30 = vmul.f32 %v1427_v34, %v1427_v34  ;;  %v349_v8 = vmax.f32 %v285_v28, 0.0  ;;  %v350_v50 = vmax.f32 %v286_v20, 0.0  ;;  %1391 = vst.msk [vmem:[%s3690_s8 + $0x8c] sm:$0xf] %vm726_vm2, %v1327_v32 }
  0xc8   :  { %v1499_v40 = vadd.f32 %v1498_v9, %v1497_v5  ;;  %v1326_v5 = vpack.c.bf16 %v1217_v57, %v1217_v57  ;;  %v597_v9 = vpop.f32.mrf.mxu2  ;;  %v2012_v28 = vunpack.c.l.bf16 %v2833_v4 }
  0xc9   :  { %v1697_v7 = vsel %vm1484_vm3, %v1627_v30, 0.0  ;;  %v386_v38 = vpack.c.bf16 %v350_v50, %v349_v8  ;;  %v979_v30 = vmax.f32 %v915_v46, 0.0  ;;  %v1222_v44 = vpop.f32.mrf.mxu3  ;;  %v220_v8 = vmul.f32 %v2735_v61, %v2013_v3 }
  0xca   :  { %v1698_v16 = vadd.f32 %v1697_v7, %v1696_v23  ;;  %v522_v26 = vpop.f32.mrf.mxu0  ;;  %v190_v23 = vmul.f32 %v2735_v61, %v1953_v12  ;;  %1390 = vst.msk [vmem:[%s3690_s8 + $0x88] sm:$0xf] %vm726_vm2, %v1326_v5  ;;  %v883_v7 = vadd.f32 %v2797_v24, %v815_v58  ;;  %v219_v6 = vmul.f32 %v2735_v61, %v2012_v28 }
  0xcb   :  { %v670_v52 = vpack.c.bf16 %v522_v26, %v522_v26  ;;  %v1017_v26 = vpack.c.bf16 %v980_v2, %v979_v30  ;;  %v1142_v18 = vpop.f32.mrf.mxu1  ;;  %v192_v58 = vmul.f32 %v2735_v61, %v1957_v0 }
  0xcc   :  { %v258_v34 = vadd.f32 %v2751_v25, %v190_v23  ;;  %v1296_v50 = vpack.c.bf16 %v1142_v18, %v1142_v18  ;;  %v287_v41 = vadd.f32 %v2751_v25, %v219_v6  ;;  %v818_v6 = vmul.f32 %v2810_v56, %v1945_v47 }
  0xcd   :  { %735 = vst.msk [vmem:[%s3689_s7 + $0x20] sm:$0xf] %vm726_vm2, %v670_v52  ;;  %v1428_v45 = vunpack.c.l.bf16 %v670_v52  ;;  %1846 = vmatmul.msk.bf16.gmra.mxu0 %vm392_vm1, %v371_v10  ;;  %v321_v10 = vmax.f32 %v257_v63, 0.0  ;;  %v947_v52 = vmax.f32 %v883_v7, 0.0  ;;  %1892 = vmatmul.msk.bf16.gmra.mxu3 %vm392_vm1, %v1017_v26  ;;  %v2852_v63 = vpack.c.bf16 %v597_v9, %v597_v9 }
  0xce   :  { %1861 = vmatmul.msk.bf16.gmra.mxu2 %vm392_vm1, %v386_v38  ;;  %v849_v38 = vmul.f32 %v2810_v56, %v2008_v60  ;;  %1360 = vst.msk [vmem:[%s3690_s8 + $0x10] sm:$0xf] %vm726_vm2, %v1296_v50  ;;  %v351_v7 = vmax.f32 %v287_v41, 0.0  ;;  %v886_v50 = vadd.f32 %v2797_v24, %v818_v6  ;;  %v2016_v41 = vunpack.c.l.bf16 %v2925_v21 }
  0xcf   :  { %v1500_v35 = vsel %vm1484_vm3, %v1428_v45, 0.0  ;;  %v1628_v42 = vmul.f32 %v1428_v45, %v1428_v45  ;;  %v1956_v45 = vunpack.c.l.bf16 %v2826_v31  ;;  %765 = vst.msk [vmem:[%s3689_s7 + $0x98] sm:$0xf] %vm726_vm2, %v2852_v63  ;;  %v851_v6 = vmul.f32 %v2810_v56, %v2012_v28 }
  0xd0   :  { %v1501_v43 = vadd.f32 %v1500_v35, %v1499_v40  ;;  %v816_v40 = vmul.f32 %v2810_v56, %v1941_v39  ;;  %v917_v26 = vadd.f32 %v2797_v24, %v849_v38 }
  0xd1   :  { %v1699_v29 = vsel %vm1484_vm3, %v1628_v42, 0.0 }
  0xd2   :  { %v1700_v57 = vadd.f32 %v1699_v29, %v1698_v16  ;;  %v524_v37 = vpop.f32.mrf.mxu0  ;;  %v884_v13 = vadd.f32 %v2797_v24, %v816_v40  ;;  %v322_v16 = vmax.f32 %v258_v34, 0.0  ;;  %v191_v29 = vmul.f32 %v2735_v61, %v1956_v45  ;;  %v1224_v40 = vpop.f32.mrf.mxu3 }
  0xd3   :  { %v671_v14 = vpack.c.bf16 %v524_v37, %v524_v37  ;;  %v1328_v34 = vpack.c.bf16 %v1222_v44, %v1222_v44  ;;  %v288_v37 = vadd.f32 %v2751_v25, %v220_v8  ;;  %v1144_v30 = vpop.f32.mrf.mxu1  ;;  %v1329_v2 = vpack.c.bf16 %v1224_v40, %v1224_v40 }
  0xd4   :  { %v948_v5 = vmax.f32 %v884_v13, 0.0  ;;  %v372_v32 = vpack.c.bf16 %v322_v16, %v321_v10  ;;  %v1297_v60 = vpack.c.bf16 %v1144_v30, %v1144_v30  ;;  %v221_v40 = vmul.f32 %v2735_v61, %v2016_v41 }
  0xd5   :  { %736 = vst.msk [vmem:[%s3689_s7 + $0x24] sm:$0xf] %vm726_vm2, %v671_v14  ;;  %v1429_v39 = vunpack.c.l.bf16 %v671_v14  ;;  %v850_v14 = vmul.f32 %v2810_v56, %v2009_v19  ;;  %v260_v19 = vadd.f32 %v2751_v25, %v192_v58  ;;  %v352_v16 = vmax.f32 %v288_v37, 0.0 }
  0xd6   :  { %v1001_v27 = vpack.c.bf16 %v948_v5, %v947_v52  ;;  %1392 = vst.msk [vmem:[%s3690_s8 + $0x90] sm:$0xf] %vm726_vm2, %v1328_v34  ;;  %v817_v52 = vmul.f32 %v2810_v56, %v1944_v11  ;;  %v950_v58 = vmax.f32 %v886_v50, 0.0  ;;  %v2017_v37 = vunpack.c.h.bf16 %v2925_v21 }
  0xd7   :  { %v1502_v20 = vsel %vm1484_vm3, %v1429_v39, 0.0  ;;  %v1629_v1 = vmul.f32 %v1429_v39, %v1429_v39  ;;  %v259_v39 = vadd.f32 %v2751_v25, %v191_v29  ;;  %1361 = vst.msk [vmem:[%s3690_s8 + $0x14] sm:$0xf] %vm726_vm2, %v1297_v60  ;;  %v918_v44 = vadd.f32 %v2797_v24, %v850_v14 }
  0xd8   :  { %v1503_v23 = vadd.f32 %v1502_v20, %v1501_v43  ;;  %1876 = vmatmul.msk.bf16.gmra.mxu1 %vm392_vm1, %v1001_v27  ;;  %v599_v43 = vpop.f32.mrf.mxu2  ;;  %1393 = vst.msk [vmem:[%s3690_s8 + $0x94] sm:$0xf] %vm726_vm2, %v1329_v2  ;;  %v981_v27 = vmax.f32 %v917_v26, 0.0  ;;  %v885_v8 = vadd.f32 %v2797_v24, %v817_v52  ;;  %v324_v11 = vmax.f32 %v260_v19, 0.0 }
  0xd9   :  { %v1701_v36 = vsel %vm1484_vm3, %v1629_v1, 0.0  ;;  %v387_v1 = vpack.c.bf16 %v352_v16, %v351_v7  ;;  %v222_v7 = vmul.f32 %v2735_v61, %v2017_v37 }
  0xda   :  { %v1702_v35 = vadd.f32 %v1701_v36, %v1700_v57  ;;  %v527_v42 = vpop.f32.mrf.mxu0  ;;  %v2867_v57 = vpack.c.bf16 %v599_v43, %v599_v43  ;;  %v1227_v29 = vpop.f32.mrf.mxu3  ;;  %v949_v34 = vmax.f32 %v885_v8, 0.0 }
  0xdb   :  { %v672_v46 = vpack.c.bf16 %v527_v42, %v527_v42  ;;  %v323_v42 = vmax.f32 %v259_v39, 0.0  ;;  %v289_v39 = vadd.f32 %v2751_v25, %v221_v40 }
  0xdc   :  { %766 = vst.msk [vmem:[%s3689_s7 + $0x9c] sm:$0xf] %vm726_vm2, %v2867_v57  ;;  %v1002_v2 = vpack.c.bf16 %v950_v58, %v949_v34  ;;  %v919_v34 = vadd.f32 %v2797_v24, %v851_v6 }
  0xdd   :  { %737 = vst.msk [vmem:[%s3689_s7 + $0x28] sm:$0xf] %vm726_vm2, %v672_v46  ;;  %v1430_v9 = vunpack.c.l.bf16 %v672_v46  ;;  %1847 = vmatmul.msk.bf16.gmra.mxu0 %vm392_vm1, %v372_v32  ;;  %v982_v32 = vmax.f32 %v918_v44, 0.0  ;;  %v1147_v46 = vpop.f32.mrf.mxu1 }
  0xde   :  { %1862 = vmatmul.msk.bf16.gmra.mxu2 %vm392_vm1, %v387_v1  ;;  %v290_v1 = vadd.f32 %v2751_v25, %v222_v7  ;;  %v983_v7 = vmax.f32 %v919_v34, 0.0 }
  0xdf   :  { %v1504_v10 = vsel %vm1484_vm3, %v1430_v9, 0.0  ;;  %v1630_v13 = vmul.f32 %v1430_v9, %v1430_v9  ;;  %v1018_v43 = vpack.c.bf16 %v982_v32, %v981_v27 }
  0xe0   :  { %v1505_v51 = vadd.f32 %v1504_v10, %v1503_v23  ;;  %v602_v23 = vpop.f32.mrf.mxu2 }
  0xe1   :  { %v1703_v18 = vsel %vm1484_vm3, %v1630_v13, 0.0  ;;  %1893 = vmatmul.msk.bf16.gmra.mxu3 %vm392_vm1, %v1018_v43  ;;  %v373_v13 = vpack.c.bf16 %v324_v11, %v323_v42  ;;  %v2945_v26 = vpack.c.bf16 %v602_v23, %v602_v23  ;;  %v353_v23 = vmax.f32 %v289_v39, 0.0 }
  0xe2   :  { %v1704_v5 = vadd.f32 %v1703_v18, %v1702_v35  ;;  %v529_v20 = vpop.f32.mrf.mxu0  ;;  %v2918_v35 = vld [vmem:[%s3683_s0 + $0x78] sm:$0xff]   ;;  %v1298_v18 = vpack.c.bf16 %v1147_v46, %v1147_v46  ;;  %v1229_v8 = vpop.f32.mrf.mxu3  ;;  %v354_v42 = vmax.f32 %v290_v1, 0.0  ;;  %v852_v11 = vmul.f32 %v2810_v56, %v2013_v3 }
  0xe3   :  { %v673_v36 = vpack.c.bf16 %v529_v20, %v529_v20  ;;  %v1960_v30 = vunpack.c.l.bf16 %v2918_v35  ;;  %v1961_v60 = vunpack.c.h.bf16 %v2918_v35  ;;  %v1330_v20 = vpack.c.bf16 %v1227_v29, %v1227_v29  ;;  %767 = vst.msk [vmem:[%s3689_s7 + $0xa0] sm:$0xf] %vm726_vm2, %v2945_v26 }
  0xe4   :  { %1362 = vst.msk [vmem:[%s3690_s8 + $0x18] sm:$0xf] %vm726_vm2, %v1298_v18  ;;  %v1331_v50 = vpack.c.bf16 %v1229_v8, %v1229_v8  ;;  %v388_v29 = vpack.c.bf16 %v354_v42, %v353_v23 }
  0xe5   :  { %738 = vst.msk [vmem:[%s3689_s7 + $0x2c] sm:$0xf] %vm726_vm2, %v673_v36  ;;  %v1431_v47 = vunpack.c.l.bf16 %v673_v36  ;;  %v193_v52 = vmul.f32 %v2735_v61, %v1960_v30  ;;  %v194_v27 = vmul.f32 %v2735_v61, %v1961_v60  ;;  %v1149_v32 = vpop.f32.mrf.mxu1 }
  0xe6   :  { %v1299_v28 = vpack.c.bf16 %v1149_v32, %v1149_v32  ;;  %1394 = vst.msk [vmem:[%s3690_s8 + $0x98] sm:$0xf] %vm726_vm2, %v1330_v20 }
  0xe7   :  { %v1506_v38 = vsel %vm1484_vm3, %v1431_v47, 0.0  ;;  %v1631_v9 = vmul.f32 %v1431_v47, %v1431_v47  ;;  %v261_v46 = vadd.f32 %v2751_v25, %v193_v52  ;;  %v262_v3 = vadd.f32 %v2751_v25, %v194_v27  ;;  %1395 = vst.msk [vmem:[%s3690_s8 + $0x9c] sm:$0xf] %vm726_vm2, %v1331_v50 }
  0xe8   :  { %v1507_v14 = vadd.f32 %v1506_v38, %v1505_v51  ;;  %1877 = vmatmul.msk.bf16.gmra.mxu1 %vm392_vm1, %v1002_v2  ;;  %v604_v51 = vpop.f32.mrf.mxu2  ;;  %1363 = vst.msk [vmem:[%s3690_s8 + $0x1c] sm:$0xf] %vm726_vm2, %v1299_v28  ;;  %v920_v38 = vadd.f32 %v2797_v24, %v852_v11 }
  0xe9   :  { %v1705_v10 = vsel %vm1484_vm3, %v1631_v9, 0.0  ;;  %v819_v9 = vmul.f32 %v2810_v56, %v1948_v54  ;;  %v325_v18 = vmax.f32 %v261_v46, 0.0 }
  0xea   :  { %v1706_v19 = vadd.f32 %v1705_v10, %v1704_v5  ;;  %v532_v16 = vpop.f32.mrf.mxu0  ;;  %v2960_v5 = vpack.c.bf16 %v604_v51, %v604_v51  ;;  %v820_v10 = vmul.f32 %v2810_v56, %v1949_v62  ;;  %v984_v39 = vmax.f32 %v920_v38, 0.0  ;;  %v1232_v52 = vpop.f32.mrf.mxu3 }
  0xeb   :  { %v674_v44 = vpack.c.bf16 %v532_v16, %v532_v16  ;;  %v887_v16 = vadd.f32 %v2797_v24, %v819_v9  ;;  %v326_v51 = vmax.f32 %v262_v3, 0.0 }
  0xec   :  { %768 = vst.msk [vmem:[%s3689_s7 + $0xa4] sm:$0xf] %vm726_vm2, %v2960_v5  ;;  %v888_v54 = vadd.f32 %v2797_v24, %v820_v10  ;;  %v1019_v62 = vpack.c.bf16 %v984_v39, %v983_v7  ;;  %v854_v39 = vmul.f32 %v2810_v56, %v2017_v37 }
  0xed   :  { %739 = vst.msk [vmem:[%s3689_s7 + $0x30] sm:$0xf] %vm726_vm2, %v674_v44  ;;  %v1432_v36 = vunpack.c.l.bf16 %v674_v44  ;;  %1848 = vmatmul.msk.bf16.gmra.mxu0 %vm392_vm1, %v373_v13  ;;  %v1152_v44 = vpop.f32.mrf.mxu1  ;;  %v951_v20 = vmax.f32 %v887_v16, 0.0  ;;  %v374_v50 = vpack.c.bf16 %v326_v51, %v325_v18 }
  0xee   :  { %1863 = vmatmul.msk.bf16.gmra.mxu2 %vm392_vm1, %v388_v29  ;;  %v952_v27 = vmax.f32 %v888_v54, 0.0  ;;  %v1300_v29 = vpack.c.bf16 %v1152_v44, %v1152_v44  ;;  %v821_v44 = vmul.f32 %v2810_v56, %v1952_v22 }
  0xef   :  { %v1508_v47 = vsel %vm1484_vm3, %v1432_v36, 0.0  ;;  %v1632_v43 = vmul.f32 %v1432_v36, %v1432_v36 }
  0xf0   :  { %v1509_v4 = vadd.f32 %v1508_v47, %v1507_v14  ;;  %v607_v2 = vpop.f32.mrf.mxu2  ;;  %v1003_v42 = vpack.c.bf16 %v952_v27, %v951_v20  ;;  %1364 = vst.msk [vmem:[%s3690_s8 + $0x20] sm:$0xf] %vm726_vm2, %v1300_v29 }
  0xf1   :  { %v1707_v58 = vsel %vm1484_vm3, %v1632_v43, 0.0  ;;  %1894 = vmatmul.msk.bf16.gmra.mxu3 %vm392_vm1, %v1019_v62  ;;  %v3030_v3 = vpack.c.bf16 %v607_v2, %v607_v2  ;;  %v922_v62 = vadd.f32 %v2797_v24, %v854_v39 }
  0xf2   :  { %v1708_v40 = vadd.f32 %v1707_v58, %v1706_v19  ;;  %v534_v14 = vpop.f32.mrf.mxu0  ;;  %v3012_v19 = vld [vmem:[%s3683_s0 + $0xf0] sm:$0xff]   ;;  %v1234_v10 = vpop.f32.mrf.mxu3 }
  0xf3   :  { %v675_v13 = vpack.c.bf16 %v534_v14, %v534_v14  ;;  %v2020_v1 = vunpack.c.l.bf16 %v3012_v19  ;;  %v2021_v23 = vunpack.c.h.bf16 %v3012_v19  ;;  %769 = vst.msk [vmem:[%s3689_s7 + $0xa8] sm:$0xf] %vm726_vm2, %v3030_v3  ;;  %v853_v14 = vmul.f32 %v2810_v56, %v2016_v41 }
  0xf4   :  { %v1333_v16 = vpack.c.bf16 %v1234_v10, %v1234_v10 }
  0xf5   :  { %740 = vst.msk [vmem:[%s3689_s7 + $0x34] sm:$0xf] %vm726_vm2, %v675_v13  ;;  %v1433_v48 = vunpack.c.l.bf16 %v675_v13  ;;  %v223_v32 = vmul.f32 %v2735_v61, %v2020_v1  ;;  %v224_v11 = vmul.f32 %v2735_v61, %v2021_v23  ;;  %v1154_v7 = vpop.f32.mrf.mxu1  ;;  %v921_v37 = vadd.f32 %v2797_v24, %v853_v14 }
  0xf6   :  { %v1301_v41 = vpack.c.bf16 %v1154_v7, %v1154_v7  ;;  %1397 = vst.msk [vmem:[%s3690_s8 + $0xa4] sm:$0xf] %vm726_vm2, %v1333_v16 }
  0xf7   :  { %v1510_v6 = vsel %vm1484_vm3, %v1433_v48, 0.0  ;;  %v1633_v36 = vmul.f32 %v1433_v48, %v1433_v48  ;;  %v291_v47 = vadd.f32 %v2751_v25, %v223_v32  ;;  %v292_v38 = vadd.f32 %v2751_v25, %v224_v11  ;;  %v3089_v11 = vld [vmem:[%s3683_s0 + $0xf8] sm:$0xff]  }
  0xf8   :  { %v1511_v8 = vadd.f32 %v1510_v6, %v1509_v4  ;;  %1878 = vmatmul.msk.bf16.gmra.mxu1 %vm392_vm1, %v1003_v42  ;;  %v609_v34 = vpop.f32.mrf.mxu2  ;;  %v1332_v4 = vpack.c.bf16 %v1232_v52, %v1232_v52  ;;  %1365 = vst.msk [vmem:[%s3690_s8 + $0x24] sm:$0xf] %vm726_vm2, %v1301_v41  ;;  %v985_v6 = vmax.f32 %v921_v37, 0.0  ;;  %v889_v42 = vadd.f32 %v2797_v24, %v821_v44 }
  0xf9   :  { %v1709_v28 = vsel %vm1484_vm3, %v1633_v36, 0.0  ;;  %v3039_v9 = vpack.c.bf16 %v609_v34, %v609_v34  ;;  %v356_v13 = vmax.f32 %v292_v38, 0.0  ;;  %v822_v36 = vmul.f32 %v2810_v56, %v1953_v12 }
  0xfa   :  { %v1710_v43 = vadd.f32 %v1709_v28, %v1708_v40  ;;  %v537_v46 = vpop.f32.mrf.mxu0  ;;  %v355_v40 = vmax.f32 %v291_v47, 0.0  ;;  %1396 = vst.msk [vmem:[%s3690_s8 + $0xa0] sm:$0xf] %vm726_vm2, %v1332_v4  ;;  %v953_v47 = vmax.f32 %v889_v42, 0.0  ;;  %v2025_v29 = vunpack.c.h.bf16 %v3089_v11 }
  0xfb   :  { %v676_v58 = vpack.c.bf16 %v537_v46, %v537_v46  ;;  %770 = vst.msk [vmem:[%s3689_s7 + $0xac] sm:$0xf] %vm726_vm2, %v3039_v9  ;;  %v890_v22 = vadd.f32 %v2797_v24, %v822_v36  ;;  %v855_v37 = vmul.f32 %v2810_v56, %v2020_v1  ;;  %v823_v42 = vmul.f32 %v2810_v56, %v1956_v45 }
  0xfc   :  { %v389_v21 = vpack.c.bf16 %v356_v13, %v355_v40  ;;  %v226_v14 = vmul.f32 %v2735_v61, %v2025_v29 }
  0xfd   :  { %741 = vst.msk [vmem:[%s3689_s7 + $0x38] sm:$0xf] %vm726_vm2, %v676_v58  ;;  %v1434_v2 = vunpack.c.l.bf16 %v676_v58  ;;  %1849 = vmatmul.msk.bf16.gmra.mxu0 %vm392_vm1, %v374_v50  ;;  %v1157_v28 = vpop.f32.mrf.mxu1  ;;  %v1237_v50 = vpop.f32.mrf.mxu3  ;;  %v954_v46 = vmax.f32 %v890_v22, 0.0 }
  0xfe   :  { %1864 = vmatmul.msk.bf16.gmra.mxu2 %vm392_vm1, %v389_v21  ;;  %v1302_v41 = vpack.c.bf16 %v1157_v28, %v1157_v28 }
  0xff   :  { %v1512_v18 = vsel %vm1484_vm3, %v1434_v2, 0.0  ;;  %v1634_v51 = vmul.f32 %v1434_v2, %v1434_v2  ;;  %v1004_v40 = vpack.c.bf16 %v954_v46, %v953_v47 }
 0x100   :  { %v1513_v54 = vadd.f32 %v1512_v18, %v1511_v8  ;;  %v612_v27 = vpop.f32.mrf.mxu2  ;;  %v986_v8 = vmax.f32 %v922_v62, 0.0  ;;  %1366 = vst.msk [vmem:[%s3690_s8 + $0x28] sm:$0xf] %vm726_vm2, %v1302_v41 }
 0x101   :  { %v1711_v48 = vsel %vm1484_vm3, %v1634_v51, 0.0  ;;  %v3107_v39 = vpack.c.bf16 %v612_v27, %v612_v27  ;;  %v1334_v51 = vpack.c.bf16 %v1237_v50, %v1237_v50  ;;  %v824_v50 = vmul.f32 %v2810_v56, %v1957_v0 }
 0x102   :  { %v1712_v52 = vadd.f32 %v1711_v48, %v1710_v43  ;;  %v539_v20 = vpop.f32.mrf.mxu0  ;;  %v1020_v12 = vpack.c.bf16 %v986_v8, %v985_v6  ;;  %v2024_v43 = vunpack.c.l.bf16 %v3089_v11 }
 0x103   :  { %v677_v32 = vpack.c.bf16 %v539_v20, %v539_v20  ;;  %771 = vst.msk [vmem:[%s3689_s7 + $0xb0] sm:$0xf] %vm726_vm2, %v3107_v39  ;;  %v892_v45 = vadd.f32 %v2797_v24, %v824_v50 }
 0x104   :  { %1895 = vmatmul.msk.bf16.gmra.mxu3 %vm392_vm1, %v1020_v12  ;;  %v225_v4 = vmul.f32 %v2735_v61, %v2024_v43  ;;  %1398 = vst.msk [vmem:[%s3690_s8 + $0xa8] sm:$0xf] %vm726_vm2, %v1334_v51 }
 0x105   :  { %742 = vst.msk [vmem:[%s3689_s7 + $0x3c] sm:$0xf] %vm726_vm2, %v677_v32  ;;  %v1435_v55 = vunpack.c.l.bf16 %v677_v32  ;;  %v1239_v62 = vpop.f32.mrf.mxu3 }
 0x106   :  { %v293_v7 = vadd.f32 %v2751_v25, %v225_v4  ;;  %v1335_v1 = vpack.c.bf16 %v1239_v62, %v1239_v62 }
 0x107   :  { %v1514_v34 = vsel %vm1484_vm3, %v1435_v55, 0.0  ;;  %v1635_v58 = vmul.f32 %v1435_v55, %v1435_v55 }
 0x108   :  { %v1515_v38 = vadd.f32 %v1514_v34, %v1513_v54  ;;  %1879 = vmatmul.msk.bf16.gmra.mxu1 %vm392_vm1, %v1004_v40  ;;  %v614_v16 = vpop.f32.mrf.mxu2  ;;  %v294_v54 = vadd.f32 %v2751_v25, %v226_v14  ;;  %v357_v21 = vmax.f32 %v293_v7, 0.0  ;;  %v1159_v25 = vpop.f32.mrf.mxu1  ;;  %1399 = vst.msk [vmem:[%s3690_s8 + $0xac] sm:$0xf] %vm726_vm2, %v1335_v1  ;;  %v891_v34 = vadd.f32 %v2797_v24, %v823_v42 }
 0x109   :  { %v1713_v2 = vsel %vm1484_vm3, %v1635_v58, 0.0  ;;  %v3116_v61 = vpack.c.bf16 %v614_v16, %v614_v16  ;;  %v1303_v20 = vpack.c.bf16 %v1159_v25, %v1159_v25  ;;  %v956_v14 = vmax.f32 %v892_v45, 0.0 }
 0x10a   :  { %v1714_v10 = vadd.f32 %v1713_v2, %v1712_v52  ;;  %v542_v13 = vpop.f32.mrf.mxu0  ;;  %v358_v44 = vmax.f32 %v294_v54, 0.0  ;;  %v856_v52 = vmul.f32 %v2810_v56, %v2021_v23  ;;  %v923_v23 = vadd.f32 %v2797_v24, %v855_v37 }
 0x10b   :  { %v678_v18 = vpack.c.bf16 %v542_v13, %v542_v13  ;;  %772 = vst.msk [vmem:[%s3689_s7 + $0xb4] sm:$0xf] %vm726_vm2, %v3116_v61  ;;  %v955_v31 = vmax.f32 %v891_v34, 0.0  ;;  %v858_v25 = vmul.f32 %v2810_v56, %v2025_v29  ;;  %v826_v42 = vmul.f32 %v2810_v56, %v1961_v60 }
 0x10c   :  { %v390_v19 = vpack.c.bf16 %v358_v44, %v357_v21  ;;  %1367 = vst.msk [vmem:[%s3690_s8 + $0x2c] sm:$0xf] %vm726_vm2, %v1303_v20  ;;  %v924_v8 = vadd.f32 %v2797_v24, %v856_v52  ;;  %v987_v28 = vmax.f32 %v923_v23, 0.0 }
 0x10d   :  { %743 = vst.msk [vmem:[%s3689_s7 + $0x40] sm:$0xf] %vm726_vm2, %v678_v18  ;;  %v1436_v48 = vunpack.c.l.bf16 %v678_v18  ;;  %v1242_v40 = vpop.f32.mrf.mxu3  ;;  %v926_v29 = vadd.f32 %v2797_v24, %v858_v25 }
 0x10e   :  { %v988_v46 = vmax.f32 %v924_v8, 0.0  ;;  %1865 = vmatmul.msk.bf16.gmra.mxu2 %vm392_vm1, %v390_v19  ;;  %v1336_v37 = vpack.c.bf16 %v1242_v40, %v1242_v40  ;;  %v825_v8 = vmul.f32 %v2810_v56, %v1960_v30 }
 0x10f   :  { %v1516_v27 = vsel %vm1484_vm3, %v1436_v48, 0.0  ;;  %v1636_v6 = vmul.f32 %v1436_v48, %v1436_v48  ;;  %v857_v48 = vmul.f32 %v2810_v56, %v2024_v43  ;;  %v990_v23 = vmax.f32 %v926_v29, 0.0 }
 0x110   :  { %v1517_v36 = vadd.f32 %v1516_v27, %v1515_v38  ;;  %v617_v12 = vpop.f32.mrf.mxu2  ;;  %v1021_v4 = vpack.c.bf16 %v988_v46, %v987_v28  ;;  %v1162_v38 = vpop.f32.mrf.mxu1  ;;  %1400 = vst.msk [vmem:[%s3690_s8 + $0xb0] sm:$0xf] %vm726_vm2, %v1336_v37  ;;  %v894_v46 = vadd.f32 %v2797_v24, %v826_v42 }
 0x111   :  { %v1715_v32 = vsel %vm1484_vm3, %v1636_v6, 0.0  ;;  %v3169_v18 = vpack.c.bf16 %v617_v12, %v617_v12  ;;  %v1304_v51 = vpack.c.bf16 %v1162_v38, %v1162_v38  ;;  %v925_v11 = vadd.f32 %v2797_v24, %v857_v48 }
 0x112   :  { %v1716_v22 = vadd.f32 %v1715_v32, %v1714_v10  ;;  %v544_v55 = vpop.f32.mrf.mxu0  ;;  %v1005_v10 = vpack.c.bf16 %v956_v14, %v955_v31  ;;  %v958_v60 = vmax.f32 %v894_v46, 0.0 }
 0x113   :  { %v679_v47 = vpack.c.bf16 %v544_v55, %v544_v55  ;;  %773 = vst.msk [vmem:[%s3689_s7 + $0xb8] sm:$0xf] %vm726_vm2, %v3169_v18  ;;  %v989_v19 = vmax.f32 %v925_v11, 0.0 }
 0x114   :  { %1896 = vmatmul.msk.bf16.gmra.mxu3 %vm392_vm1, %v1021_v4  ;;  %1368 = vst.msk [vmem:[%s3690_s8 + $0x30] sm:$0xf] %vm726_vm2, %v1304_v51 }
 0x115   :  { %744 = vst.msk [vmem:[%s3689_s7 + $0x44] sm:$0xf] %vm726_vm2, %v679_v47  ;;  %v1437_v58 = vunpack.c.l.bf16 %v679_v47  ;;  %v1244_v43 = vpop.f32.mrf.mxu3  ;;  %v1022_v50 = vpack.c.bf16 %v990_v23, %v989_v19  ;;  %v893_v47 = vadd.f32 %v2797_v24, %v825_v8 }
 0x116   :  { %v1337_v1 = vpack.c.bf16 %v1244_v43, %v1244_v43 }
 0x117   :  { %v1518_v0 = vsel %vm1484_vm3, %v1437_v58, 0.0  ;;  %v1637_v2 = vmul.f32 %v1437_v58, %v1437_v58  ;;  %v957_v30 = vmax.f32 %v893_v47, 0.0 }
 0x118   :  { %v1519_v7 = vadd.f32 %v1518_v0, %v1517_v36  ;;  %1880 = vmatmul.msk.bf16.gmra.mxu1 %vm392_vm1, %v1005_v10  ;;  %v619_v54 = vpop.f32.mrf.mxu2  ;;  %v1164_v52 = vpop.f32.mrf.mxu1  ;;  %1401 = vst.msk [vmem:[%s3690_s8 + $0xb4] sm:$0xf] %vm726_vm2, %v1337_v1 }
 0x119   :  { %v1717_v13 = vsel %vm1484_vm3, %v1637_v2, 0.0  ;;  %v3183_v62 = vpack.c.bf16 %v619_v54, %v619_v54  ;;  %v1305_v20 = vpack.c.bf16 %v1164_v52, %v1164_v52  ;;  %v1006_v4 = vpack.c.bf16 %v958_v60, %v957_v30 }
 0x11a   :  { %v1718_v41 = vadd.f32 %v1717_v13, %v1716_v22  ;;  %v547_v16 = vpop.f32.mrf.mxu0 }
 0x11b   :  { %v680_v21 = vpack.c.bf16 %v547_v16, %v547_v16  ;;  %774 = vst.msk [vmem:[%s3689_s7 + $0xbc] sm:$0xf] %vm726_vm2, %v3183_v62 }
 0x11c   :  { %1369 = vst.msk [vmem:[%s3690_s8 + $0x34] sm:$0xf] %vm726_vm2, %v1305_v20 }
 0x11d   :  { %745 = vst.msk [vmem:[%s3689_s7 + $0x48] sm:$0xf] %vm726_vm2, %v680_v21  ;;  %v1438_v44 = vunpack.c.l.bf16 %v680_v21  ;;  %v1247_v34 = vpop.f32.mrf.mxu3 }
 0x11f   :  { %v1520_v27 = vsel %vm1484_vm3, %v1438_v44, 0.0  ;;  %v1638_v6 = vmul.f32 %v1438_v44, %v1438_v44 }
 0x120   :  { %v1521_v36 = vadd.f32 %v1520_v27, %v1519_v7  ;;  %v622_v28 = vpop.f32.mrf.mxu2  ;;  %v1167_v35 = vpop.f32.mrf.mxu1  ;;  %v1338_v7 = vpack.c.bf16 %v1247_v34, %v1247_v34 }
 0x121   :  { %v1719_v32 = vsel %vm1484_vm3, %v1638_v6, 0.0  ;;  %v3229_v14 = vpack.c.bf16 %v622_v28, %v622_v28  ;;  %v1306_v0 = vpack.c.bf16 %v1167_v35, %v1167_v35 }
 0x122   :  { %v1720_v22 = vadd.f32 %v1719_v32, %v1718_v41  ;;  %v549_v55 = vpop.f32.mrf.mxu0  ;;  %1402 = vst.msk [vmem:[%s3690_s8 + $0xb8] sm:$0xf] %vm726_vm2, %v1338_v7 }
 0x123   :  { %v681_v12 = vpack.c.bf16 %v549_v55, %v549_v55  ;;  %775 = vst.msk [vmem:[%s3689_s7 + $0xc0] sm:$0xf] %vm726_vm2, %v3229_v14 }
 0x124   :  { %1897 = vmatmul.msk.bf16.gmra.mxu3 %vm392_vm1, %v1022_v50  ;;  %1370 = vst.msk [vmem:[%s3690_s8 + $0x38] sm:$0xf] %vm726_vm2, %v1306_v0 }
 0x125   :  { %746 = vst.msk [vmem:[%s3689_s7 + $0x4c] sm:$0xf] %vm726_vm2, %v681_v12  ;;  %v1439_v56 = vunpack.c.l.bf16 %v681_v12  ;;  %v1249_v54 = vpop.f32.mrf.mxu3 }
 0x126   :  { %v1339_v48 = vpack.c.bf16 %v1249_v54, %v1249_v54 }
 0x127   :  { %v1522_v45 = vsel %vm1484_vm3, %v1439_v56, 0.0  ;;  %v1639_v58 = vmul.f32 %v1439_v56, %v1439_v56 }
 0x128   :  { %v1523_v38 = vadd.f32 %v1522_v45, %v1521_v36  ;;  %1881 = vmatmul.msk.bf16.gmra.mxu1 %vm392_vm1, %v1006_v4  ;;  %v624_v10 = vpop.f32.mrf.mxu2  ;;  %v1169_v16 = vpop.f32.mrf.mxu1  ;;  %1403 = vst.msk [vmem:[%s3690_s8 + $0xbc] sm:$0xf] %vm726_vm2, %v1339_v48 }
 0x129   :  { %v1721_v40 = vsel %vm1484_vm3, %v1639_v58, 0.0  ;;  %v3237_v13 = vpack.c.bf16 %v624_v10, %v624_v10  ;;  %v1307_v51 = vpack.c.bf16 %v1169_v16, %v1169_v16 }
 0x12a   :  { %v1722_v24 = vadd.f32 %v1721_v40, %v1720_v22  ;;  %v552_v31 = vpop.f32.mrf.mxu0 }
 0x12b   :  { %v682_v2 = vpack.c.bf16 %v552_v31, %v552_v31  ;;  %776 = vst.msk [vmem:[%s3689_s7 + $0xc4] sm:$0xf] %vm726_vm2, %v3237_v13 }
 0x12c   :  { %1371 = vst.msk [vmem:[%s3690_s8 + $0x3c] sm:$0xf] %vm726_vm2, %v1307_v51 }
 0x12d   :  { %747 = vst.msk [vmem:[%s3689_s7 + $0x50] sm:$0xf] %vm726_vm2, %v682_v2  ;;  %v1440_v41 = vunpack.c.l.bf16 %v682_v2  ;;  %v1252_v1 = vpop.f32.mrf.mxu3 }
 0x12e   :  { %v1340_v23 = vpack.c.bf16 %v1252_v1, %v1252_v1 }
 0x12f   :  { %v1524_v21 = vsel %vm1484_vm3, %v1440_v41, 0.0  ;;  %v1640_v37 = vmul.f32 %v1440_v41, %v1440_v41 }
 0x130   :  { %v3252_v25 = vadd.f32 %v1524_v21, %v1523_v38  ;;  %v627_v29 = vpop.f32.mrf.mxu2  ;;  %1404 = vst.msk [vmem:[%s3690_s8 + $0xc0] sm:$0xf] %vm726_vm2, %v1340_v23 }
 0x131   :  { %v1723_v44 = vsel %vm1484_vm3, %v1640_v37, 0.0  ;;  %v1172_v20 = vpop.f32.mrf.mxu1  ;;  %v3277_v6 = vpack.c.bf16 %v627_v29, %v627_v29 }
 0x132   :  { %v3264_v52 = vadd.f32 %v1723_v44, %v1722_v24  ;;  %v554_v43 = vpop.f32.mrf.mxu0  ;;  %v1308_v36 = vpack.c.bf16 %v1172_v20, %v1172_v20 }
 0x133   :  { %v3270_v11 = vpack.c.bf16 %v554_v43, %v554_v43  ;;  %777 = vst.msk [vmem:[%s3689_s7 + $0xc8] sm:$0xf] %vm726_vm2, %v3277_v6 }
 0x134   :  { %1372 = vst.msk [vmem:[%s3690_s8 + $0x40] sm:$0xf] %vm726_vm2, %v1308_v36 }
 0x135   :  { %748 = vst.msk [vmem:[%s3689_s7 + $0x54] sm:$0xf] %vm726_vm2, %v3270_v11  ;;  %v1254_v55 = vpop.f32.mrf.mxu3 }
 0x136   :  { %v1341_v12 = vpack.c.bf16 %v1254_v55, %v1254_v55 }
 0x138   :  { %v629_v32 = vpop.f32.mrf.mxu2  ;;  %1405 = vst.msk [vmem:[%s3690_s8 + $0xc4] sm:$0xf] %vm726_vm2, %v1341_v12 }
 0x139   :  { %v3286_v8 = vpack.c.bf16 %v629_v32, %v629_v32  ;;  %v1174_v42 = vpop.f32.mrf.mxu1 }
 0x13a   :  { %v557_v27 = vpop.f32.mrf.mxu0  ;;  %v1309_v22 = vpack.c.bf16 %v1174_v42, %v1174_v42  ;;  %v1441_v42 = vunpack.c.l.bf16 %v3270_v11 }
 0x13b   :  { %v3279_v19 = vpack.c.bf16 %v557_v27, %v557_v27  ;;  %778 = vst.msk [vmem:[%s3689_s7 + $0xcc] sm:$0xf] %vm726_vm2, %v3286_v8 }
 0x13c   :  { %1373 = vst.msk [vmem:[%s3690_s8 + $0x44] sm:$0xf] %vm726_vm2, %v1309_v22 }
 0x13d   :  { %749 = vst.msk [vmem:[%s3689_s7 + $0x58] sm:$0xf] %vm726_vm2, %v3279_v19 }
 0x13f   :  { %v1257_v60 = vpop.f32.mrf.mxu3 }
 0x140   :  { %v1342_v45 = vpack.c.bf16 %v1257_v60, %v1257_v60 }
 0x141   :  { %v632_v47 = vpop.f32.mrf.mxu2 }
 0x142   :  { %v559_v28 = vpop.f32.mrf.mxu0  ;;  %v3321_v35 = vpack.c.bf16 %v632_v47, %v632_v47  ;;  %1406 = vst.msk [vmem:[%s3690_s8 + $0xc8] sm:$0xf] %vm726_vm2, %v1342_v45  ;;  %v1442_v47 = vunpack.c.l.bf16 %v3279_v19 }
 0x143   :  { %v3310_v50 = vpack.c.bf16 %v559_v28, %v559_v28  ;;  %v1177_v46 = vpop.f32.mrf.mxu1 }
 0x144   :  { %v1310_v30 = vpack.c.bf16 %v1177_v46, %v1177_v46  ;;  %779 = vst.msk [vmem:[%s3689_s7 + $0xd0] sm:$0xf] %vm726_vm2, %v3321_v35  ;;  %v1641_v46 = vmul.f32 %v1441_v42, %v1441_v42 }
 0x145   :  { %750 = vst.msk [vmem:[%s3689_s7 + $0x5c] sm:$0xf] %vm726_vm2, %v3310_v50 }
 0x146   :  { %1374 = vst.msk [vmem:[%s3690_s8 + $0x48] sm:$0xf] %vm726_vm2, %v1310_v30  ;;  %v1443_v30 = vunpack.c.l.bf16 %v3310_v50  ;;  %v1725_v50 = vsel %vm1484_vm3, %v1641_v46, 0.0 }
 0x147   :  { %v1259_v31 = vpop.f32.mrf.mxu3 }
 0x148   :  { %v1343_v2 = vpack.c.bf16 %v1259_v31, %v1259_v31 }
 0x149   :  { %v634_v58 = vpop.f32.mrf.mxu2 }
 0x14a   :  { %v562_v56 = vpop.f32.mrf.mxu0  ;;  %v3343_v38 = vpack.c.bf16 %v634_v58, %v634_v58  ;;  %1407 = vst.msk [vmem:[%s3690_s8 + $0xcc] sm:$0xf] %vm726_vm2, %v1343_v2 }
 0x14b   :  { %v3323_v34 = vpack.c.bf16 %v562_v56, %v562_v56  ;;  %v1179_v4 = vpop.f32.mrf.mxu1 }
 0x14c   :  { %v1311_v40 = vpack.c.bf16 %v1179_v4, %v1179_v4  ;;  %780 = vst.msk [vmem:[%s3689_s7 + $0xd4] sm:$0xf] %vm726_vm2, %v3343_v38  ;;  %v1526_v4 = vsel %vm1484_vm3, %v1441_v42, 0.0 }
 0x14d   :  { %751 = vst.msk [vmem:[%s3689_s7 + $0x60] sm:$0xf] %vm726_vm2, %v3323_v34 }
 0x14e   :  { %1375 = vst.msk [vmem:[%s3690_s8 + $0x4c] sm:$0xf] %vm726_vm2, %v1311_v40  ;;  %v1642_v40 = vmul.f32 %v1442_v47, %v1442_v47 }
 0x150   :  { %v1262_v54 = vpop.f32.mrf.mxu3 }
 0x151   :  { %v637_v7 = vpop.f32.mrf.mxu2  ;;  %v1344_v37 = vpack.c.bf16 %v1262_v54, %v1262_v54  ;;  %v1727_v54 = vsel %vm1484_vm3, %v1642_v40, 0.0 }
 0x152   :  { %v564_v24 = vpop.f32.mrf.mxu0  ;;  %v3362_v16 = vpack.c.bf16 %v637_v7, %v637_v7 }
 0x153   :  { %v687_v0 = vpack.c.bf16 %v564_v24, %v564_v24  ;;  %1408 = vst.msk [vmem:[%s3690_s8 + $0xd0] sm:$0xf] %vm726_vm2, %v1344_v37  ;;  %v1444_v24 = vunpack.c.l.bf16 %v3323_v34  ;;  %v1530_v37 = vsel %vm1484_vm3, %v1443_v30, 0.0 }
 0x154   :  { %781 = vst.msk [vmem:[%s3689_s7 + $0xd8] sm:$0xf] %vm726_vm2, %v3362_v16 }
 0x155   :  { %752 = vst.msk [vmem:[%s3689_s7 + $0x64] sm:$0xf] %vm726_vm2, %v687_v0  ;;  %v1182_v10 = vpop.f32.mrf.mxu1  ;;  %v1445_v31 = vunpack.c.l.bf16 %v687_v0  ;;  %v1527_v0 = vadd.f32 %v1526_v4, %v3252_v25 }
 0x156   :  { %v1312_v51 = vpack.c.bf16 %v1182_v10, %v1182_v10  ;;  %v1528_v10 = vsel %vm1484_vm3, %v1442_v47, 0.0 }
 0x158   :  { %1376 = vst.msk [vmem:[%s3690_s8 + $0x50] sm:$0xf] %vm726_vm2, %v1312_v51  ;;  %v1264_v1 = vpop.f32.mrf.mxu3 }
 0x159   :  { %v639_v48 = vpop.f32.mrf.mxu2  ;;  %v1345_v36 = vpack.c.bf16 %v1264_v1, %v1264_v1  ;;  %v1645_v1 = vmul.f32 %v1445_v31, %v1445_v31 }
 0x15a   :  { %v567_v41 = vpop.f32.mrf.mxu0  ;;  %v3381_v43 = vpack.c.bf16 %v639_v48, %v639_v48  ;;  %v1644_v48 = vmul.f32 %v1444_v24, %v1444_v24 }
 0x15b   :  { %v688_v21 = vpack.c.bf16 %v567_v41, %v567_v41  ;;  %1409 = vst.msk [vmem:[%s3690_s8 + $0xd4] sm:$0xf] %vm726_vm2, %v1345_v36  ;;  %v1643_v41 = vmul.f32 %v1443_v30, %v1443_v30  ;;  %v1532_v36 = vsel %vm1484_vm3, %v1444_v24, 0.0  ;;  %v1733_v30 = vsel %vm1484_vm3, %v1645_v1, 0.0 }
 0x15c   :  { %782 = vst.msk [vmem:[%s3689_s7 + $0xdc] sm:$0xf] %vm726_vm2, %v3381_v43 }
 0x15d   :  { %753 = vst.msk [vmem:[%s3689_s7 + $0x68] sm:$0xf] %vm726_vm2, %v688_v21  ;;  %v1184_v44 = vpop.f32.mrf.mxu1  ;;  %v1729_v25 = vsel %vm1484_vm3, %v1643_v41, 0.0 }
 0x15e   :  { %v1313_v29 = vpack.c.bf16 %v1184_v44, %v1184_v44  ;;  %v1446_v44 = vunpack.c.l.bf16 %v688_v21 }
 0x160   :  { %1377 = vst.msk [vmem:[%s3690_s8 + $0x54] sm:$0xf] %vm726_vm2, %v1313_v29  ;;  %v1726_v29 = vadd.f32 %v1725_v50, %v3264_v52  ;;  %v1534_v52 = vsel %vm1484_vm3, %v1445_v31, 0.0  ;;  %v1646_v47 = vmul.f32 %v1446_v44, %v1446_v44 }
 0x161   :  { %v642_v23 = vpop.f32.mrf.mxu2 }
 0x162   :  { %v569_v20 = vpop.f32.mrf.mxu0  ;;  %v3401_v28 = vpack.c.bf16 %v642_v23, %v642_v23  ;;  %v1728_v42 = vadd.f32 %v1727_v54, %v1726_v29 }
 0x163   :  { %v689_v27 = vpack.c.bf16 %v569_v20, %v569_v20  ;;  %v1529_v20 = vadd.f32 %v1528_v10, %v1527_v0 }
 0x164   :  { %v1267_v55 = vpop.f32.mrf.mxu3  ;;  %783 = vst.msk [vmem:[%s3689_s7 + $0xe0] sm:$0xf] %vm726_vm2, %v3401_v28 }
 0x165   :  { %754 = vst.msk [vmem:[%s3689_s7 + $0x6c] sm:$0xf] %vm726_vm2, %v689_v27  ;;  %v1187_v32 = vpop.f32.mrf.mxu1  ;;  %v1346_v56 = vpack.c.bf16 %v1267_v55, %v1267_v55  ;;  %v1447_v23 = vunpack.c.l.bf16 %v689_v27  ;;  %v1731_v55 = vsel %vm1484_vm3, %v1644_v48, 0.0 }
 0x166   :  { %v1314_v11 = vpack.c.bf16 %v1187_v32, %v1187_v32 }
 0x167   :  { %1410 = vst.msk [vmem:[%s3690_s8 + $0xd8] sm:$0xf] %vm726_vm2, %v1346_v56  ;;  %v1647_v4 = vmul.f32 %v1447_v23, %v1447_v23  ;;  %v1538_v31 = vsel %vm1484_vm3, %v1447_v23, 0.0 }
 0x168   :  { %1378 = vst.msk [vmem:[%s3690_s8 + $0x58] sm:$0xf] %vm726_vm2, %v1314_v11  ;;  %v1730_v11 = vadd.f32 %v1729_v25, %v1728_v42  ;;  %v1452_v42 = vunpack.c.l.bf16 %v2573_v53 }
 0x169   :  { %v644_v60 = vpop.f32.mrf.mxu2  ;;  %v1737_v54 = vsel %vm1484_vm3, %v1647_v4, 0.0 }
 0x16a   :  { %v572_v22 = vpop.f32.mrf.mxu0  ;;  %v3418_v19 = vpack.c.bf16 %v644_v60, %v644_v60  ;;  %v1536_v60 = vsel %vm1484_vm3, %v1446_v44, 0.0  ;;  %v1732_v50 = vadd.f32 %v1731_v55, %v1730_v11 }
 0x16b   :  { %v690_v12 = vpack.c.bf16 %v572_v22, %v572_v22  ;;  %v1531_v22 = vadd.f32 %v1530_v37, %v1529_v20 }
 0x16c   :  { %784 = vst.msk [vmem:[%s3689_s7 + $0xe4] sm:$0xf] %vm726_vm2, %v3418_v19  ;;  %v1269_v7 = vpop.f32.mrf.mxu3  ;;  %v1734_v41 = vadd.f32 %v1733_v30, %v1732_v50  ;;  %v1652_v50 = vmul.f32 %v1452_v42, %v1452_v42 }
 0x16d   :  { %755 = vst.msk [vmem:[%s3689_s7 + $0x70] sm:$0xf] %vm726_vm2, %v690_v12  ;;  %v1189_v45 = vpop.f32.mrf.mxu1  ;;  %v1347_v51 = vpack.c.bf16 %v1269_v7, %v1269_v7  ;;  %v1448_v46 = vunpack.c.l.bf16 %v690_v12  ;;  %v1533_v56 = vadd.f32 %v1532_v36, %v1531_v22  ;;  %v1735_v7 = vsel %vm1484_vm3, %v1646_v47, 0.0 }
 0x16e   :  { %v1315_v58 = vpack.c.bf16 %v1189_v45, %v1189_v45  ;;  %v1736_v20 = vadd.f32 %v1735_v7, %v1734_v41 }
 0x16f   :  { %1411 = vst.msk [vmem:[%s3690_s8 + $0xdc] sm:$0xf] %vm726_vm2, %v1347_v51  ;;  %v1648_v12 = vmul.f32 %v1448_v46, %v1448_v46  ;;  %v1540_v37 = vsel %vm1484_vm3, %v1448_v46, 0.0 }
 0x170   :  { %1379 = vst.msk [vmem:[%s3690_s8 + $0x5c] sm:$0xf] %vm726_vm2, %v1315_v58  ;;  %v1738_v22 = vadd.f32 %v1737_v54, %v1736_v20 }
 0x171   :  { %v647_v21 = vpop.f32.mrf.mxu2  ;;  %v1739_v23 = vsel %vm1484_vm3, %v1648_v12, 0.0 }
 0x172   :  { %v574_v2 = vpop.f32.mrf.mxu0  ;;  %v3455_v24 = vpack.c.bf16 %v647_v21, %v647_v21  ;;  %v1740_v30 = vadd.f32 %v1739_v23, %v1738_v22  ;;  %v1457_v22 = vunpack.c.l.bf16 %v2762_v49 }
 0x173   :  { %v691_v34 = vpack.c.bf16 %v574_v2, %v574_v2  ;;  %v1535_v2 = vadd.f32 %v1534_v52, %v1533_v56 }
 0x174   :  { %v1272_v58 = vpop.f32.mrf.mxu3  ;;  %785 = vst.msk [vmem:[%s3689_s7 + $0xe8] sm:$0xf] %vm726_vm2, %v3455_v24 }
 0x175   :  { %756 = vst.msk [vmem:[%s3689_s7 + $0x74] sm:$0xf] %vm726_vm2, %v691_v34  ;;  %v1192_v32 = vpop.f32.mrf.mxu1  ;;  %v1449_v27 = vunpack.c.l.bf16 %v691_v34  ;;  %v1537_v51 = vadd.f32 %v1536_v60, %v1535_v2  ;;  %v1348_v0 = vpack.c.bf16 %v1272_v58, %v1272_v58  ;;  %v1454_v2 = vunpack.c.l.bf16 %v2649_v33 }
 0x176   :  { %v1316_v34 = vpack.c.bf16 %v1192_v32, %v1192_v32  ;;  %v1747_v33 = vsel %vm1484_vm3, %v1652_v50, 0.0  ;;  %v1657_v50 = vmul.f32 %v1457_v22, %v1457_v22 }
 0x177   :  { %v1649_v48 = vmul.f32 %v1449_v27, %v1449_v27  ;;  %v1539_v1 = vadd.f32 %v1538_v31, %v1537_v51  ;;  %v1542_v21 = vsel %vm1484_vm3, %v1449_v27, 0.0  ;;  %1412 = vst.msk [vmem:[%s3690_s8 + $0xe0] sm:$0xf] %vm726_vm2, %v1348_v0  ;;  %v1548_v51 = vsel %vm1484_vm3, %v1452_v42, 0.0 }
 0x178   :  { %1380 = vst.msk [vmem:[%s3690_s8 + $0x60] sm:$0xf] %vm726_vm2, %v1316_v34  ;;  %v1455_v0 = vunpack.c.l.bf16 %v2660_v15  ;;  %v1654_v20 = vmul.f32 %v1454_v2, %v1454_v2  ;;  %v1552_v15 = vsel %vm1484_vm3, %v1454_v2, 0.0  ;;  %v1459_v2 = vunpack.c.l.bf16 %v2867_v57 }
 0x179   :  { %v649_v44 = vpop.f32.mrf.mxu2  ;;  %v1541_v55 = vadd.f32 %v1540_v37, %v1539_v1  ;;  %v1741_v46 = vsel %vm1484_vm3, %v1649_v48, 0.0  ;;  %v1456_v1 = vunpack.c.l.bf16 %v2745_v17  ;;  %v1460_v57 = vunpack.c.l.bf16 %v2945_v26 }
 0x17a   :  { %v577_v45 = vpop.f32.mrf.mxu0  ;;  %v3474_v25 = vpack.c.bf16 %v649_v44, %v649_v44  ;;  %v1742_v27 = vadd.f32 %v1741_v46, %v1740_v30  ;;  %v1655_v42 = vmul.f32 %v1455_v0, %v1455_v0  ;;  %v1751_v46 = vsel %vm1484_vm3, %v1654_v20, 0.0 }
 0x17b   :  { %v692_v40 = vpack.c.bf16 %v577_v45, %v577_v45  ;;  %v1543_v60 = vadd.f32 %v1542_v21, %v1541_v55  ;;  %v1453_v45 = vunpack.c.l.bf16 %v2577_v59  ;;  %v1660_v20 = vmul.f32 %v1460_v57, %v1460_v57 }
 0x17c   :  { %786 = vst.msk [vmem:[%s3689_s7 + $0xec] sm:$0xf] %vm726_vm2, %v3474_v25  ;;  %v1274_v47 = vpop.f32.mrf.mxu3 }
 0x17d   :  { %757 = vst.msk [vmem:[%s3689_s7 + $0x78] sm:$0xf] %vm726_vm2, %v692_v40  ;;  %v1450_v10 = vunpack.c.l.bf16 %v692_v40  ;;  %v1194_v29 = vpop.f32.mrf.mxu1  ;;  %v1349_v53 = vpack.c.bf16 %v1274_v47, %v1274_v47  ;;  %v1653_v34 = vmul.f32 %v1453_v45, %v1453_v45  ;;  %v1550_v37 = vsel %vm1484_vm3, %v1453_v45, 0.0 }
 0x17e   :  { %v1317_v36 = vpack.c.bf16 %v1194_v29, %v1194_v29 }
 0x17f   :  { %v1650_v32 = vmul.f32 %v1450_v10, %v1450_v10  ;;  %v1544_v11 = vsel %vm1484_vm3, %v1450_v10, 0.0  ;;  %1413 = vst.msk [vmem:[%s3690_s8 + $0xe4] sm:$0xf] %vm726_vm2, %v1349_v53  ;;  %v1458_v53 = vunpack.c.l.bf16 %v2852_v63  ;;  %v1558_v63 = vsel %vm1484_vm3, %v1457_v22, 0.0 }
 0x180   :  { %1381 = vst.msk [vmem:[%s3690_s8 + $0x64] sm:$0xf] %vm726_vm2, %v1317_v36  ;;  %v1545_v40 = vadd.f32 %v1544_v11, %v1543_v60  ;;  %v1554_v11 = vsel %vm1484_vm3, %v1455_v0, 0.0  ;;  %v1757_v0 = vsel %vm1484_vm3, %v1657_v50, 0.0 }
 0x181   :  { %v1743_v58 = vsel %vm1484_vm3, %v1650_v32, 0.0  ;;  %v652_v31 = vpop.f32.mrf.mxu2  ;;  %v1749_v32 = vsel %vm1484_vm3, %v1653_v34, 0.0 }
 0x182   :  { %v579_v52 = vpop.f32.mrf.mxu0  ;;  %v1744_v10 = vadd.f32 %v1743_v58, %v1742_v27  ;;  %v3512_v36 = vpack.c.bf16 %v652_v31, %v652_v31  ;;  %v1753_v27 = vsel %vm1484_vm3, %v1655_v42, 0.0  ;;  %v1564_v42 = vsel %vm1484_vm3, %v1460_v57, 0.0 }
 0x183   :  { %v693_v56 = vpack.c.bf16 %v579_v52, %v579_v52 }
 0x184   :  { %787 = vst.msk [vmem:[%s3689_s7 + $0xf0] sm:$0xf] %vm726_vm2, %v3512_v36 }
 0x185   :  { %758 = vst.msk [vmem:[%s3689_s7 + $0x7c] sm:$0xf] %vm726_vm2, %v693_v56  ;;  %v1451_v4 = vunpack.c.l.bf16 %v693_v56  ;;  %v1197_v12 = vpop.f32.mrf.mxu1  ;;  %v1656_v56 = vmul.f32 %v1456_v1, %v1456_v1 }
 0x186   :  { %v1318_v17 = vpack.c.bf16 %v1197_v12, %v1197_v12 }
 0x187   :  { %v1546_v59 = vsel %vm1484_vm3, %v1451_v4, 0.0  ;;  %v1651_v7 = vmul.f32 %v1451_v4, %v1451_v4  ;;  %v1277_v29 = vpop.f32.mrf.mxu3  ;;  %v1755_v12 = vsel %vm1484_vm3, %v1656_v56, 0.0 }
 0x188   :  { %v1547_v41 = vadd.f32 %v1546_v59, %v1545_v40  ;;  %v1350_v47 = vpack.c.bf16 %v1277_v29, %v1277_v29  ;;  %1382 = vst.msk [vmem:[%s3690_s8 + $0x68] sm:$0xf] %vm726_vm2, %v1318_v17  ;;  %v1556_v40 = vsel %vm1484_vm3, %v1456_v1, 0.0  ;;  %v1462_v1 = vunpack.c.l.bf16 %v3030_v3 }
 0x189   :  { %v1745_v54 = vsel %vm1484_vm3, %v1651_v7, 0.0  ;;  %v654_v30 = vpop.f32.mrf.mxu2  ;;  %v1464_v3 = vunpack.c.l.bf16 %v3107_v39 }
 0x18a   :  { %v1549_v48 = vadd.f32 %v1548_v51, %v1547_v41  ;;  %v1746_v44 = vadd.f32 %v1745_v54, %v1744_v10  ;;  %v3529_v58 = vpack.c.bf16 %v654_v30, %v654_v30  ;;  %1414 = vst.msk [vmem:[%s3690_s8 + $0xe8] sm:$0xf] %vm726_vm2, %v1350_v47  ;;  %v1658_v10 = vmul.f32 %v1458_v53, %v1458_v53 }
 0x18b   :  { %v1560_v54 = vsel %vm1484_vm3, %v1458_v53, 0.0  ;;  %v1662_v56 = vmul.f32 %v1462_v1, %v1462_v1 }
 0x18c   :  { %v1551_v23 = vadd.f32 %v1550_v37, %v1549_v48  ;;  %v1748_v21 = vadd.f32 %v1747_v33, %v1746_v44  ;;  %788 = vst.msk [vmem:[%s3689_s7 + $0xf4] sm:$0xf] %vm726_vm2, %v3529_v58  ;;  %v1659_v37 = vmul.f32 %v1459_v2, %v1459_v2  ;;  %v1461_v48 = vunpack.c.l.bf16 %v2960_v5 }
 0x18d   :  { %v1199_v60 = vpop.f32.mrf.mxu1  ;;  %v1759_v29 = vsel %vm1484_vm3, %v1658_v10, 0.0  ;;  %v1562_v33 = vsel %vm1484_vm3, %v1459_v2, 0.0  ;;  %v1767_v2 = vsel %vm1484_vm3, %v1662_v56, 0.0 }
 0x18e   :  { %v1553_v55 = vadd.f32 %v1552_v15, %v1551_v23  ;;  %v1750_v52 = vadd.f32 %v1749_v32, %v1748_v21  ;;  %v1319_v4 = vpack.c.bf16 %v1199_v60, %v1199_v60  ;;  %v1761_v5 = vsel %vm1484_vm3, %v1659_v37, 0.0 }
 0x18f   :  { %v1279_v31 = vpop.f32.mrf.mxu3  ;;  %v1661_v22 = vmul.f32 %v1461_v48, %v1461_v48 }
 0x190   :  { %v1555_v49 = vadd.f32 %v1554_v11, %v1553_v55  ;;  %v1752_v45 = vadd.f32 %v1751_v46, %v1750_v52  ;;  %1383 = vst.msk [vmem:[%s3690_s8 + $0x6c] sm:$0xf] %vm726_vm2, %v1319_v4  ;;  %v1351_v41 = vpack.c.bf16 %v1279_v31, %v1279_v31  ;;  %v1463_v55 = vunpack.c.l.bf16 %v3039_v9 }
 0x191   :  { %v657_v23 = vpop.f32.mrf.mxu2  ;;  %v1566_v52 = vsel %vm1484_vm3, %v1461_v48, 0.0  ;;  %v1763_v11 = vsel %vm1484_vm3, %v1660_v20, 0.0  ;;  %v1465_v9 = vunpack.c.l.bf16 %v3116_v61  ;;  %v1469_v20 = vunpack.c.l.bf16 %v3237_v13 }
 0x192   :  { %v1557_v59 = vadd.f32 %v1556_v40, %v1555_v49  ;;  %v1754_v7 = vadd.f32 %v1753_v27, %v1752_v45  ;;  %1415 = vst.msk [vmem:[%s3690_s8 + $0xec] sm:$0xf] %vm726_vm2, %v1351_v41  ;;  %v3566_v53 = vpack.c.bf16 %v657_v23, %v657_v23  ;;  %v1765_v49 = vsel %vm1484_vm3, %v1661_v22, 0.0 }
 0x193   :  { %v1568_v45 = vsel %vm1484_vm3, %v1462_v1, 0.0  ;;  %v1663_v4 = vmul.f32 %v1463_v55, %v1463_v55  ;;  %v1470_v13 = vunpack.c.l.bf16 %v3277_v6 }
 0x194   :  { %v1559_v51 = vadd.f32 %v1558_v63, %v1557_v59  ;;  %v1756_v34 = vadd.f32 %v1755_v12, %v1754_v7  ;;  %789 = vst.msk [vmem:[%s3689_s7 + $0xf8] sm:$0xf] %vm726_vm2, %v3566_v53  ;;  %v1570_v63 = vsel %vm1484_vm3, %v1463_v55, 0.0  ;;  %v1664_v59 = vmul.f32 %v1464_v3, %v1464_v3 }
 0x195   :  { %v1202_v21 = vpop.f32.mrf.mxu1  ;;  %v1466_v7 = vunpack.c.l.bf16 %v3169_v18  ;;  %v1574_v18 = vsel %vm1484_vm3, %v1465_v9, 0.0  ;;  %v1670_v6 = vmul.f32 %v1470_v13, %v1470_v13 }
 0x196   :  { %v1561_v26 = vadd.f32 %v1560_v54, %v1559_v51  ;;  %v1758_v44 = vadd.f32 %v1757_v0, %v1756_v34  ;;  %v1320_v39 = vpack.c.bf16 %v1202_v21, %v1202_v21  ;;  %v1769_v51 = vsel %vm1484_vm3, %v1663_v4, 0.0 }
 0x197   :  { %v1282_v46 = vpop.f32.mrf.mxu3  ;;  %v1572_v34 = vsel %vm1484_vm3, %v1464_v3, 0.0  ;;  %v1665_v0 = vmul.f32 %v1465_v9, %v1465_v9  ;;  %v1467_v54 = vunpack.c.l.bf16 %v3183_v62  ;;  %v1468_v62 = vunpack.c.l.bf16 %v3229_v14 }
 0x198   :  { %v1563_v32 = vadd.f32 %v1562_v33, %v1561_v26  ;;  %v1760_v15 = vadd.f32 %v1759_v29, %v1758_v44  ;;  %v1352_v50 = vpack.c.bf16 %v1282_v46, %v1282_v46  ;;  %1384 = vst.msk [vmem:[%s3690_s8 + $0x70] sm:$0xf] %vm726_vm2, %v1320_v39  ;;  %v1771_v44 = vsel %vm1484_vm3, %v1664_v59, 0.0 }
 0x199   :  { %v659_v31 = vpop.f32.mrf.mxu2  ;;  %v1666_v29 = vmul.f32 %v1466_v7, %v1466_v7  ;;  %v1773_v21 = vsel %vm1484_vm3, %v1665_v0, 0.0  ;;  %v1578_v22 = vsel %vm1484_vm3, %v1467_v54, 0.0  ;;  %v1668_v55 = vmul.f32 %v1468_v62, %v1468_v62 }
 0x19a   :  { %v1565_v17 = vadd.f32 %v1564_v42, %v1563_v32  ;;  %v1762_v47 = vadd.f32 %v1761_v5, %v1760_v15  ;;  %v3583_v57 = vpack.c.bf16 %v659_v31, %v659_v31  ;;  %1416 = vst.msk [vmem:[%s3690_s8 + $0xf0] sm:$0xf] %vm726_vm2, %v1352_v50  ;;  %v1576_v32 = vsel %vm1484_vm3, %v1466_v7, 0.0 }
 0x19b   :  { %v1667_v15 = vmul.f32 %v1467_v54, %v1467_v54  ;;  %v1775_v42 = vsel %vm1484_vm3, %v1666_v29, 0.0  ;;  %v1580_v56 = vsel %vm1484_vm3, %v1468_v62, 0.0  ;;  %v1471_v3 = vunpack.c.l.bf16 %v3286_v8 }
 0x19c   :  { %v1567_v30 = vadd.f32 %v1566_v52, %v1565_v17  ;;  %v1764_v60 = vadd.f32 %v1763_v11, %v1762_v47  ;;  %790 = vst.msk [vmem:[%s3689_s7 + $0xfc] sm:$0xf] %vm726_vm2, %v3583_v57  ;;  %v1669_v17 = vmul.f32 %v1469_v20, %v1469_v20  ;;  %v1779_v4 = vsel %vm1484_vm3, %v1668_v55, 0.0 }
 0x19d   :  { %v1204_v12 = vpop.f32.mrf.mxu1  ;;  %v1777_v11 = vsel %vm1484_vm3, %v1667_v15, 0.0  ;;  %v1582_v9 = vsel %vm1484_vm3, %v1469_v20, 0.0  ;;  %v1584_v50 = vsel %vm1484_vm3, %v1470_v13, 0.0  ;;  %v1473_v8 = vunpack.c.l.bf16 %v3343_v38 }
 0x19e   :  { %v1569_v27 = vadd.f32 %v1568_v45, %v1567_v30  ;;  %v1766_v40 = vadd.f32 %v1765_v49, %v1764_v60  ;;  %v1321_v41 = vpack.c.bf16 %v1204_v12, %v1204_v12  ;;  %v1472_v30 = vunpack.c.l.bf16 %v3321_v35 }
 0x19f   :  { %v1284_v26 = vpop.f32.mrf.mxu3  ;;  %v1783_v12 = vsel %vm1484_vm3, %v1670_v6, 0.0  ;;  %v1590_v29 = vsel %vm1484_vm3, %v1473_v8, 0.0  ;;  %v1477_v15 = vunpack.c.l.bf16 %v3418_v19  ;;  %v1478_v55 = vunpack.c.l.bf16 %v3455_v24 }
 0x1a0   :  { %v1571_v61 = vadd.f32 %v1570_v63, %v1569_v27  ;;  %v1768_v10 = vadd.f32 %v1767_v2, %v1766_v40  ;;  %1385 = vst.msk [vmem:[%s3690_s8 + $0x74] sm:$0xf] %vm726_vm2, %v1321_v41  ;;  %v1353_v33 = vpack.c.bf16 %v1284_v26, %v1284_v26  ;;  %v1781_v27 = vsel %vm1484_vm3, %v1669_v17, 0.0 }
 0x1a1   :  { %v1671_v2 = vmul.f32 %v1471_v3, %v1471_v3  ;;  %v1672_v63 = vmul.f32 %v1472_v30, %v1472_v30  ;;  %v1588_v54 = vsel %vm1484_vm3, %v1472_v30, 0.0  ;;  %v1598_v30 = vsel %vm1484_vm3, %v1477_v15, 0.0 }
 0x1a2   :  { %v1770_v37 = vadd.f32 %v1769_v51, %v1768_v10  ;;  %v1573_v48 = vadd.f32 %v1572_v34, %v1571_v61  ;;  %1417 = vst.msk [vmem:[%s3690_s8 + $0xf4] sm:$0xf] %vm726_vm2, %v1353_v33  ;;  %v1586_v61 = vsel %vm1484_vm3, %v1471_v3, 0.0  ;;  %v1474_v10 = vunpack.c.l.bf16 %v3362_v16 }
 0x1a3   :  { %v1785_v38 = vsel %vm1484_vm3, %v1671_v2, 0.0  ;;  %v1787_v16 = vsel %vm1484_vm3, %v1672_v63, 0.0  ;;  %v1482_v63 = vunpack.c.l.bf16 %v3566_v53 }
 0x1a4   :  { %v1575_v1 = vadd.f32 %v1574_v18, %v1573_v48  ;;  %v1772_v23 = vadd.f32 %v1771_v44, %v1770_v37  ;;  %v1673_v18 = vmul.f32 %v1473_v8, %v1473_v8  ;;  %v1475_v37 = vunpack.c.l.bf16 %v3381_v43 }
 0x1a5   :  { %v1207_v52 = vpop.f32.mrf.mxu1  ;;  %v1674_v62 = vmul.f32 %v1474_v10, %v1474_v10  ;;  %v1476_v43 = vunpack.c.l.bf16 %v3401_v28 }
 0x1a6   :  { %v1577_v14 = vadd.f32 %v1576_v32, %v1575_v1  ;;  %v1774_v5 = vadd.f32 %v1773_v21, %v1772_v23  ;;  %v1322_v7 = vpack.c.bf16 %v1207_v52, %v1207_v52  ;;  %v1789_v23 = vsel %vm1484_vm3, %v1673_v18, 0.0 }
 0x1a7   :  { %v1287_v45 = vpop.f32.mrf.mxu3  ;;  %v1592_v21 = vsel %vm1484_vm3, %v1474_v10, 0.0  ;;  %v1675_v32 = vmul.f32 %v1475_v37, %v1475_v37  ;;  %v1594_v28 = vsel %vm1484_vm3, %v1475_v37, 0.0  ;;  %v1596_v19 = vsel %vm1484_vm3, %v1476_v43, 0.0 }
 0x1a8   :  { %v1579_v47 = vadd.f32 %v1578_v22, %v1577_v14  ;;  %v1776_v46 = vadd.f32 %v1775_v42, %v1774_v5  ;;  %v1354_v31 = vpack.c.bf16 %v1287_v45, %v1287_v45  ;;  %1386 = vst.msk [vmem:[%s3690_s8 + $0x78] sm:$0xf] %vm726_vm2, %v1322_v7  ;;  %v1791_v42 = vsel %vm1484_vm3, %v1674_v62, 0.0 }
 0x1a9   :  { %v1676_v22 = vmul.f32 %v1476_v43, %v1476_v43  ;;  %v1793_v17 = vsel %vm1484_vm3, %v1675_v32, 0.0 }
 0x1aa   :  { %v1581_v60 = vadd.f32 %v1580_v56, %v1579_v47  ;;  %v1778_v49 = vadd.f32 %v1777_v11, %v1776_v46  ;;  %1418 = vst.msk [vmem:[%s3690_s8 + $0xf8] sm:$0xf] %vm726_vm2, %v1354_v31  ;;  %v1677_v47 = vmul.f32 %v1477_v15, %v1477_v15  ;;  %v1479_v46 = vunpack.c.l.bf16 %v3474_v25 }
 0x1ab   :  { %v1795_v3 = vsel %vm1484_vm3, %v1676_v22, 0.0  ;;  %v1483_v31 = vunpack.c.l.bf16 %v3583_v57 }
 0x1ac   :  { %v1583_v40 = vadd.f32 %v1582_v9, %v1581_v60  ;;  %v1780_v39 = vadd.f32 %v1779_v4, %v1778_v49  ;;  %v1678_v60 = vmul.f32 %v1478_v55, %v1478_v55  ;;  %v1480_v49 = vunpack.c.l.bf16 %v3512_v36 }
 0x1ad   :  { %v1209_v41 = vpop.f32.mrf.mxu1  ;;  %v1797_v4 = vsel %vm1484_vm3, %v1677_v47, 0.0  ;;  %v1600_v9 = vsel %vm1484_vm3, %v1478_v55, 0.0  ;;  %v1679_v6 = vmul.f32 %v1479_v46, %v1479_v46  ;;  %v1610_v57 = vsel %vm1484_vm3, %v1483_v31, 0.0 }
 0x1ae   :  { %v1585_v59 = vadd.f32 %v1584_v50, %v1583_v40  ;;  %v1782_v35 = vadd.f32 %v1781_v27, %v1780_v39  ;;  %v1323_v0 = vpack.c.bf16 %v1209_v41, %v1209_v41  ;;  %v1481_v27 = vunpack.c.l.bf16 %v3529_v58 }
 0x1af   :  { %v1289_v44 = vpop.f32.mrf.mxu3  ;;  %v1799_v39 = vsel %vm1484_vm3, %v1678_v60, 0.0  ;;  %v1602_v50 = vsel %vm1484_vm3, %v1479_v46, 0.0  ;;  %v1680_v2 = vmul.f32 %v1480_v49, %v1480_v49  ;;  %v1682_v41 = vmul.f32 %v1482_v63, %v1482_v63 }
 0x1b0   :  { %v1587_v51 = vadd.f32 %v1586_v61, %v1585_v59  ;;  %v1784_v34 = vadd.f32 %v1783_v12, %v1782_v35  ;;  %1387 = vst.msk [vmem:[%s3690_s8 + $0x7c] sm:$0xf] %vm726_vm2, %v1323_v0  ;;  %v1355_v33 = vpack.c.bf16 %v1289_v44, %v1289_v44  ;;  %v1801_v59 = vsel %vm1484_vm3, %v1679_v6, 0.0 }
 0x1b1   :  { %v1604_v35 = vsel %vm1484_vm3, %v1480_v49, 0.0  ;;  %v1681_v7 = vmul.f32 %v1481_v27, %v1481_v27  ;;  %v1803_v61 = vsel %vm1484_vm3, %v1680_v2, 0.0  ;;  %v1606_v10 = vsel %vm1484_vm3, %v1481_v27, 0.0 }
 0x1b2   :  { %v1589_v48 = vadd.f32 %v1588_v54, %v1587_v51  ;;  %v1786_v26 = vadd.f32 %v1785_v38, %v1784_v34  ;;  %1419 = vst.msk [vmem:[%s3690_s8 + $0xfc] sm:$0xf] %vm726_vm2, %v1355_v33  ;;  %v1608_v0 = vsel %vm1484_vm3, %v1482_v63, 0.0  ;;  %v1683_v38 = vmul.f32 %v1483_v31, %v1483_v31 }
 0x1b3   :  { %v1805_v53 = vsel %vm1484_vm3, %v1681_v7, 0.0  ;;  %v1807_v37 = vsel %vm1484_vm3, %v1682_v41, 0.0 }
 0x1b4   :  { %v1591_v20 = vadd.f32 %v1590_v29, %v1589_v48  ;;  %v1788_v1 = vadd.f32 %v1787_v16, %v1786_v26  ;;  %v1809_v26 = vsel %vm1484_vm3, %v1683_v38, 0.0 }
 0x1b6   :  { %v1593_v14 = vadd.f32 %v1592_v21, %v1591_v20  ;;  %v1790_v5 = vadd.f32 %v1789_v23, %v1788_v1 }
 0x1b8   :  { %v1595_v13 = vadd.f32 %v1594_v28, %v1593_v14  ;;  %v1792_v52 = vadd.f32 %v1791_v42, %v1790_v5 }
 0x1ba   :  { %v1597_v11 = vadd.f32 %v1596_v19, %v1595_v13  ;;  %v1794_v56 = vadd.f32 %v1793_v17, %v1792_v52 }
 0x1bc   :  { %v1796_v45 = vadd.f32 %v1795_v3, %v1794_v56  ;;  %v1599_v24 = vadd.f32 %v1598_v30, %v1597_v11 }
 0x1be   :  { %v1798_v40 = vadd.f32 %v1797_v4, %v1796_v45  ;;  %v1601_v25 = vadd.f32 %v1600_v9, %v1599_v24 }
 0x1c0   :  { %v1800_v8 = vadd.f32 %v1799_v39, %v1798_v40  ;;  %v1603_v36 = vadd.f32 %v1602_v50, %v1601_v25 }
 0x1c2   :  { %v1802_v12 = vadd.f32 %v1801_v59, %v1800_v8  ;;  %v1605_v58 = vadd.f32 %v1604_v35, %v1603_v36 }
 0x1c4   :  { %v1804_v51 = vadd.f32 %v1803_v61, %v1802_v12  ;;  %v1607_v34 = vadd.f32 %v1606_v10, %v1605_v58 }
 0x1c6   :  { %v1806_v54 = vadd.f32 %v1805_v53, %v1804_v51  ;;  %v1609_v18 = vadd.f32 %v1608_v0, %v1607_v34 }
 0x1c8   :  { %v1808_v16 = vadd.f32 %v1807_v37, %v1806_v54  ;;  %v1611_v48 = vadd.f32 %v1610_v57, %v1609_v18 }
 0x1ca   :  { %v1612_v44 = vrot.slane %v1611_v48, 4  ;;  %v1810_v29 = vadd.f32 %v1809_v26, %v1808_v16 }
 0x1cc   :  { %v1613_v62 = vadd.f32 %v1612_v44, %v1611_v48  ;;  %v1811_v43 = vrot.slane %v1810_v29, 4 }
 0x1ce   :  { %v1614_v33 = vrot.slane %v1613_v62, 2  ;;  %v1812_v20 = vadd.f32 %v1811_v43, %v1810_v29 }
 0x1d0   :  { %v1615_v1 = vadd.f32 %v1614_v33, %v1613_v62  ;;  %v1813_v23 = vrot.slane %v1812_v20, 2 }
 0x1d2   :  { %v1616_v21 = vrot.slane %v1615_v1, 1  ;;  %v1814_v32 = vadd.f32 %v1813_v23, %v1812_v20 }
 0x1d4   :  { %v1617_v15 = vadd.f32 %v1616_v21, %v1615_v1  ;;  %v1815_v14 = vrot.slane %v1814_v32, 1 }
 0x1d6   :  { %1619 = vst.msk [vmem:[%s3691_s9] sm:$0x1] %vm1618_vm4, %v1617_v15  ;;  %v1816_v5 = vadd.f32 %v1815_v14, %v1814_v32 }
 0x1d8   :  { %1817 = vst.msk [vmem:[%s3692_s10] sm:$0x1] %vm1618_vm4, %v1816_v5 }

// kernel: _lambda_.13
= control target key start
LH: loop header
LB: loop body
LE: loop exit
PB: predicated region body
PF: predicated region fallthrough
CT: control target
= control target key end

     0   :  { %13 = vsyncpa [#allocation3], 0  ;;  %vm612_vm0 = vcmask 1041408   ;;  %s2805_s0 = inlined_call_operand.vmem [shape: bf16[512,4], index: 0, kind: input, shape index: {}]   ;;  %s2806_s1 = inlined_call_operand.vmem [shape: f32[1,4], index: 1, kind: input, shape index: {}]   ;;  %s2807_s2 = inlined_call_operand.vmem [shape: f32[1,4], index: 2, kind: input, shape index: {}]   ;;  %s2808_s3 = inlined_call_operand.vmem [shape: bf16[4,4], index: 3, kind: input, shape index: {}]   ;;  %s2809_s4 = inlined_call_operand.vmem [shape: bf16[512,4], index: 4, kind: input, shape index: {}]   ;;  %s2810_s5 = inlined_call_operand.vmem [shape: bf16[512,4], index: 5, kind: output, shape index: {0}]   ;;  %s2811_s6 = inlined_call_operand.hbm [shape: f32[1,1,4], index: 6, kind: output, shape index: {1}]   ;;  %s2812_s7 = inlined_call_operand.hbm [shape: f32[1,1,4], index: 7, kind: output, shape index: {2}]  }
   0x1   :  { %v386_v0 = vld [vmem:[%s2808_s3] sm:$0x3] }
   0x2   :  { %v1380_v1 = vld [vmem:[%s2805_s0] sm:$0xff]   ;;  %v614_v2 = vsel %vm612_vm0, %v386_v0, 0 }
   0x3   :  { %v1381_v3 = vunpack.c.l.bf16 %v1380_v1  ;;  %v1382_v4 = vunpack.c.h.bf16 %v1380_v1  ;;  %v1807_v5 = vld [vmem:[%s2806_s1] ss:$0 sm:$0xff]  ;;  %623 = vmatpush.bf16.msra.mxu0 %v614_v2  ;;  %1697 = vmatpush.bf16.msra.mxu1 %v614_v2 }
   0x4   :  { %v1812_v6 = vld [vmem:[%s2807_s2] ss:$0 sm:$0xff]  ;;  %1698 = vmatpush.bf16.msra.mxu2 %v614_v2  ;;  %1699 = vmatpush.bf16.msra.mxu3 %v614_v2 }
   0x5   :  { %v1642_v7 = vld [vmem:[%s2805_s0 + $0x40] sm:$0xff]   ;;  %v158_v8 = vmul.f32 %v1807_v5, %v1381_v3  ;;  %v159_v9 = vmul.f32 %v1807_v5, %v1382_v4 }
   0x6   :  { %14 = vsyncpa [#allocation5], 0  ;;  %v1635_v10 = vld [vmem:[%s2805_s0 + $0x8] sm:$0xff]   ;;  %v1413_v11 = vunpack.c.l.bf16 %v1642_v7  ;;  %v1414_v12 = vunpack.c.h.bf16 %v1642_v7  ;;  %vm515_vm1 = vcmask 31744   ;;  %v1650_v38 = vld [vmem:[%s2805_s0 + $0x80] sm:$0xff]   ;;  %vm849_vm2 = vcmask 27648  }
   0x7   :  { %v226_v13 = vadd.f32 %v1812_v6, %v158_v8  ;;  %v227_v14 = vadd.f32 %v1812_v6, %v159_v9  ;;  %v1385_v19 = vunpack.c.l.bf16 %v1635_v10  ;;  %v1386_v20 = vunpack.c.h.bf16 %v1635_v10  ;;  %v1643_v23 = vld [vmem:[%s2805_s0 + $0x48] sm:$0xff]   ;;  %v1636_v41 = vld [vmem:[%s2805_s0 + $0x10] sm:$0xff]   ;;  %v1637_v2 = vld [vmem:[%s2805_s0 + $0x18] sm:$0xff]   ;;  %s1320_s21 = sshll.u32 %s2811_s6, 4  ;;  %s1757_s22 = smov [#allocation4]   ;;  %s1321_s21 = int_to_ptr.hbm [resolvable:$true] %s1320_s21 }
   0x8   :  { %v174_v15 = vmul.f32 %v1807_v5, %v1413_v11  ;;  %v175_v16 = vmul.f32 %v1807_v5, %v1414_v12  ;;  %v1417_v27 = vunpack.c.l.bf16 %v1643_v23  ;;  %v1418_v30 = vunpack.c.h.bf16 %v1643_v23  ;;  %v1644_v53 = vld [vmem:[%s2805_s0 + $0x50] sm:$0xff]   ;;  %v1651_v7 = vld [vmem:[%s2805_s0 + $0x88] sm:$0xff]   ;;  %s1329_s23 = sshll.u32 %s1757_s22, 4  ;;  %s1331_s26 = sshll.u32 %s2812_s7, 4  ;;  %s1330_s23 = int_to_ptr.vmem [resolvable:$true] %s1329_s23  ;;  %s1332_s26 = int_to_ptr.hbm [resolvable:$true] %s1331_s26 }
   0x9   :  { %v290_v17 = vmax.f32 %v226_v13, 0.0  ;;  %v291_v18 = vmax.f32 %v227_v14, 0.0  ;;  %v160_v28 = vmul.f32 %v1807_v5, %v1385_v19  ;;  %v161_v29 = vmul.f32 %v1807_v5, %v1386_v20 }
   0xa   :  { %v242_v21 = vadd.f32 %v1812_v6, %v174_v15  ;;  %v243_v22 = vadd.f32 %v1812_v6, %v175_v16  ;;  %v176_v32 = vmul.f32 %v1807_v5, %v1417_v27  ;;  %v177_v33 = vmul.f32 %v1807_v5, %v1418_v30 }
   0xb   :  { %v354_v24 = vpack.c.bf16 %v291_v18, %v290_v17  ;;  %v228_v34 = vadd.f32 %v1812_v6, %v160_v28  ;;  %v229_v35 = vadd.f32 %v1812_v6, %v161_v29  ;;  %v1445_v42 = vunpack.c.l.bf16 %v1650_v38 }
   0xc   :  { %v306_v25 = vmax.f32 %v242_v21, 0.0  ;;  %v307_v26 = vmax.f32 %v243_v22, 0.0  ;;  %v244_v36 = vadd.f32 %v1812_v6, %v176_v32  ;;  %v245_v37 = vadd.f32 %v1812_v6, %v177_v33  ;;  %v1645_v21 = vld [vmem:[%s2805_s0 + $0x58] sm:$0xff]  }
   0xd   :  { %1347 = vmatmul.msk.bf16.vlgmr.msra.gmra.mxu0 %vm515_vm1, %v354_v24  ;;  %v292_v39 = vmax.f32 %v228_v34, 0.0  ;;  %v293_v40 = vmax.f32 %v229_v35, 0.0  ;;  %v1446_v43 = vunpack.c.h.bf16 %v1650_v38  ;;  %v190_v44 = vmul.f32 %v1807_v5, %v1445_v42  ;;  %v1638_v34 = vld [vmem:[%s2805_s0 + $0x20] sm:$0xff]  }
   0xe   :  { %v362_v31 = vpack.c.bf16 %v307_v26, %v306_v25  ;;  %v1389_v46 = vunpack.c.l.bf16 %v1636_v41  ;;  %v308_v47 = vmax.f32 %v244_v36, 0.0  ;;  %v309_v48 = vmax.f32 %v245_v37, 0.0 }
   0xf   :  { %v191_v45 = vmul.f32 %v1807_v5, %v1446_v43  ;;  %v355_v49 = vpack.c.bf16 %v293_v40, %v292_v39  ;;  %v1390_v50 = vunpack.c.h.bf16 %v1636_v41  ;;  %v258_v51 = vadd.f32 %v1812_v6, %v190_v44  ;;  %v1652_v39 = vld [vmem:[%s2805_s0 + $0x90] sm:$0xff]   ;;  %v1658_v40 = vld [vmem:[%s2805_s0 + $0xc0] sm:$0xff]  }
  0x10   :  { %1355 = vmatmul.msk.bf16.vlgmr.msra.gmra.mxu1 %vm515_vm1, %v362_v31  ;;  %v363_v56 = vpack.c.bf16 %v309_v48, %v308_v47  ;;  %v1421_v57 = vunpack.c.l.bf16 %v1644_v53  ;;  %v1422_v58 = vunpack.c.h.bf16 %v1644_v53  ;;  %v162_v59 = vmul.f32 %v1807_v5, %v1389_v46 }
  0x11   :  { %v259_v52 = vadd.f32 %v1812_v6, %v191_v45  ;;  %v322_v54 = vmax.f32 %v258_v51, 0.0  ;;  %v163_v60 = vmul.f32 %v1807_v5, %v1390_v50  ;;  %v1449_v10 = vunpack.c.l.bf16 %v1651_v7 }
  0x12   :  { %v178_v62 = vmul.f32 %v1807_v5, %v1421_v57  ;;  %v179_v63 = vmul.f32 %v1807_v5, %v1422_v58  ;;  %v230_v0 = vadd.f32 %v1812_v6, %v162_v59  ;;  %v1450_v11 = vunpack.c.h.bf16 %v1651_v7  ;;  %v1646_v59 = vld [vmem:[%s2805_s0 + $0x60] sm:$0xff]  }
  0x13   :  { %v323_v55 = vmax.f32 %v259_v52, 0.0  ;;  %v231_v1 = vadd.f32 %v1812_v6, %v163_v60  ;;  %v1393_v12 = vunpack.c.l.bf16 %v1637_v2  ;;  %v192_v13 = vmul.f32 %v1807_v5, %v1449_v10 }
  0x14   :  { %v246_v3 = vadd.f32 %v1812_v6, %v178_v62  ;;  %v247_v4 = vadd.f32 %v1812_v6, %v179_v63  ;;  %v294_v8 = vmax.f32 %v230_v0, 0.0  ;;  %v193_v14 = vmul.f32 %v1807_v5, %v1450_v11 }
  0x15   :  { %v370_v61 = vpack.c.bf16 %v323_v55, %v322_v54  ;;  %v295_v9 = vmax.f32 %v231_v1, 0.0  ;;  %v1394_v15 = vunpack.c.h.bf16 %v1637_v2  ;;  %v260_v19 = vadd.f32 %v1812_v6, %v192_v13 }
  0x16   :  { %v310_v16 = vmax.f32 %v246_v3, 0.0  ;;  %v311_v17 = vmax.f32 %v247_v4, 0.0  ;;  %v261_v20 = vadd.f32 %v1812_v6, %v193_v14  ;;  %v164_v22 = vmul.f32 %v1807_v5, %v1393_v12  ;;  %v1639_v12 = vld [vmem:[%s2805_s0 + $0x28] sm:$0xff]  }
  0x17   :  { %1363 = vmatmul.msk.bf16.vlgmr.msra.gmra.mxu2 %vm515_vm1, %v370_v61  ;;  %v356_v18 = vpack.c.bf16 %v295_v9, %v294_v8  ;;  %v324_v23 = vmax.f32 %v260_v19, 0.0  ;;  %v165_v25 = vmul.f32 %v1807_v5, %v1394_v15  ;;  %v1425_v27 = vunpack.c.l.bf16 %v1645_v21 }
  0x18   :  { %v325_v24 = vmax.f32 %v261_v20, 0.0  ;;  %v364_v26 = vpack.c.bf16 %v311_v17, %v310_v16  ;;  %v1426_v28 = vunpack.c.h.bf16 %v1645_v21  ;;  %v232_v30 = vadd.f32 %v1812_v6, %v164_v22  ;;  %v1653_v17 = vld [vmem:[%s2805_s0 + $0x98] sm:$0xff]  }
  0x19   :  { %v233_v31 = vadd.f32 %v1812_v6, %v165_v25  ;;  %v180_v32 = vmul.f32 %v1807_v5, %v1425_v27  ;;  %v1453_v41 = vunpack.c.l.bf16 %v1652_v39  ;;  %v1454_v42 = vunpack.c.h.bf16 %v1652_v39 }
  0x1a   :  { %v371_v29 = vpack.c.bf16 %v325_v24, %v324_v23  ;;  %v181_v33 = vmul.f32 %v1807_v5, %v1426_v28  ;;  %v296_v35 = vmax.f32 %v232_v30, 0.0  ;;  %v1477_v43 = vunpack.c.l.bf16 %v1658_v40 }
  0x1b   :  { %v297_v36 = vmax.f32 %v233_v31, 0.0  ;;  %v248_v37 = vadd.f32 %v1812_v6, %v180_v32  ;;  %v1478_v44 = vunpack.c.h.bf16 %v1658_v40  ;;  %v1397_v45 = vunpack.c.l.bf16 %v1638_v34 }
  0x1c   :  { %v249_v38 = vadd.f32 %v1812_v6, %v181_v33  ;;  %v194_v46 = vmul.f32 %v1807_v5, %v1453_v41  ;;  %v195_v47 = vmul.f32 %v1807_v5, %v1454_v42  ;;  %v206_v48 = vmul.f32 %v1807_v5, %v1477_v43 }
  0x1d   :  { %1348 = vmatmul.msk.bf16.gmra.mxu0 %vm515_vm1, %v355_v49  ;;  %v207_v49 = vmul.f32 %v1807_v5, %v1478_v44  ;;  %v357_v50 = vpack.c.bf16 %v297_v36, %v296_v35  ;;  %v1398_v51 = vunpack.c.h.bf16 %v1638_v34  ;;  %v312_v52 = vmax.f32 %v248_v37, 0.0  ;;  %v1647_v37 = vld [vmem:[%s2805_s0 + $0x68] sm:$0xff]  }
  0x1e   :  { %v313_v53 = vmax.f32 %v249_v38, 0.0  ;;  %v262_v54 = vadd.f32 %v1812_v6, %v194_v46  ;;  %v263_v55 = vadd.f32 %v1812_v6, %v195_v47  ;;  %v166_v58 = vmul.f32 %v1807_v5, %v1397_v45 }
  0x1f   :  { %v275_v57 = vadd.f32 %v1812_v6, %v207_v49  ;;  %v167_v0 = vmul.f32 %v1807_v5, %v1398_v51  ;;  %v1429_v2 = vunpack.c.l.bf16 %v1646_v59  ;;  %v1430_v3 = vunpack.c.h.bf16 %v1646_v59 }
  0x20   :  { %1356 = vmatmul.msk.bf16.gmra.mxu1 %vm515_vm1, %v363_v56  ;;  %v274_v56 = vadd.f32 %v1812_v6, %v206_v48  ;;  %v326_v60 = vmax.f32 %v262_v54, 0.0  ;;  %v327_v61 = vmax.f32 %v263_v55, 0.0  ;;  %v365_v1 = vpack.c.bf16 %v313_v53, %v312_v52  ;;  %v1640_v52 = vld [vmem:[%s2805_s0 + $0x30] sm:$0xff]  }
  0x21   :  { %v339_v63 = vmax.f32 %v275_v57, 0.0  ;;  %v234_v8 = vadd.f32 %v1812_v6, %v166_v58  ;;  %v235_v9 = vadd.f32 %v1812_v6, %v167_v0  ;;  %v182_v10 = vmul.f32 %v1807_v5, %v1429_v2  ;;  %v1654_v57 = vld [vmem:[%s2805_s0 + $0xa0] sm:$0xff]   ;;  %v1660_v58 = vld [vmem:[%s2805_s0 + $0xd0] sm:$0xff]  }
  0x22   :  { %v338_v62 = vmax.f32 %v274_v56, 0.0  ;;  %v372_v4 = vpack.c.bf16 %v327_v61, %v326_v60  ;;  %v183_v11 = vmul.f32 %v1807_v5, %v1430_v3  ;;  %v1457_v19 = vunpack.c.l.bf16 %v1653_v17 }
  0x23   :  { %v298_v13 = vmax.f32 %v234_v8, 0.0  ;;  %v299_v14 = vmax.f32 %v235_v9, 0.0  ;;  %v250_v15 = vadd.f32 %v1812_v6, %v182_v10  ;;  %v1458_v20 = vunpack.c.h.bf16 %v1653_v17 }
  0x24   :  { %v378_v7 = vpack.c.bf16 %v339_v63, %v338_v62  ;;  %v251_v16 = vadd.f32 %v1812_v6, %v183_v11  ;;  %v1401_v23 = vunpack.c.l.bf16 %v1639_v12  ;;  %v196_v24 = vmul.f32 %v1807_v5, %v1457_v19 }
  0x25   :  { %v197_v25 = vmul.f32 %v1807_v5, %v1458_v20  ;;  %v358_v28 = vpack.c.bf16 %v299_v14, %v298_v13  ;;  %v314_v30 = vmax.f32 %v250_v15, 0.0  ;;  %v1433_v44 = vunpack.c.l.bf16 %v1647_v37  ;;  %v1648_v15 = vld [vmem:[%s2805_s0 + $0x70] sm:$0xff]  }
  0x26   :  { %1371 = vmatmul.msk.bf16.vlgmr.msra.gmra.mxu3 %vm515_vm1, %v378_v7  ;;  %v315_v31 = vmax.f32 %v251_v16, 0.0  ;;  %v264_v32 = vadd.f32 %v1812_v6, %v196_v24  ;;  %v168_v36 = vmul.f32 %v1807_v5, %v1401_v23  ;;  %v1434_v45 = vunpack.c.h.bf16 %v1647_v37 }
  0x27   :  { %1364 = vmatmul.msk.bf16.gmra.mxu2 %vm515_vm1, %v371_v29  ;;  %v1402_v29 = vunpack.c.h.bf16 %v1639_v12  ;;  %v265_v33 = vadd.f32 %v1812_v6, %v197_v25  ;;  %v1461_v59 = vunpack.c.l.bf16 %v1654_v57  ;;  %v1462_v60 = vunpack.c.h.bf16 %v1654_v57 }
  0x28   :  { %v328_v38 = vmax.f32 %v264_v32, 0.0  ;;  %v366_v43 = vpack.c.bf16 %v315_v31, %v314_v30  ;;  %v236_v48 = vadd.f32 %v1812_v6, %v168_v36  ;;  %v185_v51 = vmul.f32 %v1807_v5, %v1434_v45  ;;  %v1641_v30 = vld [vmem:[%s2805_s0 + $0x38] sm:$0xff]  }
  0x29   :  { %v329_v39 = vmax.f32 %v265_v33, 0.0  ;;  %v169_v42 = vmul.f32 %v1807_v5, %v1402_v29  ;;  %v1485_v61 = vunpack.c.l.bf16 %v1660_v58  ;;  %v1486_v62 = vunpack.c.h.bf16 %v1660_v58  ;;  %v1661_v36 = vld [vmem:[%s2805_s0 + $0xd8] sm:$0xff]  }
  0x2a   :  { %v300_v53 = vmax.f32 %v236_v48, 0.0  ;;  %v253_v56 = vadd.f32 %v1812_v6, %v185_v51  ;;  %v1405_v63 = vunpack.c.l.bf16 %v1640_v52  ;;  %v198_v0 = vmul.f32 %v1807_v5, %v1461_v59 }
  0x2b   :  { %v373_v46 = vpack.c.bf16 %v329_v39, %v328_v38  ;;  %v237_v49 = vadd.f32 %v1812_v6, %v169_v42  ;;  %v210_v2 = vmul.f32 %v1807_v5, %v1485_v61  ;;  %v211_v3 = vmul.f32 %v1807_v5, %v1486_v62 }
  0x2c   :  { %v1406_v7 = vunpack.c.h.bf16 %v1640_v52  ;;  %v317_v9 = vmax.f32 %v253_v56, 0.0  ;;  %v266_v10 = vadd.f32 %v1812_v6, %v198_v0  ;;  %v170_v14 = vmul.f32 %v1807_v5, %v1405_v63 }
  0x2d   :  { %1349 = vmatmul.msk.bf16.gmra.mxu0 %vm515_vm1, %v356_v18  ;;  %v1659_v18 = vld [vmem:[%s2805_s0 + $0xc8] sm:$0xff]   ;;  %v301_v54 = vmax.f32 %v237_v49, 0.0  ;;  %v278_v12 = vadd.f32 %v1812_v6, %v210_v2  ;;  %v279_v13 = vadd.f32 %v1812_v6, %v211_v3  ;;  %v1438_v23 = vunpack.c.h.bf16 %v1648_v15 }
  0x2e   :  { %v1481_v21 = vunpack.c.l.bf16 %v1659_v18  ;;  %v1482_v22 = vunpack.c.h.bf16 %v1659_v18  ;;  %v330_v16 = vmax.f32 %v266_v10, 0.0  ;;  %v171_v20 = vmul.f32 %v1807_v5, %v1406_v7 }
  0x2f   :  { %v342_v18 = vmax.f32 %v278_v12, 0.0  ;;  %v343_v19 = vmax.f32 %v279_v13, 0.0  ;;  %v187_v29 = vmul.f32 %v1807_v5, %v1438_v23  ;;  %v1489_v39 = vunpack.c.l.bf16 %v1661_v36  ;;  %v1656_v12 = vld [vmem:[%s2805_s0 + $0xb0] sm:$0xff]   ;;  %v1662_v13 = vld [vmem:[%s2805_s0 + $0xe0] sm:$0xff]  }
  0x30   :  { %1357 = vmatmul.msk.bf16.gmra.mxu1 %vm515_vm1, %v364_v26  ;;  %v208_v26 = vmul.f32 %v1807_v5, %v1481_v21  ;;  %v209_v27 = vmul.f32 %v1807_v5, %v1482_v22  ;;  %v1437_v22 = vunpack.c.l.bf16 %v1648_v15  ;;  %v1470_v15 = vunpack.c.h.bf16 %v1656_v12 }
  0x31   :  { %v380_v25 = vpack.c.bf16 %v343_v19, %v342_v18  ;;  %vm1111_vm3 = vcmask 24576  }
  0x32   :  { %v276_v34 = vadd.f32 %v1812_v6, %v208_v26  ;;  %v277_v35 = vadd.f32 %v1812_v6, %v209_v27  ;;  %v238_v26 = vadd.f32 %v1812_v6, %v170_v14  ;;  %v239_v27 = vadd.f32 %v1812_v6, %v171_v20 }
  0x33   :  { %v1469_v14 = vunpack.c.l.bf16 %v1656_v12  ;;  %v203_v19 = vmul.f32 %v1807_v5, %v1470_v15 }
  0x34   :  { %v340_v40 = vmax.f32 %v276_v34, 0.0  ;;  %v341_v41 = vmax.f32 %v277_v35, 0.0  ;;  %v302_v31 = vmax.f32 %v238_v26, 0.0  ;;  %v303_v32 = vmax.f32 %v239_v27, 0.0  ;;  %v1655_v35 = vld [vmem:[%s2805_s0 + $0xa8] sm:$0xff]  }
  0x35   :  { %v255_v34 = vadd.f32 %v1812_v6, %v187_v29  ;;  %v1465_v37 = vunpack.c.l.bf16 %v1655_v35  ;;  %v1466_v38 = vunpack.c.h.bf16 %v1655_v35  ;;  %v202_v18 = vmul.f32 %v1807_v5, %v1469_v14 }
  0x36   :  { %v379_v47 = vpack.c.bf16 %v341_v41, %v340_v40  ;;  %v1490_v40 = vunpack.c.h.bf16 %v1661_v36  ;;  %v1409_v41 = vunpack.c.l.bf16 %v1641_v30  ;;  %v271_v26 = vadd.f32 %v1812_v6, %v203_v19  ;;  %v1508_v36 = vld [vmem:[%s2809_s4] sm:$0xff]  }
  0x37   :  { %1365 = vmatmul.msk.bf16.gmra.mxu2 %vm515_vm1, %v372_v4  ;;  %v359_v4 = vpack.c.bf16 %v301_v54, %v300_v53  ;;  %v200_v42 = vmul.f32 %v1807_v5, %v1465_v37  ;;  %v319_v49 = vmax.f32 %v255_v34, 0.0  ;;  %v1657_v37 = vld [vmem:[%s2805_s0 + $0xb8] sm:$0xff]  }
  0x38   :  { %1372 = vmatmul.msk.bf16.gmra.mxu3 %vm515_vm1, %v379_v47  ;;  %v213_v45 = vmul.f32 %v1807_v5, %v1490_v40  ;;  %v1410_v47 = vunpack.c.h.bf16 %v1641_v30  ;;  %v172_v54 = vmul.f32 %v1807_v5, %v1409_v41  ;;  %v335_v30 = vmax.f32 %v271_v26, 0.0 }
  0x39   :  { %v1474_v40 = vunpack.c.h.bf16 %v1657_v37 }
  0x3a   :  { %v281_v53 = vadd.f32 %v1812_v6, %v213_v45  ;;  %v240_v2 = vadd.f32 %v1812_v6, %v172_v54 }
  0x3b   :  { %v205_v45 = vmul.f32 %v1807_v5, %v1474_v40 }
  0x3c   :  { %v345_v59 = vmax.f32 %v281_v53, 0.0 }
  0x3d   :  { %1350 = vmatmul.msk.bf16.gmra.mxu0 %vm515_vm1, %v357_v50  ;;  %v184_v50 = vmul.f32 %v1807_v5, %v1433_v44  ;;  %v212_v44 = vmul.f32 %v1807_v5, %v1489_v39  ;;  %v1473_v39 = vunpack.c.l.bf16 %v1657_v37 }
  0x3f   :  { %v252_v55 = vadd.f32 %v1812_v6, %v184_v50  ;;  %v268_v50 = vadd.f32 %v1812_v6, %v200_v42  ;;  %v280_v52 = vadd.f32 %v1812_v6, %v212_v44  ;;  %v204_v44 = vmul.f32 %v1807_v5, %v1473_v39 }
  0x40   :  { %1358 = vmatmul.msk.bf16.gmra.mxu1 %vm515_vm1, %v365_v1  ;;  %v199_v1 = vmul.f32 %v1807_v5, %v1462_v60  ;;  %v173_v60 = vmul.f32 %v1807_v5, %v1410_v47 }
  0x41   :  { %v316_v8 = vmax.f32 %v252_v55, 0.0  ;;  %v1649_v55 = vld [vmem:[%s2805_s0 + $0x78] sm:$0xff]   ;;  %v332_v56 = vmax.f32 %v268_v50, 0.0  ;;  %v344_v58 = vmax.f32 %v280_v52, 0.0  ;;  %v273_v52 = vadd.f32 %v1812_v6, %v205_v45 }
  0x42   :  { %v267_v11 = vadd.f32 %v1812_v6, %v199_v1  ;;  %v1441_v62 = vunpack.c.l.bf16 %v1649_v55  ;;  %v1442_v63 = vunpack.c.h.bf16 %v1649_v55  ;;  %v241_v3 = vadd.f32 %v1812_v6, %v173_v60 }
  0x43   :  { %v367_v21 = vpack.c.bf16 %v317_v9, %v316_v8  ;;  %v381_v1 = vpack.c.bf16 %v345_v59, %v344_v58  ;;  %v304_v8 = vmax.f32 %v240_v2, 0.0 }
  0x44   :  { %v331_v17 = vmax.f32 %v267_v11, 0.0  ;;  %v189_v7 = vmul.f32 %v1807_v5, %v1442_v63  ;;  %v305_v9 = vmax.f32 %v241_v3, 0.0 }
  0x46   :  { %v374_v24 = vpack.c.bf16 %v331_v17, %v330_v16  ;;  %v257_v11 = vadd.f32 %v1812_v6, %v189_v7  ;;  %v1493_v16 = vunpack.c.l.bf16 %v1662_v13  ;;  %v1494_v17 = vunpack.c.h.bf16 %v1662_v13 }
  0x47   :  { %1366 = vmatmul.msk.bf16.gmra.mxu2 %vm515_vm1, %v373_v46  ;;  %v360_v46 = vpack.c.bf16 %v303_v32, %v302_v31 }
  0x48   :  { %1373 = vmatmul.msk.bf16.gmra.mxu3 %vm515_vm1, %v380_v25  ;;  %v214_v20 = vmul.f32 %v1807_v5, %v1493_v16  ;;  %v321_v23 = vmax.f32 %v257_v11, 0.0  ;;  %v270_v25 = vadd.f32 %v1812_v6, %v202_v18 }
  0x4a   :  { %v282_v27 = vadd.f32 %v1812_v6, %v214_v20  ;;  %v334_v29 = vmax.f32 %v270_v25, 0.0 }
  0x4c   :  { %v346_v31 = vmax.f32 %v282_v27, 0.0  ;;  %v376_v34 = vpack.c.bf16 %v335_v30, %v334_v29 }
  0x4d   :  { %1351 = vmatmul.msk.bf16.gmra.mxu0 %vm515_vm1, %v358_v28  ;;  %v186_v28 = vmul.f32 %v1807_v5, %v1437_v22 }
  0x4f   :  { %v254_v33 = vadd.f32 %v1812_v6, %v186_v28 }
  0x50   :  { %1359 = vmatmul.msk.bf16.gmra.mxu1 %vm515_vm1, %v366_v43  ;;  %v201_v43 = vmul.f32 %v1807_v5, %v1466_v38  ;;  %v1663_v38 = vld [vmem:[%s2805_s0 + $0xe8] sm:$0xff]  }
  0x51   :  { %v318_v48 = vmax.f32 %v254_v33, 0.0  ;;  %v1497_v41 = vunpack.c.l.bf16 %v1663_v38  ;;  %v1498_v42 = vunpack.c.h.bf16 %v1663_v38 }
  0x52   :  { %v269_v51 = vadd.f32 %v1812_v6, %v201_v43  ;;  %v1509_v43 = vunpack.c.l.bf16 %v1508_v36 }
  0x53   :  { %v368_v61 = vpack.c.bf16 %v319_v49, %v318_v48  ;;  %v217_v47 = vmul.f32 %v1807_v5, %v1498_v42  ;;  %v1673_v48 = vld [vmem:[%s2809_s4 + $0x40] sm:$0xff]   ;;  %v272_v49 = vadd.f32 %v1812_v6, %v204_v44 }
  0x54   :  { %v333_v57 = vmax.f32 %v269_v51, 0.0  ;;  %v1541_v51 = vunpack.c.l.bf16 %v1673_v48 }
  0x55   :  { %v285_v54 = vadd.f32 %v1812_v6, %v217_v47 }
  0x56   :  { %v375_v0 = vpack.c.bf16 %v333_v57, %v332_v56  ;;  %v336_v56 = vmax.f32 %v272_v49, 0.0  ;;  %v337_v57 = vmax.f32 %v273_v52, 0.0 }
  0x57   :  { %1367 = vmatmul.msk.bf16.gmra.mxu2 %vm515_vm1, %v374_v24  ;;  %v361_v24 = vpack.c.bf16 %v305_v9, %v304_v8  ;;  %v349_v59 = vmax.f32 %v285_v54, 0.0  ;;  %v1666_v9 = vld [vmem:[%s2809_s4 + $0x8] sm:$0xff]   ;;  %v1665_v54 = vld [vmem:[%s2805_s0 + $0xf8] sm:$0xff]  }
  0x58   :  { %1374 = vmatmul.msk.bf16.gmra.mxu3 %vm515_vm1, %v381_v1  ;;  %v377_v63 = vpack.c.bf16 %v337_v57, %v336_v56  ;;  %v1510_v1 = vunpack.c.h.bf16 %v1508_v36  ;;  %v1513_v15 = vunpack.c.l.bf16 %v1666_v9  ;;  %v1505_v57 = vunpack.c.l.bf16 %v1665_v54 }
  0x5d   :  { %1352 = vmatmul.msk.bf16.gmra.mxu0 %vm515_vm1, %v359_v4  ;;  %v188_v4 = vmul.f32 %v1807_v5, %v1441_v62 }
  0x5f   :  { %v256_v10 = vadd.f32 %v1812_v6, %v188_v4  ;;  %v1542_v4 = vunpack.c.h.bf16 %v1673_v48 }
  0x60   :  { %1360 = vmatmul.msk.bf16.gmra.mxu1 %vm515_vm1, %v367_v21  ;;  %v215_v21 = vmul.f32 %v1807_v5, %v1494_v17 }
  0x61   :  { %v320_v22 = vmax.f32 %v256_v10, 0.0  ;;  %v1664_v10 = vld [vmem:[%s2805_s0 + $0xf0] sm:$0xff]  }
  0x62   :  { %v283_v28 = vadd.f32 %v1812_v6, %v215_v21  ;;  %v1501_v13 = vunpack.c.l.bf16 %v1664_v10  ;;  %v1502_v14 = vunpack.c.h.bf16 %v1664_v10 }
  0x63   :  { %v369_v32 = vpack.c.bf16 %v321_v23, %v320_v22  ;;  %v1674_v22 = vld [vmem:[%s2809_s4 + $0x48] sm:$0xff]  }
  0x64   :  { %v347_v33 = vmax.f32 %v283_v28, 0.0  ;;  %v218_v19 = vmul.f32 %v1807_v5, %v1501_v13  ;;  %v219_v20 = vmul.f32 %v1807_v5, %v1502_v14  ;;  %v1545_v28 = vunpack.c.l.bf16 %v1674_v22 }
  0x65   :  { %v1546_v48 = vunpack.c.h.bf16 %v1674_v22 }
  0x66   :  { %v382_v35 = vpack.c.bf16 %v347_v33, %v346_v31  ;;  %v286_v29 = vadd.f32 %v1812_v6, %v218_v19  ;;  %v287_v33 = vadd.f32 %v1812_v6, %v219_v20 }
  0x67   :  { %1368 = vmatmul.msk.bf16.gmra.mxu2 %vm515_vm1, %v375_v0 }
  0x68   :  { %1375 = vmatmul.msk.bf16.gmra.mxu3 %vm515_vm1, %v382_v35  ;;  %v350_v35 = vmax.f32 %v286_v29, 0.0  ;;  %v351_v38 = vmax.f32 %v287_v33, 0.0 }
  0x6a   :  { %v384_v42 = vpack.c.bf16 %v351_v38, %v350_v35 }
  0x6d   :  { %1353 = vmatmul.msk.bf16.gmra.mxu0 %vm515_vm1, %v360_v46  ;;  %v216_v46 = vmul.f32 %v1807_v5, %v1497_v41  ;;  %v1514_v41 = vunpack.c.h.bf16 %v1666_v9 }
  0x6f   :  { %v284_v53 = vadd.f32 %v1812_v6, %v216_v46 }
  0x70   :  { %1361 = vmatmul.msk.bf16.gmra.mxu1 %vm515_vm1, %v368_v61 }
  0x71   :  { %v348_v58 = vmax.f32 %v284_v53, 0.0  ;;  %v1667_v53 = vld [vmem:[%s2809_s4 + $0x10] sm:$0xff]  }
  0x73   :  { %v383_v0 = vpack.c.bf16 %v349_v59, %v348_v58  ;;  %v1506_v58 = vunpack.c.h.bf16 %v1665_v54 }
  0x77   :  { %1369 = vmatmul.msk.bf16.gmra.mxu2 %vm515_vm1, %v376_v34 }
  0x78   :  { %1376 = vmatmul.msk.bf16.gmra.mxu3 %vm515_vm1, %v383_v0  ;;  %v1681_v0 = vld [vmem:[%s2809_s4 + $0x80] sm:$0xff]  }
  0x7d   :  { %1354 = vmatmul.msk.bf16.gmra.mxu0 %vm515_vm1, %v361_v24 }
  0x80   :  { %1362 = vmatmul.msk.bf16.gmra.mxu1 %vm515_vm1, %v369_v32 }
  0x87   :  { %1370 = vmatmul.msk.bf16.gmra.mxu2 %vm515_vm1, %v377_v63  ;;  %v1675_v63 = vld [vmem:[%s2809_s4 + $0x50] sm:$0xff]  }
  0x88   :  { %1377 = vmatmul.msk.bf16.gmra.mxu3 %vm515_vm1, %v384_v42 }
  0x8a   :  { %v625_v50 = vpop.f32.mrf.mxu0 }
  0x8b   :  { %v626_v55 = vadd.f32 %v1509_v43, %v625_v50 }
  0x8d   :  { %v785_v60 = vpack.c.bf16 %v626_v55, %v626_v55  ;;  %v665_v61 = vpop.f32.mrf.mxu1 }
  0x8e   :  { %v666_v62 = vadd.f32 %v1541_v51, %v665_v61  ;;  %v1517_v61 = vunpack.c.l.bf16 %v1667_v53 }
  0x8f   :  { %850 = vst.msk [vmem:[%s2810_s5] sm:$0xf] %vm849_vm2, %v785_v60  ;;  %v914_v7 = vunpack.c.l.bf16 %v785_v60 }
  0x90   :  { %v2059_v2 = vpack.c.bf16 %v666_v62, %v666_v62 }
  0x91   :  { %v1113_v17 = vmul.f32 %v914_v7, %v914_v7  ;;  %v978_v23 = vsel %vm515_vm1, %v914_v7, 0.0  ;;  %v1573_v7 = vunpack.c.l.bf16 %v1681_v0 }
  0x92   :  { %v627_v3 = vpop.f32.mrf.mxu0  ;;  %866 = vst.msk [vmem:[%s2810_s5 + $0x40] sm:$0xf] %vm849_vm2, %v2059_v2 }
  0x93   :  { %v628_v8 = vadd.f32 %v1510_v1, %v627_v3  ;;  %v1177_v30 = vsel %vm515_vm1, %v1113_v17, 0.0  ;;  %v220_v1 = vmul.f32 %v1807_v5, %v1505_v57 }
  0x95   :  { %v786_v11 = vpack.c.bf16 %v628_v8, %v628_v8  ;;  %v667_v12 = vpop.f32.mrf.mxu1  ;;  %v221_v8 = vmul.f32 %v1807_v5, %v1506_v58 }
  0x96   :  { %v668_v16 = vadd.f32 %v1542_v4, %v667_v12 }
  0x97   :  { %851 = vst.msk [vmem:[%s2810_s5 + $0x4] sm:$0xf] %vm849_vm2, %v786_v11  ;;  %v915_v18 = vunpack.c.l.bf16 %v786_v11  ;;  %v1549_v11 = vunpack.c.l.bf16 %v1675_v63 }
  0x98   :  { %v2080_v21 = vpack.c.bf16 %v668_v16, %v668_v16  ;;  %v1574_v16 = vunpack.c.h.bf16 %v1681_v0 }
  0x99   :  { %v979_v24 = vsel %vm515_vm1, %v915_v18, 0.0  ;;  %v1114_v25 = vmul.f32 %v915_v18, %v915_v18  ;;  %v288_v18 = vadd.f32 %v1812_v6, %v220_v1 }
  0x9a   :  { %v980_v26 = vadd.f32 %v979_v24, %v978_v23  ;;  %v630_v27 = vpop.f32.mrf.mxu0  ;;  %867 = vst.msk [vmem:[%s2810_s5 + $0x44] sm:$0xf] %vm849_vm2, %v2080_v21  ;;  %v705_v49 = vpop.f32.mrf.mxu2  ;;  %v289_v23 = vadd.f32 %v1812_v6, %v221_v8 }
  0x9b   :  { %v1178_v31 = vsel %vm515_vm1, %v1114_v25, 0.0  ;;  %v631_v32 = vadd.f32 %v1513_v15, %v630_v27  ;;  %v706_v15 = vadd.f32 %v1573_v7, %v705_v49  ;;  %v352_v25 = vmax.f32 %v288_v18, 0.0 }
  0x9c   :  { %v1179_v34 = vadd.f32 %v1178_v31, %v1177_v30  ;;  %v1518_v27 = vunpack.c.h.bf16 %v1667_v53  ;;  %v353_v29 = vmax.f32 %v289_v23, 0.0 }
  0x9d   :  { %v787_v36 = vpack.c.bf16 %v631_v32, %v631_v32  ;;  %v670_v37 = vpop.f32.mrf.mxu1  ;;  %v2138_v20 = vpack.c.bf16 %v706_v15, %v706_v15  ;;  %v1677_v15 = vld [vmem:[%s2809_s4 + $0x60] sm:$0xff]  }
  0x9e   :  { %v671_v39 = vadd.f32 %v1545_v28, %v670_v37  ;;  %v385_v35 = vpack.c.bf16 %v353_v29, %v352_v25 }
  0x9f   :  { %852 = vst.msk [vmem:[%s2810_s5 + $0x8] sm:$0xf] %vm849_vm2, %v787_v36  ;;  %v916_v40 = vunpack.c.l.bf16 %v787_v36 }
  0xa0   :  { %v2100_v43 = vpack.c.bf16 %v671_v39, %v671_v39  ;;  %882 = vst.msk [vmem:[%s2810_s5 + $0x80] sm:$0xf] %vm849_vm2, %v2138_v20  ;;  %1378 = vmatmul.msk.bf16.gmra.mxu3 %vm515_vm1, %v385_v35 }
  0xa1   :  { %v981_v44 = vsel %vm515_vm1, %v916_v40, 0.0  ;;  %v1115_v45 = vmul.f32 %v916_v40, %v916_v40  ;;  %v1668_v40 = vld [vmem:[%s2809_s4 + $0x18] sm:$0xff]  }
  0xa2   :  { %v982_v46 = vadd.f32 %v981_v44, %v980_v26  ;;  %v632_v47 = vpop.f32.mrf.mxu0  ;;  %868 = vst.msk [vmem:[%s2810_s5 + $0x48] sm:$0xf] %vm849_vm2, %v2100_v43  ;;  %v707_v12 = vpop.f32.mrf.mxu2 }
  0xa3   :  { %v1180_v50 = vsel %vm515_vm1, %v1115_v45, 0.0  ;;  %v633_v51 = vadd.f32 %v1514_v41, %v632_v47  ;;  %v708_v22 = vadd.f32 %v1574_v16, %v707_v12  ;;  %v1521_v45 = vunpack.c.l.bf16 %v1668_v40  ;;  %v1676_v47 = vld [vmem:[%s2809_s4 + $0x58] sm:$0xff]   ;;  %v1683_v16 = vld [vmem:[%s2809_s4 + $0x90] sm:$0xff]  }
  0xa4   :  { %v1181_v52 = vadd.f32 %v1180_v50, %v1179_v34  ;;  %v1550_v34 = vunpack.c.h.bf16 %v1675_v63  ;;  %v1581_v18 = vunpack.c.l.bf16 %v1683_v16 }
  0xa5   :  { %v788_v55 = vpack.c.bf16 %v633_v51, %v633_v51  ;;  %v672_v56 = vpop.f32.mrf.mxu1  ;;  %v2145_v28 = vpack.c.bf16 %v708_v22, %v708_v22  ;;  %v1553_v51 = vunpack.c.l.bf16 %v1676_v47 }
  0xa6   :  { %v673_v59 = vadd.f32 %v1546_v48, %v672_v56  ;;  %v1682_v48 = vld [vmem:[%s2809_s4 + $0x88] sm:$0xff]  }
  0xa7   :  { %853 = vst.msk [vmem:[%s2810_s5 + $0xc] sm:$0xf] %vm849_vm2, %v788_v55  ;;  %v917_v60 = vunpack.c.l.bf16 %v788_v55  ;;  %v1577_v49 = vunpack.c.l.bf16 %v1682_v48  ;;  %v1578_v55 = vunpack.c.h.bf16 %v1682_v48 }
  0xa8   :  { %v2120_v62 = vpack.c.bf16 %v673_v59, %v673_v59  ;;  %883 = vst.msk [vmem:[%s2810_s5 + $0x84] sm:$0xf] %vm849_vm2, %v2145_v28 }
  0xa9   :  { %v983_v3 = vsel %vm515_vm1, %v917_v60, 0.0  ;;  %v1116_v4 = vmul.f32 %v917_v60, %v917_v60  ;;  %v745_v8 = vpop.f32.mrf.mxu3 }
  0xaa   :  { %v984_v9 = vadd.f32 %v983_v3, %v982_v46  ;;  %v635_v10 = vpop.f32.mrf.mxu0  ;;  %869 = vst.msk [vmem:[%s2810_s5 + $0x4c] sm:$0xf] %vm849_vm2, %v2120_v62  ;;  %v710_v36 = vpop.f32.mrf.mxu2  ;;  %v1554_v3 = vunpack.c.h.bf16 %v1676_v47 }
  0xab   :  { %v1182_v13 = vsel %vm515_vm1, %v1116_v4, 0.0  ;;  %v636_v14 = vadd.f32 %v1517_v61, %v635_v10  ;;  %v711_v54 = vadd.f32 %v1577_v49, %v710_v36  ;;  %v1522_v61 = vunpack.c.h.bf16 %v1668_v40 }
  0xac   :  { %v1183_v17 = vadd.f32 %v1182_v13, %v1181_v52 }
  0xad   :  { %v789_v19 = vpack.c.bf16 %v636_v14, %v636_v14  ;;  %v675_v5 = vpop.f32.mrf.mxu1  ;;  %v2196_v58 = vpack.c.bf16 %v711_v54, %v711_v54 }
  0xae   :  { %v676_v24 = vadd.f32 %v1549_v11, %v675_v5  ;;  %v1557_v5 = vunpack.c.l.bf16 %v1677_v15 }
  0xaf   :  { %854 = vst.msk [vmem:[%s2810_s5 + $0x10] sm:$0xf] %vm849_vm2, %v789_v19  ;;  %v918_v26 = vunpack.c.l.bf16 %v789_v19 }
  0xb0   :  { %v2147_v30 = vpack.c.bf16 %v676_v24, %v676_v24  ;;  %884 = vst.msk [vmem:[%s2810_s5 + $0x88] sm:$0xf] %vm849_vm2, %v2196_v58 }
  0xb1   :  { %v985_v6 = vsel %vm515_vm1, %v918_v26, 0.0  ;;  %v1117_v31 = vmul.f32 %v918_v26, %v918_v26  ;;  %v747_v26 = vpop.f32.mrf.mxu3 }
  0xb2   :  { %v2160_v32 = vadd.f32 %v985_v6, %v984_v9  ;;  %v637_v33 = vpop.f32.mrf.mxu0  ;;  %870 = vst.msk [vmem:[%s2810_s5 + $0x50] sm:$0xf] %vm849_vm2, %v2147_v30  ;;  %v712_v52 = vpop.f32.mrf.mxu2  ;;  %v1669_v9 = vld [vmem:[%s2809_s4 + $0x20] sm:$0xff]  }
  0xb3   :  { %v1184_v37 = vsel %vm515_vm1, %v1117_v31, 0.0  ;;  %v638_v38 = vadd.f32 %v1518_v27, %v637_v33  ;;  %v713_v59 = vadd.f32 %v1578_v55, %v712_v52  ;;  %v1525_v13 = vunpack.c.l.bf16 %v1669_v9 }
  0xb4   :  { %v2168_v39 = vadd.f32 %v1184_v37, %v1183_v17  ;;  %v1689_v17 = vld [vmem:[%s2809_s4 + $0xc0] sm:$0xff]   ;;  %v1582_v33 = vunpack.c.h.bf16 %v1683_v16  ;;  %v1526_v37 = vunpack.c.h.bf16 %v1669_v9 }
  0xb5   :  { %v2174_v41 = vpack.c.bf16 %v638_v38, %v638_v38  ;;  %v677_v42 = vpop.f32.mrf.mxu1  ;;  %v2203_v63 = vpack.c.bf16 %v713_v59, %v713_v59  ;;  %v1605_v22 = vunpack.c.l.bf16 %v1689_v17 }
  0xb6   :  { %v678_v44 = vadd.f32 %v1550_v34, %v677_v42  ;;  %v1606_v34 = vunpack.c.h.bf16 %v1689_v17 }
  0xb7   :  { %855 = vst.msk [vmem:[%s2810_s5 + $0x14] sm:$0xf] %vm849_vm2, %v2174_v41  ;;  %v746_v27 = vadd.f32 %v1605_v22, %v745_v8 }
  0xb8   :  { %v2181_v46 = vpack.c.bf16 %v678_v44, %v678_v44  ;;  %885 = vst.msk [vmem:[%s2810_s5 + $0x8c] sm:$0xf] %vm849_vm2, %v2203_v63  ;;  %v748_v42 = vadd.f32 %v1606_v34, %v747_v26 }
  0xb9   :  { %v2252_v36 = vpack.c.bf16 %v746_v27, %v746_v27 }
  0xba   :  { %v640_v50 = vpop.f32.mrf.mxu0  ;;  %871 = vst.msk [vmem:[%s2810_s5 + $0x54] sm:$0xf] %vm849_vm2, %v2181_v46  ;;  %v715_v4 = vpop.f32.mrf.mxu2  ;;  %v2288_v54 = vpack.c.bf16 %v748_v42, %v748_v42  ;;  %v1671_v42 = vld [vmem:[%s2809_s4 + $0x30] sm:$0xff]  }
  0xbb   :  { %v641_v53 = vadd.f32 %v1521_v45, %v640_v50  ;;  %v716_v25 = vadd.f32 %v1581_v18, %v715_v4  ;;  %898 = vst.msk [vmem:[%s2810_s5 + $0xc0] sm:$0xf] %vm849_vm2, %v2252_v36  ;;  %v1558_v45 = vunpack.c.h.bf16 %v1677_v15  ;;  %v750_v50 = vpop.f32.mrf.mxu3 }
  0xbc   :  { %899 = vst.msk [vmem:[%s2810_s5 + $0xc4] sm:$0xf] %vm849_vm2, %v2288_v54 }
  0xbd   :  { %v2194_v56 = vpack.c.bf16 %v641_v53, %v641_v53  ;;  %v680_v57 = vpop.f32.mrf.mxu1  ;;  %v2250_v31 = vpack.c.bf16 %v716_v25, %v716_v25 }
  0xbe   :  { %v681_v60 = vadd.f32 %v1553_v51, %v680_v57  ;;  %v1670_v51 = vld [vmem:[%s2809_s4 + $0x28] sm:$0xff]  }
  0xbf   :  { %856 = vst.msk [vmem:[%s2810_s5 + $0x18] sm:$0xf] %vm849_vm2, %v2194_v56  ;;  %v1529_v57 = vunpack.c.l.bf16 %v1670_v51 }
  0xc0   :  { %v2205_v0 = vpack.c.bf16 %v681_v60, %v681_v60  ;;  %886 = vst.msk [vmem:[%s2810_s5 + $0x90] sm:$0xf] %vm849_vm2, %v2250_v31  ;;  %v1678_v60 = vld [vmem:[%s2809_s4 + $0x68] sm:$0xff]  }
  0xc1   :  { %v1561_v4 = vunpack.c.l.bf16 %v1678_v60 }
  0xc2   :  { %v642_v1 = vpop.f32.mrf.mxu0  ;;  %872 = vst.msk [vmem:[%s2810_s5 + $0x58] sm:$0xf] %vm849_vm2, %v2205_v0  ;;  %v717_v23 = vpop.f32.mrf.mxu2 }
  0xc3   :  { %v643_v7 = vadd.f32 %v1522_v61, %v642_v1  ;;  %v718_v38 = vadd.f32 %v1582_v33, %v717_v23  ;;  %v1684_v61 = vld [vmem:[%s2809_s4 + $0x98] sm:$0xff]   ;;  %v1690_v1 = vld [vmem:[%s2809_s4 + $0xc8] sm:$0xff]  }
  0xc4   :  { %v1585_v9 = vunpack.c.l.bf16 %v1684_v61 }
  0xc5   :  { %v2225_v10 = vpack.c.bf16 %v643_v7, %v643_v7  ;;  %v682_v11 = vpop.f32.mrf.mxu1  ;;  %v2276_v49 = vpack.c.bf16 %v718_v38, %v718_v38 }
  0xc6   :  { %v683_v12 = vadd.f32 %v1554_v3, %v682_v11  ;;  %v1609_v11 = vunpack.c.l.bf16 %v1690_v1 }
  0xc7   :  { %857 = vst.msk [vmem:[%s2810_s5 + $0x1c] sm:$0xf] %vm849_vm2, %v2225_v10 }
  0xc8   :  { %v2232_v14 = vpack.c.bf16 %v683_v12, %v683_v12  ;;  %887 = vst.msk [vmem:[%s2810_s5 + $0x94] sm:$0xf] %vm849_vm2, %v2276_v49  ;;  %v752_v12 = vpop.f32.mrf.mxu3  ;;  %v751_v17 = vadd.f32 %v1609_v11, %v750_v50  ;;  %v919_v50 = vunpack.c.l.bf16 %v2174_v41  ;;  %v2375_v41 = vld [vmem:[%s2809_s4 + $0x70] sm:$0xff]  }
  0xca   :  { %v645_v19 = vpop.f32.mrf.mxu0  ;;  %873 = vst.msk [vmem:[%s2810_s5 + $0x5c] sm:$0xf] %vm849_vm2, %v2232_v14  ;;  %v720_v47 = vpop.f32.mrf.mxu2  ;;  %v2325_v23 = vpack.c.bf16 %v751_v17, %v751_v17 }
  0xcb   :  { %v646_v24 = vadd.f32 %v1525_v13, %v645_v19  ;;  %v721_v16 = vadd.f32 %v1585_v9, %v720_v47  ;;  %v1586_v19 = vunpack.c.h.bf16 %v1684_v61  ;;  %v1565_v61 = vunpack.c.l.bf16 %v2375_v41 }
  0xcc   :  { %900 = vst.msk [vmem:[%s2810_s5 + $0xc8] sm:$0xf] %vm849_vm2, %v2325_v23 }
  0xcd   :  { %v2248_v29 = vpack.c.bf16 %v646_v24, %v646_v24  ;;  %v685_v6 = vpop.f32.mrf.mxu1  ;;  %v2323_v22 = vpack.c.bf16 %v721_v16, %v721_v16  ;;  %v1610_v24 = vunpack.c.h.bf16 %v1690_v1 }
  0xce   :  { %v686_v35 = vadd.f32 %v1557_v5, %v685_v6  ;;  %v1530_v5 = vunpack.c.h.bf16 %v1670_v51  ;;  %v1562_v6 = vunpack.c.h.bf16 %v1678_v60  ;;  %v1533_v51 = vunpack.c.l.bf16 %v1671_v42 }
  0xcf   :  { %858 = vst.msk [vmem:[%s2810_s5 + $0x20] sm:$0xf] %vm849_vm2, %v2248_v29  ;;  %v753_v34 = vadd.f32 %v1610_v24, %v752_v12  ;;  %v921_v12 = vunpack.c.l.bf16 %v2225_v10  ;;  %v1534_v10 = vunpack.c.h.bf16 %v1671_v42 }
  0xd0   :  { %v2259_v40 = vpack.c.bf16 %v686_v35, %v686_v35  ;;  %888 = vst.msk [vmem:[%s2810_s5 + $0x98] sm:$0xf] %vm849_vm2, %v2323_v22  ;;  %v755_v38 = vpop.f32.mrf.mxu3 }
  0xd2   :  { %v647_v44 = vpop.f32.mrf.mxu0  ;;  %874 = vst.msk [vmem:[%s2810_s5 + $0x60] sm:$0xf] %vm849_vm2, %v2259_v40  ;;  %v722_v7 = vpop.f32.mrf.mxu2 }
  0xd3   :  { %v648_v48 = vadd.f32 %v1526_v37, %v647_v44  ;;  %v723_v26 = vadd.f32 %v1586_v19, %v722_v7 }
  0xd5   :  { %v2281_v52 = vpack.c.bf16 %v648_v48, %v648_v48  ;;  %v687_v53 = vpop.f32.mrf.mxu1  ;;  %v2339_v33 = vpack.c.bf16 %v723_v26, %v723_v26  ;;  %v2356_v48 = vpack.c.bf16 %v753_v34, %v753_v34 }
  0xd6   :  { %v688_v55 = vadd.f32 %v1558_v45, %v687_v53  ;;  %v920_v53 = vunpack.c.l.bf16 %v2194_v56  ;;  %v1691_v56 = vld [vmem:[%s2809_s4 + $0xd0] sm:$0xff]  }
  0xd7   :  { %859 = vst.msk [vmem:[%s2810_s5 + $0x24] sm:$0xf] %vm849_vm2, %v2281_v52  ;;  %v923_v42 = vunpack.c.l.bf16 %v2281_v52 }
  0xd8   :  { %v2295_v59 = vpack.c.bf16 %v688_v55, %v688_v55  ;;  %889 = vst.msk [vmem:[%s2810_s5 + $0x9c] sm:$0xf] %vm849_vm2, %v2339_v33  ;;  %v757_v9 = vpop.f32.mrf.mxu3  ;;  %v1119_v11 = vmul.f32 %v920_v53, %v920_v53 }
  0xd9   :  { %901 = vst.msk [vmem:[%s2810_s5 + $0xcc] sm:$0xf] %vm849_vm2, %v2356_v48 }
  0xda   :  { %v650_v3 = vpop.f32.mrf.mxu0  ;;  %875 = vst.msk [vmem:[%s2810_s5 + $0x64] sm:$0xf] %vm849_vm2, %v2295_v59  ;;  %v725_v35 = vpop.f32.mrf.mxu2 }
  0xdb   :  { %v651_v8 = vadd.f32 %v1529_v57, %v650_v3  ;;  %v1685_v57 = vld [vmem:[%s2809_s4 + $0xa0] sm:$0xff]   ;;  %v1118_v3 = vmul.f32 %v919_v50, %v919_v50 }
  0xdc   :  { %v1589_v7 = vunpack.c.l.bf16 %v1685_v57  ;;  %v1590_v26 = vunpack.c.h.bf16 %v1685_v57 }
  0xdd   :  { %v2316_v13 = vpack.c.bf16 %v651_v8, %v651_v8  ;;  %v690_v15 = vpop.f32.mrf.mxu1  ;;  %v1613_v8 = vunpack.c.l.bf16 %v1691_v56 }
  0xde   :  { %v691_v18 = vadd.f32 %v1561_v4, %v690_v15  ;;  %v922_v15 = vunpack.c.l.bf16 %v2248_v29 }
  0xdf   :  { %860 = vst.msk [vmem:[%s2810_s5 + $0x28] sm:$0xf] %vm849_vm2, %v2316_v13  ;;  %v756_v19 = vadd.f32 %v1613_v8, %v755_v38  ;;  %v924_v8 = vunpack.c.l.bf16 %v2316_v13 }
  0xe0   :  { %v2327_v25 = vpack.c.bf16 %v691_v18, %v691_v18  ;;  %v726_v18 = vadd.f32 %v1589_v7, %v725_v35  ;;  %v1120_v35 = vmul.f32 %v921_v12, %v921_v12  ;;  %v1121_v57 = vmul.f32 %v922_v15, %v922_v15  ;;  %v760_v52 = vpop.f32.mrf.mxu3 }
  0xe1   :  { %v2402_v34 = vpack.c.bf16 %v756_v19, %v756_v19  ;;  %v1122_v19 = vmul.f32 %v923_v42, %v923_v42 }
  0xe2   :  { %v652_v27 = vpop.f32.mrf.mxu0  ;;  %876 = vst.msk [vmem:[%s2810_s5 + $0x68] sm:$0xf] %vm849_vm2, %v2327_v25  ;;  %v727_v1 = vpop.f32.mrf.mxu2  ;;  %v2400_v29 = vpack.c.bf16 %v726_v18, %v726_v18  ;;  %v1192_v18 = vsel %vm515_vm1, %v1121_v57, 0.0 }
  0xe3   :  { %v653_v37 = vadd.f32 %v1530_v5, %v652_v27  ;;  %v987_v5 = vsel %vm515_vm1, %v919_v50, 0.0  ;;  %v1614_v27 = vunpack.c.h.bf16 %v1691_v56  ;;  %2815 = vst [vmem:[#allocation8_spill] sm:$0xff] %v2402_v34  ;;  %v728_v38 = vadd.f32 %v1590_v26, %v727_v1 }
  0xe4   :  { %v989_v50 = vsel %vm515_vm1, %v920_v53, 0.0  ;;  %890 = vst.msk [vmem:[%s2810_s5 + $0xa0] sm:$0xf] %vm849_vm2, %v2400_v29  ;;  %v995_v26 = vsel %vm515_vm1, %v923_v42, 0.0  ;;  %v1194_v42 = vsel %vm515_vm1, %v1122_v19, 0.0 }
  0xe5   :  { %v2354_v44 = vpack.c.bf16 %v653_v37, %v653_v37  ;;  %v692_v45 = vpop.f32.mrf.mxu1  ;;  %v2421_v53 = vpack.c.bf16 %v728_v38, %v728_v38  ;;  %902 = vst.msk [vmem:[%s2810_s5 + $0xd0] sm:$0xf] %vm849_vm2, %v2402_v34  ;;  %v2463_v38 = vld [vmem:[%s2809_s4 + $0x78] sm:$0xff]  }
  0xe6   :  { %v693_v47 = vadd.f32 %v1562_v6, %v692_v45  ;;  %v1186_v6 = vsel %vm515_vm1, %v1118_v3, 0.0  ;;  %v758_v45 = vadd.f32 %v1614_v27, %v757_v9  ;;  %v991_v3 = vsel %vm515_vm1, %v921_v12, 0.0  ;;  %v2437_v9 = vld [vmem:[%s2809_s4 + $0x38] sm:$0xff]  }
  0xe7   :  { %861 = vst.msk [vmem:[%s2810_s5 + $0x2c] sm:$0xf] %vm849_vm2, %v2354_v44  ;;  %v1187_v1 = vadd.f32 %v1186_v6, %v2168_v39  ;;  %v1123_v6 = vmul.f32 %v924_v8, %v924_v8 }
  0xe8   :  { %v2365_v55 = vpack.c.bf16 %v693_v47, %v693_v47  ;;  %v988_v47 = vadd.f32 %v987_v5, %v2160_v32  ;;  %v1566_v32 = vunpack.c.h.bf16 %v2375_v41  ;;  %v1190_v41 = vsel %vm515_vm1, %v1120_v35, 0.0  ;;  %891 = vst.msk [vmem:[%s2810_s5 + $0xa4] sm:$0xf] %vm849_vm2, %v2421_v53 }
  0xea   :  { %v655_v60 = vpop.f32.mrf.mxu0  ;;  %877 = vst.msk [vmem:[%s2810_s5 + $0x6c] sm:$0xf] %vm849_vm2, %v2365_v55  ;;  %v990_v7 = vadd.f32 %v989_v50, %v988_v47  ;;  %v1692_v47 = vld [vmem:[%s2809_s4 + $0xd8] sm:$0xff]   ;;  %v2472_v50 = vunpack.c.l.bf16 %v2059_v2  ;;  %v997_v2 = vsel %vm515_vm1, %v924_v8, 0.0 }
  0xeb   :  { %v656_v4 = vadd.f32 %v1533_v51, %v655_v60  ;;  %v1188_v51 = vsel %vm515_vm1, %v1119_v11, 0.0  ;;  %v2423_v60 = vpack.c.bf16 %v758_v45, %v758_v45  ;;  %v993_v11 = vsel %vm515_vm1, %v922_v15, 0.0  ;;  %v1686_v45 = vld [vmem:[%s2809_s4 + $0xa8] sm:$0xff]  }
  0xec   :  { %v1189_v39 = vadd.f32 %v1188_v51, %v1187_v1  ;;  %v992_v13 = vadd.f32 %v991_v3, %v990_v7  ;;  %v1537_v15 = vunpack.c.l.bf16 %v2437_v9  ;;  %v1593_v1 = vunpack.c.l.bf16 %v1686_v45 }
  0xed   :  { %v2391_v16 = vpack.c.bf16 %v656_v4, %v656_v4  ;;  %v695_v17 = vpop.f32.mrf.mxu1  ;;  %2816 = vst [vmem:[#allocation9_spill] sm:$0xff] %v2423_v60  ;;  %v1617_v7 = vunpack.c.l.bf16 %v1692_v47 }
  0xee   :  { %v696_v24 = vadd.f32 %v1565_v61, %v695_v17  ;;  %v730_v61 = vpop.f32.mrf.mxu2  ;;  %903 = vst.msk [vmem:[%s2810_s5 + $0xd4] sm:$0xf] %vm849_vm2, %v2423_v60  ;;  %v994_v27 = vadd.f32 %v993_v11, %v992_v13  ;;  %v1538_v60 = vunpack.c.h.bf16 %v2437_v9 }
  0xef   :  { %862 = vst.msk [vmem:[%s2810_s5 + $0x30] sm:$0xf] %vm849_vm2, %v2391_v16  ;;  %v731_v13 = vadd.f32 %v1593_v1, %v730_v61 }
  0xf0   :  { %v2404_v37 = vpack.c.bf16 %v696_v24, %v696_v24  ;;  %v1191_v24 = vadd.f32 %v1190_v41, %v1189_v39  ;;  %v996_v57 = vadd.f32 %v995_v26, %v994_v27  ;;  %v762_v41 = vpop.f32.mrf.mxu3  ;;  %v1196_v39 = vsel %vm515_vm1, %v1123_v6, 0.0 }
  0xf1   :  { %v1618_v26 = vunpack.c.h.bf16 %v1692_v47  ;;  %v2489_v34 = vpack.c.bf16 %v731_v13, %v731_v13  ;;  %v932_v13 = vunpack.c.l.bf16 %v2100_v43 }
  0xf2   :  { %v657_v56 = vpop.f32.mrf.mxu0  ;;  %878 = vst.msk [vmem:[%s2810_s5 + $0x70] sm:$0xf] %vm849_vm2, %v2404_v37  ;;  %v1193_v51 = vadd.f32 %v1192_v18, %v1191_v24  ;;  %v1594_v24 = vunpack.c.h.bf16 %v1686_v45  ;;  %v998_v6 = vadd.f32 %v997_v2, %v996_v57 }
  0xf3   :  { %v658_v4 = vadd.f32 %v1534_v10, %v657_v56  ;;  %v925_v10 = vunpack.c.l.bf16 %v2354_v44  ;;  %v2475_v44 = vunpack.c.l.bf16 %v2080_v21  ;;  %v926_v21 = vunpack.c.l.bf16 %v2391_v16  ;;  %892 = vst.msk [vmem:[%s2810_s5 + $0xa8] sm:$0xf] %vm849_vm2, %v2489_v34 }
  0xf4   :  { %v763_v57 = vadd.f32 %v1618_v26, %v762_v41  ;;  %v1009_v26 = vsel %vm515_vm1, %v2472_v50, 0.0 }
  0xf5   :  { %v798_v12 = vpack.c.bf16 %v658_v4, %v658_v4  ;;  %v697_v17 = vpop.f32.mrf.mxu1  ;;  %v1124_v11 = vmul.f32 %v925_v10, %v925_v10  ;;  %v999_v27 = vsel %vm515_vm1, %v925_v10, 0.0  ;;  %v1125_v16 = vmul.f32 %v926_v21, %v926_v21 }
  0xf6   :  { %v698_v5 = vadd.f32 %v1566_v32, %v697_v17  ;;  %v1569_v32 = vunpack.c.l.bf16 %v2463_v38  ;;  %v732_v3 = vpop.f32.mrf.mxu2  ;;  %v1001_v9 = vsel %vm515_vm1, %v926_v21, 0.0  ;;  %v1011_v43 = vsel %vm515_vm1, %v2475_v44, 0.0 }
  0xf7   :  { %863 = vst.msk [vmem:[%s2810_s5 + $0x34] sm:$0xf] %vm849_vm2, %v798_v12  ;;  %v927_v17 = vunpack.c.l.bf16 %v798_v12  ;;  %v1198_v45 = vsel %vm515_vm1, %v1124_v11, 0.0  ;;  %v1200_v21 = vsel %vm515_vm1, %v1125_v16, 0.0  ;;  %v1130_v11 = vmul.f32 %v2475_v44, %v2475_v44  ;;  %v1687_v44 = vld [vmem:[%s2809_s4 + $0xb0] sm:$0xff]  }
  0xf8   :  { %v2458_v35 = vpack.c.bf16 %v698_v5, %v698_v5  ;;  %v761_v5 = vadd.f32 %v1617_v7, %v760_v52  ;;  %v1195_v52 = vadd.f32 %v1194_v42, %v1193_v51  ;;  %v1129_v42 = vmul.f32 %v2472_v50, %v2472_v50 }
  0xf9   :  { %v1126_v47 = vmul.f32 %v927_v17, %v927_v17 }
  0xfa   :  { %v660_v56 = vpop.f32.mrf.mxu0  ;;  %879 = vst.msk [vmem:[%s2810_s5 + $0x74] sm:$0xf] %vm849_vm2, %v2458_v35  ;;  %v2495_v61 = vpack.c.bf16 %v761_v5, %v761_v5 }
  0xfb   :  { %v661_v4 = vadd.f32 %v1537_v15, %v660_v56  ;;  %v733_v15 = vadd.f32 %v1594_v24, %v732_v3  ;;  %v1197_v56 = vadd.f32 %v1196_v39, %v1195_v52  ;;  %v1570_v3 = vunpack.c.h.bf16 %v2463_v38  ;;  %v765_v39 = vpop.f32.mrf.mxu3 }
  0xfc   :  { %904 = vst.msk [vmem:[%s2810_s5 + $0xd8] sm:$0xf] %vm849_vm2, %v2495_v61  ;;  %v2533_v24 = vpack.c.bf16 %v763_v57, %v763_v57  ;;  %v1013_v57 = vsel %vm515_vm1, %v932_v13, 0.0 }
  0xfd   :  { %v799_v18 = vpack.c.bf16 %v661_v4, %v661_v4  ;;  %v700_v19 = vpop.f32.mrf.mxu1  ;;  %v2511_v51 = vpack.c.bf16 %v733_v15, %v733_v15  ;;  %v1003_v4 = vsel %vm515_vm1, %v927_v17, 0.0  ;;  %v1199_v38 = vadd.f32 %v1198_v45, %v1197_v56 }
  0xfe   :  { %v701_v8 = vadd.f32 %v1569_v32, %v700_v19  ;;  %v1000_v32 = vadd.f32 %v999_v27, %v998_v6  ;;  %v735_v2 = vpop.f32.mrf.mxu2  ;;  %v1202_v19 = vsel %vm515_vm1, %v1126_v47, 0.0  ;;  %v1208_v15 = vsel %vm515_vm1, %v1129_v42, 0.0  ;;  %905 = vst.msk [vmem:[%s2810_s5 + $0xdc] sm:$0xf] %vm849_vm2, %v2533_v24  ;;  %v1693_v47 = vld [vmem:[%s2809_s4 + $0xe0] sm:$0xff]  }
  0xff   :  { %864 = vst.msk [vmem:[%s2810_s5 + $0x38] sm:$0xf] %vm849_vm2, %v799_v18  ;;  %v928_v12 = vunpack.c.l.bf16 %v799_v18  ;;  %v1201_v27 = vadd.f32 %v1200_v21, %v1199_v38  ;;  %v933_v6 = vunpack.c.l.bf16 %v2120_v62  ;;  %v1210_v62 = vsel %vm515_vm1, %v1130_v11, 0.0 }
 0x100   :  { %v2498_v10 = vpack.c.bf16 %v701_v8, %v701_v8  ;;  %893 = vst.msk [vmem:[%s2810_s5 + $0xac] sm:$0xf] %vm849_vm2, %v2511_v51  ;;  %v1002_v18 = vadd.f32 %v1001_v9, %v1000_v32  ;;  %v1131_v32 = vmul.f32 %v932_v13, %v932_v13  ;;  %v1597_v21 = vunpack.c.l.bf16 %v1687_v44 }
 0x101   :  { %v1127_v7 = vmul.f32 %v928_v12, %v928_v12  ;;  %v1005_v17 = vsel %vm515_vm1, %v928_v12, 0.0  ;;  %v1203_v45 = vadd.f32 %v1202_v19, %v1201_v27  ;;  %v1598_v11 = vunpack.c.h.bf16 %v1687_v44 }
 0x102   :  { %v662_v1 = vpop.f32.mrf.mxu0  ;;  %880 = vst.msk [vmem:[%s2810_s5 + $0x78] sm:$0xf] %vm849_vm2, %v2498_v10  ;;  %v1004_v8 = vadd.f32 %v1003_v4, %v1002_v18  ;;  %v1622_v38 = vunpack.c.h.bf16 %v1693_v47  ;;  %v1132_v19 = vmul.f32 %v933_v6, %v933_v6  ;;  %v736_v27 = vadd.f32 %v1597_v21, %v735_v2 }
 0x103   :  { %v663_v41 = vadd.f32 %v1538_v60, %v662_v1  ;;  %v1204_v52 = vsel %vm515_vm1, %v1127_v7, 0.0  ;;  %v767_v18 = vpop.f32.mrf.mxu3  ;;  %v1015_v2 = vsel %vm515_vm1, %v933_v6, 0.0 }
 0x104   :  { %v1006_v50 = vadd.f32 %v1005_v17, %v1004_v8  ;;  %v1205_v1 = vadd.f32 %v1204_v52, %v1203_v45  ;;  %v934_v17 = vunpack.c.l.bf16 %v2147_v30  ;;  %v936_v52 = vunpack.c.l.bf16 %v2205_v0 }
 0x105   :  { %v800_v5 = vpack.c.bf16 %v663_v41, %v663_v41  ;;  %v702_v60 = vpop.f32.mrf.mxu1  ;;  %v1621_v41 = vunpack.c.l.bf16 %v1693_v47  ;;  %v2572_v44 = vpack.c.bf16 %v736_v27, %v736_v27  ;;  %v1214_v6 = vsel %vm515_vm1, %v1132_v19, 0.0 }
 0x106   :  { %v703_v16 = vadd.f32 %v1570_v3, %v702_v60  ;;  %v737_v4 = vpop.f32.mrf.mxu2  ;;  %v935_v60 = vunpack.c.l.bf16 %v2181_v46  ;;  %v1212_v46 = vsel %vm515_vm1, %v1131_v32, 0.0  ;;  %v1133_v0 = vmul.f32 %v934_v17, %v934_v17 }
 0x107   :  { %865 = vst.msk [vmem:[%s2810_s5 + $0x3c] sm:$0xf] %vm849_vm2, %v800_v5  ;;  %v929_v12 = vunpack.c.l.bf16 %v800_v5  ;;  %v766_v8 = vadd.f32 %v1621_v41, %v765_v39 }
 0x108   :  { %v2546_v9 = vpack.c.bf16 %v703_v16, %v703_v16  ;;  %v738_v16 = vadd.f32 %v1598_v11, %v737_v4  ;;  %v1134_v39 = vmul.f32 %v935_v60, %v935_v60  ;;  %894 = vst.msk [vmem:[%s2810_s5 + $0xb0] sm:$0xf] %vm849_vm2, %v2572_v44  ;;  %v1019_v41 = vsel %vm515_vm1, %v935_v60, 0.0 }
 0x109   :  { %v1007_v42 = vsel %vm515_vm1, %v929_v12, 0.0  ;;  %v1128_v56 = vmul.f32 %v929_v12, %v929_v12  ;;  %v2574_v47 = vpack.c.bf16 %v766_v8, %v766_v8 }
 0x10a   :  { %v1008_v3 = vadd.f32 %v1007_v42, %v1006_v50  ;;  %881 = vst.msk [vmem:[%s2810_s5 + $0x7c] sm:$0xf] %vm849_vm2, %v2546_v9  ;;  %v768_v50 = vadd.f32 %v1622_v38, %v767_v18  ;;  %v937_v42 = vunpack.c.l.bf16 %v2232_v14  ;;  %v938_v14 = vunpack.c.l.bf16 %v2259_v40 }
 0x10b   :  { %v1206_v7 = vsel %vm515_vm1, %v1128_v56, 0.0  ;;  %v2576_v56 = vpack.c.bf16 %v738_v16, %v738_v16  ;;  %906 = vst.msk [vmem:[%s2810_s5 + $0xe0] sm:$0xf] %vm849_vm2, %v2574_v47  ;;  %v1218_v11 = vsel %vm515_vm1, %v1134_v39, 0.0  ;;  %v939_v18 = vunpack.c.l.bf16 %v2295_v59  ;;  %v1688_v59 = vld [vmem:[%s2809_s4 + $0xb8] sm:$0xff]  }
 0x10c   :  { %v1010_v13 = vadd.f32 %v1009_v26, %v1008_v3  ;;  %v1207_v5 = vadd.f32 %v1206_v7, %v1205_v1  ;;  %v2578_v1 = vpack.c.bf16 %v768_v50, %v768_v50  ;;  %v1136_v32 = vmul.f32 %v937_v42, %v937_v42  ;;  %v770_v3 = vpop.f32.mrf.mxu3 }
 0x10d   :  { %895 = vst.msk [vmem:[%s2810_s5 + $0xb4] sm:$0xf] %vm849_vm2, %v2576_v56  ;;  %v1216_v7 = vsel %vm515_vm1, %v1133_v0, 0.0  ;;  %v1137_v38 = vmul.f32 %v938_v14, %v938_v14  ;;  %v1023_v27 = vsel %vm515_vm1, %v937_v42, 0.0  ;;  %v1025_v16 = vsel %vm515_vm1, %v938_v14, 0.0 }
 0x10e   :  { %v1012_v12 = vadd.f32 %v1011_v43, %v1010_v13  ;;  %v1209_v45 = vadd.f32 %v1208_v15, %v1207_v5  ;;  %v740_v40 = vpop.f32.mrf.mxu2  ;;  %907 = vst.msk [vmem:[%s2810_s5 + $0xe4] sm:$0xf] %vm849_vm2, %v2578_v1  ;;  %v1021_v13 = vsel %vm515_vm1, %v936_v52, 0.0  ;;  %v1222_v8 = vsel %vm515_vm1, %v1136_v32, 0.0 }
 0x10f   :  { %v1601_v50 = vunpack.c.l.bf16 %v1688_v59  ;;  %v1138_v39 = vmul.f32 %v939_v18, %v939_v18  ;;  %v941_v14 = vunpack.c.l.bf16 %v2365_v55 }
 0x110   :  { %v1014_v30 = vadd.f32 %v1013_v57, %v1012_v12  ;;  %v1211_v26 = vadd.f32 %v1210_v62, %v1209_v45  ;;  %v1017_v62 = vsel %vm515_vm1, %v934_v17, 0.0  ;;  %v1135_v57 = vmul.f32 %v936_v52, %v936_v52  ;;  %v1694_v52 = vld [vmem:[%s2809_s4 + $0xe8] sm:$0xff]  }
 0x111   :  { %v940_v12 = vunpack.c.l.bf16 %v2327_v25  ;;  %v1626_v42 = vunpack.c.h.bf16 %v1694_v52 }
 0x112   :  { %v1016_v15 = vadd.f32 %v1015_v2, %v1014_v30  ;;  %v1213_v43 = vadd.f32 %v1212_v46, %v1211_v26  ;;  %v1220_v5 = vsel %vm515_vm1, %v1135_v57, 0.0  ;;  %v1625_v30 = vunpack.c.l.bf16 %v1694_v52 }
 0x113   :  { %v1602_v26 = vunpack.c.h.bf16 %v1688_v59  ;;  %v1224_v46 = vsel %vm515_vm1, %v1137_v38, 0.0  ;;  %v1027_v2 = vsel %vm515_vm1, %v939_v18, 0.0 }
 0x114   :  { %v1018_v21 = vadd.f32 %v1017_v62, %v1016_v15  ;;  %v1215_v4 = vadd.f32 %v1214_v6, %v1213_v43  ;;  %v741_v15 = vadd.f32 %v1601_v50, %v740_v40  ;;  %v771_v43 = vadd.f32 %v1625_v30, %v770_v3  ;;  %v772_v62 = vpop.f32.mrf.mxu3 }
 0x115   :  { %v1226_v40 = vsel %vm515_vm1, %v1138_v39, 0.0  ;;  %v1029_v3 = vsel %vm515_vm1, %v940_v12, 0.0  ;;  %v946_v30 = vunpack.c.l.bf16 %v2138_v20  ;;  %v947_v39 = vunpack.c.l.bf16 %v2145_v28 }
 0x116   :  { %v1020_v19 = vadd.f32 %v1019_v41, %v1018_v21  ;;  %v1217_v17 = vadd.f32 %v1216_v7, %v1215_v4  ;;  %v742_v6 = vpop.f32.mrf.mxu2  ;;  %v773_v4 = vadd.f32 %v1626_v42, %v772_v62  ;;  %v1139_v7 = vmul.f32 %v940_v12, %v940_v12 }
 0x117   :  { %v743_v21 = vadd.f32 %v1602_v26, %v742_v6  ;;  %v942_v41 = vunpack.c.l.bf16 %v2404_v37  ;;  %v2627_v38 = vpack.c.bf16 %v771_v43, %v771_v43  ;;  %v948_v20 = vunpack.c.l.bf16 %v2196_v58 }
 0x118   :  { %v1219_v60 = vadd.f32 %v1218_v11, %v1217_v17  ;;  %v1022_v45 = vadd.f32 %v1021_v13, %v1020_v19  ;;  %v2625_v11 = vpack.c.bf16 %v741_v15, %v741_v15  ;;  %v2631_v55 = vpack.c.bf16 %v773_v4, %v773_v4 }
 0x119   :  { %v2629_v18 = vpack.c.bf16 %v743_v21, %v743_v21  ;;  %v1140_v13 = vmul.f32 %v941_v14, %v941_v14  ;;  %908 = vst.msk [vmem:[%s2810_s5 + $0xe8] sm:$0xf] %vm849_vm2, %v2627_v38  ;;  %v1141_v12 = vmul.f32 %v942_v41, %v942_v41  ;;  %v1033_v52 = vsel %vm515_vm1, %v942_v41, 0.0  ;;  %v1695_v21 = vld [vmem:[%s2809_s4 + $0xf0] sm:$0xff]  }
 0x11a   :  { %v1024_v0 = vadd.f32 %v1023_v27, %v1022_v45  ;;  %v1221_v25 = vadd.f32 %v1220_v5, %v1219_v60  ;;  %v943_v5 = vunpack.c.l.bf16 %v2458_v35  ;;  %896 = vst.msk [vmem:[%s2810_s5 + $0xb8] sm:$0xf] %vm849_vm2, %v2625_v11  ;;  %v944_v35 = vunpack.c.l.bf16 %v2498_v10 }
 0x11b   :  { %897 = vst.msk [vmem:[%s2810_s5 + $0xbc] sm:$0xf] %vm849_vm2, %v2629_v18  ;;  %v1230_v59 = vsel %vm515_vm1, %v1140_v13, 0.0  ;;  %v945_v10 = vunpack.c.l.bf16 %v2546_v9  ;;  %v1145_v9 = vmul.f32 %v946_v30, %v946_v30  ;;  %v1630_v41 = vunpack.c.h.bf16 %v1695_v21 }
 0x11c   :  { %v1026_v57 = vadd.f32 %v1025_v16, %v1024_v0  ;;  %v1223_v32 = vadd.f32 %v1222_v8, %v1221_v25  ;;  %v1228_v8 = vsel %vm515_vm1, %v1139_v7, 0.0  ;;  %v1031_v16 = vsel %vm515_vm1, %v941_v14, 0.0  ;;  %909 = vst.msk [vmem:[%s2810_s5 + $0xec] sm:$0xf] %vm849_vm2, %v2631_v55 }
 0x11d   :  { %v1142_v50 = vmul.f32 %v943_v5, %v943_v5  ;;  %v1035_v0 = vsel %vm515_vm1, %v943_v5, 0.0  ;;  %v1143_v25 = vmul.f32 %v944_v35, %v944_v35  ;;  %v1037_v6 = vsel %vm515_vm1, %v944_v35, 0.0 }
 0x11e   :  { %v1028_v19 = vadd.f32 %v1027_v2, %v1026_v57  ;;  %v1225_v17 = vadd.f32 %v1224_v46, %v1223_v32  ;;  %v775_v46 = vpop.f32.mrf.mxu3  ;;  %v1232_v2 = vsel %vm515_vm1, %v1141_v12, 0.0  ;;  %v1144_v62 = vmul.f32 %v945_v10, %v945_v10 }
 0x11f   :  { %v1234_v43 = vsel %vm515_vm1, %v1142_v50, 0.0  ;;  %v1236_v4 = vsel %vm515_vm1, %v1143_v25, 0.0  ;;  %v1039_v28 = vsel %vm515_vm1, %v945_v10, 0.0  ;;  %v1629_v7 = vunpack.c.l.bf16 %v1695_v21 }
 0x120   :  { %v1030_v37 = vadd.f32 %v1029_v3, %v1028_v19  ;;  %v1227_v27 = vadd.f32 %v1226_v40, %v1225_v17  ;;  %v1146_v19 = vmul.f32 %v947_v39, %v947_v39  ;;  %v1041_v3 = vsel %vm515_vm1, %v946_v30, 0.0 }
 0x121   :  { %v949_v13 = vunpack.c.l.bf16 %v2203_v63  ;;  %v1238_v58 = vsel %vm515_vm1, %v1144_v62, 0.0  ;;  %v776_v5 = vadd.f32 %v1629_v7, %v775_v46  ;;  %v1147_v35 = vmul.f32 %v948_v20, %v948_v20 }
 0x122   :  { %v1032_v60 = vadd.f32 %v1031_v16, %v1030_v37  ;;  %v1229_v45 = vadd.f32 %v1228_v8, %v1227_v27  ;;  %v1240_v37 = vsel %vm515_vm1, %v1145_v9, 0.0  ;;  %v1043_v27 = vsel %vm515_vm1, %v947_v39, 0.0 }
 0x123   :  { %v1045_v10 = vsel %vm515_vm1, %v948_v20, 0.0  ;;  %v1148_v30 = vmul.f32 %v949_v13, %v949_v13  ;;  %v952_v39 = vunpack.c.l.bf16 %v2323_v22  ;;  %v954_v9 = vunpack.c.l.bf16 %v2400_v29 }
 0x124   :  { %v1034_v26 = vadd.f32 %v1033_v52, %v1032_v60  ;;  %v1231_v42 = vadd.f32 %v1230_v59, %v1229_v45  ;;  %v950_v60 = vunpack.c.l.bf16 %v2250_v31  ;;  %v2680_v45 = vpack.c.bf16 %v776_v5, %v776_v5 }
 0x125   :  { %v1242_v52 = vsel %vm515_vm1, %v1146_v19, 0.0  ;;  %v1151_v21 = vmul.f32 %v952_v39, %v952_v39  ;;  %v955_v19 = vunpack.c.l.bf16 %v2421_v53  ;;  %v1057_v53 = vsel %vm515_vm1, %v954_v9, 0.0 }
 0x126   :  { %v1233_v14 = vadd.f32 %v1232_v2, %v1231_v42  ;;  %v1036_v15 = vadd.f32 %v1035_v0, %v1034_v26  ;;  %v777_v12 = vpop.f32.mrf.mxu3  ;;  %v951_v26 = vunpack.c.l.bf16 %v2276_v49  ;;  %910 = vst.msk [vmem:[%s2810_s5 + $0xf0] sm:$0xf] %vm849_vm2, %v2680_v45  ;;  %v1244_v2 = vsel %vm515_vm1, %v1147_v35, 0.0 }
 0x127   :  { %v778_v59 = vadd.f32 %v1630_v41, %v777_v12  ;;  %v1047_v0 = vsel %vm515_vm1, %v949_v13, 0.0  ;;  %v1149_v25 = vmul.f32 %v950_v60, %v950_v60  ;;  %v953_v49 = vunpack.c.l.bf16 %v2339_v33  ;;  %v1696_v13 = vld [vmem:[%s2809_s4 + $0xf8] sm:$0xff]  }
 0x128   :  { %v1235_v57 = vadd.f32 %v1234_v43, %v1233_v14  ;;  %v1038_v32 = vadd.f32 %v1037_v6, %v1036_v15  ;;  %v1246_v43 = vsel %vm515_vm1, %v1148_v30, 0.0  ;;  %v1049_v6 = vsel %vm515_vm1, %v950_v60, 0.0 }
 0x129   :  { %v2690_v42 = vpack.c.bf16 %v778_v59, %v778_v59  ;;  %v1150_v62 = vmul.f32 %v951_v26, %v951_v26  ;;  %v1248_v22 = vsel %vm515_vm1, %v1149_v25, 0.0  ;;  %v1053_v41 = vsel %vm515_vm1, %v952_v39, 0.0 }
 0x12a   :  { %v1237_v17 = vadd.f32 %v1236_v4, %v1235_v57  ;;  %v1040_v40 = vadd.f32 %v1039_v28, %v1038_v32  ;;  %v1051_v32 = vsel %vm515_vm1, %v951_v26, 0.0  ;;  %v1152_v4 = vmul.f32 %v953_v49, %v953_v49 }
 0x12b   :  { %911 = vst.msk [vmem:[%s2810_s5 + $0xf4] sm:$0xf] %vm849_vm2, %v2690_v42  ;;  %v1250_v33 = vsel %vm515_vm1, %v1150_v62, 0.0  ;;  %v1055_v5 = vsel %vm515_vm1, %v953_v49, 0.0  ;;  %v1154_v35 = vmul.f32 %v955_v19, %v955_v19  ;;  %v957_v60 = vunpack.c.l.bf16 %v2511_v51 }
 0x12c   :  { %v1042_v8 = vadd.f32 %v1041_v3, %v1040_v40  ;;  %v1239_v16 = vadd.f32 %v1238_v58, %v1237_v17  ;;  %v1153_v40 = vmul.f32 %v954_v9, %v954_v9  ;;  %v1252_v58 = vsel %vm515_vm1, %v1151_v21, 0.0 }
 0x12d   :  { %v1059_v30 = vsel %vm515_vm1, %v955_v19, 0.0  ;;  %v1156_v51 = vmul.f32 %v957_v60, %v957_v60  ;;  %v959_v39 = vunpack.c.l.bf16 %v2576_v56  ;;  %v960_v9 = vunpack.c.l.bf16 %v2625_v11 }
 0x12e   :  { %v1044_v50 = vadd.f32 %v1043_v27, %v1042_v8  ;;  %v1241_v63 = vadd.f32 %v1240_v37, %v1239_v16  ;;  %v780_v17 = vpop.f32.mrf.mxu3  ;;  %v956_v37 = vunpack.c.l.bf16 %v2489_v34  ;;  %v1633_v27 = vunpack.c.l.bf16 %v1696_v13 }
 0x12f   :  { %v1254_v8 = vsel %vm515_vm1, %v1152_v4, 0.0  ;;  %v958_v34 = vunpack.c.l.bf16 %v2572_v44  ;;  %v1158_v21 = vmul.f32 %v959_v39, %v959_v39  ;;  %v961_v4 = vunpack.c.l.bf16 %v2629_v18 }
 0x130   :  { %v1046_v31 = vadd.f32 %v1045_v10, %v1044_v50  ;;  %v1243_v46 = vadd.f32 %v1242_v52, %v1241_v63  ;;  %v781_v59 = vadd.f32 %v1633_v27, %v780_v17  ;;  %v1256_v52 = vsel %vm515_vm1, %v1153_v40, 0.0 }
 0x131   :  { %v1634_v10 = vunpack.c.h.bf16 %v1696_v13  ;;  %v1155_v26 = vmul.f32 %v956_v37, %v956_v37  ;;  %v1061_v25 = vsel %vm515_vm1, %v956_v37, 0.0  ;;  %v1157_v62 = vmul.f32 %v958_v34, %v958_v34 }
 0x132   :  { %v1048_v14 = vadd.f32 %v1047_v0, %v1046_v31  ;;  %v1245_v15 = vadd.f32 %v1244_v2, %v1243_v46  ;;  %v2721_v31 = vpack.c.bf16 %v781_v59, %v781_v59  ;;  %v1258_v0 = vsel %vm515_vm1, %v1154_v35, 0.0 }
 0x133   :  { %v962_v11 = vunpack.c.l.bf16 %v2252_v36  ;;  %v1159_v19 = vmul.f32 %v960_v9, %v960_v9  ;;  %v1266_v18 = vsel %vm515_vm1, %v1158_v21, 0.0  ;;  %v1160_v13 = vmul.f32 %v961_v4, %v961_v4 }
 0x134   :  { %v1050_v20 = vadd.f32 %v1049_v6, %v1048_v14  ;;  %v1247_v57 = vadd.f32 %v1246_v43, %v1245_v15  ;;  %912 = vst.msk [vmem:[%s2810_s5 + $0xf8] sm:$0xf] %vm849_vm2, %v2721_v31  ;;  %v1260_v43 = vsel %vm515_vm1, %v1155_v26, 0.0  ;;  %v1063_v6 = vsel %vm515_vm1, %v957_v60, 0.0 }
 0x135   :  { %v1161_v37 = vmul.f32 %v962_v11, %v962_v11  ;;  %v964_v27 = vunpack.c.l.bf16 %v2325_v23  ;;  %v1268_v36 = vsel %vm515_vm1, %v1159_v19, 0.0  ;;  %v1270_v60 = vsel %vm515_vm1, %v1160_v13, 0.0 }
 0x136   :  { %v1249_v28 = vadd.f32 %v1248_v22, %v1247_v57  ;;  %v1052_v7 = vadd.f32 %v1051_v32, %v1050_v20  ;;  %v782_v49 = vpop.f32.mrf.mxu3  ;;  %v1262_v22 = vsel %vm515_vm1, %v1156_v51, 0.0  ;;  %v1065_v32 = vsel %vm515_vm1, %v958_v34, 0.0 }
 0x137   :  { %v783_v15 = vadd.f32 %v1634_v10, %v782_v49  ;;  %v1163_v23 = vmul.f32 %v964_v27, %v964_v27  ;;  %v2817_v10 = vld [vmem:[#allocation8_spill] sm:$0xff]  ;;  %v972_v13 = vunpack.c.l.bf16 %v2627_v38 }
 0x138   :  { %v1054_v3 = vadd.f32 %v1053_v41, %v1052_v7  ;;  %v1251_v29 = vadd.f32 %v1250_v33, %v1249_v28  ;;  %v1264_v33 = vsel %vm515_vm1, %v1157_v62, 0.0  ;;  %v1067_v41 = vsel %vm515_vm1, %v959_v39, 0.0 }
 0x139   :  { %v2734_v56 = vpack.c.bf16 %v783_v15, %v783_v15  ;;  %v1276_v49 = vsel %vm515_vm1, %v1163_v23, 0.0  ;;  %v968_v15 = vunpack.c.l.bf16 %v2495_v61 }
 0x13a   :  { %v1056_v16 = vadd.f32 %v1055_v5, %v1054_v3  ;;  %v1253_v12 = vadd.f32 %v1252_v58, %v1251_v29  ;;  %v963_v3 = vunpack.c.l.bf16 %v2288_v54  ;;  %v1069_v29 = vsel %vm515_vm1, %v960_v9, 0.0 }
 0x13b   :  { %913 = vst.msk [vmem:[%s2810_s5 + $0xfc] sm:$0xf] %vm849_vm2, %v2734_v56  ;;  %v965_v54 = vunpack.c.l.bf16 %v2356_v48  ;;  %s1756_s5 = smov [#allocation2]  }
 0x13c   :  { %v1058_v50 = vadd.f32 %v1057_v53, %v1056_v16  ;;  %v1255_v63 = vadd.f32 %v1254_v8, %v1253_v12  ;;  %v1071_v8 = vsel %vm515_vm1, %v961_v4, 0.0  ;;  %v1073_v53 = vsel %vm515_vm1, %v962_v11, 0.0  ;;  %s1318_s18 = sshll.u32 %s1756_s5, 4  ;;  %s1319_s18 = int_to_ptr.vmem [resolvable:$true] %s1318_s18 }
 0x13d   :  { %v1162_v35 = vmul.f32 %v963_v3, %v963_v3 }
 0x13e   :  { %v1060_v46 = vadd.f32 %v1059_v30, %v1058_v50  ;;  %v1257_v2 = vadd.f32 %v1256_v52, %v1255_v63  ;;  %v1272_v50 = vsel %vm515_vm1, %v1161_v37, 0.0  ;;  %v1075_v63 = vsel %vm515_vm1, %v963_v3, 0.0 }
 0x13f   :  { %v966_v30 = vunpack.c.l.bf16 %v2817_v10 }
 0x140   :  { %v1062_v14 = vadd.f32 %v1061_v25, %v1060_v46  ;;  %v1259_v44 = vadd.f32 %v1258_v0, %v1257_v2  ;;  %v1274_v46 = vsel %vm515_vm1, %v1162_v35, 0.0  ;;  %v1077_v2 = vsel %vm515_vm1, %v964_v27, 0.0  ;;  %v2818_v25 = vld [vmem:[#allocation9_spill] sm:$0xff] }
 0x141   :  { %v1164_v0 = vmul.f32 %v965_v54, %v965_v54  ;;  %v967_v48 = vunpack.c.l.bf16 %v2818_v25  ;;  %v1081_v9 = vsel %vm515_vm1, %v966_v30, 0.0  ;;  %v974_v35 = vunpack.c.l.bf16 %v2680_v45 }
 0x142   :  { %v1064_v20 = vadd.f32 %v1063_v6, %v1062_v14  ;;  %v1261_v57 = vadd.f32 %v1260_v43, %v1259_v44  ;;  %v1079_v14 = vsel %vm515_vm1, %v965_v54, 0.0  ;;  %v1165_v44 = vmul.f32 %v966_v30, %v966_v30 }
 0x143   :  { %v1278_v62 = vsel %vm515_vm1, %v1164_v0, 0.0  ;;  %v1083_v4 = vsel %vm515_vm1, %v967_v48, 0.0  ;;  %v1173_v30 = vmul.f32 %v974_v35, %v974_v35  ;;  %v977_v25 = vunpack.c.l.bf16 %v2734_v56 }
 0x144   :  { %v1263_v28 = vadd.f32 %v1262_v22, %v1261_v57  ;;  %v1066_v7 = vadd.f32 %v1065_v32, %v1064_v20  ;;  %v1166_v20 = vmul.f32 %v967_v48, %v967_v48  ;;  %v969_v57 = vunpack.c.l.bf16 %v2533_v24 }
 0x145   :  { %v1280_v21 = vsel %vm515_vm1, %v1165_v44, 0.0  ;;  %v1103_v56 = vsel %vm515_vm1, %v977_v25, 0.0 }
 0x146   :  { %v1265_v17 = vadd.f32 %v1264_v33, %v1263_v28  ;;  %v1068_v40 = vadd.f32 %v1067_v41, %v1066_v7  ;;  %v1167_v28 = vmul.f32 %v968_v15, %v968_v15  ;;  %v970_v7 = vunpack.c.l.bf16 %v2574_v47 }
 0x147   :  { %v1282_v33 = vsel %vm515_vm1, %v1166_v20, 0.0  ;;  %v1085_v41 = vsel %vm515_vm1, %v968_v15, 0.0  ;;  %v1168_v19 = vmul.f32 %v969_v57, %v969_v57 }
 0x148   :  { %v1267_v58 = vadd.f32 %v1266_v18, %v1265_v17  ;;  %v1070_v5 = vadd.f32 %v1069_v29, %v1068_v40  ;;  %v971_v17 = vunpack.c.l.bf16 %v2578_v1  ;;  %v1284_v3 = vsel %vm515_vm1, %v1167_v28, 0.0 }
 0x149   :  { %v1087_v18 = vsel %vm515_vm1, %v969_v57, 0.0  ;;  %v1169_v29 = vmul.f32 %v970_v7, %v970_v7  ;;  %v1089_v37 = vsel %vm515_vm1, %v970_v7, 0.0 }
 0x14a   :  { %v1269_v16 = vadd.f32 %v1268_v36, %v1267_v58  ;;  %v1072_v12 = vadd.f32 %v1071_v8, %v1070_v5  ;;  %v1286_v5 = vsel %vm515_vm1, %v1168_v19, 0.0  ;;  %v1170_v27 = vmul.f32 %v971_v17, %v971_v17 }
 0x14b   :  { %v973_v36 = vunpack.c.l.bf16 %v2631_v55 }
 0x14c   :  { %v1074_v59 = vadd.f32 %v1073_v53, %v1072_v12  ;;  %v1271_v52 = vadd.f32 %v1270_v60, %v1269_v16  ;;  %v1288_v16 = vsel %vm515_vm1, %v1169_v29, 0.0  ;;  %v1091_v12 = vsel %vm515_vm1, %v971_v17, 0.0 }
 0x14d   :  { %v1171_v53 = vmul.f32 %v972_v13, %v972_v13  ;;  %v1290_v60 = vsel %vm515_vm1, %v1170_v27, 0.0  ;;  %v1095_v10 = vsel %vm515_vm1, %v973_v36, 0.0 }
 0x14e   :  { %v1076_v26 = vadd.f32 %v1075_v63, %v1074_v59  ;;  %v1273_v34 = vadd.f32 %v1272_v50, %v1271_v52  ;;  %v1093_v59 = vsel %vm515_vm1, %v972_v13, 0.0  ;;  %v1172_v52 = vmul.f32 %v973_v36, %v973_v36 }
 0x14f   :  { %v975_v50 = vunpack.c.l.bf16 %v2690_v42  ;;  %v1292_v23 = vsel %vm515_vm1, %v1171_v53, 0.0 }
 0x150   :  { %v1078_v51 = vadd.f32 %v1077_v2, %v1076_v26  ;;  %v1275_v39 = vadd.f32 %v1274_v46, %v1273_v34  ;;  %v976_v26 = vunpack.c.l.bf16 %v2721_v31  ;;  %v1294_v46 = vsel %vm515_vm1, %v1172_v52, 0.0 }
 0x151   :  { %v1097_v2 = vsel %vm515_vm1, %v974_v35, 0.0  ;;  %v1174_v0 = vmul.f32 %v975_v50, %v975_v50 }
 0x152   :  { %v1080_v43 = vadd.f32 %v1079_v14, %v1078_v51  ;;  %v1277_v6 = vadd.f32 %v1276_v49, %v1275_v39  ;;  %v1296_v51 = vsel %vm515_vm1, %v1173_v30, 0.0  ;;  %v1099_v39 = vsel %vm515_vm1, %v975_v50, 0.0 }
 0x153   :  { %v1175_v49 = vmul.f32 %v976_v26, %v976_v26  ;;  %v1298_v31 = vsel %vm515_vm1, %v1174_v0, 0.0  ;;  %v1101_v15 = vsel %vm515_vm1, %v976_v26, 0.0 }
 0x154   :  { %v1082_v22 = vadd.f32 %v1081_v9, %v1080_v43  ;;  %v1279_v32 = vadd.f32 %v1278_v62, %v1277_v6  ;;  %v1176_v43 = vmul.f32 %v977_v25, %v977_v25 }
 0x155   :  { %v1300_v9 = vsel %vm515_vm1, %v1175_v49, 0.0 }
 0x156   :  { %v1281_v11 = vadd.f32 %v1280_v21, %v1279_v32  ;;  %v1084_v61 = vadd.f32 %v1083_v4, %v1082_v22  ;;  %v1302_v22 = vsel %vm515_vm1, %v1176_v43, 0.0 }
 0x158   :  { %v1086_v40 = vadd.f32 %v1085_v41, %v1084_v61  ;;  %v1283_v24 = vadd.f32 %v1282_v33, %v1281_v11 }
 0x15a   :  { %v1088_v58 = vadd.f32 %v1087_v18, %v1086_v40  ;;  %v1285_v47 = vadd.f32 %v1284_v3, %v1283_v24 }
 0x15c   :  { %v1090_v8 = vadd.f32 %v1089_v37, %v1088_v58  ;;  %v1287_v1 = vadd.f32 %v1286_v5, %v1285_v47 }
 0x15e   :  { %v1092_v54 = vadd.f32 %v1091_v12, %v1090_v8  ;;  %v1289_v38 = vadd.f32 %v1288_v16, %v1287_v1 }
 0x160   :  { %v1094_v63 = vadd.f32 %v1093_v59, %v1092_v54  ;;  %v1291_v55 = vadd.f32 %v1290_v60, %v1289_v38 }
 0x162   :  { %v1096_v34 = vadd.f32 %v1095_v10, %v1094_v63  ;;  %v1293_v45 = vadd.f32 %v1292_v23, %v1291_v55 }
 0x164   :  { %v1295_v48 = vadd.f32 %v1294_v46, %v1293_v45  ;;  %v1098_v42 = vadd.f32 %v1097_v2, %v1096_v34 }
 0x166   :  { %v1297_v14 = vadd.f32 %v1296_v51, %v1295_v48  ;;  %v1100_v44 = vadd.f32 %v1099_v39, %v1098_v42 }
 0x168   :  { %v1299_v6 = vadd.f32 %v1298_v31, %v1297_v14  ;;  %v1102_v62 = vadd.f32 %v1101_v15, %v1100_v44 }
 0x16a   :  { %v1301_v20 = vadd.f32 %v1300_v9, %v1299_v6  ;;  %v1104_v57 = vadd.f32 %v1103_v56, %v1102_v62 }
 0x16c   :  { %v1105_v32 = vrot.slane %v1104_v57, 4  ;;  %v1303_v21 = vadd.f32 %v1302_v22, %v1301_v20 }
 0x16e   :  { %v1304_v4 = vrot.slane %v1303_v21, 4  ;;  %v1106_v28 = vadd.f32 %v1105_v32, %v1104_v57 }
 0x170   :  { %v1107_v7 = vrot.slane %v1106_v28, 2  ;;  %v1305_v11 = vadd.f32 %v1304_v4, %v1303_v21 }
 0x172   :  { %v1108_v61 = vadd.f32 %v1107_v7, %v1106_v28  ;;  %v1306_v33 = vrot.slane %v1305_v11, 2 }
 0x174   :  { %v1109_v41 = vrot.slane %v1108_v61, 1  ;;  %v1307_v19 = vadd.f32 %v1306_v33, %v1305_v11 }
 0x176   :  { %v1110_v17 = vadd.f32 %v1109_v41, %v1108_v61  ;;  %v1308_v40 = vrot.slane %v1307_v19, 1 }
 0x178   :  { %1112 = vst.msk [vmem:[#allocation2] sm:$0x1] %vm1111_vm3, %v1110_v17  ;;  %v1309_v24 = vadd.f32 %v1308_v40, %v1307_v19 }
 0x179   :  { %1323 = dma.vmem_to_hbm [thread:$0]  %s1319_s18, 16, %s1321_s21, [#allocation3]  }
 0x17a   :  { %1310 = vst.msk [vmem:[#allocation4] sm:$0x1] %vm1111_vm3, %v1309_v24 }
 0x17b   :  { %1334 = dma.vmem_to_hbm [thread:$0]  %s1330_s23, 16, %s1332_s26, [#allocation5]  }
 0x17c   :  { %1752 = dma.done.wait [#allocation3], 16  }
 0x17d   :  { %1753 = vsyncadd [#allocation3], 4294967280 }
 0x17e   :  { %1754 = dma.done.wait [#allocation5], 16  }
 0x17f   :  { %1755 = vsyncadd [#allocation5], 4294967280 }
 0x180   :  { %1345 = vsyncpa [#allocation3], 1 }
 0x181   :  { %1346 = vsyncpa [#allocation5], 1 }

</bundles_post_ra>
